<compile_context>
chip_gen: v6e
topology: v6e:2x2x1
jax: 0.10.0
libtpu: 0.0.40
codegen_flags: <defaults>
</compile_context>

<pallas_src>
import functools

import jax
import jax.numpy as jnp
from jax import lax
from jax.experimental import pallas as pl
from jax.experimental.pallas import tpu as pltpu

EPS = 1e-3                                   # nn.BatchNorm2d(eps=0.001)
_NEG_FILL = float(jnp.finfo(jnp.float32).min)  # maxpool pad (never -inf)
_VMEM_LIMIT = 48 * 1024 * 1024               # <= v7x 64 MiB physical


# ----------------------------------------------------------------------------
# Pallas kernels
# ----------------------------------------------------------------------------
def _fused_pointwise_kernel(x_ref, w_ref, b_ref, o_ref):
    # x_ref: (tm, Cin)   w_ref: (Cin, Csum)  BN-scale already folded into w
    # b_ref: (1, Csum)   o_ref: (tm, Csum) = relu(x @ w + b)
    y = jnp.dot(x_ref[...], w_ref[...], preferred_element_type=jnp.float32)
    o_ref[...] = jnp.maximum(y + b_ref[...], 0.0).astype(o_ref.dtype)


def _inception_tail_kernel(t2p_ref, t3p_ref, xp_ref,
                           w2_ref, b2_ref, w3_ref, b3_ref, w4_ref, b4_ref,
                           o2_ref, o3_ref, o4_ref):
    # One image per grid step (batch-tiled).
    #   t2p_ref/t3p_ref: (H+2, W+2, Cred)  zero-padded reduced activations
    #   xp_ref:          (H+2, W+2, Cin)   -FLT_MAX-padded input (maxpool)
    #   w2/w3:           (3, 3, Cred, Cout) scale-folded 3x3 weights
    #   w4:              (Cin, pool_proj)   scale-folded 1x1 weight
    #   b*:              (1, Cout)
    Hp, Wp, _ = xp_ref.shape
    H, W = Hp - 2, Wp - 2
    M = H * W

    def conv3x3_bn_relu(tp_ref, w_ref, bias_ref, cout):
        tp = tp_ref[...]                               # (H+2, W+2, C)
        C = tp.shape[-1]
        acc = jnp.zeros((M, cout), jnp.float32)
        # 9 accumulating MXU dots on shifted slices of the VMEM-resident tile
        # (review option (b); per-tile so patch temporaries stay bounded).
        # TODO(synk): single K=9*C im2col matmul for better MXU depth.
        for dy in range(3):
            for dx in range(3):
                patch = tp[dy:dy + H, dx:dx + W, :].reshape(M, C)
                acc = acc + jnp.dot(patch, w_ref[dy, dx],
                                    preferred_element_type=jnp.float32)
        return jnp.maximum(acc + bias_ref[...], 0.0)

    # branch2 / branch3: 3x3 conv (pad=1) + BN + ReLU
    o2_ref[...] = conv3x3_bn_relu(
        t2p_ref, w2_ref, b2_ref, o2_ref.shape[-1]).astype(o2_ref.dtype)
    o3_ref[...] = conv3x3_bn_relu(
        t3p_ref, w3_ref, b3_ref, o3_ref.shape[-1]).astype(o3_ref.dtype)

    # branch4: 3x3 maxpool (stride 1, pad 1) -> 1x1 conv + BN + ReLU
    xp = xp_ref[...]                                   # (H+2, W+2, Cin)
    Cin = xp.shape[-1]
    pooled = xp[1:H + 1, 1:W + 1, :]                   # center tap
    for dy in range(3):
        for dx in range(3):
            if dy == 1 and dx == 1:
                continue
            pooled = jnp.maximum(pooled, xp[dy:dy + H, dx:dx + W, :])
    y4 = jnp.dot(pooled.reshape(M, Cin), w4_ref[...],
                 preferred_element_type=jnp.float32)
    o4_ref[...] = jnp.maximum(y4 + b4_ref[...], 0.0).astype(o4_ref.dtype)


# ----------------------------------------------------------------------------
# pallas_call wrappers
# ----------------------------------------------------------------------------
def _pick_row_tile(m, candidates=(2048, 1024, 512, 256, 128, 64, 32, 16, 8)):
    for tm in candidates:
        if m % tm == 0:
            return tm
    return m  # fallback: single block (M not a multiple of 8)


def fused_pointwise(x2d, wcat, bcat):
    """relu(x2d @ wcat + bcat): all three 1x1 convs in one matmul, tiled."""
    M, cin = x2d.shape
    csum = wcat.shape[-1]
    tm = _pick_row_tile(M)
    flops = 2 * M * cin * csum
    bytes_accessed = 4 * (M * cin + cin * csum + M * csum)
    return pl.pallas_call(
        _fused_pointwise_kernel,
        out_shape=jax.ShapeDtypeStruct((M, csum), x2d.dtype),
        grid=(M // tm,),
        in_specs=[pl.BlockSpec((tm, cin), lambda i: (i, 0)),
                  pl.BlockSpec((cin, csum), lambda i: (0, 0)),
                  pl.BlockSpec((1, csum), lambda i: (0, 0))],
        out_specs=pl.BlockSpec((tm, csum), lambda i: (i, 0)),
        compiler_params=pltpu.CompilerParams(
            dimension_semantics=("parallel",),
            vmem_limit_bytes=_VMEM_LIMIT),
        cost_estimate=pl.CostEstimate(flops=flops, transcendentals=0,
                                      bytes_accessed=bytes_accessed),
    )(x2d, wcat, bcat)


def inception_tail(t2p, t3p, xp, w2, bb2, w3, bb3, w4, bb4):
    """Fused branch2/branch3 3x3 convs + branch4 maxpool/1x1, batch-tiled."""
    N, Hp, Wp, cin = xp.shape
    H, W = Hp - 2, Wp - 2
    Mimg = H * W  # NB: assumed multiple of 8 (holds for typical H, W)
    c2r, c3r = t2p.shape[-1], t3p.shape[-1]
    c3, c5, cp = w2.shape[-1], w3.shape[-1], w4.shape[-1]

    flops = 2 * N * Mimg * (9 * c2r * c3 + 9 * c3r * c5 + cin * cp)
    bytes_accessed = 4 * (t2p.size + t3p.size + xp.size
                          + N * Mimg * (c3 + c5 + cp)
                          + w2.size + w3.size + w4.size)

    return pl.pallas_call(
        _inception_tail_kernel,
        out_shape=(jax.ShapeDtypeStruct((N * Mimg, c3), jnp.float32),
                   jax.ShapeDtypeStruct((N * Mimg, c5), jnp.float32),
                   jax.ShapeDtypeStruct((N * Mimg, cp), jnp.float32)),
        grid=(N,),
        in_specs=[
            pl.BlockSpec((None, Hp, Wp, c2r), lambda n: (n, 0, 0, 0)),
            pl.BlockSpec((None, Hp, Wp, c3r), lambda n: (n, 0, 0, 0)),
            pl.BlockSpec((None, Hp, Wp, cin), lambda n: (n, 0, 0, 0)),
            pl.BlockSpec((3, 3, c2r, c3), lambda n: (0, 0, 0, 0)),
            pl.BlockSpec((1, c3), lambda n: (0, 0)),
            pl.BlockSpec((3, 3, c3r, c5), lambda n: (0, 0, 0, 0)),
            pl.BlockSpec((1, c5), lambda n: (0, 0)),
            pl.BlockSpec((cin, cp), lambda n: (0, 0)),
            pl.BlockSpec((1, cp), lambda n: (0, 0)),
        ],
        out_specs=(pl.BlockSpec((Mimg, c3), lambda n: (n, 0)),
                   pl.BlockSpec((Mimg, c5), lambda n: (n, 0)),
                   pl.BlockSpec((Mimg, cp), lambda n: (n, 0))),
        compiler_params=pltpu.CompilerParams(
            dimension_semantics=("parallel",),
            vmem_limit_bytes=_VMEM_LIMIT),
        cost_estimate=pl.CostEstimate(flops=flops, transcendentals=0,
                                      bytes_accessed=bytes_accessed),
    )(t2p, t3p, xp, w2, bb2, w3, bb3, w4, bb4)


# ----------------------------------------------------------------------------
# Parameter construction (deterministic) + BN folding / weight fusion
# ----------------------------------------------------------------------------
def make_basic_conv_params(key, cin, cout, ksize):
    k1, k2, k3, k4, k5 = jax.random.split(key, 5)
    if ksize == 1:
        w = jax.random.normal(k1, (cin, cout), jnp.float32) * 0.1
    else:
        w = jax.random.normal(k1, (ksize, ksize, cin, cout), jnp.float32) * 0.1
    gamma = jax.random.uniform(k2, (cout,), jnp.float32, 0.5, 1.5)
    beta = jax.random.normal(k3, (cout,), jnp.float32) * 0.1
    running_mean = jax.random.normal(k4, (cout,), jnp.float32) * 0.1
    running_var = jax.random.uniform(k5, (cout,), jnp.float32, 0.5, 1.5)
    scale = gamma / jnp.sqrt(running_var + EPS)
    bias = beta - running_mean * scale
    return w, scale.reshape(1, cout), bias.reshape(1, cout)


def make_inception_params(key, in_channels, ch1x1, ch3x3red, ch3x3,
                          ch5x5red, ch5x5, pool_proj):
    ks = jax.random.split(key, 6)
    return {
        "b1": make_basic_conv_params(ks[0], in_channels, ch1x1, 1),
        "b2a": make_basic_conv_params(ks[1], in_channels, ch3x3red, 1),
        "b2b": make_basic_conv_params(ks[2], ch3x3red, ch3x3, 3),
        "b3a": make_basic_conv_params(ks[3], in_channels, ch5x5red, 1),
        # NB: matches the PyTorch module — branch3's second conv is 3x3.
        "b3b": make_basic_conv_params(ks[4], ch5x5red, ch5x5, 3),
        "b4": make_basic_conv_params(ks[5], in_channels, pool_proj, 1),
    }


def prepare_inception_params(params):
    """One-time prep: fold BN scale into conv weights and concatenate the
    three 1x1 weight matrices so the hot path does no weight math."""
    def fold1x1(p):
        w, s, b = p
        return w * s, b                                 # (Cin, Cout), (1, Cout)

    def fold3x3(p):
        w, s, b = p
        return w * s.reshape(1, 1, 1, -1), b            # (3,3,Cin,Cout)

    w1, b1 = fold1x1(params["b1"])
    w2a, b2a = fold1x1(params["b2a"])
    w3a, b3a = fold1x1(params["b3a"])
    w2b, b2b = fold3x3(params["b2b"])
    w3b, b3b = fold3x3(params["b3b"])
    w4, b4 = fold1x1(params["b4"])

    prep = {
        "w_point": jnp.concatenate([w1, w2a, w3a], axis=1),
        "b_point": jnp.concatenate([b1, b2a, b3a], axis=1),
        "w2b": w2b, "b2b": b2b,
        "w3b": w3b, "b3b": b3b,
        "w4": w4, "b4": b4,
    }
    splits = (int(w1.shape[1]), int(w2a.shape[1]), int(w3a.shape[1]))
    return prep, splits


# ----------------------------------------------------------------------------
# Inception forward (wrapper; glue only — hot paths are in the kernels)
# ----------------------------------------------------------------------------
@functools.partial(jax.jit, static_argnames=("splits",))
def inception_forward(x_nchw, prep, *, splits):
    N, C, H, W = x_nchw.shape
    x = jnp.transpose(x_nchw, (0, 2, 3, 1)).astype(jnp.float32)     # NHWC
    x2d = x.reshape(N * H * W, C)

    # Stage 1: branch1 + branch2-reduce + branch3-reduce 1x1 convs fused
    # into one matmul (single read of the activation, lane-dense store).
    y = fused_pointwise(x2d, prep["w_point"], prep["b_point"])      # (M, Csum)
    c1, c2r, c3r = splits
    b1 = y[:, :c1]
    t2 = y[:, c1:c1 + c2r].reshape(N, H, W, c2r)
    t3 = y[:, c1 + c2r:].reshape(N, H, W, c3r)

    # Spatial halos built once in XLA (small reduced-channel tensors).
    t2p = jnp.pad(t2, ((0, 0), (1, 1), (1, 1), (0, 0)))
    t3p = jnp.pad(t3, ((0, 0), (1, 1), (1, 1), (0, 0)))
    xp = jnp.pad(x, ((0, 0), (1, 1), (1, 1), (0, 0)),
                 constant_values=_NEG_FILL)

    # Stage 2: fused 3x3 convs + maxpool/1x1 branch, batch-tiled.
    b2, b3, b4 = inception_tail(t2p, t3p, xp,
                                prep["w2b"], prep["b2b"],
                                prep["w3b"], prep["b3b"],
                                prep["w4"], prep["b4"])

    out = jnp.concatenate([b1, b2, b3, b4], axis=1)                 # (M, Ctot)
    out = out.reshape(N, H, W, -1)
    return jnp.transpose(out, (0, 3, 1, 2))                         # NCHW


# ----------------------------------------------------------------------------
# Pure-JAX reference (for correctness check only)
# ----------------------------------------------------------------------------
def _ref_basic_conv(x, w, s, b):
    if w.ndim == 2:
        w4 = w.reshape(1, 1, *w.shape)
        pad = "VALID"
    else:
        w4 = w
        pad = "SAME"
    y = lax.conv_general_dilated(x, w4, (1, 1), pad,
                                 dimension_numbers=("NHWC", "HWIO", "NHWC"))
    y = y * s.reshape(1, 1, 1, -1) + b.reshape(1, 1, 1, -1)
    return jnp.maximum(y, 0.0)


def _ref_inception(x_nchw, params):
    x = jnp.transpose(x_nchw, (0, 2, 3, 1)).astype(jnp.float32)
    b1 = _ref_basic_conv(x, *params["b1"])
    b2 = _ref_basic_conv(_ref_basic_conv(x, *params["b2a"]), *params["b2b"])
    b3 = _ref_basic_conv(_ref_basic_conv(x, *params["b3a"]), *params["b3b"])
    pooled = lax.reduce_window(x, -jnp.inf, lax.max,
                               (1, 3, 3, 1), (1, 1, 1, 1), "SAME")
    b4 = _ref_basic_conv(pooled, *params["b4"])
    out = jnp.concatenate([b1, b2, b3, b4], axis=-1)
    return jnp.transpose(out, (0, 3, 1, 2))


# ----------------------------------------------------------------------------
if __name__ == "__main__":
    key = jax.random.PRNGKey(0)
    kx, kp = jax.random.split(key)

    # Small, module-consistent shapes.
    N, C, H, W = 2, 4, 16, 16
    ch1x1, ch3x3red, ch3x3, ch5x5red, ch5x5, pool_proj = 8, 4, 8, 4, 8, 8

    x = jax.random.normal(kx, (N, C, H, W), jnp.float32)
    params = make_inception_params(kp, C, ch1x1, ch3x3red, ch3x3,
                                   ch5x5red, ch5x5, pool_proj)
    prep, splits = prepare_inception_params(params)

    out = inception_forward(x, prep, splits=splits)
    out = jax.block_until_ready(out)

    expected_channels = ch1x1 + ch3x3 + ch5x5 + pool_proj
    assert out.shape == (N, expected_channels, H, W), out.shape

    ref = jax.block_until_ready(_ref_inception(x, params))
    max_err = float(jnp.max(jnp.abs(out - ref)))
    assert jnp.allclose(out, ref, atol=1e-4, rtol=1e-4), max_err

    print("KERNEL_OK")
</pallas_src>

<mosaic_0001>
module attributes {stable_mosaic.version = 11 : i64} {
  func.func @_fused_pointwise_kernel(%arg0: i32, %arg1: memref<512x4xf32, #tpu.memory_space<vmem>>, %arg2: memref<4x16xf32, #tpu.memory_space<vmem>>, %arg3: memref<1x16xf32, #tpu.memory_space<vmem>>, %arg4: memref<512x16xf32, #tpu.memory_space<vmem>>) attributes {dimension_semantics = [#tpu.dimension_semantics<parallel>], iteration_bounds = array<i64: 1>, scalar_prefetch = 0 : i64, scratch_operands = 0 : i64, tpu.core_type = #tpu.core_type<tc>, window_params = [{transform_indices = @transform_0, window_bounds = array<i64: 512, 4>}, {pipeline_mode = #tpu.pipeline_mode<synchronous>, transform_indices = @transform_1, window_bounds = array<i64: 4, 16>}, {pipeline_mode = #tpu.pipeline_mode<synchronous>, transform_indices = @transform_2, window_bounds = array<i64: 1, 16>}, {transform_indices = @transform_3, window_bounds = array<i64: 512, 16>}]} {
    %c0 = arith.constant 0 : index
    %c0_0 = arith.constant 0 : index
    %0 = vector.load %arg1[%c0, %c0_0] : memref<512x4xf32, #tpu.memory_space<vmem>>, vector<512x4xf32>
    %c0_1 = arith.constant 0 : index
    %c0_2 = arith.constant 0 : index
    %1 = vector.load %arg2[%c0_1, %c0_2] : memref<4x16xf32, #tpu.memory_space<vmem>>, vector<4x16xf32>
    %cst = arith.constant dense<0.000000e+00> : vector<512x16xf32>
    %2 = tpu.matmul %0, %1, %cst {dimension_numbers = #tpu.dot_dimension_numbers<[1], [0], [0], [1], [0, 0, 1, 1], [], []>} : vector<512x4xf32>, vector<4x16xf32>, vector<512x16xf32> -> vector<512x16xf32>
    %c0_3 = arith.constant 0 : index
    %c0_4 = arith.constant 0 : index
    %3 = vector.load %arg3[%c0_3, %c0_4] : memref<1x16xf32, #tpu.memory_space<vmem>>, vector<1x16xf32>
    %4 = vector.broadcast %3 : vector<1x16xf32> to vector<512x16xf32>
    %5 = arith.addf %2, %4 : vector<512x16xf32>
    %cst_5 = arith.constant 0.000000e+00 : f32
    %6 = vector.broadcast %cst_5 : f32 to vector<512x16xf32>
    %7 = arith.maximumf %5, %6 : vector<512x16xf32>
    %c0_6 = arith.constant 0 : index
    %c0_7 = arith.constant 0 : index
    %8 = vector.load %arg4[%c0_6, %c0_7] : memref<512x16xf32, #tpu.memory_space<vmem>>, vector<512x16xf32>
    tpu.vector_store %arg4[%c0_6, %c0_7], %7 {strides = array<i32>} : memref<512x16xf32, #tpu.memory_space<vmem>>, vector<512x16xf32>,
    return
  }
  func.func @transform_0(%arg0: i32) -> (i32, i32) {
    %c0_i32 = arith.constant 0 : i32
    %c0_i32_0 = arith.constant 0 : i32
    return %arg0, %c0_i32 : i32, i32
  }
  func.func @transform_1(%arg0: i32) -> (i32, i32) {
    %c0_i32 = arith.constant 0 : i32
    %c0_i32_0 = arith.constant 0 : i32
    %c0_i32_1 = arith.constant 0 : i32
    return %c0_i32, %c0_i32_0 : i32, i32
  }
  func.func @transform_2(%arg0: i32) -> (i32, i32) {
    %c0_i32 = arith.constant 0 : i32
    %c0_i32_0 = arith.constant 0 : i32
    %c0_i32_1 = arith.constant 0 : i32
    return %c0_i32, %c0_i32_0 : i32, i32
  }
  func.func @transform_3(%arg0: i32) -> (i32, i32) {
    %c0_i32 = arith.constant 0 : i32
    %c0_i32_0 = arith.constant 0 : i32
    return %arg0, %c0_i32 : i32, i32
  }
}

module attributes {stable_mosaic.version = 11 : i64} {
  func.func @_inception_tail_kernel(%arg0: i32, %arg1: memref<1x18x18x4xf32, #tpu.memory_space<vmem>>, %arg2: memref<1x18x18x4xf32, #tpu.memory_space<vmem>>, %arg3: memref<1x18x18x4xf32, #tpu.memory_space<vmem>>, %arg4: memref<3x3x4x8xf32, #tpu.memory_space<vmem>>, %arg5: memref<1x8xf32, #tpu.memory_space<vmem>>, %arg6: memref<3x3x4x8xf32, #tpu.memory_space<vmem>>, %arg7: memref<1x8xf32, #tpu.memory_space<vmem>>, %arg8: memref<4x8xf32, #tpu.memory_space<vmem>>, %arg9: memref<1x8xf32, #tpu.memory_space<vmem>>, %arg10: memref<256x8xf32, #tpu.memory_space<vmem>>, %arg11: memref<256x8xf32, #tpu.memory_space<vmem>>, %arg12: memref<256x8xf32, #tpu.memory_space<vmem>>) attributes {dimension_semantics = [#tpu.dimension_semantics<parallel>], iteration_bounds = array<i64: 2>, scalar_prefetch = 0 : i64, scratch_operands = 0 : i64, tpu.core_type = #tpu.core_type<tc>, window_params = [{transform_indices = @transform_0, window_bounds = array<i64: 1, 18, 18, 4>}, {transform_indices = @transform_1, window_bounds = array<i64: 1, 18, 18, 4>}, {transform_indices = @transform_2, window_bounds = array<i64: 1, 18, 18, 4>}, {pipeline_mode = #tpu.pipeline_mode<synchronous>, transform_indices = @transform_3, window_bounds = array<i64: 3, 3, 4, 8>}, {pipeline_mode = #tpu.pipeline_mode<synchronous>, transform_indices = @transform_4, window_bounds = array<i64: 1, 8>}, {pipeline_mode = #tpu.pipeline_mode<synchronous>, transform_indices = @transform_5, window_bounds = array<i64: 3, 3, 4, 8>}, {pipeline_mode = #tpu.pipeline_mode<synchronous>, transform_indices = @transform_6, window_bounds = array<i64: 1, 8>}, {pipeline_mode = #tpu.pipeline_mode<synchronous>, transform_indices = @transform_7, window_bounds = array<i64: 4, 8>}, {pipeline_mode = #tpu.pipeline_mode<synchronous>, transform_indices = @transform_8, window_bounds = array<i64: 1, 8>}, {transform_indices = @transform_9, window_bounds = array<i64: 256, 8>}, {transform_indices = @transform_10, window_bounds = array<i64: 256, 8>}, {transform_indices = @transform_11, window_bounds = array<i64: 256, 8>}]} {
    %c0 = arith.constant 0 : index
    %c0_0 = arith.constant 0 : index
    %c0_1 = arith.constant 0 : index
    %c0_2 = arith.constant 0 : index
    %0 = vector.load %arg1[%c0, %c0_0, %c0_1, %c0_2] : memref<1x18x18x4xf32, #tpu.memory_space<vmem>>, vector<1x18x18x4xf32>
    %1 = vector.shape_cast %0 : vector<1x18x18x4xf32> to vector<18x18x4xf32>
    %cst = arith.constant 0.000000e+00 : f32
    %2 = vector.broadcast %cst : f32 to vector<256x8xf32>
    %3 = vector.extract_strided_slice %1 {offsets = [0, 0, 0], sizes = [16, 16, 4], strides = [1, 1, 1]} : vector<18x18x4xf32> to vector<16x16x4xf32>
    %4 = vector.shape_cast %3 : vector<16x16x4xf32> to vector<256x4xf32>
    %c0_3 = arith.constant 0 : index
    %c0_4 = arith.constant 0 : index
    %c0_5 = arith.constant 0 : index
    %c0_6 = arith.constant 0 : index
    %5 = vector.load %arg4[%c0_3, %c0_4, %c0_5, %c0_6] : memref<3x3x4x8xf32, #tpu.memory_space<vmem>>, vector<1x1x4x8xf32>
    %6 = vector.shape_cast %5 : vector<1x1x4x8xf32> to vector<4x8xf32>
    %cst_7 = arith.constant dense<0.000000e+00> : vector<256x8xf32>
    %7 = tpu.matmul %4, %6, %cst_7 {dimension_numbers = #tpu.dot_dimension_numbers<[1], [0], [0], [1], [0, 0, 1, 1], [], []>} : vector<256x4xf32>, vector<4x8xf32>, vector<256x8xf32> -> vector<256x8xf32>
    %8 = arith.addf %2, %7 : vector<256x8xf32>
    %9 = vector.extract_strided_slice %1 {offsets = [0, 1, 0], sizes = [16, 16, 4], strides = [1, 1, 1]} : vector<18x18x4xf32> to vector<16x16x4xf32>
    %10 = vector.shape_cast %9 : vector<16x16x4xf32> to vector<256x4xf32>
    %c0_8 = arith.constant 0 : index
    %c1 = arith.constant 1 : index
    %c0_9 = arith.constant 0 : index
    %c0_10 = arith.constant 0 : index
    %11 = vector.load %arg4[%c0_8, %c1, %c0_9, %c0_10] : memref<3x3x4x8xf32, #tpu.memory_space<vmem>>, vector<1x1x4x8xf32>
    %12 = vector.shape_cast %11 : vector<1x1x4x8xf32> to vector<4x8xf32>
    %cst_11 = arith.constant dense<0.000000e+00> : vector<256x8xf32>
    %13 = tpu.matmul %10, %12, %cst_11 {dimension_numbers = #tpu.dot_dimension_numbers<[1], [0], [0], [1], [0, 0, 1, 1], [], []>} : vector<256x4xf32>, vector<4x8xf32>, vector<256x8xf32> -> vector<256x8xf32>
    %14 = arith.addf %8, %13 : vector<256x8xf32>
    %15 = vector.extract_strided_slice %1 {offsets = [0, 2, 0], sizes = [16, 16, 4], strides = [1, 1, 1]} : vector<18x18x4xf32> to vector<16x16x4xf32>
    %16 = vector.shape_cast %15 : vector<16x16x4xf32> to vector<256x4xf32>
    %c0_12 = arith.constant 0 : index
    %c2 = arith.constant 2 : index
    %c0_13 = arith.constant 0 : index
    %c0_14 = arith.constant 0 : index
    %17 = vector.load %arg4[%c0_12, %c2, %c0_13, %c0_14] : memref<3x3x4x8xf32, #tpu.memory_space<vmem>>, vector<1x1x4x8xf32>
    %18 = vector.shape_cast %17 : vector<1x1x4x8xf32> to vector<4x8xf32>
    %cst_15 = arith.constant dense<0.000000e+00> : vector<256x8xf32>
    %19 = tpu.matmul %16, %18, %cst_15 {dimension_numbers = #tpu.dot_dimension_numbers<[1], [0], [0], [1], [0, 0, 1, 1], [], []>} : vector<256x4xf32>, vector<4x8xf32>, vector<256x8xf32> -> vector<256x8xf32>
    %20 = arith.addf %14, %19 : vector<256x8xf32>
    %21 = vector.extract_strided_slice %1 {offsets = [1, 0, 0], sizes = [16, 16, 4], strides = [1, 1, 1]} : vector<18x18x4xf32> to vector<16x16x4xf32>
    %22 = vector.shape_cast %21 : vector<16x16x4xf32> to vector<256x4xf32>
    %c1_16 = arith.constant 1 : index
    %c0_17 = arith.constant 0 : index
    %c0_18 = arith.constant 0 : index
    %c0_19 = arith.constant 0 : index
    %23 = vector.load %arg4[%c1_16, %c0_17, %c0_18, %c0_19] : memref<3x3x4x8xf32, #tpu.memory_space<vmem>>, vector<1x1x4x8xf32>
    %24 = vector.shape_cast %23 : vector<1x1x4x8xf32> to vector<4x8xf32>
    %cst_20 = arith.constant dense<0.000000e+00> : vector<256x8xf32>
    %25 = tpu.matmul %22, %24, %cst_20 {dimension_numbers = #tpu.dot_dimension_numbers<[1], [0], [0], [1], [0, 0, 1, 1], [], []>} : vector<256x4xf32>, vector<4x8xf32>, vector<256x8xf32> -> vector<256x8xf32>
    %26 = arith.addf %20, %25 : vector<256x8xf32>
    %27 = vector.extract_strided_slice %1 {offsets = [1, 1, 0], sizes = [16, 16, 4], strides = [1, 1, 1]} : vector<18x18x4xf32> to vector<16x16x4xf32>
    %28 = vector.shape_cast %27 : vector<16x16x4xf32> to vector<256x4xf32>
    %c1_21 = arith.constant 1 : index
    %c1_22 = arith.constant 1 : index
    %c0_23 = arith.constant 0 : index
    %c0_24 = arith.constant 0 : index
    %29 = vector.load %arg4[%c1_21, %c1_22, %c0_23, %c0_24] : memref<3x3x4x8xf32, #tpu.memory_space<vmem>>, vector<1x1x4x8xf32>
    %30 = vector.shape_cast %29 : vector<1x1x4x8xf32> to vector<4x8xf32>
    %cst_25 = arith.constant dense<0.000000e+00> : vector<256x8xf32>
    %31 = tpu.matmul %28, %30, %cst_25 {dimension_numbers = #tpu.dot_dimension_numbers<[1], [0], [0], [1], [0, 0, 1, 1], [], []>} : vector<256x4xf32>, vector<4x8xf32>, vector<256x8xf32> -> vector<256x8xf32>
    %32 = arith.addf %26, %31 : vector<256x8xf32>
    %33 = vector.extract_strided_slice %1 {offsets = [1, 2, 0], sizes = [16, 16, 4], strides = [1, 1, 1]} : vector<18x18x4xf32> to vector<16x16x4xf32>
    %34 = vector.shape_cast %33 : vector<16x16x4xf32> to vector<256x4xf32>
    %c1_26 = arith.constant 1 : index
    %c2_27 = arith.constant 2 : index
    %c0_28 = arith.constant 0 : index
    %c0_29 = arith.constant 0 : index
    %35 = vector.load %arg4[%c1_26, %c2_27, %c0_28, %c0_29] : memref<3x3x4x8xf32, #tpu.memory_space<vmem>>, vector<1x1x4x8xf32>
    %36 = vector.shape_cast %35 : vector<1x1x4x8xf32> to vector<4x8xf32>
    %cst_30 = arith.constant dense<0.000000e+00> : vector<256x8xf32>
    %37 = tpu.matmul %34, %36, %cst_30 {dimension_numbers = #tpu.dot_dimension_numbers<[1], [0], [0], [1], [0, 0, 1, 1], [], []>} : vector<256x4xf32>, vector<4x8xf32>, vector<256x8xf32> -> vector<256x8xf32>
    %38 = arith.addf %32, %37 : vector<256x8xf32>
    %39 = vector.extract_strided_slice %1 {offsets = [2, 0, 0], sizes = [16, 16, 4], strides = [1, 1, 1]} : vector<18x18x4xf32> to vector<16x16x4xf32>
    %40 = vector.shape_cast %39 : vector<16x16x4xf32> to vector<256x4xf32>
    %c2_31 = arith.constant 2 : index
    %c0_32 = arith.constant 0 : index
    %c0_33 = arith.constant 0 : index
    %c0_34 = arith.constant 0 : index
    %41 = vector.load %arg4[%c2_31, %c0_32, %c0_33, %c0_34] : memref<3x3x4x8xf32, #tpu.memory_space<vmem>>, vector<1x1x4x8xf32>
    %42 = vector.shape_cast %41 : vector<1x1x4x8xf32> to vector<4x8xf32>
    %cst_35 = arith.constant dense<0.000000e+00> : vector<256x8xf32>
    %43 = tpu.matmul %40, %42, %cst_35 {dimension_numbers = #tpu.dot_dimension_numbers<[1], [0], [0], [1], [0, 0, 1, 1], [], []>} : vector<256x4xf32>, vector<4x8xf32>, vector<256x8xf32> -> vector<256x8xf32>
    %44 = arith.addf %38, %43 : vector<256x8xf32>
    %45 = vector.extract_strided_slice %1 {offsets = [2, 1, 0], sizes = [16, 16, 4], strides = [1, 1, 1]} : vector<18x18x4xf32> to vector<16x16x4xf32>
    %46 = vector.shape_cast %45 : vector<16x16x4xf32> to vector<256x4xf32>
    %c2_36 = arith.constant 2 : index
    %c1_37 = arith.constant 1 : index
    %c0_38 = arith.constant 0 : index
    %c0_39 = arith.constant 0 : index
    %47 = vector.load %arg4[%c2_36, %c1_37, %c0_38, %c0_39] : memref<3x3x4x8xf32, #tpu.memory_space<vmem>>, vector<1x1x4x8xf32>
    %48 = vector.shape_cast %47 : vector<1x1x4x8xf32> to vector<4x8xf32>
    %cst_40 = arith.constant dense<0.000000e+00> : vector<256x8xf32>
    %49 = tpu.matmul %46, %48, %cst_40 {dimension_numbers = #tpu.dot_dimension_numbers<[1], [0], [0], [1], [0, 0, 1, 1], [], []>} : vector<256x4xf32>, vector<4x8xf32>, vector<256x8xf32> -> vector<256x8xf32>
    %50 = arith.addf %44, %49 : vector<256x8xf32>
    %51 = vector.extract_strided_slice %1 {offsets = [2, 2, 0], sizes = [16, 16, 4], strides = [1, 1, 1]} : vector<18x18x4xf32> to vector<16x16x4xf32>
    %52 = vector.shape_cast %51 : vector<16x16x4xf32> to vector<256x4xf32>
    %c2_41 = arith.constant 2 : index
    %c2_42 = arith.constant 2 : index
    %c0_43 = arith.constant 0 : index
    %c0_44 = arith.constant 0 : index
    %53 = vector.load %arg4[%c2_41, %c2_42, %c0_43, %c0_44] : memref<3x3x4x8xf32, #tpu.memory_space<vmem>>, vector<1x1x4x8xf32>
    %54 = vector.shape_cast %53 : vector<1x1x4x8xf32> to vector<4x8xf32>
    %cst_45 = arith.constant dense<0.000000e+00> : vector<256x8xf32>
    %55 = tpu.matmul %52, %54, %cst_45 {dimension_numbers = #tpu.dot_dimension_numbers<[1], [0], [0], [1], [0, 0, 1, 1], [], []>} : vector<256x4xf32>, vector<4x8xf32>, vector<256x8xf32> -> vector<256x8xf32>
    %56 = arith.addf %50, %55 : vector<256x8xf32>
    %c0_46 = arith.constant 0 : index
    %c0_47 = arith.constant 0 : index
    %57 = vector.load %arg5[%c0_46, %c0_47] : memref<1x8xf32, #tpu.memory_space<vmem>>, vector<1x8xf32>
    %58 = vector.broadcast %57 : vector<1x8xf32> to vector<256x8xf32>
    %59 = arith.addf %56, %58 : vector<256x8xf32>
    %cst_48 = arith.constant 0.000000e+00 : f32
    %60 = vector.broadcast %cst_48 : f32 to vector<256x8xf32>
    %61 = arith.maximumf %59, %60 : vector<256x8xf32>
    %c0_49 = arith.constant 0 : index
    %c0_50 = arith.constant 0 : index
    %62 = vector.load %arg10[%c0_49, %c0_50] : memref<256x8xf32, #tpu.memory_space<vmem>>, vector<256x8xf32>
    tpu.vector_store %arg10[%c0_49, %c0_50], %61 {strides = array<i32>} : memref<256x8xf32, #tpu.memory_space<vmem>>, vector<256x8xf32>,
    %c0_51 = arith.constant 0 : index
    %c0_52 = arith.constant 0 : index
    %c0_53 = arith.constant 0 : index
    %c0_54 = arith.constant 0 : index
    %63 = vector.load %arg2[%c0_51, %c0_52, %c0_53, %c0_54] : memref<1x18x18x4xf32, #tpu.memory_space<vmem>>, vector<1x18x18x4xf32>
    %64 = vector.shape_cast %63 : vector<1x18x18x4xf32> to vector<18x18x4xf32>
    %cst_55 = arith.constant 0.000000e+00 : f32
    %65 = vector.broadcast %cst_55 : f32 to vector<256x8xf32>
    %66 = vector.extract_strided_slice %64 {offsets = [0, 0, 0], sizes = [16, 16, 4], strides = [1, 1, 1]} : vector<18x18x4xf32> to vector<16x16x4xf32>
    %67 = vector.shape_cast %66 : vector<16x16x4xf32> to vector<256x4xf32>
    %c0_56 = arith.constant 0 : index
    %c0_57 = arith.constant 0 : index
    %c0_58 = arith.constant 0 : index
    %c0_59 = arith.constant 0 : index
    %68 = vector.load %arg6[%c0_56, %c0_57, %c0_58, %c0_59] : memref<3x3x4x8xf32, #tpu.memory_space<vmem>>, vector<1x1x4x8xf32>
    %69 = vector.shape_cast %68 : vector<1x1x4x8xf32> to vector<4x8xf32>
    %cst_60 = arith.constant dense<0.000000e+00> : vector<256x8xf32>
    %70 = tpu.matmul %67, %69, %cst_60 {dimension_numbers = #tpu.dot_dimension_numbers<[1], [0], [0], [1], [0, 0, 1, 1], [], []>} : vector<256x4xf32>, vector<4x8xf32>, vector<256x8xf32> -> vector<256x8xf32>
    %71 = arith.addf %65, %70 : vector<256x8xf32>
    %72 = vector.extract_strided_slice %64 {offsets = [0, 1, 0], sizes = [16, 16, 4], strides = [1, 1, 1]} : vector<18x18x4xf32> to vector<16x16x4xf32>
    %73 = vector.shape_cast %72 : vector<16x16x4xf32> to vector<256x4xf32>
    %c0_61 = arith.constant 0 : index
    %c1_62 = arith.constant 1 : index
    %c0_63 = arith.constant 0 : index
    %c0_64 = arith.constant 0 : index
    %74 = vector.load %arg6[%c0_61, %c1_62, %c0_63, %c0_64] : memref<3x3x4x8xf32, #tpu.memory_space<vmem>>, vector<1x1x4x8xf32>
    %75 = vector.shape_cast %74 : vector<1x1x4x8xf32> to vector<4x8xf32>
    %cst_65 = arith.constant dense<0.000000e+00> : vector<256x8xf32>
    %76 = tpu.matmul %73, %75, %cst_65 {dimension_numbers = #tpu.dot_dimension_numbers<[1], [0], [0], [1], [0, 0, 1, 1], [], []>} : vector<256x4xf32>, vector<4x8xf32>, vector<256x8xf32> -> vector<256x8xf32>
    %77 = arith.addf %71, %76 : vector<256x8xf32>
    %78 = vector.extract_strided_slice %64 {offsets = [0, 2, 0], sizes = [16, 16, 4], strides = [1, 1, 1]} : vector<18x18x4xf32> to vector<16x16x4xf32>
    %79 = vector.shape_cast %78 : vector<16x16x4xf32> to vector<256x4xf32>
    %c0_66 = arith.constant 0 : index
    %c2_67 = arith.constant 2 : index
    %c0_68 = arith.constant 0 : index
    %c0_69 = arith.constant 0 : index
    %80 = vector.load %arg6[%c0_66, %c2_67, %c0_68, %c0_69] : memref<3x3x4x8xf32, #tpu.memory_space<vmem>>, vector<1x1x4x8xf32>
    %81 = vector.shape_cast %80 : vector<1x1x4x8xf32> to vector<4x8xf32>
    %cst_70 = arith.constant dense<0.000000e+00> : vector<256x8xf32>
    %82 = tpu.matmul %79, %81, %cst_70 {dimension_numbers = #tpu.dot_dimension_numbers<[1], [0], [0], [1], [0, 0, 1, 1], [], []>} : vector<256x4xf32>, vector<4x8xf32>, vector<256x8xf32> -> vector<256x8xf32>
    %83 = arith.addf %77, %82 : vector<256x8xf32>
    %84 = vector.extract_strided_slice %64 {offsets = [1, 0, 0], sizes = [16, 16, 4], strides = [1, 1, 1]} : vector<18x18x4xf32> to vector<16x16x4xf32>
    %85 = vector.shape_cast %84 : vector<16x16x4xf32> to vector<256x4xf32>
    %c1_71 = arith.constant 1 : index
    %c0_72 = arith.constant 0 : index
    %c0_73 = arith.constant 0 : index
    %c0_74 = arith.constant 0 : index
    %86 = vector.load %arg6[%c1_71, %c0_72, %c0_73, %c0_74] : memref<3x3x4x8xf32, #tpu.memory_space<vmem>>, vector<1x1x4x8xf32>
    %87 = vector.shape_cast %86 : vector<1x1x4x8xf32> to vector<4x8xf32>
    %cst_75 = arith.constant dense<0.000000e+00> : vector<256x8xf32>
    %88 = tpu.matmul %85, %87, %cst_75 {dimension_numbers = #tpu.dot_dimension_numbers<[1], [0], [0], [1], [0, 0, 1, 1], [], []>} : vector<256x4xf32>, vector<4x8xf32>, vector<256x8xf32> -> vector<256x8xf32>
    %89 = arith.addf %83, %88 : vector<256x8xf32>
    %90 = vector.extract_strided_slice %64 {offsets = [1, 1, 0], sizes = [16, 16, 4], strides = [1, 1, 1]} : vector<18x18x4xf32> to vector<16x16x4xf32>
    %91 = vector.shape_cast %90 : vector<16x16x4xf32> to vector<256x4xf32>
    %c1_76 = arith.constant 1 : index
    %c1_77 = arith.constant 1 : index
    %c0_78 = arith.constant 0 : index
    %c0_79 = arith.constant 0 : index
    %92 = vector.load %arg6[%c1_76, %c1_77, %c0_78, %c0_79] : memref<3x3x4x8xf32, #tpu.memory_space<vmem>>, vector<1x1x4x8xf32>
    %93 = vector.shape_cast %92 : vector<1x1x4x8xf32> to vector<4x8xf32>
    %cst_80 = arith.constant dense<0.000000e+00> : vector<256x8xf32>
    %94 = tpu.matmul %91, %93, %cst_80 {dimension_numbers = #tpu.dot_dimension_numbers<[1], [0], [0], [1], [0, 0, 1, 1], [], []>} : vector<256x4xf32>, vector<4x8xf32>, vector<256x8xf32> -> vector<256x8xf32>
    %95 = arith.addf %89, %94 : vector<256x8xf32>
    %96 = vector.extract_strided_slice %64 {offsets = [1, 2, 0], sizes = [16, 16, 4], strides = [1, 1, 1]} : vector<18x18x4xf32> to vector<16x16x4xf32>
    %97 = vector.shape_cast %96 : vector<16x16x4xf32> to vector<256x4xf32>
    %c1_81 = arith.constant 1 : index
    %c2_82 = arith.constant 2 : index
    %c0_83 = arith.constant 0 : index
    %c0_84 = arith.constant 0 : index
    %98 = vector.load %arg6[%c1_81, %c2_82, %c0_83, %c0_84] : memref<3x3x4x8xf32, #tpu.memory_space<vmem>>, vector<1x1x4x8xf32>
    %99 = vector.shape_cast %98 : vector<1x1x4x8xf32> to vector<4x8xf32>
    %cst_85 = arith.constant dense<0.000000e+00> : vector<256x8xf32>
    %100 = tpu.matmul %97, %99, %cst_85 {dimension_numbers = #tpu.dot_dimension_numbers<[1], [0], [0], [1], [0, 0, 1, 1], [], []>} : vector<256x4xf32>, vector<4x8xf32>, vector<256x8xf32> -> vector<256x8xf32>
    %101 = arith.addf %95, %100 : vector<256x8xf32>
    %102 = vector.extract_strided_slice %64 {offsets = [2, 0, 0], sizes = [16, 16, 4], strides = [1, 1, 1]} : vector<18x18x4xf32> to vector<16x16x4xf32>
    %103 = vector.shape_cast %102 : vector<16x16x4xf32> to vector<256x4xf32>
    %c2_86 = arith.constant 2 : index
    %c0_87 = arith.constant 0 : index
    %c0_88 = arith.constant 0 : index
    %c0_89 = arith.constant 0 : index
    %104 = vector.load %arg6[%c2_86, %c0_87, %c0_88, %c0_89] : memref<3x3x4x8xf32, #tpu.memory_space<vmem>>, vector<1x1x4x8xf32>
    %105 = vector.shape_cast %104 : vector<1x1x4x8xf32> to vector<4x8xf32>
    %cst_90 = arith.constant dense<0.000000e+00> : vector<256x8xf32>
    %106 = tpu.matmul %103, %105, %cst_90 {dimension_numbers = #tpu.dot_dimension_numbers<[1], [0], [0], [1], [0, 0, 1, 1], [], []>} : vector<256x4xf32>, vector<4x8xf32>, vector<256x8xf32> -> vector<256x8xf32>
    %107 = arith.addf %101, %106 : vector<256x8xf32>
    %108 = vector.extract_strided_slice %64 {offsets = [2, 1, 0], sizes = [16, 16, 4], strides = [1, 1, 1]} : vector<18x18x4xf32> to vector<16x16x4xf32>
    %109 = vector.shape_cast %108 : vector<16x16x4xf32> to vector<256x4xf32>
    %c2_91 = arith.constant 2 : index
    %c1_92 = arith.constant 1 : index
    %c0_93 = arith.constant 0 : index
    %c0_94 = arith.constant 0 : index
    %110 = vector.load %arg6[%c2_91, %c1_92, %c0_93, %c0_94] : memref<3x3x4x8xf32, #tpu.memory_space<vmem>>, vector<1x1x4x8xf32>
    %111 = vector.shape_cast %110 : vector<1x1x4x8xf32> to vector<4x8xf32>
    %cst_95 = arith.constant dense<0.000000e+00> : vector<256x8xf32>
    %112 = tpu.matmul %109, %111, %cst_95 {dimension_numbers = #tpu.dot_dimension_numbers<[1], [0], [0], [1], [0, 0, 1, 1], [], []>} : vector<256x4xf32>, vector<4x8xf32>, vector<256x8xf32> -> vector<256x8xf32>
    %113 = arith.addf %107, %112 : vector<256x8xf32>
    %114 = vector.extract_strided_slice %64 {offsets = [2, 2, 0], sizes = [16, 16, 4], strides = [1, 1, 1]} : vector<18x18x4xf32> to vector<16x16x4xf32>
    %115 = vector.shape_cast %114 : vector<16x16x4xf32> to vector<256x4xf32>
    %c2_96 = arith.constant 2 : index
    %c2_97 = arith.constant 2 : index
    %c0_98 = arith.constant 0 : index
    %c0_99 = arith.constant 0 : index
    %116 = vector.load %arg6[%c2_96, %c2_97, %c0_98, %c0_99] : memref<3x3x4x8xf32, #tpu.memory_space<vmem>>, vector<1x1x4x8xf32>
    %117 = vector.shape_cast %116 : vector<1x1x4x8xf32> to vector<4x8xf32>
    %cst_100 = arith.constant dense<0.000000e+00> : vector<256x8xf32>
    %118 = tpu.matmul %115, %117, %cst_100 {dimension_numbers = #tpu.dot_dimension_numbers<[1], [0], [0], [1], [0, 0, 1, 1], [], []>} : vector<256x4xf32>, vector<4x8xf32>, vector<256x8xf32> -> vector<256x8xf32>
    %119 = arith.addf %113, %118 : vector<256x8xf32>
    %c0_101 = arith.constant 0 : index
    %c0_102 = arith.constant 0 : index
    %120 = vector.load %arg7[%c0_101, %c0_102] : memref<1x8xf32, #tpu.memory_space<vmem>>, vector<1x8xf32>
    %121 = vector.broadcast %120 : vector<1x8xf32> to vector<256x8xf32>
    %122 = arith.addf %119, %121 : vector<256x8xf32>
    %cst_103 = arith.constant 0.000000e+00 : f32
    %123 = vector.broadcast %cst_103 : f32 to vector<256x8xf32>
    %124 = arith.maximumf %122, %123 : vector<256x8xf32>
    %c0_104 = arith.constant 0 : index
    %c0_105 = arith.constant 0 : index
    %125 = vector.load %arg11[%c0_104, %c0_105] : memref<256x8xf32, #tpu.memory_space<vmem>>, vector<256x8xf32>
    tpu.vector_store %arg11[%c0_104, %c0_105], %124 {strides = array<i32>} : memref<256x8xf32, #tpu.memory_space<vmem>>, vector<256x8xf32>,
    %c0_106 = arith.constant 0 : index
    %c0_107 = arith.constant 0 : index
    %c0_108 = arith.constant 0 : index
    %c0_109 = arith.constant 0 : index
    %126 = vector.load %arg3[%c0_106, %c0_107, %c0_108, %c0_109] : memref<1x18x18x4xf32, #tpu.memory_space<vmem>>, vector<1x18x18x4xf32>
    %127 = vector.shape_cast %126 : vector<1x18x18x4xf32> to vector<18x18x4xf32>
    %128 = vector.extract_strided_slice %127 {offsets = [1, 1, 0], sizes = [16, 16, 4], strides = [1, 1, 1]} : vector<18x18x4xf32> to vector<16x16x4xf32>
    %129 = vector.extract_strided_slice %127 {offsets = [0, 0, 0], sizes = [16, 16, 4], strides = [1, 1, 1]} : vector<18x18x4xf32> to vector<16x16x4xf32>
    %130 = arith.maximumf %128, %129 : vector<16x16x4xf32>
    %131 = vector.extract_strided_slice %127 {offsets = [0, 1, 0], sizes = [16, 16, 4], strides = [1, 1, 1]} : vector<18x18x4xf32> to vector<16x16x4xf32>
    %132 = arith.maximumf %130, %131 : vector<16x16x4xf32>
    %133 = vector.extract_strided_slice %127 {offsets = [0, 2, 0], sizes = [16, 16, 4], strides = [1, 1, 1]} : vector<18x18x4xf32> to vector<16x16x4xf32>
    %134 = arith.maximumf %132, %133 : vector<16x16x4xf32>
    %135 = vector.extract_strided_slice %127 {offsets = [1, 0, 0], sizes = [16, 16, 4], strides = [1, 1, 1]} : vector<18x18x4xf32> to vector<16x16x4xf32>
    %136 = arith.maximumf %134, %135 : vector<16x16x4xf32>
    %137 = vector.extract_strided_slice %127 {offsets = [1, 2, 0], sizes = [16, 16, 4], strides = [1, 1, 1]} : vector<18x18x4xf32> to vector<16x16x4xf32>
    %138 = arith.maximumf %136, %137 : vector<16x16x4xf32>
    %139 = vector.extract_strided_slice %127 {offsets = [2, 0, 0], sizes = [16, 16, 4], strides = [1, 1, 1]} : vector<18x18x4xf32> to vector<16x16x4xf32>
    %140 = arith.maximumf %138, %139 : vector<16x16x4xf32>
    %141 = vector.extract_strided_slice %127 {offsets = [2, 1, 0], sizes = [16, 16, 4], strides = [1, 1, 1]} : vector<18x18x4xf32> to vector<16x16x4xf32>
    %142 = arith.maximumf %140, %141 : vector<16x16x4xf32>
    %143 = vector.extract_strided_slice %127 {offsets = [2, 2, 0], sizes = [16, 16, 4], strides = [1, 1, 1]} : vector<18x18x4xf32> to vector<16x16x4xf32>
    %144 = arith.maximumf %142, %143 : vector<16x16x4xf32>
    %145 = vector.shape_cast %144 : vector<16x16x4xf32> to vector<256x4xf32>
    %c0_110 = arith.constant 0 : index
    %c0_111 = arith.constant 0 : index
    %146 = vector.load %arg8[%c0_110, %c0_111] : memref<4x8xf32, #tpu.memory_space<vmem>>, vector<4x8xf32>
    %cst_112 = arith.constant dense<0.000000e+00> : vector<256x8xf32>
    %147 = tpu.matmul %145, %146, %cst_112 {dimension_numbers = #tpu.dot_dimension_numbers<[1], [0], [0], [1], [0, 0, 1, 1], [], []>} : vector<256x4xf32>, vector<4x8xf32>, vector<256x8xf32> -> vector<256x8xf32>
    %c0_113 = arith.constant 0 : index
    %c0_114 = arith.constant 0 : index
    %148 = vector.load %arg9[%c0_113, %c0_114] : memref<1x8xf32, #tpu.memory_space<vmem>>, vector<1x8xf32>
    %149 = vector.broadcast %148 : vector<1x8xf32> to vector<256x8xf32>
    %150 = arith.addf %147, %149 : vector<256x8xf32>
    %cst_115 = arith.constant 0.000000e+00 : f32
    %151 = vector.broadcast %cst_115 : f32 to vector<256x8xf32>
    %152 = arith.maximumf %150, %151 : vector<256x8xf32>
    %c0_116 = arith.constant 0 : index
    %c0_117 = arith.constant 0 : index
    %153 = vector.load %arg12[%c0_116, %c0_117] : memref<256x8xf32, #tpu.memory_space<vmem>>, vector<256x8xf32>
    tpu.vector_store %arg12[%c0_116, %c0_117], %152 {strides = array<i32>} : memref<256x8xf32, #tpu.memory_space<vmem>>, vector<256x8xf32>,
    return
  }
  func.func @transform_0(%arg0: i32) -> (i32, i32, i32, i32) {
    %c0_i32 = arith.constant 0 : i32
    %c0_i32_0 = arith.constant 0 : i32
    %c0_i32_1 = arith.constant 0 : i32
    %c0_i32_2 = arith.constant 0 : i32
    return %arg0, %c0_i32, %c0_i32_0, %c0_i32_1 : i32, i32, i32, i32
  }
  func.func @transform_1(%arg0: i32) -> (i32, i32, i32, i32) {
    %c0_i32 = arith.constant 0 : i32
    %c0_i32_0 = arith.constant 0 : i32
    %c0_i32_1 = arith.constant 0 : i32
    %c0_i32_2 = arith.constant 0 : i32
    return %arg0, %c0_i32, %c0_i32_0, %c0_i32_1 : i32, i32, i32, i32
  }
  func.func @transform_2(%arg0: i32) -> (i32, i32, i32, i32) {
    %c0_i32 = arith.constant 0 : i32
    %c0_i32_0 = arith.constant 0 : i32
    %c0_i32_1 = arith.constant 0 : i32
    %c0_i32_2 = arith.constant 0 : i32
    return %arg0, %c0_i32, %c0_i32_0, %c0_i32_1 : i32, i32, i32, i32
  }
  func.func @transform_3(%arg0: i32) -> (i32, i32, i32, i32) {
    %c0_i32 = arith.constant 0 : i32
    %c0_i32_0 = arith.constant 0 : i32
    %c0_i32_1 = arith.constant 0 : i32
    %c0_i32_2 = arith.constant 0 : i32
    %c0_i32_3 = arith.constant 0 : i32
    return %c0_i32, %c0_i32_0, %c0_i32_1, %c0_i32_2 : i32, i32, i32, i32
  }
  func.func @transform_4(%arg0: i32) -> (i32, i32) {
    %c0_i32 = arith.constant 0 : i32
    %c0_i32_0 = arith.constant 0 : i32
    %c0_i32_1 = arith.constant 0 : i32
    return %c0_i32, %c0_i32_0 : i32, i32
  }
  func.func @transform_5(%arg0: i32) -> (i32, i32, i32, i32) {
    %c0_i32 = arith.constant 0 : i32
    %c0_i32_0 = arith.constant 0 : i32
    %c0_i32_1 = arith.constant 0 : i32
    %c0_i32_2 = arith.constant 0 : i32
    %c0_i32_3 = arith.constant 0 : i32
    return %c0_i32, %c0_i32_0, %c0_i32_1, %c0_i32_2 : i32, i32, i32, i32
  }
  func.func @transform_6(%arg0: i32) -> (i32, i32) {
    %c0_i32 = arith.constant 0 : i32
    %c0_i32_0 = arith.constant 0 : i32
    %c0_i32_1 = arith.constant 0 : i32
    return %c0_i32, %c0_i32_0 : i32, i32
  }
  func.func @transform_7(%arg0: i32) -> (i32, i32) {
    %c0_i32 = arith.constant 0 : i32
    %c0_i32_0 = arith.constant 0 : i32
    %c0_i32_1 = arith.constant 0 : i32
    return %c0_i32, %c0_i32_0 : i32, i32
  }
  func.func @transform_8(%arg0: i32) -> (i32, i32) {
    %c0_i32 = arith.constant 0 : i32
    %c0_i32_0 = arith.constant 0 : i32
    %c0_i32_1 = arith.constant 0 : i32
    return %c0_i32, %c0_i32_0 : i32, i32
  }
  func.func @transform_9(%arg0: i32) -> (i32, i32) {
    %c0_i32 = arith.constant 0 : i32
    %c0_i32_0 = arith.constant 0 : i32
    return %arg0, %c0_i32 : i32, i32
  }
  func.func @transform_10(%arg0: i32) -> (i32, i32) {
    %c0_i32 = arith.constant 0 : i32
    %c0_i32_0 = arith.constant 0 : i32
    return %arg0, %c0_i32 : i32, i32
  }
  func.func @transform_11(%arg0: i32) -> (i32, i32) {
    %c0_i32 = arith.constant 0 : i32
    %c0_i32_0 = arith.constant 0 : i32
    return %arg0, %c0_i32 : i32, i32
  }
}

</mosaic_0001>

<bundles_post_ra>
// kernel: inception_forward.2
= control target key start
LH: loop header
LB: loop body
LE: loop exit
PB: predicated region body
PF: predicated region fallthrough
CT: control target
= control target key end

     0   :  { %vm279_vm0 = vcmask 1043456   ;;  %vm86_vm1 = vcmask 31744   ;;  %vm732_vm2 = vcmask 130048   ;;  %s1636_s1 = inlined_call_operand.vmem [shape: f32[4,16], index: 1, kind: input, shape index: {}]   ;;  %s1637_s0 = inlined_call_operand.vmem [shape: f32[512,4], index: 0, kind: input, shape index: {}]   ;;  %s1638_s2 = inlined_call_operand.vmem [shape: f32[1,16], index: 2, kind: input, shape index: {}]   ;;  %s1639_s3 = inlined_call_operand.vmem [shape: f32[512,16], index: 3, kind: output, shape index: {}]  }
   0x1   :  { %v78_v0 = vld [vmem:[%s1636_s1] sm:$0xf]  ;;  %v15_v3 = vld [vmem:[%s1637_s0 + $0x8] sm:$0xff]  ;;  %v16_v5 = vld [vmem:[%s1637_s0 + $0x10] sm:$0xff] }
   0x2   :  { %v14_v1 = vld [vmem:[%s1637_s0] sm:$0xff]  ;;  %932 = vmatprep.subr.msk.mxu0 %vm279_vm0, %v78_v0  ;;  %1030 = vmatprep.subr.msk.mxu1 %vm279_vm0, %v78_v0  ;;  %v47_v4 = vld [vmem:[%s1637_s0 + $0x108] sm:$0xff]  ;;  %v48_v6 = vld [vmem:[%s1637_s0 + $0x110] sm:$0xff] }
   0x3   :  { %v46_v2 = vld [vmem:[%s1637_s0 + $0x100] sm:$0xff]  ;;  %933 = vmatpush3.msk.msra.mxu0 %vm279_vm0, %v78_v0  ;;  %1031 = vmatpush3.msk.msra.mxu1 %vm279_vm0, %v78_v0  ;;  %v17_v7 = vld [vmem:[%s1637_s0 + $0x18] sm:$0xff]  ;;  %v19_v11 = vld [vmem:[%s1637_s0 + $0x28] sm:$0xff] }
   0x4   :  { %934 = vmatprep.mubr.msk.f32.mxu0 %vm86_vm1, %v14_v1  ;;  %982 = vmatprep.mubr.msk.f32.mxu1 %vm86_vm1, %v46_v2  ;;  %v49_v8 = vld [vmem:[%s1637_s0 + $0x118] sm:$0xff]  ;;  %v18_v9 = vld [vmem:[%s1637_s0 + $0x20] sm:$0xff]  ;;  %v51_v12 = vld [vmem:[%s1637_s0 + $0x128] sm:$0xff] }
   0x5   :  { %935 = vmatmul.mubr.msk.f32.vlgmr.msra.gmra.mxu0 %vm86_vm1, %v15_v3  ;;  %983 = vmatmul.mubr.msk.f32.vlgmr.msra.gmra.mxu1 %vm86_vm1, %v47_v4  ;;  %v50_v10 = vld [vmem:[%s1637_s0 + $0x120] sm:$0xff]  ;;  %v20_v13 = vld [vmem:[%s1637_s0 + $0x30] sm:$0xff]  ;;  %v21_v15 = vld [vmem:[%s1637_s0 + $0x38] sm:$0xff] }
   0x6   :  { %937 = vmatprep.mubr.msk.f32.mxu0 %vm86_vm1, %v16_v5  ;;  %985 = vmatprep.mubr.msk.f32.mxu1 %vm86_vm1, %v48_v6  ;;  %v52_v14 = vld [vmem:[%s1637_s0 + $0x130] sm:$0xff]  ;;  %v53_v16 = vld [vmem:[%s1637_s0 + $0x138] sm:$0xff]  ;;  %v22_v17 = vld [vmem:[%s1637_s0 + $0x40] sm:$0xff] }
   0x7   :  { %v54_v18 = vld [vmem:[%s1637_s0 + $0x140] sm:$0xff]  ;;  %v23_v19 = vld [vmem:[%s1637_s0 + $0x48] sm:$0xff]  ;;  %v24_v21 = vld [vmem:[%s1637_s0 + $0x50] sm:$0xff] }
   0x8   :  { %v55_v20 = vld [vmem:[%s1637_s0 + $0x148] sm:$0xff]  ;;  %v56_v22 = vld [vmem:[%s1637_s0 + $0x150] sm:$0xff]  ;;  %v25_v23 = vld [vmem:[%s1637_s0 + $0x58] sm:$0xff] }
   0x9   :  { %938 = vmatmul.mubr.msk.f32.gmra.mxu0 %vm86_vm1, %v17_v7  ;;  %986 = vmatmul.mubr.msk.f32.gmra.mxu1 %vm86_vm1, %v49_v8  ;;  %v57_v24 = vld [vmem:[%s1637_s0 + $0x158] sm:$0xff]  ;;  %v26_v25 = vld [vmem:[%s1637_s0 + $0x60] sm:$0xff]  ;;  %v27_v27 = vld [vmem:[%s1637_s0 + $0x68] sm:$0xff] }
   0xa   :  { %940 = vmatprep.mubr.msk.f32.mxu0 %vm86_vm1, %v18_v9  ;;  %988 = vmatprep.mubr.msk.f32.mxu1 %vm86_vm1, %v50_v10  ;;  %v58_v26 = vld [vmem:[%s1637_s0 + $0x160] sm:$0xff]  ;;  %v59_v28 = vld [vmem:[%s1637_s0 + $0x168] sm:$0xff]  ;;  %v28_v29 = vld [vmem:[%s1637_s0 + $0x70] sm:$0xff] }
   0xb   :  { %v60_v30 = vld [vmem:[%s1637_s0 + $0x170] sm:$0xff]  ;;  %v29_v31 = vld [vmem:[%s1637_s0 + $0x78] sm:$0xff]  ;;  %v30_v33 = vld [vmem:[%s1637_s0 + $0x80] sm:$0xff] }
   0xc   :  { %v61_v32 = vld [vmem:[%s1637_s0 + $0x178] sm:$0xff]  ;;  %v62_v34 = vld [vmem:[%s1637_s0 + $0x180] sm:$0xff]  ;;  %v31_v35 = vld [vmem:[%s1637_s0 + $0x88] sm:$0xff] }
   0xd   :  { %941 = vmatmul.mubr.msk.f32.gmra.mxu0 %vm86_vm1, %v19_v11  ;;  %989 = vmatmul.mubr.msk.f32.gmra.mxu1 %vm86_vm1, %v51_v12  ;;  %v63_v36 = vld [vmem:[%s1637_s0 + $0x188] sm:$0xff]  ;;  %v32_v37 = vld [vmem:[%s1637_s0 + $0x90] sm:$0xff]  ;;  %v33_v39 = vld [vmem:[%s1637_s0 + $0x98] sm:$0xff] }
   0xe   :  { %943 = vmatprep.mubr.msk.f32.mxu0 %vm86_vm1, %v20_v13  ;;  %991 = vmatprep.mubr.msk.f32.mxu1 %vm86_vm1, %v52_v14  ;;  %v64_v38 = vld [vmem:[%s1637_s0 + $0x190] sm:$0xff]  ;;  %v65_v40 = vld [vmem:[%s1637_s0 + $0x198] sm:$0xff]  ;;  %v34_v41 = vld [vmem:[%s1637_s0 + $0xa0] sm:$0xff] }
   0xf   :  { %v66_v42 = vld [vmem:[%s1637_s0 + $0x1a0] sm:$0xff]  ;;  %v35_v43 = vld [vmem:[%s1637_s0 + $0xa8] sm:$0xff]  ;;  %v36_v45 = vld [vmem:[%s1637_s0 + $0xb0] sm:$0xff] }
  0x10   :  { %v67_v44 = vld [vmem:[%s1637_s0 + $0x1a8] sm:$0xff]  ;;  %v68_v46 = vld [vmem:[%s1637_s0 + $0x1b0] sm:$0xff]  ;;  %v37_v47 = vld [vmem:[%s1637_s0 + $0xb8] sm:$0xff] }
  0x11   :  { %944 = vmatmul.mubr.msk.f32.gmra.mxu0 %vm86_vm1, %v21_v15  ;;  %992 = vmatmul.mubr.msk.f32.gmra.mxu1 %vm86_vm1, %v53_v16  ;;  %v69_v48 = vld [vmem:[%s1637_s0 + $0x1b8] sm:$0xff]  ;;  %v38_v49 = vld [vmem:[%s1637_s0 + $0xc0] sm:$0xff]  ;;  %v39_v51 = vld [vmem:[%s1637_s0 + $0xc8] sm:$0xff] }
  0x12   :  { %946 = vmatprep.mubr.msk.f32.mxu0 %vm86_vm1, %v22_v17  ;;  %994 = vmatprep.mubr.msk.f32.mxu1 %vm86_vm1, %v54_v18  ;;  %v70_v50 = vld [vmem:[%s1637_s0 + $0x1c0] sm:$0xff]  ;;  %v71_v52 = vld [vmem:[%s1637_s0 + $0x1c8] sm:$0xff]  ;;  %v40_v53 = vld [vmem:[%s1637_s0 + $0xd0] sm:$0xff] }
  0x13   :  { %v72_v54 = vld [vmem:[%s1637_s0 + $0x1d0] sm:$0xff]  ;;  %v41_v55 = vld [vmem:[%s1637_s0 + $0xd8] sm:$0xff]  ;;  %v42_v57 = vld [vmem:[%s1637_s0 + $0xe0] sm:$0xff] }
  0x14   :  { %v73_v56 = vld [vmem:[%s1637_s0 + $0x1d8] sm:$0xff]  ;;  %v74_v58 = vld [vmem:[%s1637_s0 + $0x1e0] sm:$0xff]  ;;  %v43_v59 = vld [vmem:[%s1637_s0 + $0xe8] sm:$0xff] }
  0x15   :  { %947 = vmatmul.mubr.msk.f32.gmra.mxu0 %vm86_vm1, %v23_v19  ;;  %995 = vmatmul.mubr.msk.f32.gmra.mxu1 %vm86_vm1, %v55_v20  ;;  %v75_v60 = vld [vmem:[%s1637_s0 + $0x1e8] sm:$0xff]  ;;  %v44_v61 = vld [vmem:[%s1637_s0 + $0xf0] sm:$0xff]  ;;  %v45_v63 = vld [vmem:[%s1637_s0 + $0xf8] sm:$0xff] }
  0x16   :  { %949 = vmatprep.mubr.msk.f32.mxu0 %vm86_vm1, %v24_v21  ;;  %997 = vmatprep.mubr.msk.f32.mxu1 %vm86_vm1, %v56_v22  ;;  %v76_v62 = vld [vmem:[%s1637_s0 + $0x1f0] sm:$0xff]  ;;  %v77_v0 = vld [vmem:[%s1637_s0 + $0x1f8] sm:$0xff]  ;;  %v1314_v1 = vld [vmem:[%s1638_s2] ss:$0 sm:$0xff] }
  0x19   :  { %950 = vmatmul.mubr.msk.f32.gmra.mxu0 %vm86_vm1, %v25_v23  ;;  %998 = vmatmul.mubr.msk.f32.gmra.mxu1 %vm86_vm1, %v57_v24 }
  0x1a   :  { %952 = vmatprep.mubr.msk.f32.mxu0 %vm86_vm1, %v26_v25  ;;  %1000 = vmatprep.mubr.msk.f32.mxu1 %vm86_vm1, %v58_v26 }
  0x1d   :  { %953 = vmatmul.mubr.msk.f32.gmra.mxu0 %vm86_vm1, %v27_v27  ;;  %1001 = vmatmul.mubr.msk.f32.gmra.mxu1 %vm86_vm1, %v59_v28 }
  0x1e   :  { %955 = vmatprep.mubr.msk.f32.mxu0 %vm86_vm1, %v28_v29  ;;  %1003 = vmatprep.mubr.msk.f32.mxu1 %vm86_vm1, %v60_v30 }
  0x21   :  { %956 = vmatmul.mubr.msk.f32.gmra.mxu0 %vm86_vm1, %v29_v31  ;;  %1004 = vmatmul.mubr.msk.f32.gmra.mxu1 %vm86_vm1, %v61_v32 }
  0x22   :  { %958 = vmatprep.mubr.msk.f32.mxu0 %vm86_vm1, %v30_v33  ;;  %1006 = vmatprep.mubr.msk.f32.mxu1 %vm86_vm1, %v62_v34 }
  0x25   :  { %959 = vmatmul.mubr.msk.f32.gmra.mxu0 %vm86_vm1, %v31_v35  ;;  %1007 = vmatmul.mubr.msk.f32.gmra.mxu1 %vm86_vm1, %v63_v36 }
  0x26   :  { %961 = vmatprep.mubr.msk.f32.mxu0 %vm86_vm1, %v32_v37  ;;  %1009 = vmatprep.mubr.msk.f32.mxu1 %vm86_vm1, %v64_v38 }
  0x29   :  { %962 = vmatmul.mubr.msk.f32.gmra.mxu0 %vm86_vm1, %v33_v39  ;;  %1010 = vmatmul.mubr.msk.f32.gmra.mxu1 %vm86_vm1, %v65_v40 }
  0x2a   :  { %964 = vmatprep.mubr.msk.f32.mxu0 %vm86_vm1, %v34_v41  ;;  %1012 = vmatprep.mubr.msk.f32.mxu1 %vm86_vm1, %v66_v42 }
  0x2d   :  { %965 = vmatmul.mubr.msk.f32.gmra.mxu0 %vm86_vm1, %v35_v43  ;;  %1013 = vmatmul.mubr.msk.f32.gmra.mxu1 %vm86_vm1, %v67_v44 }
  0x2e   :  { %967 = vmatprep.mubr.msk.f32.mxu0 %vm86_vm1, %v36_v45  ;;  %1015 = vmatprep.mubr.msk.f32.mxu1 %vm86_vm1, %v68_v46 }
  0x31   :  { %968 = vmatmul.mubr.msk.f32.gmra.mxu0 %vm86_vm1, %v37_v47  ;;  %1016 = vmatmul.mubr.msk.f32.gmra.mxu1 %vm86_vm1, %v69_v48 }
  0x32   :  { %970 = vmatprep.mubr.msk.f32.mxu0 %vm86_vm1, %v38_v49  ;;  %1018 = vmatprep.mubr.msk.f32.mxu1 %vm86_vm1, %v70_v50 }
  0x35   :  { %971 = vmatmul.mubr.msk.f32.gmra.mxu0 %vm86_vm1, %v39_v51  ;;  %1019 = vmatmul.mubr.msk.f32.gmra.mxu1 %vm86_vm1, %v71_v52 }
  0x36   :  { %973 = vmatprep.mubr.msk.f32.mxu0 %vm86_vm1, %v40_v53  ;;  %1021 = vmatprep.mubr.msk.f32.mxu1 %vm86_vm1, %v72_v54 }
  0x39   :  { %974 = vmatmul.mubr.msk.f32.gmra.mxu0 %vm86_vm1, %v41_v55  ;;  %1022 = vmatmul.mubr.msk.f32.gmra.mxu1 %vm86_vm1, %v73_v56 }
  0x3a   :  { %976 = vmatprep.mubr.msk.f32.mxu0 %vm86_vm1, %v42_v57  ;;  %1024 = vmatprep.mubr.msk.f32.mxu1 %vm86_vm1, %v74_v58 }
  0x3d   :  { %977 = vmatmul.mubr.msk.f32.gmra.mxu0 %vm86_vm1, %v43_v59  ;;  %1025 = vmatmul.mubr.msk.f32.gmra.mxu1 %vm86_vm1, %v75_v60 }
  0x3e   :  { %979 = vmatprep.mubr.msk.f32.mxu0 %vm86_vm1, %v44_v61  ;;  %1027 = vmatprep.mubr.msk.f32.mxu1 %vm86_vm1, %v76_v62 }
  0x41   :  { %980 = vmatmul.mubr.msk.f32.gmra.mxu0 %vm86_vm1, %v45_v63  ;;  %1028 = vmatmul.mubr.msk.f32.gmra.mxu1 %vm86_vm1, %v77_v0 }
  0xc5   :  { %v936_v2 = vpop.f32.mrf.mxu0  ;;  %v984_v3 = vpop.f32.mrf.mxu1 }
  0xc6   :  { %v355_v4 = vadd.f32 %v936_v2, %v1314_v1  ;;  %v515_v5 = vadd.f32 %v984_v3, %v1314_v1 }
  0xc7   :  { %v349_v6 = vpop.f32.mrf.mxu0  ;;  %v509_v7 = vpop.f32.mrf.mxu1 }
  0xc8   :  { %v669_v8 = vmax.f32 %v355_v4, 0.0  ;;  %v701_v9 = vmax.f32 %v515_v5, 0.0  ;;  %v350_v10 = vadd.f32 %v1314_v1, %v349_v6  ;;  %v510_v11 = vadd.f32 %v1314_v1, %v509_v7 }
  0xc9   :  { %v939_v12 = vpop.f32.mrf.mxu0  ;;  %v987_v13 = vpop.f32.mrf.mxu1 }
  0xca   :  { %734 = vst.msk [vmem:[%s1639_s3 + $0x8] sm:$0xff] %vm732_vm2, %v669_v8  ;;  %766 = vst.msk [vmem:[%s1639_s3 + $0x108] sm:$0xff] %vm732_vm2, %v701_v9  ;;  %v668_v14 = vmax.f32 %v350_v10, 0.0  ;;  %v700_v15 = vmax.f32 %v510_v11, 0.0  ;;  %v365_v16 = vadd.f32 %v939_v12, %v1314_v1  ;;  %v525_v17 = vadd.f32 %v987_v13, %v1314_v1 }
  0xcb   :  { %v359_v18 = vpop.f32.mrf.mxu0  ;;  %v519_v19 = vpop.f32.mrf.mxu1 }
  0xcc   :  { %733 = vst.msk [vmem:[%s1639_s3] sm:$0xff] %vm732_vm2, %v668_v14  ;;  %765 = vst.msk [vmem:[%s1639_s3 + $0x100] sm:$0xff] %vm732_vm2, %v700_v15  ;;  %v671_v20 = vmax.f32 %v365_v16, 0.0  ;;  %v703_v21 = vmax.f32 %v525_v17, 0.0  ;;  %v360_v22 = vadd.f32 %v1314_v1, %v359_v18  ;;  %v520_v23 = vadd.f32 %v1314_v1, %v519_v19 }
  0xcd   :  { %v942_v24 = vpop.f32.mrf.mxu0  ;;  %v990_v25 = vpop.f32.mrf.mxu1 }
  0xce   :  { %736 = vst.msk [vmem:[%s1639_s3 + $0x18] sm:$0xff] %vm732_vm2, %v671_v20  ;;  %768 = vst.msk [vmem:[%s1639_s3 + $0x118] sm:$0xff] %vm732_vm2, %v703_v21  ;;  %v670_v26 = vmax.f32 %v360_v22, 0.0  ;;  %v702_v27 = vmax.f32 %v520_v23, 0.0  ;;  %v375_v28 = vadd.f32 %v942_v24, %v1314_v1  ;;  %v535_v29 = vadd.f32 %v990_v25, %v1314_v1 }
  0xcf   :  { %v369_v30 = vpop.f32.mrf.mxu0  ;;  %v529_v31 = vpop.f32.mrf.mxu1 }
  0xd0   :  { %735 = vst.msk [vmem:[%s1639_s3 + $0x10] sm:$0xff] %vm732_vm2, %v670_v26  ;;  %767 = vst.msk [vmem:[%s1639_s3 + $0x110] sm:$0xff] %vm732_vm2, %v702_v27  ;;  %v673_v32 = vmax.f32 %v375_v28, 0.0  ;;  %v705_v33 = vmax.f32 %v535_v29, 0.0  ;;  %v370_v34 = vadd.f32 %v1314_v1, %v369_v30  ;;  %v530_v35 = vadd.f32 %v1314_v1, %v529_v31 }
  0xd1   :  { %v945_v36 = vpop.f32.mrf.mxu0  ;;  %v993_v37 = vpop.f32.mrf.mxu1 }
  0xd2   :  { %738 = vst.msk [vmem:[%s1639_s3 + $0x28] sm:$0xff] %vm732_vm2, %v673_v32  ;;  %770 = vst.msk [vmem:[%s1639_s3 + $0x128] sm:$0xff] %vm732_vm2, %v705_v33  ;;  %v672_v38 = vmax.f32 %v370_v34, 0.0  ;;  %v704_v39 = vmax.f32 %v530_v35, 0.0  ;;  %v385_v40 = vadd.f32 %v945_v36, %v1314_v1  ;;  %v545_v41 = vadd.f32 %v993_v37, %v1314_v1 }
  0xd3   :  { %v379_v42 = vpop.f32.mrf.mxu0  ;;  %v539_v43 = vpop.f32.mrf.mxu1 }
  0xd4   :  { %737 = vst.msk [vmem:[%s1639_s3 + $0x20] sm:$0xff] %vm732_vm2, %v672_v38  ;;  %769 = vst.msk [vmem:[%s1639_s3 + $0x120] sm:$0xff] %vm732_vm2, %v704_v39  ;;  %v675_v44 = vmax.f32 %v385_v40, 0.0  ;;  %v707_v45 = vmax.f32 %v545_v41, 0.0  ;;  %v380_v46 = vadd.f32 %v1314_v1, %v379_v42  ;;  %v540_v47 = vadd.f32 %v1314_v1, %v539_v43 }
  0xd5   :  { %v948_v48 = vpop.f32.mrf.mxu0  ;;  %v996_v49 = vpop.f32.mrf.mxu1 }
  0xd6   :  { %740 = vst.msk [vmem:[%s1639_s3 + $0x38] sm:$0xff] %vm732_vm2, %v675_v44  ;;  %772 = vst.msk [vmem:[%s1639_s3 + $0x138] sm:$0xff] %vm732_vm2, %v707_v45  ;;  %v674_v50 = vmax.f32 %v380_v46, 0.0  ;;  %v706_v51 = vmax.f32 %v540_v47, 0.0  ;;  %v395_v52 = vadd.f32 %v948_v48, %v1314_v1  ;;  %v555_v53 = vadd.f32 %v996_v49, %v1314_v1 }
  0xd7   :  { %v389_v54 = vpop.f32.mrf.mxu0  ;;  %v549_v55 = vpop.f32.mrf.mxu1 }
  0xd8   :  { %739 = vst.msk [vmem:[%s1639_s3 + $0x30] sm:$0xff] %vm732_vm2, %v674_v50  ;;  %771 = vst.msk [vmem:[%s1639_s3 + $0x130] sm:$0xff] %vm732_vm2, %v706_v51  ;;  %v677_v56 = vmax.f32 %v395_v52, 0.0  ;;  %v709_v57 = vmax.f32 %v555_v53, 0.0  ;;  %v390_v58 = vadd.f32 %v1314_v1, %v389_v54  ;;  %v550_v59 = vadd.f32 %v1314_v1, %v549_v55 }
  0xd9   :  { %v951_v60 = vpop.f32.mrf.mxu0  ;;  %v999_v61 = vpop.f32.mrf.mxu1 }
  0xda   :  { %742 = vst.msk [vmem:[%s1639_s3 + $0x48] sm:$0xff] %vm732_vm2, %v677_v56  ;;  %774 = vst.msk [vmem:[%s1639_s3 + $0x148] sm:$0xff] %vm732_vm2, %v709_v57  ;;  %v676_v62 = vmax.f32 %v390_v58, 0.0  ;;  %v708_v63 = vmax.f32 %v550_v59, 0.0  ;;  %v405_v0 = vadd.f32 %v951_v60, %v1314_v1  ;;  %v565_v2 = vadd.f32 %v999_v61, %v1314_v1 }
  0xdb   :  { %v399_v3 = vpop.f32.mrf.mxu0  ;;  %v559_v4 = vpop.f32.mrf.mxu1 }
  0xdc   :  { %741 = vst.msk [vmem:[%s1639_s3 + $0x40] sm:$0xff] %vm732_vm2, %v676_v62  ;;  %773 = vst.msk [vmem:[%s1639_s3 + $0x140] sm:$0xff] %vm732_vm2, %v708_v63  ;;  %v679_v5 = vmax.f32 %v405_v0, 0.0  ;;  %v711_v6 = vmax.f32 %v565_v2, 0.0  ;;  %v400_v7 = vadd.f32 %v1314_v1, %v399_v3  ;;  %v560_v8 = vadd.f32 %v1314_v1, %v559_v4 }
  0xdd   :  { %v954_v9 = vpop.f32.mrf.mxu0  ;;  %v1002_v10 = vpop.f32.mrf.mxu1 }
  0xde   :  { %744 = vst.msk [vmem:[%s1639_s3 + $0x58] sm:$0xff] %vm732_vm2, %v679_v5  ;;  %776 = vst.msk [vmem:[%s1639_s3 + $0x158] sm:$0xff] %vm732_vm2, %v711_v6  ;;  %v678_v11 = vmax.f32 %v400_v7, 0.0  ;;  %v710_v12 = vmax.f32 %v560_v8, 0.0  ;;  %v415_v13 = vadd.f32 %v954_v9, %v1314_v1  ;;  %v575_v14 = vadd.f32 %v1002_v10, %v1314_v1 }
  0xdf   :  { %v409_v15 = vpop.f32.mrf.mxu0  ;;  %v569_v16 = vpop.f32.mrf.mxu1 }
  0xe0   :  { %743 = vst.msk [vmem:[%s1639_s3 + $0x50] sm:$0xff] %vm732_vm2, %v678_v11  ;;  %775 = vst.msk [vmem:[%s1639_s3 + $0x150] sm:$0xff] %vm732_vm2, %v710_v12  ;;  %v681_v17 = vmax.f32 %v415_v13, 0.0  ;;  %v713_v18 = vmax.f32 %v575_v14, 0.0  ;;  %v410_v19 = vadd.f32 %v1314_v1, %v409_v15  ;;  %v570_v20 = vadd.f32 %v1314_v1, %v569_v16 }
  0xe1   :  { %v957_v21 = vpop.f32.mrf.mxu0  ;;  %v1005_v22 = vpop.f32.mrf.mxu1 }
  0xe2   :  { %746 = vst.msk [vmem:[%s1639_s3 + $0x68] sm:$0xff] %vm732_vm2, %v681_v17  ;;  %778 = vst.msk [vmem:[%s1639_s3 + $0x168] sm:$0xff] %vm732_vm2, %v713_v18  ;;  %v680_v23 = vmax.f32 %v410_v19, 0.0  ;;  %v712_v24 = vmax.f32 %v570_v20, 0.0  ;;  %v425_v25 = vadd.f32 %v957_v21, %v1314_v1  ;;  %v585_v26 = vadd.f32 %v1005_v22, %v1314_v1 }
  0xe3   :  { %v419_v27 = vpop.f32.mrf.mxu0  ;;  %v579_v28 = vpop.f32.mrf.mxu1 }
  0xe4   :  { %745 = vst.msk [vmem:[%s1639_s3 + $0x60] sm:$0xff] %vm732_vm2, %v680_v23  ;;  %777 = vst.msk [vmem:[%s1639_s3 + $0x160] sm:$0xff] %vm732_vm2, %v712_v24  ;;  %v683_v29 = vmax.f32 %v425_v25, 0.0  ;;  %v715_v30 = vmax.f32 %v585_v26, 0.0  ;;  %v420_v31 = vadd.f32 %v1314_v1, %v419_v27  ;;  %v580_v32 = vadd.f32 %v1314_v1, %v579_v28 }
  0xe5   :  { %v960_v33 = vpop.f32.mrf.mxu0  ;;  %v1008_v34 = vpop.f32.mrf.mxu1 }
  0xe6   :  { %748 = vst.msk [vmem:[%s1639_s3 + $0x78] sm:$0xff] %vm732_vm2, %v683_v29  ;;  %780 = vst.msk [vmem:[%s1639_s3 + $0x178] sm:$0xff] %vm732_vm2, %v715_v30  ;;  %v682_v35 = vmax.f32 %v420_v31, 0.0  ;;  %v714_v36 = vmax.f32 %v580_v32, 0.0  ;;  %v435_v37 = vadd.f32 %v960_v33, %v1314_v1  ;;  %v595_v38 = vadd.f32 %v1008_v34, %v1314_v1 }
  0xe7   :  { %v429_v39 = vpop.f32.mrf.mxu0  ;;  %v589_v40 = vpop.f32.mrf.mxu1 }
  0xe8   :  { %747 = vst.msk [vmem:[%s1639_s3 + $0x70] sm:$0xff] %vm732_vm2, %v682_v35  ;;  %779 = vst.msk [vmem:[%s1639_s3 + $0x170] sm:$0xff] %vm732_vm2, %v714_v36  ;;  %v685_v41 = vmax.f32 %v435_v37, 0.0  ;;  %v717_v42 = vmax.f32 %v595_v38, 0.0  ;;  %v430_v43 = vadd.f32 %v1314_v1, %v429_v39  ;;  %v590_v44 = vadd.f32 %v1314_v1, %v589_v40 }
  0xe9   :  { %v963_v45 = vpop.f32.mrf.mxu0  ;;  %v1011_v46 = vpop.f32.mrf.mxu1 }
  0xea   :  { %750 = vst.msk [vmem:[%s1639_s3 + $0x88] sm:$0xff] %vm732_vm2, %v685_v41  ;;  %782 = vst.msk [vmem:[%s1639_s3 + $0x188] sm:$0xff] %vm732_vm2, %v717_v42  ;;  %v684_v47 = vmax.f32 %v430_v43, 0.0  ;;  %v716_v48 = vmax.f32 %v590_v44, 0.0  ;;  %v445_v49 = vadd.f32 %v963_v45, %v1314_v1  ;;  %v605_v50 = vadd.f32 %v1011_v46, %v1314_v1 }
  0xeb   :  { %v439_v51 = vpop.f32.mrf.mxu0  ;;  %v599_v52 = vpop.f32.mrf.mxu1 }
  0xec   :  { %749 = vst.msk [vmem:[%s1639_s3 + $0x80] sm:$0xff] %vm732_vm2, %v684_v47  ;;  %781 = vst.msk [vmem:[%s1639_s3 + $0x180] sm:$0xff] %vm732_vm2, %v716_v48  ;;  %v687_v53 = vmax.f32 %v445_v49, 0.0  ;;  %v719_v54 = vmax.f32 %v605_v50, 0.0  ;;  %v440_v55 = vadd.f32 %v1314_v1, %v439_v51  ;;  %v600_v56 = vadd.f32 %v1314_v1, %v599_v52 }
  0xed   :  { %v966_v57 = vpop.f32.mrf.mxu0  ;;  %v1014_v58 = vpop.f32.mrf.mxu1 }
  0xee   :  { %752 = vst.msk [vmem:[%s1639_s3 + $0x98] sm:$0xff] %vm732_vm2, %v687_v53  ;;  %784 = vst.msk [vmem:[%s1639_s3 + $0x198] sm:$0xff] %vm732_vm2, %v719_v54  ;;  %v686_v59 = vmax.f32 %v440_v55, 0.0  ;;  %v718_v60 = vmax.f32 %v600_v56, 0.0  ;;  %v455_v61 = vadd.f32 %v966_v57, %v1314_v1  ;;  %v615_v62 = vadd.f32 %v1014_v58, %v1314_v1 }
  0xef   :  { %v449_v63 = vpop.f32.mrf.mxu0  ;;  %v609_v0 = vpop.f32.mrf.mxu1 }
  0xf0   :  { %751 = vst.msk [vmem:[%s1639_s3 + $0x90] sm:$0xff] %vm732_vm2, %v686_v59  ;;  %783 = vst.msk [vmem:[%s1639_s3 + $0x190] sm:$0xff] %vm732_vm2, %v718_v60  ;;  %v689_v2 = vmax.f32 %v455_v61, 0.0  ;;  %v721_v3 = vmax.f32 %v615_v62, 0.0  ;;  %v450_v4 = vadd.f32 %v1314_v1, %v449_v63  ;;  %v610_v5 = vadd.f32 %v1314_v1, %v609_v0 }
  0xf1   :  { %v969_v6 = vpop.f32.mrf.mxu0  ;;  %v1017_v7 = vpop.f32.mrf.mxu1 }
  0xf2   :  { %754 = vst.msk [vmem:[%s1639_s3 + $0xa8] sm:$0xff] %vm732_vm2, %v689_v2  ;;  %786 = vst.msk [vmem:[%s1639_s3 + $0x1a8] sm:$0xff] %vm732_vm2, %v721_v3  ;;  %v688_v8 = vmax.f32 %v450_v4, 0.0  ;;  %v720_v9 = vmax.f32 %v610_v5, 0.0  ;;  %v465_v10 = vadd.f32 %v969_v6, %v1314_v1  ;;  %v625_v11 = vadd.f32 %v1017_v7, %v1314_v1 }
  0xf3   :  { %v459_v12 = vpop.f32.mrf.mxu0  ;;  %v619_v13 = vpop.f32.mrf.mxu1 }
  0xf4   :  { %753 = vst.msk [vmem:[%s1639_s3 + $0xa0] sm:$0xff] %vm732_vm2, %v688_v8  ;;  %785 = vst.msk [vmem:[%s1639_s3 + $0x1a0] sm:$0xff] %vm732_vm2, %v720_v9  ;;  %v691_v14 = vmax.f32 %v465_v10, 0.0  ;;  %v723_v15 = vmax.f32 %v625_v11, 0.0  ;;  %v460_v16 = vadd.f32 %v1314_v1, %v459_v12  ;;  %v620_v17 = vadd.f32 %v1314_v1, %v619_v13 }
  0xf5   :  { %v972_v18 = vpop.f32.mrf.mxu0  ;;  %v1020_v19 = vpop.f32.mrf.mxu1 }
  0xf6   :  { %756 = vst.msk [vmem:[%s1639_s3 + $0xb8] sm:$0xff] %vm732_vm2, %v691_v14  ;;  %788 = vst.msk [vmem:[%s1639_s3 + $0x1b8] sm:$0xff] %vm732_vm2, %v723_v15  ;;  %v690_v20 = vmax.f32 %v460_v16, 0.0  ;;  %v722_v21 = vmax.f32 %v620_v17, 0.0  ;;  %v475_v22 = vadd.f32 %v972_v18, %v1314_v1  ;;  %v635_v23 = vadd.f32 %v1020_v19, %v1314_v1 }
  0xf7   :  { %v469_v24 = vpop.f32.mrf.mxu0  ;;  %v629_v25 = vpop.f32.mrf.mxu1 }
  0xf8   :  { %755 = vst.msk [vmem:[%s1639_s3 + $0xb0] sm:$0xff] %vm732_vm2, %v690_v20  ;;  %787 = vst.msk [vmem:[%s1639_s3 + $0x1b0] sm:$0xff] %vm732_vm2, %v722_v21  ;;  %v693_v26 = vmax.f32 %v475_v22, 0.0  ;;  %v725_v27 = vmax.f32 %v635_v23, 0.0  ;;  %v470_v28 = vadd.f32 %v1314_v1, %v469_v24  ;;  %v630_v29 = vadd.f32 %v1314_v1, %v629_v25 }
  0xf9   :  { %v975_v30 = vpop.f32.mrf.mxu0  ;;  %v1023_v31 = vpop.f32.mrf.mxu1 }
  0xfa   :  { %758 = vst.msk [vmem:[%s1639_s3 + $0xc8] sm:$0xff] %vm732_vm2, %v693_v26  ;;  %790 = vst.msk [vmem:[%s1639_s3 + $0x1c8] sm:$0xff] %vm732_vm2, %v725_v27  ;;  %v692_v32 = vmax.f32 %v470_v28, 0.0  ;;  %v724_v33 = vmax.f32 %v630_v29, 0.0  ;;  %v485_v34 = vadd.f32 %v975_v30, %v1314_v1  ;;  %v645_v35 = vadd.f32 %v1023_v31, %v1314_v1 }
  0xfb   :  { %v479_v36 = vpop.f32.mrf.mxu0  ;;  %v639_v37 = vpop.f32.mrf.mxu1 }
  0xfc   :  { %757 = vst.msk [vmem:[%s1639_s3 + $0xc0] sm:$0xff] %vm732_vm2, %v692_v32  ;;  %789 = vst.msk [vmem:[%s1639_s3 + $0x1c0] sm:$0xff] %vm732_vm2, %v724_v33  ;;  %v695_v38 = vmax.f32 %v485_v34, 0.0  ;;  %v727_v39 = vmax.f32 %v645_v35, 0.0  ;;  %v480_v40 = vadd.f32 %v1314_v1, %v479_v36  ;;  %v640_v41 = vadd.f32 %v1314_v1, %v639_v37 }
  0xfd   :  { %v978_v42 = vpop.f32.mrf.mxu0  ;;  %v1026_v43 = vpop.f32.mrf.mxu1 }
  0xfe   :  { %760 = vst.msk [vmem:[%s1639_s3 + $0xd8] sm:$0xff] %vm732_vm2, %v695_v38  ;;  %792 = vst.msk [vmem:[%s1639_s3 + $0x1d8] sm:$0xff] %vm732_vm2, %v727_v39  ;;  %v694_v44 = vmax.f32 %v480_v40, 0.0  ;;  %v726_v45 = vmax.f32 %v640_v41, 0.0  ;;  %v495_v46 = vadd.f32 %v978_v42, %v1314_v1  ;;  %v655_v47 = vadd.f32 %v1026_v43, %v1314_v1 }
  0xff   :  { %v489_v48 = vpop.f32.mrf.mxu0  ;;  %v649_v49 = vpop.f32.mrf.mxu1 }
 0x100   :  { %759 = vst.msk [vmem:[%s1639_s3 + $0xd0] sm:$0xff] %vm732_vm2, %v694_v44  ;;  %791 = vst.msk [vmem:[%s1639_s3 + $0x1d0] sm:$0xff] %vm732_vm2, %v726_v45  ;;  %v697_v50 = vmax.f32 %v495_v46, 0.0  ;;  %v729_v51 = vmax.f32 %v655_v47, 0.0  ;;  %v490_v52 = vadd.f32 %v1314_v1, %v489_v48  ;;  %v650_v53 = vadd.f32 %v1314_v1, %v649_v49 }
 0x101   :  { %v981_v54 = vpop.f32.mrf.mxu0  ;;  %v1029_v55 = vpop.f32.mrf.mxu1 }
 0x102   :  { %762 = vst.msk [vmem:[%s1639_s3 + $0xe8] sm:$0xff] %vm732_vm2, %v697_v50  ;;  %794 = vst.msk [vmem:[%s1639_s3 + $0x1e8] sm:$0xff] %vm732_vm2, %v729_v51  ;;  %v696_v56 = vmax.f32 %v490_v52, 0.0  ;;  %v728_v57 = vmax.f32 %v650_v53, 0.0  ;;  %v505_v58 = vadd.f32 %v981_v54, %v1314_v1  ;;  %v665_v59 = vadd.f32 %v1029_v55, %v1314_v1 }
 0x103   :  { %v499_v60 = vpop.f32.mrf.mxu0  ;;  %v659_v61 = vpop.f32.mrf.mxu1 }
 0x104   :  { %761 = vst.msk [vmem:[%s1639_s3 + $0xe0] sm:$0xff] %vm732_vm2, %v696_v56  ;;  %793 = vst.msk [vmem:[%s1639_s3 + $0x1e0] sm:$0xff] %vm732_vm2, %v728_v57  ;;  %v699_v62 = vmax.f32 %v505_v58, 0.0  ;;  %v731_v63 = vmax.f32 %v665_v59, 0.0  ;;  %v500_v0 = vadd.f32 %v1314_v1, %v499_v60  ;;  %v660_v2 = vadd.f32 %v1314_v1, %v659_v61 }
 0x106   :  { %764 = vst.msk [vmem:[%s1639_s3 + $0xf8] sm:$0xff] %vm732_vm2, %v699_v62  ;;  %796 = vst.msk [vmem:[%s1639_s3 + $0x1f8] sm:$0xff] %vm732_vm2, %v731_v63  ;;  %v698_v3 = vmax.f32 %v500_v0, 0.0  ;;  %v730_v4 = vmax.f32 %v660_v2, 0.0 }
 0x108   :  { %763 = vst.msk [vmem:[%s1639_s3 + $0xf0] sm:$0xff] %vm732_vm2, %v698_v3  ;;  %795 = vst.msk [vmem:[%s1639_s3 + $0x1f0] sm:$0xff] %vm732_vm2, %v730_v4 }

// kernel: inception_forward.3
= control target key start
LH: loop header
LB: loop body
LE: loop exit
PB: predicated region body
PF: predicated region fallthrough
CT: control target
= control target key end

     0   :  { %s9996_s17 = smov 0   ;;  %s15027_s0 = inlined_call_operand.vmem [shape: f32[2,18,18,4], index: 0, kind: input, shape index: {}]   ;;  %s15028_s1 = inlined_call_operand.vmem [shape: f32[2,18,18,4], index: 1, kind: input, shape index: {}]   ;;  %s15029_s2 = inlined_call_operand.vmem [shape: f32[2,18,18,4], index: 2, kind: input, shape index: {}]   ;;  %s15030_s3 = inlined_call_operand.vmem [shape: f32[3,3,4,8], index: 3, kind: input, shape index: {}]   ;;  %s15031_s4 = inlined_call_operand.vmem [shape: f32[1,8], index: 4, kind: input, shape index: {}]   ;;  %s15032_s5 = inlined_call_operand.vmem [shape: f32[3,3,4,8], index: 5, kind: input, shape index: {}]   ;;  %s15033_s6 = inlined_call_operand.vmem [shape: f32[1,8], index: 6, kind: input, shape index: {}]   ;;  %s15034_s7 = inlined_call_operand.vmem [shape: f32[4,8], index: 7, kind: input, shape index: {}]   ;;  %s15035_s8 = inlined_call_operand.vmem [shape: f32[1,8], index: 8, kind: input, shape index: {}]   ;;  %s15036_s9 = inlined_call_operand.vmem [shape: f32[512,8], index: 9, kind: output, shape index: {0}]   ;;  %s15037_s10 = inlined_call_operand.vmem [shape: f32[512,8], index: 10, kind: output, shape index: {1}]   ;;  %s15038_s11 = inlined_call_operand.vmem [shape: f32[512,8], index: 11, kind: output, shape index: {2}]  }
   0x1 LB: > { %s10002_s18 = sadd.s32 4294967295, %s9934_s17   ;;  %p7649_p0 = scmp.ge.s32.totalorder %s9934_s17, 1  ;;  %s9934_s17 = sphi %s9996_s17, %s22_s17  }
   0x2   : > { %p362_p1 = scmp.lt.s32.totalorder %s9934_s17, 3 }
   0x4   : > { %p363_p2 = pnand %p7649_p0, %p362_p1 }
   0x6   : > { %366 = sbr.rel (%p363_p2) target bundleno = 855 (0x357), region = 56 }
   0xb   : > { %v7659_v0 = vld [vmem:[%s15030_s3 + $0x4] sm:$0xf]  ;;  %vm706_vm0 = vcmask 1043456   ;;  %p422_p3 = scmp.lt.s32.totalorder %s10002_s18, 1  ;;  %v509_v1 = vld [vmem:[%s15030_s3] sm:$0xf] }
   0xc   : > { %9884 = vmatprep.subr.msk.mxu1 %vm706_vm0, %v7659_v0  ;;  %8934 = vmatprep.subr.msk.mxu0 %vm706_vm0, %v7659_v0  ;;  %v7726_v2 = vld [vmem:[%s15030_s3 + $0x8] sm:$0xf]  ;;  %vm558_vm1 = vcmask 1046528   ;;  %vm641_vm2 = vcmask 31744   ;;  %v10072_v21 = vld [vmem:[%s15030_s3 + $0xc] sm:$0xf] }
   0xd   : > { %9885 = vmatpush3.msk.msra.mxu1 %vm706_vm0, %v7659_v0  ;;  %8935 = vmatpush3.msk.msra.mxu0 %vm706_vm0, %v7659_v0  ;;  %s423_s25 = scalar_select %p422_p3, %s10002_s18, 1  ;;  %v10090_v28 = vld [vmem:[%s15030_s3 + $0x10] sm:$0xf]  ;;  %vm1227_vm3 = vcmask 1045504   ;;  %vm6346_vm4 = vcmask 1040384   ;;  %vm3327_vm5 = vcmask 64512  }
   0xe   : > { %8984 = vmatprep.subr.msk.mxu1 %vm706_vm0, %v509_v1  ;;  %9034 = vmatprep.subr.msk.mxu0 %vm706_vm0, %v7726_v2 }
   0xf   : > { %s10023_s26 = smul.u32 432, %s423_s25 }
  0x11   : > { %s10029_s29 = scalar_lea.vmem %s15027_s0, %s10023_s26  ;;  %s11049_s14 = scalar_lea.vmem %s15028_s1, %s10023_s26 }
  0x12   : > { %v10032_v3 = vld [vmem:[%s10029_s29] sm:$0xff]  ;;  %v10035_v4 = vld [vmem:[%s10029_s29 + $0x8] sm:$0xff]  ;;  %v10047_v10 = vld [vmem:[%s10029_s29 + $0x10] sm:$0x3]  ;;  %s12216_s13 = scalar_lea.vmem %s15029_s2, %s10023_s26  ;;  %s7653_s26 = sshll.u32 %s10002_s18, 5 }
  0x13   : > { %v10038_v5 = vld [vmem:[%s10029_s29 + $0xc0] sm:$0xff]  ;;  %v559_v6 = vrot.slane %v10032_v3, 1  ;;  %v560_v7 = vrot.slane %v10035_v4, 1  ;;  %v10043_v8 = vld [vmem:[%s10029_s29 + $0xc8] sm:$0xff]  ;;  %v562_v12 = vrot.slane %v10047_v10, 1  ;;  %v10055_v14 = vld [vmem:[%s10029_s29 + $0x18] sm:$0xff] }
  0x14   : > { %v599_v9 = vrot.slane %v10038_v5, 1  ;;  %v600_v11 = vrot.slane %v10043_v8, 1  ;;  %v10052_v13 = vld [vmem:[%s10029_s29 + $0xd0] sm:$0x3]  ;;  %v10060_v17 = vld [vmem:[%s10029_s29 + $0x20] sm:$0xff]  ;;  %v564_v18 = vrot.slane %v10055_v14, 1 }
  0x15   : > { %v561_v15 = vsel %vm558_vm1, %v559_v6, %v560_v7  ;;  %v602_v16 = vrot.slane %v10052_v13, 1  ;;  %v10064_v19 = vld [vmem:[%s10029_s29 + $0xd8] sm:$0xff]  ;;  %v10067_v20 = vld [vmem:[%s10029_s29 + $0xe0] sm:$0xff]  ;;  %v563_v23 = vsel %vm558_vm1, %v560_v7, %v562_v12  ;;  %v565_v24 = vrot.slane %v10060_v17, 1  ;;  %v10082_v26 = vld [vmem:[%s10029_s29 + $0x28] sm:$0x3] }
  0x16   : > { %8936 = vmatprep.mubr.msk.f32.mxu0 %vm641_vm2, %v561_v15  ;;  %v10076_v22 = vsel %vm558_vm1, %v599_v9, %v600_v11  ;;  %v604_v25 = vrot.slane %v10064_v19, 1  ;;  %v10085_v27 = vld [vmem:[%s10029_s29 + $0xe8] sm:$0x3]  ;;  %v605_v30 = vrot.slane %v10067_v20, 1  ;;  %v567_v31 = vrot.slane %v10082_v26, 1  ;;  %v10102_v33 = vld [vmem:[%s10029_s29 + $0x30] sm:$0xff] }
  0x17   : > { %15277 = vst [vmem:[#allocation2_spill] sm:$0xff] %v10076_v22  ;;  %8960 = vmatprep.mubr.msk.f32.mxu1 %vm641_vm2, %v10076_v22  ;;  %8937 = vmatmul.mubr.msk.f32.vlgmr.msra.gmra.mxu0 %vm641_vm2, %v563_v23  ;;  %v10096_v29 = vsel %vm558_vm1, %v600_v11, %v602_v16  ;;  %v607_v32 = vrot.slane %v10085_v27, 1  ;;  %v10105_v34 = vld [vmem:[%s10029_s29 + $0x38] sm:$0xff]  ;;  %v10108_v35 = vld [vmem:[%s10029_s29 + $0xf0] sm:$0xff]  ;;  %v10114_v36 = vsel %vm558_vm1, %v564_v18, %v565_v24  ;;  %v569_v37 = vrot.slane %v10102_v33, 1  ;;  %v10142_v47 = vld [vmem:[%s10029_s29 + $0x48] sm:$0xff] }
  0x18   : > { %15278 = vst [vmem:[#allocation3_spill] sm:$0xff] %v10096_v29  ;;  %8961 = vmatmul.mubr.msk.f32.vlgmr.msra.gmra.mxu1 %vm641_vm2, %v10096_v29  ;;  %9035 = vmatpush3.msk.msra.mxu0 %vm706_vm0, %v7726_v2  ;;  %15279 = vst [vmem:[#allocation4_spill] sm:$0xff] %v10114_v36  ;;  %v570_v38 = vrot.slane %v10105_v34, 1  ;;  %v10119_v39 = vld [vmem:[%s10029_s29 + $0xf8] sm:$0xff]  ;;  %v609_v40 = vrot.slane %v10108_v35, 1  ;;  %v10129_v42 = vsel %vm558_vm1, %v604_v25, %v605_v30  ;;  %v10145_v48 = vld [vmem:[%s10029_s29 + $0x50] sm:$0xff] }
  0x19   : > { %v10123_v41 = vld [vmem:[%s10029_s29 + $0x40] sm:$0x3]  ;;  %8985 = vmatpush3.msk.msra.mxu1 %vm706_vm0, %v509_v1  ;;  %8939 = vmatprep.mubr.msk.f32.mxu0 %vm641_vm2, %v10114_v36  ;;  %15280 = vst [vmem:[#allocation5_spill] sm:$0xff] %v10129_v42  ;;  %v10132_v43 = vsel %vm558_vm1, %v565_v24, %v567_v31  ;;  %v10135_v44 = vsel %vm558_vm1, %v605_v30, %v607_v32  ;;  %v610_v45 = vrot.slane %v10119_v39, 1  ;;  %v574_v52 = vrot.slane %v10142_v47, 1  ;;  %v10156_v53 = vld [vmem:[%s10029_s29 + $0x108] sm:$0xff] }
  0x1a   : > { %15281 = vst [vmem:[#allocation6_spill] sm:$0xff] %v10132_v43  ;;  %15282 = vst [vmem:[#allocation7_spill] sm:$0xff] %v10135_v44  ;;  %v10139_v46 = vld [vmem:[%s10029_s29 + $0x100] sm:$0x3]  ;;  %8963 = vmatprep.mubr.msk.f32.mxu1 %vm641_vm2, %v10129_v42  ;;  %v10150_v49 = vsel %vm558_vm1, %v569_v37, %v570_v38  ;;  %v572_v50 = vrot.slane %v10123_v41, 1  ;;  %v10159_v54 = vld [vmem:[%s10029_s29 + $0x110] sm:$0xff]  ;;  %9084 = vmatprep.subr.msk.mxu1 %vm706_vm0, %v10072_v21 }
  0x1b   : > { %15283 = vst [vmem:[#allocation8_spill] sm:$0xff] %v10150_v49  ;;  %v612_v51 = vrot.slane %v10139_v46, 1  ;;  %v10162_v55 = vld [vmem:[%s10029_s29 + $0x60] sm:$0xff]  ;;  %8940 = vmatmul.mubr.msk.f32.gmra.mxu0 %vm641_vm2, %v10132_v43  ;;  %v10169_v56 = vsel %vm558_vm1, %v609_v40, %v610_v45  ;;  %v575_v57 = vrot.slane %v10145_v48, 1  ;;  %v614_v58 = vrot.slane %v10156_v53, 1  ;;  %v10178_v61 = vld [vmem:[%s10029_s29 + $0x68] sm:$0xff]  ;;  %9134 = vmatprep.subr.msk.mxu0 %vm706_vm0, %v10090_v28 }
  0x1c   : > { %15284 = vst [vmem:[#allocation9_spill] sm:$0xff] %v10169_v56  ;;  %v615_v59 = vrot.slane %v10159_v54, 1  ;;  %v10175_v60 = vld [vmem:[%s10029_s29 + $0x58] sm:$0x3]  ;;  %8964 = vmatmul.mubr.msk.f32.gmra.mxu1 %vm641_vm2, %v10135_v44  ;;  %8942 = vmatprep.mubr.msk.f32.mxu0 %vm641_vm2, %v10150_v49  ;;  %v10187_v62 = vsel %vm558_vm1, %v570_v38, %v572_v50  ;;  %v579_v1 = vrot.slane %v10162_v55, 1  ;;  %v10195_v2 = vld [vmem:[%s10029_s29 + $0x120] sm:$0xff] }
  0x1d   : > { %15285 = vst [vmem:[#allocation10_spill] sm:$0xff] %v10187_v62  ;;  %v577_v63 = vrot.slane %v10175_v60, 1  ;;  %v10191_v0 = vld [vmem:[%s10029_s29 + $0x118] sm:$0x3]  ;;  %v10198_v6 = vld [vmem:[%s10029_s29 + $0x128] sm:$0xff]  ;;  %8966 = vmatprep.mubr.msk.f32.mxu1 %vm641_vm2, %v10169_v56  ;;  %v10203_v7 = vsel %vm558_vm1, %v610_v45, %v612_v51  ;;  %v10206_v9 = vsel %vm558_vm1, %v574_v52, %v575_v57  ;;  %v580_v12 = vrot.slane %v10178_v61, 1 }
  0x1e   : > { %15286 = vst [vmem:[#allocation11_spill] sm:$0xff] %v10203_v7  ;;  %15287 = vst [vmem:[#allocation12_spill] sm:$0xff] %v10206_v9  ;;  %v617_v11 = vrot.slane %v10191_v0, 1  ;;  %v10211_v15 = vld [vmem:[%s10029_s29 + $0x70] sm:$0x3]  ;;  %v10217_v18 = vsel %vm558_vm1, %v614_v58, %v615_v59  ;;  %v619_v23 = vrot.slane %v10195_v2, 1 }
  0x1f   : > { %v10214_v16 = vld [vmem:[%s10029_s29 + $0x130] sm:$0x3]  ;;  %15288 = vst [vmem:[#allocation13_spill] sm:$0xff] %v10217_v18  ;;  %v620_v24 = vrot.slane %v10198_v6, 1  ;;  %v10222_v25 = vld [vmem:[%s10029_s29 + $0x78] sm:$0xff]  ;;  %v10225_v30 = vld [vmem:[%s10029_s29 + $0x80] sm:$0xff]  ;;  %8943 = vmatmul.mubr.msk.f32.gmra.mxu0 %vm641_vm2, %v10187_v62  ;;  %v10240_v37 = vsel %vm558_vm1, %v575_v57, %v577_v63  ;;  %v10250_v50 = vsel %vm558_vm1, %v579_v1, %v580_v12 }
  0x20   : > { %v10230_v31 = vld [vmem:[%s10029_s29 + $0x138] sm:$0xff]  ;;  %v10233_v32 = vld [vmem:[%s10029_s29 + $0x140] sm:$0xff]  ;;  %8967 = vmatmul.mubr.msk.f32.gmra.mxu1 %vm641_vm2, %v10203_v7  ;;  %8945 = vmatprep.mubr.msk.f32.mxu0 %vm641_vm2, %v10206_v9  ;;  %15289 = vst [vmem:[#allocation14_spill] sm:$0xff] %v10240_v37  ;;  %v582_v38 = vrot.slane %v10211_v15, 1  ;;  %v622_v40 = vrot.slane %v10214_v16, 1  ;;  %v10247_v45 = vsel %vm558_vm1, %v615_v59, %v617_v11  ;;  %15291 = vst [vmem:[#allocation16_spill] sm:$0xff] %v10250_v50 }
  0x21   : > { %8969 = vmatprep.mubr.msk.f32.mxu1 %vm641_vm2, %v10217_v18  ;;  %15290 = vst [vmem:[#allocation15_spill] sm:$0xff] %v10247_v45  ;;  %v584_v51 = vrot.slane %v10222_v25, 1  ;;  %v585_v52 = vrot.slane %v10225_v30, 1  ;;  %v10255_v57 = vld [vmem:[%s10029_s29 + $0x88] sm:$0x3]  ;;  %v10261_v63 = vsel %vm558_vm1, %v619_v23, %v620_v24  ;;  %v624_v7 = vrot.slane %v10230_v31, 1 }
  0x22   : > { %v10258_v58 = vld [vmem:[%s10029_s29 + $0x148] sm:$0x3]  ;;  %15292 = vst [vmem:[#allocation17_spill] sm:$0xff] %v10261_v63  ;;  %v625_v18 = vrot.slane %v10233_v32, 1  ;;  %v10266_v59 = vld [vmem:[%s10029_s29 + $0x90] sm:$0xff]  ;;  %v10269_v1 = vld [vmem:[%s10029_s29 + $0x98] sm:$0xff]  ;;  %v10284_v23 = vsel %vm558_vm1, %v580_v12, %v582_v38  ;;  %v10291_v29 = vsel %vm558_vm1, %v620_v24, %v622_v40 }
  0x23   : > { %8946 = vmatmul.mubr.msk.f32.gmra.mxu0 %vm641_vm2, %v10240_v37  ;;  %v10274_v11 = vld [vmem:[%s10029_s29 + $0x150] sm:$0xff]  ;;  %v10277_v56 = vld [vmem:[%s10029_s29 + $0x158] sm:$0xff]  ;;  %15294 = vst [vmem:[#allocation19_spill] sm:$0xff] %v10284_v23  ;;  %v587_v44 = vrot.slane %v10255_v57, 1  ;;  %v627_v42 = vrot.slane %v10258_v58, 1  ;;  %15295 = vst [vmem:[#allocation20_spill] sm:$0xff] %v10291_v29 }
  0x24   : > { %15293 = vst [vmem:[#allocation18_spill] sm:$0xff] %v10277_v56  ;;  %8970 = vmatmul.mubr.msk.f32.gmra.mxu1 %vm641_vm2, %v10247_v45  ;;  %8948 = vmatprep.mubr.msk.f32.mxu0 %vm641_vm2, %v10250_v50  ;;  %v10294_v45 = vsel %vm558_vm1, %v584_v51, %v585_v52  ;;  %v589_v22 = vrot.slane %v10266_v59, 1  ;;  %v590_v12 = vrot.slane %v10269_v1, 1  ;;  %v10299_v38 = vld [vmem:[%s10029_s29 + $0xa0] sm:$0x3]  ;;  %v10302_v50 = vsel %vm558_vm1, %v624_v7, %v625_v18  ;;  %v10310_v24 = vld [vmem:[%s10029_s29 + $0xa8] sm:$0xff] }
  0x25   : > { %8972 = vmatprep.mubr.msk.f32.mxu1 %vm641_vm2, %v10261_v63  ;;  %15296 = vst [vmem:[#allocation21_spill] sm:$0xff] %v10294_v45  ;;  %15297 = vst [vmem:[#allocation22_spill] sm:$0xff] %v10302_v50  ;;  %v629_v37 = vrot.slane %v10274_v11, 1  ;;  %v630_v9 = vrot.slane %v10277_v56, 1  ;;  %v10307_v63 = vld [vmem:[%s10029_s29 + $0x160] sm:$0x3]  ;;  %v10328_v7 = vsel %vm558_vm1, %v585_v52, %v587_v44  ;;  %v10331_v49 = vsel %vm558_vm1, %v625_v18, %v627_v42 }
  0x26   : > { %v10313_v40 = vld [vmem:[%s10029_s29 + $0xb0] sm:$0xff]  ;;  %v10318_v51 = vld [vmem:[%s10029_s29 + $0x168] sm:$0xff]  ;;  %15299 = vst [vmem:[#allocation24_spill] sm:$0xff] %v10328_v7  ;;  %15300 = vst [vmem:[#allocation25_spill] sm:$0xff] %v10331_v49  ;;  %v592_v43 = vrot.slane %v10299_v38, 1  ;;  %v632_v36 = vrot.slane %v10307_v63, 1 }
  0x27   : > { %8949 = vmatmul.mubr.msk.f32.gmra.mxu0 %vm641_vm2, %v10284_v23  ;;  %v10321_v62 = vld [vmem:[%s10029_s29 + $0x170] sm:$0xff]  ;;  %v10337_v23 = vsel %vm558_vm1, %v589_v22, %v590_v12  ;;  %v10343_v56 = vld [vmem:[%s10029_s29 + $0xb8] sm:$0x3]  ;;  %v10346_v44 = vsel %vm558_vm1, %v629_v37, %v630_v9  ;;  %v634_v42 = vrot.slane %v10318_v51, 1  ;;  %p12486_p4 = scmp.lt.s32.totalorder %s7653_s26, 63 }
  0x28   : > { %15298 = vst [vmem:[#allocation23_spill] sm:$0xff] %v10321_v62  ;;  %8973 = vmatmul.mubr.msk.f32.gmra.mxu1 %vm641_vm2, %v10291_v29  ;;  %8951 = vmatprep.mubr.msk.f32.mxu0 %vm641_vm2, %v10294_v45  ;;  %15301 = vst [vmem:[#allocation26_spill] sm:$0xff] %v10337_v23  ;;  %v594_v29 = vrot.slane %v10310_v24, 1  ;;  %v595_v45 = vrot.slane %v10313_v40, 1  ;;  %v635_v18 = vrot.slane %v10321_v62, 1  ;;  %v10360_v22 = vsel %vm558_vm1, %v590_v12, %v592_v43 }
  0x29   : > { %8975 = vmatprep.mubr.msk.f32.mxu1 %vm641_vm2, %v10302_v50  ;;  %15302 = vst [vmem:[#allocation27_spill] sm:$0xff] %v10346_v44  ;;  %v10351_v52 = vld [vmem:[%s10029_s29 + $0x178] sm:$0x3]  ;;  %15303 = vst [vmem:[#allocation28_spill] sm:$0xff] %v10360_v22  ;;  %v597_v37 = vrot.slane %v10343_v56, 1  ;;  %v1228_v50 = vrot.slane %v10032_v3, 2  ;;  %v10367_v62 = vsel %vm558_vm1, %v630_v9, %v632_v36 }
  0x2a   : > { %15304 = vst [vmem:[#allocation29_spill] sm:$0xff] %v10367_v62  ;;  %v10375_v43 = vsel %vm558_vm1, %v634_v42, %v635_v18  ;;  %v1231_v12 = vrot.slane %v10047_v10, 2  ;;  %v1233_v10 = vrot.slane %v10055_v14, 2  ;;  %v1234_v42 = vrot.slane %v10060_v17, 2  ;;  %s15941_s26 = smov (!%p12486_p4, %s7653_s26), 63 }
  0x2b   : > { %8952 = vmatmul.mubr.msk.f32.gmra.mxu0 %vm641_vm2, %v10328_v7  ;;  %v10370_v7 = vsel %vm558_vm1, %v594_v29, %v595_v45  ;;  %15306 = vst [vmem:[#allocation31_spill] sm:$0xff] %v10375_v43  ;;  %v10385_v29 = vsel %vm558_vm1, %v595_v45, %v597_v37  ;;  %v1236_v37 = vrot.slane %v10082_v26, 2  ;;  %v1241_v26 = vrot.slane %v10123_v41, 2  ;;  %s12593_s22 = sshll.u32 %s15941_s26, 3 }
  0x2c   : > { %8976 = vmatmul.mubr.msk.f32.gmra.mxu1 %vm641_vm2, %v10331_v49  ;;  %8954 = vmatprep.mubr.msk.f32.mxu0 %vm641_vm2, %v10337_v23  ;;  %15305 = vst [vmem:[#allocation30_spill] sm:$0xff] %v10370_v7  ;;  %v637_v49 = vrot.slane %v10351_v52, 1  ;;  %v1229_v23 = vrot.slane %v10035_v4, 2  ;;  %15307 = vst [vmem:[#allocation32_spill] sm:$0xff] %v10385_v29  ;;  %v1246_v41 = vrot.slane %v10175_v60, 2  ;;  %s12624_s25 = scalar_lea.vmem %s15036_s9, %s12593_s22  ;;  %s14743_s26 = scalar_lea.vmem %s15038_s11, %s12593_s22 }
  0x2d   : > { %8978 = vmatprep.mubr.msk.f32.mxu1 %vm641_vm2, %v10346_v44  ;;  %s14756_s19 = scalar_lea.vmem %s15037_s10, %s12593_s22 }
  0x2e   : > { %v10390_v36 = vsel %vm558_vm1, %v635_v18, %v637_v49  ;;  %v1230_v9 = vsel %vm1227_vm3, %v1228_v50, %v1229_v23  ;;  %v1232_v45 = vsel %vm1227_vm3, %v1229_v23, %v1231_v12  ;;  %v1238_v49 = vrot.slane %v10102_v33, 2  ;;  %v10426_v23 = vld [vmem:[%s15030_s3 + $0x18] sm:$0xf] }
  0x2f   : > { %8955 = vmatmul.mubr.msk.f32.gmra.mxu0 %vm641_vm2, %v10360_v22  ;;  %15308 = vst [vmem:[#allocation33_spill] sm:$0xff] %v10390_v36  ;;  %v1239_v50 = vrot.slane %v10105_v34, 2  ;;  %v10408_v18 = vsel %vm1227_vm3, %v1233_v10, %v1234_v42  ;;  %v1244_v12 = vrot.slane %v10145_v48, 2 }
  0x30   : > { %8979 = vmatmul.mubr.msk.f32.gmra.mxu1 %vm641_vm2, %v10367_v62  ;;  %8957 = vmatprep.mubr.msk.f32.mxu0 %vm641_vm2, %v10370_v7 }
  0x31   : > { %8981 = vmatprep.mubr.msk.f32.mxu1 %vm641_vm2, %v10375_v43  ;;  %v10467_v60 = vsel %vm1227_vm3, %v1244_v12, %v1246_v41  ;;  %v1258_v41 = vrot.slane %v10266_v59, 2 }
  0x33   : > { %8958 = vmatmul.mubr.msk.f32.gmra.mxu0 %vm641_vm2, %v10385_v29 }
  0x34   : > { %8982 = vmatmul.mubr.msk.f32.gmra.mxu1 %vm641_vm2, %v10390_v36  ;;  %9036 = vmatprep.mubr.msk.f32.mxu0 %vm641_vm2, %v1230_v9  ;;  %v10413_v9 = vld [vmem:[%s15030_s3 + $0x14] sm:$0xf] }
  0x35   : > { %8986 = vmatprep.mubr.msk.f32.mxu1 %vm641_vm2, %v10032_v3  ;;  %v10420_v3 = vsel %vm1227_vm3, %v1234_v42, %v1236_v37  ;;  %v1248_v42 = vrot.slane %v10162_v55, 2  ;;  %v1251_v37 = vrot.slane %v10211_v15, 2 }
  0x37   : > { %9037 = vmatmul.mubr.msk.f32.vlgmr.msra.gmra.mxu0 %vm641_vm2, %v1232_v45  ;;  %v1249_v45 = vrot.slane %v10178_v61, 2 }
  0x38   : > { %8987 = vmatmul.mubr.msk.f32.vlgmr.msra.gmra.mxu1 %vm641_vm2, %v10035_v4  ;;  %9135 = vmatpush3.msk.msra.mxu0 %vm706_vm0, %v10090_v28  ;;  %v10433_v4 = vsel %vm1227_vm3, %v1238_v49, %v1239_v50  ;;  %v1243_v28 = vrot.slane %v10142_v47, 2 }
  0x39   : > { %9085 = vmatpush3.msk.msra.mxu1 %vm706_vm0, %v10072_v21  ;;  %8989 = vmatprep.mubr.msk.f32.mxu1 %vm641_vm2, %v10055_v14  ;;  %v10450_v21 = vsel %vm1227_vm3, %v1239_v50, %v1241_v26  ;;  %v10473_v49 = vsel %vm1227_vm3, %v1248_v42, %v1249_v45  ;;  %v1253_v50 = vrot.slane %v10222_v25, 2  ;;  %v1254_v26 = vrot.slane %v10225_v30, 2 }
  0x3a   : > { %9039 = vmatprep.mubr.msk.f32.mxu0 %vm641_vm2, %v10408_v18  ;;  %9184 = vmatprep.subr.msk.mxu1 %vm706_vm0, %v10413_v9  ;;  %v10456_v10 = vsel %vm1227_vm3, %v1243_v28, %v1244_v12  ;;  %v10484_v15 = vsel %vm1227_vm3, %v1249_v45, %v1251_v37  ;;  %v1256_v28 = vrot.slane %v10255_v57, 2  ;;  %v1259_v42 = vrot.slane %v10269_v1, 2 }
  0x3b   : > { %9040 = vmatmul.mubr.msk.f32.gmra.mxu0 %vm641_vm2, %v10420_v3  ;;  %9234 = vmatprep.subr.msk.mxu0 %vm706_vm0, %v10426_v23  ;;  %15309 = vst [vmem:[#allocation34_spill] sm:$0xff] %v10484_v15  ;;  %v10490_v12 = vsel %vm1227_vm3, %v1253_v50, %v1254_v26  ;;  %v1261_v45 = vrot.slane %v10299_v38, 2  ;;  %v1263_v50 = vrot.slane %v10310_v24, 2 }
  0x3c   : > { %8990 = vmatmul.mubr.msk.f32.gmra.mxu1 %vm641_vm2, %v10060_v17  ;;  %9042 = vmatprep.mubr.msk.f32.mxu0 %vm641_vm2, %v10433_v4  ;;  %v10501_v57 = vsel %vm1227_vm3, %v1254_v26, %v1256_v28  ;;  %v10507_v37 = vsel %vm1227_vm3, %v1258_v41, %v1259_v42  ;;  %v1266_v26 = vrot.slane %v10343_v56, 2  ;;  %v1268_v41 = vrot.slane %v10038_v5, 2 }
  0x3d   : > { %8992 = vmatprep.mubr.msk.f32.mxu1 %vm641_vm2, %v10102_v33  ;;  %15310 = vst [vmem:[#allocation35_spill] sm:$0xff] %v10501_v57  ;;  %v10518_v38 = vsel %vm1227_vm3, %v1259_v42, %v1261_v45  ;;  %v1271_v42 = vrot.slane %v10052_v13, 2 }
  0x3e   : > { %15311 = vst [vmem:[#allocation36_spill] sm:$0xff] %v10518_v38 }
  0x3f   : > { %9043 = vmatmul.mubr.msk.f32.gmra.mxu0 %vm641_vm2, %v10450_v21 }
  0x40   : > { %8993 = vmatmul.mubr.msk.f32.gmra.mxu1 %vm641_vm2, %v10105_v34  ;;  %9045 = vmatprep.mubr.msk.f32.mxu0 %vm641_vm2, %v10456_v10 }
  0x41   : > { %8995 = vmatprep.mubr.msk.f32.mxu1 %vm641_vm2, %v10142_v47 }
  0x43   : > { %9046 = vmatmul.mubr.msk.f32.gmra.mxu0 %vm641_vm2, %v10467_v60 }
  0x44   : > { %8996 = vmatmul.mubr.msk.f32.gmra.mxu1 %vm641_vm2, %v10145_v48  ;;  %9048 = vmatprep.mubr.msk.f32.mxu0 %vm641_vm2, %v10473_v49 }
  0x45   : > { %8998 = vmatprep.mubr.msk.f32.mxu1 %vm641_vm2, %v10162_v55 }
  0x47   : > { %9049 = vmatmul.mubr.msk.f32.gmra.mxu0 %vm641_vm2, %v10484_v15  ;;  %v1264_v15 = vrot.slane %v10313_v40, 2 }
  0x48   : > { %8999 = vmatmul.mubr.msk.f32.gmra.mxu1 %vm641_vm2, %v10178_v61  ;;  %9051 = vmatprep.mubr.msk.f32.mxu0 %vm641_vm2, %v10490_v12 }
  0x49   : > { %9001 = vmatprep.mubr.msk.f32.mxu1 %vm641_vm2, %v10222_v25  ;;  %v10524_v28 = vsel %vm1227_vm3, %v1263_v50, %v1264_v15  ;;  %v10535_v56 = vsel %vm1227_vm3, %v1264_v15, %v1266_v26  ;;  %v1273_v50 = vrot.slane %v10064_v19, 2  ;;  %v1276_v15 = vrot.slane %v10085_v27, 2 }
  0x4a   : > { %15312 = vst [vmem:[#allocation37_spill] sm:$0xff] %v10535_v56 }
  0x4b   : > { %9052 = vmatmul.mubr.msk.f32.gmra.mxu0 %vm641_vm2, %v10501_v57  ;;  %v1269_v57 = vrot.slane %v10043_v8, 2 }
  0x4c   : > { %9002 = vmatmul.mubr.msk.f32.gmra.mxu1 %vm641_vm2, %v10225_v30  ;;  %9054 = vmatprep.mubr.msk.f32.mxu0 %vm641_vm2, %v10507_v37 }
  0x4d   : > { %9004 = vmatprep.mubr.msk.f32.mxu1 %vm641_vm2, %v10266_v59  ;;  %v10541_v45 = vsel %vm1227_vm3, %v1268_v41, %v1269_v57  ;;  %v10552_v13 = vsel %vm1227_vm3, %v1269_v57, %v1271_v42  ;;  %v1278_v41 = vrot.slane %v10108_v35, 2  ;;  %v1281_v57 = vrot.slane %v10139_v46, 2 }
  0x4e   : > { %15313 = vst [vmem:[#allocation38_spill] sm:$0xff] %v10552_v13 }
  0x4f   : > { %9055 = vmatmul.mubr.msk.f32.gmra.mxu0 %vm641_vm2, %v10518_v38  ;;  %v1274_v38 = vrot.slane %v10067_v20, 2 }
  0x50   : > { %9005 = vmatmul.mubr.msk.f32.gmra.mxu1 %vm641_vm2, %v10269_v1  ;;  %9057 = vmatprep.mubr.msk.f32.mxu0 %vm641_vm2, %v10524_v28 }
  0x51   : > { %9007 = vmatprep.mubr.msk.f32.mxu1 %vm641_vm2, %v10310_v24  ;;  %v10558_v26 = vsel %vm1227_vm3, %v1273_v50, %v1274_v38  ;;  %v10569_v27 = vsel %vm1227_vm3, %v1274_v38, %v1276_v15  ;;  %v1283_v50 = vrot.slane %v10156_v53, 2  ;;  %v1286_v38 = vrot.slane %v10191_v0, 2 }
  0x52   : > { %15314 = vst [vmem:[#allocation39_spill] sm:$0xff] %v10569_v27 }
  0x53   : > { %9058 = vmatmul.mubr.msk.f32.gmra.mxu0 %vm641_vm2, %v10535_v56  ;;  %v1279_v56 = vrot.slane %v10119_v39, 2 }
  0x54   : > { %9008 = vmatmul.mubr.msk.f32.gmra.mxu1 %vm641_vm2, %v10313_v40  ;;  %9060 = vmatprep.mubr.msk.f32.mxu0 %vm641_vm2, %v10541_v45 }
  0x55   : > { %9010 = vmatprep.mubr.msk.f32.mxu1 %vm641_vm2, %v10038_v5  ;;  %v10575_v42 = vsel %vm1227_vm3, %v1278_v41, %v1279_v56  ;;  %v10586_v46 = vsel %vm1227_vm3, %v1279_v56, %v1281_v57  ;;  %v1288_v41 = vrot.slane %v10195_v2, 2  ;;  %v1291_v56 = vrot.slane %v10214_v16, 2 }
  0x56   : > { %15315 = vst [vmem:[#allocation40_spill] sm:$0xff] %v10586_v46 }
  0x57   : > { %9061 = vmatmul.mubr.msk.f32.gmra.mxu0 %vm641_vm2, %v10552_v13  ;;  %v1284_v13 = vrot.slane %v10159_v54, 2 }
  0x58   : > { %9011 = vmatmul.mubr.msk.f32.gmra.mxu1 %vm641_vm2, %v10043_v8  ;;  %9063 = vmatprep.mubr.msk.f32.mxu0 %vm641_vm2, %v10558_v26 }
  0x59   : > { %9013 = vmatprep.mubr.msk.f32.mxu1 %vm641_vm2, %v10064_v19  ;;  %v10592_v15 = vsel %vm1227_vm3, %v1283_v50, %v1284_v13  ;;  %v10603_v0 = vsel %vm1227_vm3, %v1284_v13, %v1286_v38  ;;  %v1293_v50 = vrot.slane %v10230_v31, 2  ;;  %v1296_v13 = vrot.slane %v10258_v58, 2 }
  0x5a   : > { %15316 = vst [vmem:[#allocation41_spill] sm:$0xff] %v10592_v15  ;;  %15317 = vst [vmem:[#allocation42_spill] sm:$0xff] %v10603_v0 }
  0x5b   : > { %9064 = vmatmul.mubr.msk.f32.gmra.mxu0 %vm641_vm2, %v10569_v27  ;;  %v1289_v27 = vrot.slane %v10198_v6, 2 }
  0x5c   : > { %9014 = vmatmul.mubr.msk.f32.gmra.mxu1 %vm641_vm2, %v10067_v20  ;;  %9066 = vmatprep.mubr.msk.f32.mxu0 %vm641_vm2, %v10575_v42 }
  0x5d   : > { %9016 = vmatprep.mubr.msk.f32.mxu1 %vm641_vm2, %v10108_v35  ;;  %v10609_v57 = vsel %vm1227_vm3, %v1288_v41, %v1289_v27  ;;  %v10620_v16 = vsel %vm1227_vm3, %v1289_v27, %v1291_v56  ;;  %v1298_v41 = vrot.slane %v10274_v11, 2  ;;  %v1301_v27 = vrot.slane %v10307_v63, 2 }
  0x5e   : > { %15318 = vst [vmem:[#allocation43_spill] sm:$0xff] %v10609_v57  ;;  %15319 = vst [vmem:[#allocation44_spill] sm:$0xff] %v10620_v16 }
  0x5f   : > { %9067 = vmatmul.mubr.msk.f32.gmra.mxu0 %vm641_vm2, %v10586_v46  ;;  %v1294_v46 = vrot.slane %v10233_v32, 2 }
  0x60   : > { %9017 = vmatmul.mubr.msk.f32.gmra.mxu1 %vm641_vm2, %v10119_v39  ;;  %9069 = vmatprep.mubr.msk.f32.mxu0 %vm641_vm2, %v10592_v15 }
  0x61   : > { %9019 = vmatprep.mubr.msk.f32.mxu1 %vm641_vm2, %v10156_v53  ;;  %v10626_v38 = vsel %vm1227_vm3, %v1293_v50, %v1294_v46  ;;  %v10637_v58 = vsel %vm1227_vm3, %v1294_v46, %v1296_v13  ;;  %v1303_v50 = vrot.slane %v10318_v51, 2  ;;  %v1306_v46 = vrot.slane %v10351_v52, 2  ;;  %v15325_v52 = vld [vmem:[#allocation4_spill] sm:$0xff] }
  0x63   : > { %9070 = vmatmul.mubr.msk.f32.gmra.mxu0 %vm641_vm2, %v10603_v0  ;;  %v15320_v0 = vld [vmem:[#allocation18_spill] sm:$0xff] }
  0x64   : > { %9020 = vmatmul.mubr.msk.f32.gmra.mxu1 %vm641_vm2, %v10159_v54  ;;  %9072 = vmatprep.mubr.msk.f32.mxu0 %vm641_vm2, %v10609_v57  ;;  %v1299_v15 = vrot.slane %v15320_v0, 2 }
  0x65   : > { %9022 = vmatprep.mubr.msk.f32.mxu1 %vm641_vm2, %v10195_v2 }
  0x66   : > { %v10643_v56 = vsel %vm1227_vm3, %v1298_v41, %v1299_v15  ;;  %v10654_v63 = vsel %vm1227_vm3, %v1299_v15, %v1301_v27  ;;  %v15326_v41 = vld [vmem:[#allocation6_spill] sm:$0xff] }
  0x67   : > { %9073 = vmatmul.mubr.msk.f32.gmra.mxu0 %vm641_vm2, %v10620_v16  ;;  %v15321_v16 = vld [vmem:[#allocation23_spill] sm:$0xff]  ;;  %15322 = vst [vmem:[#allocation18_spill] sm:$0xff] %v10654_v63  ;;  %v10695_v27 = vld [vmem:[%s15030_s3 + $0x20] sm:$0xf] }
  0x68   : > { %9023 = vmatmul.mubr.msk.f32.gmra.mxu1 %vm641_vm2, %v10198_v6  ;;  %9075 = vmatprep.mubr.msk.f32.mxu0 %vm641_vm2, %v10626_v38  ;;  %v1304_v57 = vrot.slane %v15321_v16, 2 }
  0x69   : > { %9025 = vmatprep.mubr.msk.f32.mxu1 %vm641_vm2, %v10230_v31 }
  0x6a   : > { %v10660_v13 = vsel %vm1227_vm3, %v1303_v50, %v1304_v57  ;;  %v10669_v15 = vsel %vm1227_vm3, %v1304_v57, %v1306_v46  ;;  %v10686_v57 = vld [vmem:[%s15030_s3 + $0x1c] sm:$0xf]  ;;  %v15331_v50 = vld [vmem:[#allocation16_spill] sm:$0xff]  ;;  %v15332_v46 = vld [vmem:[#allocation19_spill] sm:$0xff] }
  0x6b   : > { %9076 = vmatmul.mubr.msk.f32.gmra.mxu0 %vm641_vm2, %v10637_v58  ;;  %15323 = vst [vmem:[#allocation23_spill] sm:$0xff] %v10660_v13  ;;  %15324 = vst [vmem:[#allocation45_spill] sm:$0xff] %v10669_v15 }
  0x6c   : > { %9026 = vmatmul.mubr.msk.f32.gmra.mxu1 %vm641_vm2, %v10233_v32  ;;  %9078 = vmatprep.mubr.msk.f32.mxu0 %vm641_vm2, %v10643_v56 }
  0x6d   : > { %9028 = vmatprep.mubr.msk.f32.mxu1 %vm641_vm2, %v10274_v11 }
  0x6f   : > { %9079 = vmatmul.mubr.msk.f32.gmra.mxu0 %vm641_vm2, %v10654_v63 }
  0x70   : > { %9029 = vmatmul.mubr.msk.f32.gmra.mxu1 %vm641_vm2, %v15320_v0  ;;  %9081 = vmatprep.mubr.msk.f32.mxu0 %vm641_vm2, %v10660_v13 }
  0x71   : > { %9031 = vmatprep.mubr.msk.f32.mxu1 %vm641_vm2, %v10318_v51 }
  0x73   : > { %9082 = vmatmul.mubr.msk.f32.gmra.mxu0 %vm641_vm2, %v10669_v15 }
  0x74   : > { %9032 = vmatmul.mubr.msk.f32.gmra.mxu1 %vm641_vm2, %v15321_v16  ;;  %9136 = vmatprep.mubr.msk.f32.mxu0 %vm641_vm2, %v15325_v52  ;;  %v15333_v52 = vld [vmem:[#allocation21_spill] sm:$0xff] }
  0x75   : > { %9086 = vmatprep.mubr.msk.f32.mxu1 %vm641_vm2, %v10055_v14  ;;  %v15327_v14 = vld [vmem:[#allocation8_spill] sm:$0xff] }
  0x77   : > { %9137 = vmatmul.mubr.msk.f32.vlgmr.msra.gmra.mxu0 %vm641_vm2, %v15326_v41  ;;  %v15334_v41 = vld [vmem:[#allocation24_spill] sm:$0xff] }
  0x78   : > { %9087 = vmatmul.mubr.msk.f32.vlgmr.msra.gmra.mxu1 %vm641_vm2, %v10060_v17  ;;  %9235 = vmatpush3.msk.msra.mxu0 %vm706_vm0, %v10426_v23  ;;  %v15328_v17 = vld [vmem:[#allocation10_spill] sm:$0xff]  ;;  %v15329_v23 = vld [vmem:[#allocation12_spill] sm:$0xff] }
  0x79   : > { %9185 = vmatpush3.msk.msra.mxu1 %vm706_vm0, %v10413_v9  ;;  %9089 = vmatprep.mubr.msk.f32.mxu1 %vm641_vm2, %v10102_v33  ;;  %v15330_v9 = vld [vmem:[#allocation14_spill] sm:$0xff] }
  0x7a   : > { %9139 = vmatprep.mubr.msk.f32.mxu0 %vm641_vm2, %v15327_v14  ;;  %9284 = vmatprep.subr.msk.mxu1 %vm706_vm0, %v10686_v57 }
  0x7b   : > { %9140 = vmatmul.mubr.msk.f32.gmra.mxu0 %vm641_vm2, %v15328_v17  ;;  %9334 = vmatprep.subr.msk.mxu0 %vm706_vm0, %v10695_v27 }
  0x7c   : > { %9090 = vmatmul.mubr.msk.f32.gmra.mxu1 %vm641_vm2, %v10105_v34  ;;  %9142 = vmatprep.mubr.msk.f32.mxu0 %vm641_vm2, %v15329_v23 }
  0x7d   : > { %9092 = vmatprep.mubr.msk.f32.mxu1 %vm641_vm2, %v10142_v47 }
  0x7f   : > { %9143 = vmatmul.mubr.msk.f32.gmra.mxu0 %vm641_vm2, %v15330_v9 }
  0x80   : > { %9093 = vmatmul.mubr.msk.f32.gmra.mxu1 %vm641_vm2, %v10145_v48  ;;  %9145 = vmatprep.mubr.msk.f32.mxu0 %vm641_vm2, %v15331_v50  ;;  %v15335_v50 = vld [vmem:[#allocation26_spill] sm:$0xff] }
  0x81   : > { %9095 = vmatprep.mubr.msk.f32.mxu1 %vm641_vm2, %v10162_v55 }
  0x83   : > { %9146 = vmatmul.mubr.msk.f32.gmra.mxu0 %vm641_vm2, %v15332_v46 }
  0x84   : > { %9096 = vmatmul.mubr.msk.f32.gmra.mxu1 %vm641_vm2, %v10178_v61  ;;  %9148 = vmatprep.mubr.msk.f32.mxu0 %vm641_vm2, %v15333_v52  ;;  %v10812_v52 = vld [vmem:[%s10029_s29 + $0x190] sm:$0x3] }
  0x85   : > { %9098 = vmatprep.mubr.msk.f32.mxu1 %vm641_vm2, %v10222_v25 }
  0x87   : > { %9149 = vmatmul.mubr.msk.f32.gmra.mxu0 %vm641_vm2, %v15334_v41  ;;  %v10799_v41 = vld [vmem:[%s10029_s29 + $0x188] sm:$0xff] }
  0x88   : > { %9099 = vmatmul.mubr.msk.f32.gmra.mxu1 %vm641_vm2, %v10225_v30  ;;  %9151 = vmatprep.mubr.msk.f32.mxu0 %vm641_vm2, %v15335_v50  ;;  %v15336_v50 = vld [vmem:[#allocation2_spill] sm:$0xff] }
  0x89   : > { %9101 = vmatprep.mubr.msk.f32.mxu1 %vm641_vm2, %v10266_v59 }
  0x8b   : > { %9152 = vmatmul.mubr.msk.f32.gmra.mxu0 %vm641_vm2, %v10360_v22  ;;  %v15337_v22 = vld [vmem:[#allocation3_spill] sm:$0xff] }
  0x8c   : > { %9102 = vmatmul.mubr.msk.f32.gmra.mxu1 %vm641_vm2, %v10269_v1  ;;  %9154 = vmatprep.mubr.msk.f32.mxu0 %vm641_vm2, %v10370_v7  ;;  %v15338_v7 = vld [vmem:[#allocation5_spill] sm:$0xff] }
  0x8d   : > { %9104 = vmatprep.mubr.msk.f32.mxu1 %vm641_vm2, %v10310_v24 }
  0x8f   : > { %9155 = vmatmul.mubr.msk.f32.gmra.mxu0 %vm641_vm2, %v10385_v29  ;;  %v15339_v29 = vld [vmem:[#allocation7_spill] sm:$0xff] }
  0x90   : > { %9105 = vmatmul.mubr.msk.f32.gmra.mxu1 %vm641_vm2, %v10313_v40  ;;  %9157 = vmatprep.mubr.msk.f32.mxu0 %vm641_vm2, %v15336_v50  ;;  %v15340_v50 = vld [vmem:[#allocation9_spill] sm:$0xff] }
  0x91   : > { %9107 = vmatprep.mubr.msk.f32.mxu1 %vm641_vm2, %v10038_v5 }
  0x93   : > { %9158 = vmatmul.mubr.msk.f32.gmra.mxu0 %vm641_vm2, %v15337_v22  ;;  %v15341_v22 = vld [vmem:[#allocation11_spill] sm:$0xff] }
  0x94   : > { %9108 = vmatmul.mubr.msk.f32.gmra.mxu1 %vm641_vm2, %v10043_v8  ;;  %9160 = vmatprep.mubr.msk.f32.mxu0 %vm641_vm2, %v15338_v7  ;;  %v15342_v7 = vld [vmem:[#allocation13_spill] sm:$0xff] }
  0x95   : > { %9110 = vmatprep.mubr.msk.f32.mxu1 %vm641_vm2, %v10064_v19 }
  0x97   : > { %9161 = vmatmul.mubr.msk.f32.gmra.mxu0 %vm641_vm2, %v15339_v29  ;;  %v15343_v29 = vld [vmem:[#allocation15_spill] sm:$0xff] }
  0x98   : > { %9111 = vmatmul.mubr.msk.f32.gmra.mxu1 %vm641_vm2, %v10067_v20  ;;  %9163 = vmatprep.mubr.msk.f32.mxu0 %vm641_vm2, %v15340_v50  ;;  %v15344_v50 = vld [vmem:[#allocation17_spill] sm:$0xff] }
  0x99   : > { %9113 = vmatprep.mubr.msk.f32.mxu1 %vm641_vm2, %v10108_v35 }
  0x9b   : > { %9164 = vmatmul.mubr.msk.f32.gmra.mxu0 %vm641_vm2, %v15341_v22  ;;  %v15345_v22 = vld [vmem:[#allocation20_spill] sm:$0xff] }
  0x9c   : > { %9114 = vmatmul.mubr.msk.f32.gmra.mxu1 %vm641_vm2, %v10119_v39  ;;  %9166 = vmatprep.mubr.msk.f32.mxu0 %vm641_vm2, %v15342_v7  ;;  %v15346_v7 = vld [vmem:[#allocation22_spill] sm:$0xff] }
  0x9d   : > { %9116 = vmatprep.mubr.msk.f32.mxu1 %vm641_vm2, %v10156_v53 }
  0x9f   : > { %9167 = vmatmul.mubr.msk.f32.gmra.mxu0 %vm641_vm2, %v15343_v29  ;;  %v10796_v29 = vld [vmem:[%s10029_s29 + $0x180] sm:$0xff] }
  0xa0   : > { %9117 = vmatmul.mubr.msk.f32.gmra.mxu1 %vm641_vm2, %v10159_v54  ;;  %9169 = vmatprep.mubr.msk.f32.mxu0 %vm641_vm2, %v15344_v50  ;;  %v15347_v50 = vld [vmem:[#allocation25_spill] sm:$0xff] }
  0xa1   : > { %9119 = vmatprep.mubr.msk.f32.mxu1 %vm641_vm2, %v10195_v2 }
  0xa3   : > { %9170 = vmatmul.mubr.msk.f32.gmra.mxu0 %vm641_vm2, %v15345_v22  ;;  %v1904_v22 = vrot.slane %v10799_v41, 1 }
  0xa4   : > { %9120 = vmatmul.mubr.msk.f32.gmra.mxu1 %vm641_vm2, %v10198_v6  ;;  %9172 = vmatprep.mubr.msk.f32.mxu0 %vm641_vm2, %v15346_v7  ;;  %v1903_v7 = vrot.slane %v10796_v29, 1 }
  0xa5   : > { %9122 = vmatprep.mubr.msk.f32.mxu1 %vm641_vm2, %v10230_v31 }
  0xa7   : > { %9173 = vmatmul.mubr.msk.f32.gmra.mxu0 %vm641_vm2, %v15347_v50  ;;  %v10824_v50 = vsel %vm558_vm1, %v1903_v7, %v1904_v22  ;;  %v10850_v7 = vld [vmem:[%s15032_s5 + $0x4] sm:$0xf] }
  0xa8   : > { %9123 = vmatmul.mubr.msk.f32.gmra.mxu1 %vm641_vm2, %v10233_v32  ;;  %9175 = vmatprep.mubr.msk.f32.mxu0 %vm641_vm2, %v10346_v44  ;;  %v1906_v44 = vrot.slane %v10812_v52, 1  ;;  %15348 = vst [vmem:[#allocation4_spill] sm:$0xff] %v10824_v50 }
  0xa9   : > { %9125 = vmatprep.mubr.msk.f32.mxu1 %vm641_vm2, %v10274_v11 }
  0xab   : > { %9176 = vmatmul.mubr.msk.f32.gmra.mxu0 %vm641_vm2, %v10367_v62  ;;  %v10833_v62 = vsel %vm558_vm1, %v1904_v22, %v1906_v44  ;;  %v15359_v44 = vld [vmem:[#allocation43_spill] sm:$0xff] }
  0xac   : > { %9126 = vmatmul.mubr.msk.f32.gmra.mxu1 %vm641_vm2, %v15320_v0  ;;  %9178 = vmatprep.mubr.msk.f32.mxu0 %vm641_vm2, %v10375_v43  ;;  %15349 = vst [vmem:[#allocation6_spill] sm:$0xff] %v10833_v62 }
  0xad   : > { %9128 = vmatprep.mubr.msk.f32.mxu1 %vm641_vm2, %v10318_v51 }
  0xaf   : > { %9179 = vmatmul.mubr.msk.f32.gmra.mxu0 %vm641_vm2, %v10390_v36 }
  0xb0   : > { %9129 = vmatmul.mubr.msk.f32.gmra.mxu1 %vm641_vm2, %v15321_v16  ;;  %9181 = vmatprep.mubr.msk.f32.mxu0 %vm641_vm2, %v10824_v50 }
  0xb1   : > { %9131 = vmatprep.mubr.msk.f32.mxu1 %vm641_vm2, %v10796_v29 }
  0xb3   : > { %9182 = vmatmul.mubr.msk.f32.gmra.mxu0 %vm641_vm2, %v10833_v62  ;;  %v2174_v62 = vrot.slane %v10796_v29, 2 }
  0xb4   : > { %9132 = vmatmul.mubr.msk.f32.gmra.mxu1 %vm641_vm2, %v10799_v41  ;;  %9236 = vmatprep.mubr.msk.f32.mxu0 %vm641_vm2, %v10102_v33  ;;  %v10859_v33 = vld [vmem:[%s15032_s5] sm:$0xf] }
  0xb5   : > { %9186 = vmatprep.mubr.msk.f32.mxu1 %vm641_vm2, %v10408_v18 }
  0xb7   : > { %9237 = vmatmul.mubr.msk.f32.vlgmr.msra.gmra.mxu0 %vm641_vm2, %v10105_v34  ;;  %v15350_v34 = vld [vmem:[#allocation34_spill] sm:$0xff] }
  0xb8   : > { %9187 = vmatmul.mubr.msk.f32.vlgmr.msra.gmra.mxu1 %vm641_vm2, %v10420_v3  ;;  %9335 = vmatpush3.msk.msra.mxu0 %vm706_vm0, %v10695_v27  ;;  %v15360_v3 = vld [vmem:[#allocation44_spill] sm:$0xff] }
  0xb9   : > { %9285 = vmatpush3.msk.msra.mxu1 %vm706_vm0, %v10686_v57  ;;  %9189 = vmatprep.mubr.msk.f32.mxu1 %vm641_vm2, %v10433_v4 }
  0xba   : > { %9239 = vmatprep.mubr.msk.f32.mxu0 %vm641_vm2, %v10142_v47  ;;  %9384 = vmatprep.subr.msk.mxu1 %vm706_vm0, %v10850_v7  ;;  %v15351_v47 = vld [vmem:[#allocation35_spill] sm:$0xff] }
  0xbb   : > { %9240 = vmatmul.mubr.msk.f32.gmra.mxu0 %vm641_vm2, %v10145_v48  ;;  %9434 = vmatprep.subr.msk.mxu0 %vm706_vm0, %v10859_v33  ;;  %v15352_v48 = vld [vmem:[#allocation36_spill] sm:$0xff] }
  0xbc   : > { %9190 = vmatmul.mubr.msk.f32.gmra.mxu1 %vm641_vm2, %v10450_v21  ;;  %9242 = vmatprep.mubr.msk.f32.mxu0 %vm641_vm2, %v10162_v55  ;;  %v15353_v55 = vld [vmem:[#allocation37_spill] sm:$0xff] }
  0xbd   : > { %9192 = vmatprep.mubr.msk.f32.mxu1 %vm641_vm2, %v10456_v10 }
  0xbf   : > { %9243 = vmatmul.mubr.msk.f32.gmra.mxu0 %vm641_vm2, %v10178_v61  ;;  %v15354_v61 = vld [vmem:[#allocation38_spill] sm:$0xff] }
  0xc0   : > { %9193 = vmatmul.mubr.msk.f32.gmra.mxu1 %vm641_vm2, %v10467_v60  ;;  %9245 = vmatprep.mubr.msk.f32.mxu0 %vm641_vm2, %v10222_v25 }
  0xc1   : > { %9195 = vmatprep.mubr.msk.f32.mxu1 %vm641_vm2, %v10473_v49 }
  0xc3   : > { %9246 = vmatmul.mubr.msk.f32.gmra.mxu0 %vm641_vm2, %v10225_v30  ;;  %v15356_v30 = vld [vmem:[#allocation40_spill] sm:$0xff] }
  0xc4   : > { %9196 = vmatmul.mubr.msk.f32.gmra.mxu1 %vm641_vm2, %v15350_v34  ;;  %9248 = vmatprep.mubr.msk.f32.mxu0 %vm641_vm2, %v10266_v59  ;;  %v15357_v59 = vld [vmem:[#allocation41_spill] sm:$0xff] }
  0xc5   : > { %9198 = vmatprep.mubr.msk.f32.mxu1 %vm641_vm2, %v10490_v12 }
  0xc7   : > { %9249 = vmatmul.mubr.msk.f32.gmra.mxu0 %vm641_vm2, %v10269_v1 }
  0xc8   : > { %9199 = vmatmul.mubr.msk.f32.gmra.mxu1 %vm641_vm2, %v15351_v47  ;;  %9251 = vmatprep.mubr.msk.f32.mxu0 %vm641_vm2, %v10310_v24 }
  0xc9   : > { %9201 = vmatprep.mubr.msk.f32.mxu1 %vm641_vm2, %v10507_v37 }
  0xcb   : > { %9252 = vmatmul.mubr.msk.f32.gmra.mxu0 %vm641_vm2, %v10313_v40  ;;  %v15358_v40 = vld [vmem:[#allocation42_spill] sm:$0xff] }
  0xcc   : > { %9202 = vmatmul.mubr.msk.f32.gmra.mxu1 %vm641_vm2, %v15352_v48  ;;  %9254 = vmatprep.mubr.msk.f32.mxu0 %vm641_vm2, %v10038_v5 }
  0xcd   : > { %9204 = vmatprep.mubr.msk.f32.mxu1 %vm641_vm2, %v10524_v28 }
  0xcf   : > { %9255 = vmatmul.mubr.msk.f32.gmra.mxu0 %vm641_vm2, %v10043_v8 }
  0xd0   : > { %9205 = vmatmul.mubr.msk.f32.gmra.mxu1 %vm641_vm2, %v15353_v55  ;;  %9257 = vmatprep.mubr.msk.f32.mxu0 %vm641_vm2, %v10064_v19  ;;  %v15355_v19 = vld [vmem:[#allocation39_spill] sm:$0xff] }
  0xd1   : > { %9207 = vmatprep.mubr.msk.f32.mxu1 %vm641_vm2, %v10541_v45 }
  0xd3   : > { %9258 = vmatmul.mubr.msk.f32.gmra.mxu0 %vm641_vm2, %v10067_v20 }
  0xd4   : > { %9208 = vmatmul.mubr.msk.f32.gmra.mxu1 %vm641_vm2, %v15354_v61  ;;  %9260 = vmatprep.mubr.msk.f32.mxu0 %vm641_vm2, %v10108_v35 }
  0xd5   : > { %9210 = vmatprep.mubr.msk.f32.mxu1 %vm641_vm2, %v10558_v26 }
  0xd7   : > { %v10927_v5 = vpop.f32.mrf.mxu0  ;;  %9261 = vmatmul.mubr.msk.f32.gmra.mxu0 %vm641_vm2, %v10119_v39 }
  0xd8   : > { %v10931_v8 = vpop.f32.mrf.mxu1  ;;  %9211 = vmatmul.mubr.msk.f32.gmra.mxu1 %vm641_vm2, %v15355_v19  ;;  %9263 = vmatprep.mubr.msk.f32.mxu0 %vm641_vm2, %v10156_v53 }
  0xd9   : > { %v10937_v20 = vpop.f32.mrf.mxu0  ;;  %9213 = vmatprep.mubr.msk.f32.mxu1 %vm641_vm2, %v10575_v42 }
  0xda   : > { %v10941_v35 = vpop.f32.mrf.mxu1 }
  0xdb   : > { %v10943_v25 = vpop.f32.mrf.mxu0  ;;  %9264 = vmatmul.mubr.msk.f32.gmra.mxu0 %vm641_vm2, %v10159_v54 }
  0xdc   : > { %v10947_v39 = vpop.f32.mrf.mxu1  ;;  %9214 = vmatmul.mubr.msk.f32.gmra.mxu1 %vm641_vm2, %v15356_v30  ;;  %9266 = vmatprep.mubr.msk.f32.mxu0 %vm641_vm2, %v10195_v2 }
  0xdd   : > { %v10953_v53 = vpop.f32.mrf.mxu0  ;;  %9216 = vmatprep.mubr.msk.f32.mxu1 %vm641_vm2, %v15357_v59 }
  0xde   : > { %v10957_v1 = vpop.f32.mrf.mxu1 }
  0xdf   : > { %v10959_v24 = vpop.f32.mrf.mxu0  ;;  %9267 = vmatmul.mubr.msk.f32.gmra.mxu0 %vm641_vm2, %v10198_v6 }
  0xe0   : > { %v10963_v54 = vpop.f32.mrf.mxu1  ;;  %9217 = vmatmul.mubr.msk.f32.gmra.mxu1 %vm641_vm2, %v15358_v40  ;;  %9269 = vmatprep.mubr.msk.f32.mxu0 %vm641_vm2, %v10230_v31 }
  0xe1   : > { %v10969_v2 = vpop.f32.mrf.mxu0  ;;  %9219 = vmatprep.mubr.msk.f32.mxu1 %vm641_vm2, %v15359_v44 }
  0xe2   : > { %v10973_v22 = vpop.f32.mrf.mxu1 }
  0xe3   : > { %v10975_v18 = vpop.f32.mrf.mxu0  ;;  %9270 = vmatmul.mubr.msk.f32.gmra.mxu0 %vm641_vm2, %v10233_v32 }
  0xe4   : > { %v10979_v6 = vpop.f32.mrf.mxu1  ;;  %9220 = vmatmul.mubr.msk.f32.gmra.mxu1 %vm641_vm2, %v15360_v3  ;;  %9272 = vmatprep.mubr.msk.f32.mxu0 %vm641_vm2, %v10274_v11 }
  0xe5   : > { %v10985_v31 = vpop.f32.mrf.mxu0  ;;  %9222 = vmatprep.mubr.msk.f32.mxu1 %vm641_vm2, %v10626_v38 }
  0xe6   : > { %v10989_v57 = vpop.f32.mrf.mxu1 }
  0xe7   : > { %15361 = vst [vmem:[#allocation8_spill] sm:$0xff] %v10989_v57  ;;  %v10991_v27 = vpop.f32.mrf.mxu0  ;;  %9273 = vmatmul.mubr.msk.f32.gmra.mxu0 %vm641_vm2, %v15320_v0  ;;  %v2175_v0 = vrot.slane %v10799_v41, 2 }
  0xe8   : > { %v10995_v32 = vpop.f32.mrf.mxu1  ;;  %9223 = vmatmul.mubr.msk.f32.gmra.mxu1 %vm641_vm2, %v10637_v58  ;;  %9275 = vmatprep.mubr.msk.f32.mxu0 %vm641_vm2, %v10318_v51 }
  0xe9   : > { %15362 = vst [vmem:[#allocation10_spill] sm:$0xff] %v10995_v32  ;;  %v11001_v11 = vpop.f32.mrf.mxu0  ;;  %9225 = vmatprep.mubr.msk.f32.mxu1 %vm641_vm2, %v10643_v56  ;;  %v2177_v32 = vrot.slane %v10812_v52, 2 }
  0xea   : > { %v11006_v50 = vpop.f32.mrf.mxu1 }
  0xeb   : > { %15363 = vst [vmem:[#allocation12_spill] sm:$0xff] %v11006_v50  ;;  %v11009_v36 = vpop.f32.mrf.mxu0  ;;  %9276 = vmatmul.mubr.msk.f32.gmra.mxu0 %vm641_vm2, %v15321_v16  ;;  %v11024_v50 = vld [vmem:[%s10029_s29 + $0x198] sm:$0xff]  ;;  %v11030_v16 = vsel %vm1227_vm3, %v2174_v62, %v2175_v0  ;;  %v11056_v52 = vsel %vm1227_vm3, %v2175_v0, %v2177_v32  ;;  %v11077_v32 = vld [vmem:[%s11049_s14 + $0x10] sm:$0x3] }
  0xec   : > { %v11013_v43 = vpop.f32.mrf.mxu1  ;;  %9226 = vmatmul.mubr.msk.f32.gmra.mxu1 %vm641_vm2, %v10654_v63  ;;  %9278 = vmatprep.mubr.msk.f32.mxu0 %vm641_vm2, %v10796_v29  ;;  %15365 = vst [vmem:[#allocation19_spill] sm:$0xff] %v11024_v50  ;;  %15367 = vst [vmem:[#allocation35_spill] sm:$0xff] %v11030_v16 }
  0xed   : > { %15364 = vst [vmem:[#allocation14_spill] sm:$0xff] %v11013_v43  ;;  %v11019_v51 = vpop.f32.mrf.mxu0  ;;  %9228 = vmatprep.mubr.msk.f32.mxu1 %vm641_vm2, %v10660_v13  ;;  %v11043_v13 = vld [vmem:[%s10029_s29 + $0x1a0] sm:$0xff]  ;;  %15370 = vst [vmem:[#allocation38_spill] sm:$0xff] %v11056_v52 }
  0xee   : > { %v11027_v57 = vpop.f32.mrf.mxu1  ;;  %15369 = vst [vmem:[#allocation37_spill] sm:$0xff] %v11043_v13 }
  0xef   : > { %15366 = vst [vmem:[#allocation34_spill] sm:$0xff] %v11027_v57  ;;  %v11032_v43 = vpop.f32.mrf.mxu0  ;;  %9279 = vmatmul.mubr.msk.f32.gmra.mxu0 %vm641_vm2, %v10799_v41  ;;  %v11065_v57 = vld [vmem:[%s11049_s14] sm:$0xff] }
  0xf0   : > { %v11036_v29 = vpop.f32.mrf.mxu1  ;;  %9229 = vmatmul.mubr.msk.f32.gmra.mxu1 %vm641_vm2, %v10669_v15  ;;  %9281 = vmatprep.mubr.msk.f32.mxu0 %vm641_vm2, %v11024_v50  ;;  %v11068_v15 = vld [vmem:[%s11049_s14 + $0x8] sm:$0xff]  ;;  %v4129_v0 = vrot.slane %v11065_v57, 2 }
  0xf1   : > { %15368 = vst [vmem:[#allocation36_spill] sm:$0xff] %v11036_v29  ;;  %v11051_v62 = vpop.f32.mrf.mxu0  ;;  %9231 = vmatprep.mubr.msk.f32.mxu1 %vm641_vm2, %v11030_v16  ;;  %15372 = vst [vmem:[#allocation40_spill] sm:$0xff] %v11068_v15 }
  0xf2   : > { %v11058_v41 = vpop.f32.mrf.mxu1 }
  0xf3   : > { %15371 = vst [vmem:[#allocation39_spill] sm:$0xff] %v11058_v41  ;;  %v11060_v29 = vpop.f32.mrf.mxu0  ;;  %9282 = vmatmul.mubr.msk.f32.gmra.mxu0 %vm641_vm2, %v11043_v13  ;;  %v4130_v41 = vrot.slane %v11068_v15, 2  ;;  %v4132_v13 = vrot.slane %v11077_v32, 2 }
  0xf4   : > { %v11070_v50 = vpop.f32.mrf.mxu1  ;;  %9232 = vmatmul.mubr.msk.f32.gmra.mxu1 %vm641_vm2, %v11056_v52  ;;  %9336 = vmatprep.mubr.msk.f32.mxu0 %vm641_vm2, %v10433_v4  ;;  %v11096_v4 = vld [vmem:[%s15032_s5 + $0x8] sm:$0xf] }
  0xf5   : > { %15373 = vst [vmem:[#allocation41_spill] sm:$0xff] %v11070_v50  ;;  %v11081_v16 = vpop.f32.mrf.mxu0  ;;  %9286 = vmatprep.mubr.msk.f32.mxu1 %vm641_vm2, %v15327_v14  ;;  %v11089_v52 = vsel %vm1227_vm3, %v4129_v0, %v4130_v41  ;;  %v11099_v15 = vsel %vm1227_vm3, %v4130_v41, %v4132_v13  ;;  %v11108_v0 = vld [vmem:[%s15032_s5 + $0xc] sm:$0xf] }
  0xf6   : > { %v11086_v50 = vpop.f32.mrf.mxu1  ;;  %15374 = vst [vmem:[#allocation42_spill] sm:$0xff] %v11089_v52 }
  0xf7   : > { %v9038_v63 = vpop.f32.mrf.mxu0  ;;  %9337 = vmatmul.mubr.msk.f32.vlgmr.msra.gmra.mxu0 %vm641_vm2, %v10450_v21 }
  0xf8   : > { %v8988_v14 = vpop.f32.mrf.mxu1  ;;  %9287 = vmatmul.mubr.msk.f32.vlgmr.msra.gmra.mxu1 %vm641_vm2, %v15328_v17  ;;  %9435 = vmatpush3.msk.msra.mxu0 %vm706_vm0, %v10859_v33 }
  0xf9   : > { %v1074_v21 = vadd.f32 %v8988_v14, %v10927_v5  ;;  %9385 = vmatpush3.msk.msra.mxu1 %vm706_vm0, %v10850_v7  ;;  %v1443_v52 = vpop.f32.mrf.mxu0  ;;  %9289 = vmatprep.mubr.msk.f32.mxu1 %vm641_vm2, %v15329_v23  ;;  %v15375_v5 = vld [vmem:[#allocation16_spill] sm:$0xff] }
  0xfa   : > { %v1068_v13 = vpop.f32.mrf.mxu1  ;;  %9339 = vmatprep.mubr.msk.f32.mxu0 %vm641_vm2, %v10456_v10  ;;  %9484 = vmatprep.subr.msk.mxu1 %vm706_vm0, %v11096_v4 }
  0xfb   : > { %v11119_v17 = vadd.f32 %v9038_v63, %v1074_v21  ;;  %v1069_v33 = vadd.f32 %v1068_v13, %v10937_v20  ;;  %v9041_v41 = vpop.f32.mrf.mxu0  ;;  %9340 = vmatmul.mubr.msk.f32.gmra.mxu0 %vm641_vm2, %v10467_v60  ;;  %9534 = vmatprep.subr.msk.mxu0 %vm706_vm0, %v11108_v0  ;;  %v15376_v13 = vld [vmem:[#allocation21_spill] sm:$0xff] }
  0xfc   : > { %v8991_v7 = vpop.f32.mrf.mxu1  ;;  %9290 = vmatmul.mubr.msk.f32.gmra.mxu1 %vm641_vm2, %v15330_v9  ;;  %9342 = vmatprep.mubr.msk.f32.mxu0 %vm641_vm2, %v10473_v49 }
  0xfd   : > { %v11130_v10 = vadd.f32 %v1443_v52, %v1069_v33  ;;  %v1084_v63 = vadd.f32 %v8991_v7, %v10943_v25  ;;  %v1453_v23 = vpop.f32.mrf.mxu0  ;;  %9292 = vmatprep.mubr.msk.f32.mxu1 %vm641_vm2, %v15375_v5  ;;  %v15377_v7 = vld [vmem:[#allocation24_spill] sm:$0xff] }
  0xfe   : > { %v1078_v20 = vpop.f32.mrf.mxu1 }
  0xff   : > { %v11135_v60 = vadd.f32 %v9041_v41, %v1084_v63  ;;  %v1079_v14 = vadd.f32 %v1078_v20, %v10953_v53  ;;  %v9044_v21 = vpop.f32.mrf.mxu0  ;;  %9343 = vmatmul.mubr.msk.f32.gmra.mxu0 %vm641_vm2, %v15350_v34 }
 0x100   : > { %v8994_v9 = vpop.f32.mrf.mxu1  ;;  %9293 = vmatmul.mubr.msk.f32.gmra.mxu1 %vm641_vm2, %v15332_v46  ;;  %9345 = vmatprep.mubr.msk.f32.mxu0 %vm641_vm2, %v10490_v12 }
 0x101   : > { %v11144_v49 = vadd.f32 %v1453_v23, %v1079_v14  ;;  %v1094_v25 = vadd.f32 %v8994_v9, %v10959_v24  ;;  %v1463_v52 = vpop.f32.mrf.mxu0  ;;  %9295 = vmatprep.mubr.msk.f32.mxu1 %vm641_vm2, %v15376_v13  ;;  %v15378_v23 = vld [vmem:[#allocation26_spill] sm:$0xff] }
 0x102   : > { %v1088_v53 = vpop.f32.mrf.mxu1 }
 0x103   : > { %v11149_v33 = vadd.f32 %v9044_v21, %v1094_v25  ;;  %v1089_v34 = vadd.f32 %v1088_v53, %v10969_v2  ;;  %v9047_v41 = vpop.f32.mrf.mxu0  ;;  %9346 = vmatmul.mubr.msk.f32.gmra.mxu0 %vm641_vm2, %v15351_v47  ;;  %v15379_v21 = vld [vmem:[#allocation28_spill] sm:$0xff]  ;;  %v15380_v25 = vld [vmem:[#allocation30_spill] sm:$0xff] }
 0x104   : > { %v8997_v46 = vpop.f32.mrf.mxu1  ;;  %9296 = vmatmul.mubr.msk.f32.gmra.mxu1 %vm641_vm2, %v15377_v7  ;;  %9348 = vmatprep.mubr.msk.f32.mxu0 %vm641_vm2, %v10507_v37 }
 0x105   : > { %v11158_v12 = vadd.f32 %v1463_v52, %v1089_v34  ;;  %v1104_v24 = vadd.f32 %v8997_v46, %v10975_v18  ;;  %v1473_v63 = vpop.f32.mrf.mxu0  ;;  %9298 = vmatprep.mubr.msk.f32.mxu1 %vm641_vm2, %v15378_v23  ;;  %v15381_v34 = vld [vmem:[#allocation32_spill] sm:$0xff]  ;;  %v15382_v46 = vld [vmem:[#allocation2_spill] sm:$0xff]  ;;  %v15383_v23 = vld [vmem:[#allocation3_spill] sm:$0xff] }
 0x106   : > { %v1098_v2 = vpop.f32.mrf.mxu1 }
 0x107   : > { %v11163_v5 = vadd.f32 %v9047_v41, %v1104_v24  ;;  %v1099_v47 = vadd.f32 %v1098_v2, %v10985_v31  ;;  %v9050_v20 = vpop.f32.mrf.mxu0  ;;  %9349 = vmatmul.mubr.msk.f32.gmra.mxu0 %vm641_vm2, %v15352_v48 }
 0x108   : > { %v9000_v14 = vpop.f32.mrf.mxu1  ;;  %9299 = vmatmul.mubr.msk.f32.gmra.mxu1 %vm641_vm2, %v15379_v21  ;;  %9351 = vmatprep.mubr.msk.f32.mxu0 %vm641_vm2, %v10524_v28 }
 0x109   : > { %v11172_v37 = vadd.f32 %v1473_v63, %v1099_v47  ;;  %v1114_v18 = vadd.f32 %v9000_v14, %v10991_v27  ;;  %v1483_v9 = vpop.f32.mrf.mxu0  ;;  %9301 = vmatprep.mubr.msk.f32.mxu1 %vm641_vm2, %v15380_v25  ;;  %v15384_v47 = vld [vmem:[#allocation5_spill] sm:$0xff] }
 0x10a   : > { %v1108_v31 = vpop.f32.mrf.mxu1  ;;  %v15386_v25 = vld [vmem:[#allocation9_spill] sm:$0xff] }
 0x10b   : > { %v11177_v52 = vadd.f32 %v9050_v20, %v1114_v18  ;;  %v1109_v48 = vadd.f32 %v1108_v31, %v11001_v11  ;;  %v9053_v13 = vpop.f32.mrf.mxu0  ;;  %9352 = vmatmul.mubr.msk.f32.gmra.mxu0 %vm641_vm2, %v15353_v55  ;;  %v15385_v18 = vld [vmem:[#allocation7_spill] sm:$0xff] }
 0x10c   : > { %v9003_v53 = vpop.f32.mrf.mxu1  ;;  %9302 = vmatmul.mubr.msk.f32.gmra.mxu1 %vm641_vm2, %v15381_v34  ;;  %9354 = vmatprep.mubr.msk.f32.mxu0 %vm641_vm2, %v10541_v45 }
 0x10d   : > { %v11186_v28 = vadd.f32 %v1483_v9, %v1109_v48  ;;  %v1124_v27 = vadd.f32 %v9003_v53, %v11009_v36  ;;  %v1493_v41 = vpop.f32.mrf.mxu0  ;;  %9304 = vmatprep.mubr.msk.f32.mxu1 %vm641_vm2, %v15382_v46  ;;  %v15387_v53 = vld [vmem:[#allocation11_spill] sm:$0xff] }
 0x10e   : > { %v1118_v11 = vpop.f32.mrf.mxu1 }
 0x10f   : > { %v11191_v7 = vadd.f32 %v9053_v13, %v1124_v27  ;;  %v1119_v55 = vadd.f32 %v1118_v11, %v11019_v51  ;;  %v9056_v24 = vpop.f32.mrf.mxu0  ;;  %9355 = vmatmul.mubr.msk.f32.gmra.mxu0 %vm641_vm2, %v15354_v61  ;;  %v15388_v27 = vld [vmem:[#allocation13_spill] sm:$0xff] }
 0x110   : > { %v9006_v63 = vpop.f32.mrf.mxu1  ;;  %9305 = vmatmul.mubr.msk.f32.gmra.mxu1 %vm641_vm2, %v15383_v23  ;;  %9357 = vmatprep.mubr.msk.f32.mxu0 %vm641_vm2, %v10558_v26 }
 0x111   : > { %v11200_v36 = vadd.f32 %v1493_v41, %v1119_v55  ;;  %v1134_v45 = vadd.f32 %v9006_v63, %v11032_v43  ;;  %v1503_v2 = vpop.f32.mrf.mxu0  ;;  %9307 = vmatprep.mubr.msk.f32.mxu1 %vm641_vm2, %v15384_v47  ;;  %v15389_v55 = vld [vmem:[#allocation15_spill] sm:$0xff]  ;;  %v15390_v63 = vld [vmem:[#allocation17_spill] sm:$0xff]  ;;  %v15391_v47 = vld [vmem:[#allocation20_spill] sm:$0xff] }
 0x112   : > { %v1128_v51 = vpop.f32.mrf.mxu1 }
 0x113   : > { %v11205_v20 = vadd.f32 %v9056_v24, %v1134_v45  ;;  %v1129_v61 = vadd.f32 %v1128_v51, %v11051_v62  ;;  %v9059_v14 = vpop.f32.mrf.mxu0  ;;  %9358 = vmatmul.mubr.msk.f32.gmra.mxu0 %vm641_vm2, %v15355_v19 }
 0x114   : > { %v9009_v21 = vpop.f32.mrf.mxu1  ;;  %9308 = vmatmul.mubr.msk.f32.gmra.mxu1 %vm641_vm2, %v15385_v18  ;;  %9360 = vmatprep.mubr.msk.f32.mxu0 %vm641_vm2, %v10575_v42 }
 0x115   : > { %v11214_v43 = vadd.f32 %v1503_v2, %v1129_v61  ;;  %v1144_v26 = vadd.f32 %v9009_v21, %v11060_v29  ;;  %v1513_v9 = vpop.f32.mrf.mxu0  ;;  %9310 = vmatprep.mubr.msk.f32.mxu1 %vm641_vm2, %v15386_v25  ;;  %v15392_v61 = vld [vmem:[#allocation22_spill] sm:$0xff]  ;;  %v15394_v25 = vld [vmem:[#allocation27_spill] sm:$0xff] }
 0x116   : > { %v1138_v62 = vpop.f32.mrf.mxu1 }
 0x117   : > { %v11219_v31 = vadd.f32 %v9059_v14, %v1144_v26  ;;  %v1139_v19 = vadd.f32 %v1138_v62, %v11081_v16  ;;  %v9062_v48 = vpop.f32.mrf.mxu0  ;;  %9361 = vmatmul.mubr.msk.f32.gmra.mxu0 %vm641_vm2, %v15356_v30  ;;  %v15393_v26 = vld [vmem:[#allocation25_spill] sm:$0xff] }
 0x118   : > { %v9012_v13 = vpop.f32.mrf.mxu1  ;;  %9311 = vmatmul.mubr.msk.f32.gmra.mxu1 %vm641_vm2, %v15387_v53  ;;  %9363 = vmatprep.mubr.msk.f32.mxu0 %vm641_vm2, %v15357_v59 }
 0x119   : > { %v11228_v42 = vadd.f32 %v1513_v9, %v1139_v19  ;;  %v1154_v29 = vadd.f32 %v9012_v13, %v10931_v8  ;;  %v1523_v34 = vpop.f32.mrf.mxu0  ;;  %9313 = vmatprep.mubr.msk.f32.mxu1 %vm641_vm2, %v15388_v27  ;;  %v15396_v13 = vld [vmem:[#allocation18_spill] sm:$0xff]  ;;  %v15400_v27 = vld [vmem:[#allocation37_spill] sm:$0xff] }
 0x11a   : > { %v1148_v16 = vpop.f32.mrf.mxu1 }
 0x11b   : > { %v11233_v41 = vadd.f32 %v9062_v48, %v1154_v29  ;;  %v1149_v30 = vadd.f32 %v1148_v16, %v10941_v35  ;;  %v9065_v46 = vpop.f32.mrf.mxu0  ;;  %9364 = vmatmul.mubr.msk.f32.gmra.mxu0 %vm641_vm2, %v15358_v40  ;;  %v15398_v29 = vld [vmem:[#allocation23_spill] sm:$0xff]  ;;  %v2986_v16 = vrot.slane %v15400_v27, 2 }
 0x11c   : > { %v9015_v11 = vpop.f32.mrf.mxu1  ;;  %9314 = vmatmul.mubr.msk.f32.gmra.mxu1 %vm641_vm2, %v15389_v55  ;;  %9366 = vmatprep.mubr.msk.f32.mxu0 %vm641_vm2, %v15359_v44 }
 0x11d   : > { %v11242_v8 = vadd.f32 %v1523_v34, %v1149_v30  ;;  %v1164_v59 = vadd.f32 %v9015_v11, %v10947_v39  ;;  %v1533_v24 = vpop.f32.mrf.mxu0  ;;  %9316 = vmatprep.mubr.msk.f32.mxu1 %vm641_vm2, %v15390_v63 }
 0x11e   : > { %v1158_v35 = vpop.f32.mrf.mxu1 }
 0x11f   : > { %v11247_v23 = vadd.f32 %v9065_v46, %v1164_v59  ;;  %v1159_v40 = vadd.f32 %v1158_v35, %v10957_v1  ;;  %v9068_v45 = vpop.f32.mrf.mxu0  ;;  %9367 = vmatmul.mubr.msk.f32.gmra.mxu0 %vm641_vm2, %v15360_v3  ;;  %v15401_v46 = vld [vmem:[#allocation10_spill] sm:$0xff]  ;;  %v15402_v59 = vld [vmem:[#allocation31_spill] sm:$0xff]  ;;  %v2715_v35 = vrot.slane %v15400_v27, 1 }
 0x120   : > { %v9018_v2 = vpop.f32.mrf.mxu1  ;;  %9317 = vmatmul.mubr.msk.f32.gmra.mxu1 %vm641_vm2, %v15391_v47  ;;  %9369 = vmatprep.mubr.msk.f32.mxu0 %vm641_vm2, %v10626_v38 }
 0x121   : > { %v11256_v39 = vadd.f32 %v1533_v24, %v1159_v40  ;;  %v1174_v44 = vadd.f32 %v9018_v2, %v10963_v54  ;;  %v1543_v51 = vpop.f32.mrf.mxu0  ;;  %9319 = vmatprep.mubr.msk.f32.mxu1 %vm641_vm2, %v15392_v61  ;;  %v508_v24 = vld [vmem:[%s10029_s29 + $0x1a8] sm:$0x3]  ;;  %v15403_v2 = vld [vmem:[#allocation12_spill] sm:$0xff] }
 0x122   : > { %v1168_v1 = vpop.f32.mrf.mxu1 }
 0x123   : > { %v11261_v14 = vadd.f32 %v9068_v45, %v1174_v44  ;;  %v1169_v3 = vadd.f32 %v1168_v1, %v10973_v22  ;;  %v9071_v21 = vpop.f32.mrf.mxu0  ;;  %9370 = vmatmul.mubr.msk.f32.gmra.mxu0 %vm641_vm2, %v10637_v58  ;;  %v15395_v58 = vld [vmem:[#allocation8_spill] sm:$0xff]  ;;  %v15405_v1 = vld [vmem:[#allocation33_spill] sm:$0xff] }
 0x124   : > { %v9021_v18 = vpop.f32.mrf.mxu1  ;;  %9320 = vmatmul.mubr.msk.f32.gmra.mxu1 %vm641_vm2, %v15393_v26  ;;  %9372 = vmatprep.mubr.msk.f32.mxu0 %vm641_vm2, %v10643_v56  ;;  %v15397_v56 = vld [vmem:[#allocation29_spill] sm:$0xff]  ;;  %v15407_v26 = vld [vmem:[#allocation14_spill] sm:$0xff] }
 0x125   : > { %v11270_v38 = vadd.f32 %v1543_v51, %v1169_v3  ;;  %v1184_v54 = vadd.f32 %v9021_v18, %v10979_v6  ;;  %v1553_v9 = vpop.f32.mrf.mxu0  ;;  %9322 = vmatprep.mubr.msk.f32.mxu1 %vm641_vm2, %v15394_v25  ;;  %v15399_v6 = vld [vmem:[#allocation19_spill] sm:$0xff]  ;;  %v15404_v51 = vld [vmem:[#allocation45_spill] sm:$0xff]  ;;  %v15408_v25 = vld [vmem:[#allocation4_spill] sm:$0xff] }
 0x126   : > { %v1178_v22 = vpop.f32.mrf.mxu1  ;;  %v2985_v34 = vrot.slane %v15399_v6, 2  ;;  %v2714_v63 = vrot.slane %v15399_v6, 1  ;;  %v15406_v3 = vld [vmem:[#allocation35_spill] sm:$0xff]  ;;  %v15410_v6 = vld [vmem:[#allocation34_spill] sm:$0xff] }
 0x127   : > { %v11275_v62 = vadd.f32 %v9071_v21, %v1184_v54  ;;  %v1179_v19 = vadd.f32 %v1178_v22, %v15395_v58  ;;  %v9074_v48 = vpop.f32.mrf.mxu0  ;;  %9373 = vmatmul.mubr.msk.f32.gmra.mxu0 %vm641_vm2, %v15396_v13  ;;  %v2988_v21 = vrot.slane %v508_v24, 2  ;;  %v2717_v58 = vrot.slane %v508_v24, 1  ;;  %v15412_v24 = vld [vmem:[#allocation6_spill] sm:$0xff] }
 0x128   : > { %v9024_v53 = vpop.f32.mrf.mxu1  ;;  %9323 = vmatmul.mubr.msk.f32.gmra.mxu1 %vm641_vm2, %v15397_v56  ;;  %9375 = vmatprep.mubr.msk.f32.mxu0 %vm641_vm2, %v15398_v29  ;;  %v2987_v22 = vsel %vm1227_vm3, %v2985_v34, %v2986_v16  ;;  %v3463_v13 = vrot.slane %v11065_v57, 1  ;;  %v11321_v34 = vld [vmem:[%s11049_s14 + $0x20] sm:$0xff] }
 0x129   : > { %v11286_v30 = vadd.f32 %v1553_v9, %v1179_v19  ;;  %v1194_v11 = vadd.f32 %v9024_v53, %v15401_v46  ;;  %v1563_v55 = vpop.f32.mrf.mxu0  ;;  %9325 = vmatprep.mubr.msk.f32.mxu1 %vm641_vm2, %v15402_v59  ;;  %v15409_v53 = vld [vmem:[#allocation40_spill] sm:$0xff] }
 0x12a   : > { %v1188_v40 = vpop.f32.mrf.mxu1  ;;  %v3464_v56 = vrot.slane %v15409_v53, 1 }
 0x12b   : > { %v11294_v45 = vadd.f32 %v9074_v48, %v1194_v11  ;;  %v1189_v47 = vadd.f32 %v1188_v40, %v15403_v2  ;;  %v9077_v44 = vpop.f32.mrf.mxu0  ;;  %9376 = vmatmul.mubr.msk.f32.gmra.mxu0 %vm641_vm2, %v15404_v51  ;;  %v2716_v48 = vsel %vm558_vm1, %v2714_v63, %v2715_v35  ;;  %v15411_v11 = vld [vmem:[#allocation38_spill] sm:$0xff]  ;;  %v2989_v63 = vsel %vm1227_vm3, %v2986_v16, %v2988_v21  ;;  %v15413_v2 = vld [vmem:[#allocation36_spill] sm:$0xff]  ;;  %v11337_v21 = vld [vmem:[%s11049_s14 + $0x28] sm:$0x3] }
 0x12c   : > { %v9027_v61 = vpop.f32.mrf.mxu1  ;;  %9326 = vmatmul.mubr.msk.f32.gmra.mxu1 %vm641_vm2, %v15405_v1  ;;  %9378 = vmatprep.mubr.msk.f32.mxu0 %vm641_vm2, %v15406_v3  ;;  %v2718_v51 = vsel %vm558_vm1, %v2715_v35, %v2717_v58  ;;  %v3465_v3 = vsel %vm558_vm1, %v3463_v13, %v3464_v56  ;;  %v3469_v16 = vrot.slane %v11321_v34, 1  ;;  %v11344_v35 = vld [vmem:[%s11049_s14 + $0x30] sm:$0xff] }
 0x12d   : > { %v11303_v18 = vadd.f32 %v1563_v55, %v1189_v47  ;;  %v1204_v54 = vadd.f32 %v9027_v61, %v15407_v26  ;;  %v1573_v9 = vpop.f32.mrf.mxu0  ;;  %9328 = vmatprep.mubr.msk.f32.mxu1 %vm641_vm2, %v15408_v25  ;;  %v11318_v55 = vld [vmem:[%s11049_s14 + $0x18] sm:$0xff]  ;;  %v3466_v61 = vrot.slane %v11077_v32, 1 }
 0x12e   : > { %v1198_v19 = vpop.f32.mrf.mxu1  ;;  %v3468_v26 = vrot.slane %v11318_v55, 1  ;;  %v11347_v32 = vld [vmem:[%s11049_s14 + $0x38] sm:$0xff] }
 0x12f   : > { %v11312_v29 = vadd.f32 %v9077_v44, %v1204_v54  ;;  %v1199_v27 = vadd.f32 %v1198_v19, %v15410_v6  ;;  %v9080_v46 = vpop.f32.mrf.mxu0  ;;  %9379 = vmatmul.mubr.msk.f32.gmra.mxu0 %vm641_vm2, %v15411_v11 }
 0x130   : > { %v9030_v59 = vpop.f32.mrf.mxu1  ;;  %9329 = vmatmul.mubr.msk.f32.gmra.mxu1 %vm641_vm2, %v15412_v24  ;;  %9381 = vmatprep.mubr.msk.f32.mxu0 %vm641_vm2, %v2987_v22  ;;  %v3473_v24 = vrot.slane %v11344_v35, 1 }
 0x131   : > { %v11327_v40 = vadd.f32 %v1573_v9, %v1199_v27  ;;  %v1214_v47 = vadd.f32 %v9030_v59, %v15413_v2  ;;  %v1583_v44 = vpop.f32.mrf.mxu0  ;;  %9331 = vmatprep.mubr.msk.f32.mxu1 %vm641_vm2, %v2716_v48  ;;  %v15414_v9 = vld [vmem:[#allocation39_spill] sm:$0xff]  ;;  %v15415_v48 = vld [vmem:[#allocation41_spill] sm:$0xff]  ;;  %v3467_v27 = vsel %vm558_vm1, %v3464_v56, %v3466_v61  ;;  %v11359_v59 = vsel %vm558_vm1, %v3468_v26, %v3469_v16  ;;  %v11380_v61 = vld [vmem:[%s15032_s5 + $0x10] sm:$0xf] }
 0x132   : > { %v1208_v1 = vpop.f32.mrf.mxu1  ;;  %15416 = vst [vmem:[#allocation43_spill] sm:$0xff] %v11359_v59  ;;  %v11372_v56 = vld [vmem:[%s11049_s14 + $0x48] sm:$0xff] }
 0x133   : > { %v11339_v54 = vadd.f32 %v9080_v46, %v1214_v47  ;;  %v1209_v25 = vadd.f32 %v1208_v1, %v15414_v9  ;;  %v9083_v22 = vpop.f32.mrf.mxu0  ;;  %9382 = vmatmul.mubr.msk.f32.gmra.mxu0 %vm641_vm2, %v2989_v63  ;;  %v3471_v46 = vrot.slane %v11337_v21, 1  ;;  %v11364_v63 = vld [vmem:[%s11049_s14 + $0x40] sm:$0x3] }
 0x134   : > { %v9033_v58 = vpop.f32.mrf.mxu1  ;;  %9332 = vmatmul.mubr.msk.f32.gmra.mxu1 %vm641_vm2, %v2718_v51  ;;  %9436 = vmatprep.mubr.msk.f32.mxu0 %vm641_vm2, %v11065_v57  ;;  %v3474_v57 = vrot.slane %v11347_v32, 1  ;;  %v11375_v51 = vld [vmem:[%s11049_s14 + $0x50] sm:$0xff]  ;;  %v3476_v9 = vrot.slane %v11364_v63, 1 }
 0x135   : > { %v11352_v19 = vadd.f32 %v1583_v44, %v1209_v25  ;;  %v1224_v13 = vadd.f32 %v9033_v58, %v15415_v48  ;;  %v1593_v6 = vpop.f32.mrf.mxu0  ;;  %9386 = vmatprep.mubr.msk.f32.mxu1 %vm641_vm2, %v3465_v3  ;;  %v11409_v58 = vld [vmem:[%s11049_s14 + $0x58] sm:$0x3] }
 0x136   : > { %v1218_v11 = vpop.f32.mrf.mxu1 }
 0x137   : > { %v11366_v2 = vadd.f32 %v9083_v22, %v1224_v13  ;;  %v1219_v47 = vadd.f32 %v1218_v11, %v11086_v50  ;;  %v9138_v44 = vpop.f32.mrf.mxu0  ;;  %9437 = vmatmul.mubr.msk.f32.vlgmr.msra.gmra.mxu0 %vm641_vm2, %v15409_v53  ;;  %v11388_v50 = vld [vmem:[%s15032_s5 + $0x14] sm:$0xf]  ;;  %v3479_v22 = vrot.slane %v11375_v51, 1 }
 0x138   : > { %v9088_v1 = vpop.f32.mrf.mxu1  ;;  %9387 = vmatmul.mubr.msk.f32.vlgmr.msra.gmra.mxu1 %vm641_vm2, %v3467_v27  ;;  %9535 = vmatpush3.msk.msra.mxu0 %vm706_vm0, %v11108_v0  ;;  %v11398_v0 = vsel %vm558_vm1, %v3469_v16, %v3471_v46  ;;  %v11422_v27 = vld [vmem:[%s11049_s14 + $0x68] sm:$0xff] }
 0x139   : > { %v11390_v53 = vadd.f32 %v1593_v6, %v1219_v47  ;;  %v1871_v3 = vadd.f32 %v9088_v1, %v11119_v17  ;;  %9485 = vmatpush3.msk.msra.mxu1 %vm706_vm0, %v11096_v4  ;;  %v1983_v26 = vpop.f32.mrf.mxu0  ;;  %9389 = vmatprep.mubr.msk.f32.mxu1 %vm641_vm2, %v11359_v59  ;;  %15417 = vst [vmem:[#allocation44_spill] sm:$0xff] %v11398_v0  ;;  %v3478_v4 = vrot.slane %v11372_v56, 1  ;;  %v11419_v6 = vld [vmem:[%s11049_s14 + $0x60] sm:$0xff] }
 0x13a   : > { %v1711_v25 = vpop.f32.mrf.mxu1  ;;  %9439 = vmatprep.mubr.msk.f32.mxu0 %vm641_vm2, %v11318_v55  ;;  %v11404_v17 = vsel %vm558_vm1, %v3473_v24, %v3474_v57  ;;  %9584 = vmatprep.subr.msk.mxu1 %vm706_vm0, %v11380_v61  ;;  %v11436_v47 = vsel %vm558_vm1, %v3474_v57, %v3476_v9  ;;  %v11453_v57 = vld [vmem:[%s11049_s14 + $0x78] sm:$0xff]  ;;  %v11456_v9 = vld [vmem:[%s11049_s14 + $0x80] sm:$0xff] }
 0x13b   : > { %15418 = vst [vmem:[#allocation16_spill] sm:$0xff] %v11404_v17  ;;  %v11413_v16 = vadd.f32 %v9138_v44, %v1871_v3  ;;  %v1870_v48 = vadd.f32 %v1711_v25, %v11130_v10  ;;  %v9141_v13 = vpop.f32.mrf.mxu0  ;;  %9440 = vmatmul.mubr.msk.f32.gmra.mxu0 %vm641_vm2, %v11321_v34  ;;  %9634 = vmatprep.subr.msk.mxu0 %vm706_vm0, %v11388_v50  ;;  %15421 = vst [vmem:[#allocation26_spill] sm:$0xff] %v11436_v47  ;;  %v3481_v44 = vrot.slane %v11409_v58, 1 }
 0x13c   : > { %v9091_v46 = vpop.f32.mrf.mxu1  ;;  %9390 = vmatmul.mubr.msk.f32.gmra.mxu1 %vm641_vm2, %v11398_v0  ;;  %9442 = vmatprep.mubr.msk.f32.mxu0 %vm641_vm2, %v11344_v35  ;;  %v11440_v3 = vsel %vm558_vm1, %v3478_v4, %v3479_v22  ;;  %v3483_v25 = vrot.slane %v11419_v6, 1 }
 0x13d   : > { %15419 = vst [vmem:[#allocation21_spill] sm:$0xff] %v11413_v16  ;;  %v11430_v10 = vadd.f32 %v1983_v26, %v1870_v48  ;;  %v1873_v11 = vadd.f32 %v9091_v46, %v11135_v60  ;;  %v1993_v24 = vpop.f32.mrf.mxu0  ;;  %9392 = vmatprep.mubr.msk.f32.mxu1 %vm641_vm2, %v11404_v17  ;;  %15422 = vst [vmem:[#allocation28_spill] sm:$0xff] %v11440_v3  ;;  %v3484_v26 = vrot.slane %v11422_v27, 1  ;;  %v11445_v48 = vld [vmem:[%s11049_s14 + $0x70] sm:$0x3] }
 0x13e   : > { %v1721_v1 = vpop.f32.mrf.mxu1  ;;  %v3486_v0 = vrot.slane %v11445_v48, 1 }
 0x13f   : > { %15420 = vst [vmem:[#allocation24_spill] sm:$0xff] %v11430_v10  ;;  %v11447_v60 = vadd.f32 %v9141_v13, %v1873_v11  ;;  %v1872_v46 = vadd.f32 %v1721_v1, %v11144_v49  ;;  %v9144_v17 = vpop.f32.mrf.mxu0  ;;  %9443 = vmatmul.mubr.msk.f32.gmra.mxu0 %vm641_vm2, %v11347_v32  ;;  %v11468_v1 = vsel %vm558_vm1, %v3479_v22, %v3481_v44  ;;  %v11485_v22 = vld [vmem:[%s11049_s14 + $0x90] sm:$0xff]  ;;  %v11488_v44 = vld [vmem:[%s11049_s14 + $0x98] sm:$0xff] }
 0x140   : > { %v9094_v4 = vpop.f32.mrf.mxu1  ;;  %9393 = vmatmul.mubr.msk.f32.gmra.mxu1 %vm641_vm2, %v11436_v47  ;;  %9445 = vmatprep.mubr.msk.f32.mxu0 %vm641_vm2, %v11372_v56  ;;  %15425 = vst [vmem:[#allocation2_spill] sm:$0xff] %v11468_v1  ;;  %v11472_v47 = vsel %vm558_vm1, %v3483_v25, %v3484_v26  ;;  %v3493_v10 = vrot.slane %v11485_v22, 1 }
 0x141   : > { %15423 = vst [vmem:[#allocation30_spill] sm:$0xff] %v11447_v60  ;;  %v11462_v13 = vadd.f32 %v1993_v24, %v1872_v46  ;;  %v1875_v49 = vadd.f32 %v9094_v4, %v11149_v33  ;;  %v2003_v11 = vpop.f32.mrf.mxu0  ;;  %9395 = vmatprep.mubr.msk.f32.mxu1 %vm641_vm2, %v11440_v3  ;;  %15426 = vst [vmem:[#allocation3_spill] sm:$0xff] %v11472_v47  ;;  %v3488_v60 = vrot.slane %v11453_v57, 1  ;;  %v3489_v24 = vrot.slane %v11456_v9, 1  ;;  %v11477_v46 = vld [vmem:[%s11049_s14 + $0x88] sm:$0x3] }
 0x142   : > { %v1731_v59 = vpop.f32.mrf.mxu1 }
 0x143   : > { %15424 = vst [vmem:[#allocation32_spill] sm:$0xff] %v11462_v13  ;;  %v11479_v33 = vadd.f32 %v9144_v17, %v1875_v49  ;;  %v1874_v4 = vadd.f32 %v1731_v59, %v11158_v12  ;;  %v9147_v3 = vpop.f32.mrf.mxu0  ;;  %9446 = vmatmul.mubr.msk.f32.gmra.mxu0 %vm641_vm2, %v11375_v51  ;;  %v11500_v49 = vsel %vm558_vm1, %v3484_v26, %v3486_v0  ;;  %v11517_v0 = vld [vmem:[%s11049_s14 + $0xa8] sm:$0xff]  ;;  %v11520_v26 = vld [vmem:[%s11049_s14 + $0xb0] sm:$0xff] }
 0x144   : > { %v9097_v25 = vpop.f32.mrf.mxu1  ;;  %9396 = vmatmul.mubr.msk.f32.gmra.mxu1 %vm641_vm2, %v11468_v1  ;;  %9448 = vmatprep.mubr.msk.f32.mxu0 %vm641_vm2, %v11419_v6  ;;  %15429 = vst [vmem:[#allocation9_spill] sm:$0xff] %v11500_v49  ;;  %v11504_v1 = vsel %vm558_vm1, %v3488_v60, %v3489_v24  ;;  %v3498_v16 = vrot.slane %v11517_v0, 1 }
 0x145   : > { %15427 = vst [vmem:[#allocation5_spill] sm:$0xff] %v11479_v33  ;;  %v11494_v17 = vadd.f32 %v2003_v11, %v1874_v4  ;;  %v1877_v12 = vadd.f32 %v9097_v25, %v11163_v5  ;;  %v2013_v59 = vpop.f32.mrf.mxu0  ;;  %9398 = vmatprep.mubr.msk.f32.mxu1 %vm641_vm2, %v11472_v47  ;;  %v3491_v33 = vrot.slane %v11477_v46, 1  ;;  %15430 = vst [vmem:[#allocation11_spill] sm:$0xff] %v11504_v1  ;;  %v3494_v11 = vrot.slane %v11488_v44, 1  ;;  %v11509_v4 = vld [vmem:[%s11049_s14 + $0xa0] sm:$0x3] }
 0x146   : > { %v1741_v13 = vpop.f32.mrf.mxu1  ;;  %15431 = vst [vmem:[#allocation13_spill] sm:$0xff] %v11509_v4 }
 0x147   : > { %15428 = vst [vmem:[#allocation7_spill] sm:$0xff] %v11494_v17  ;;  %v11511_v5 = vadd.f32 %v9147_v3, %v1877_v12  ;;  %v1876_v25 = vadd.f32 %v1741_v13, %v11172_v37  ;;  %v9150_v47 = vpop.f32.mrf.mxu0  ;;  %9449 = vmatmul.mubr.msk.f32.gmra.mxu0 %vm641_vm2, %v11422_v27  ;;  %v11532_v12 = vsel %vm558_vm1, %v3489_v24, %v3491_v33  ;;  %v11549_v24 = vld [vmem:[%s11049_s14 + $0xc0] sm:$0xff]  ;;  %v11552_v33 = vld [vmem:[%s11049_s14 + $0xc8] sm:$0xff] }
 0x148   : > { %v9100_v60 = vpop.f32.mrf.mxu1  ;;  %9399 = vmatmul.mubr.msk.f32.gmra.mxu1 %vm641_vm2, %v11500_v49  ;;  %9451 = vmatprep.mubr.msk.f32.mxu0 %vm641_vm2, %v11453_v57  ;;  %15434 = vst [vmem:[#allocation20_spill] sm:$0xff] %v11532_v12  ;;  %v11536_v49 = vsel %vm558_vm1, %v3493_v10, %v3494_v11 }
 0x149   : > { %15432 = vst [vmem:[#allocation15_spill] sm:$0xff] %v11511_v5  ;;  %v11526_v3 = vadd.f32 %v2013_v59, %v1876_v25  ;;  %v1879_v37 = vadd.f32 %v9100_v60, %v11177_v52  ;;  %v2023_v13 = vpop.f32.mrf.mxu0  ;;  %9401 = vmatprep.mubr.msk.f32.mxu1 %vm641_vm2, %v11504_v1  ;;  %v3496_v5 = vrot.slane %v11509_v4, 1  ;;  %15435 = vst [vmem:[#allocation22_spill] sm:$0xff] %v11536_v49  ;;  %v3499_v59 = vrot.slane %v11520_v26, 1  ;;  %v11541_v25 = vld [vmem:[%s11049_s14 + $0xb8] sm:$0x3] }
 0x14a   : > { %v1751_v17 = vpop.f32.mrf.mxu1  ;;  %15436 = vst [vmem:[#allocation25_spill] sm:$0xff] %v11541_v25  ;;  %v3503_v4 = vrot.slane %v11549_v24, 1 }
 0x14b   : > { %15433 = vst [vmem:[#allocation17_spill] sm:$0xff] %v11526_v3  ;;  %v11543_v52 = vadd.f32 %v9150_v47, %v1879_v37  ;;  %v1878_v60 = vadd.f32 %v1751_v17, %v11186_v28  ;;  %v9153_v1 = vpop.f32.mrf.mxu0  ;;  %9452 = vmatmul.mubr.msk.f32.gmra.mxu0 %vm641_vm2, %v11456_v9  ;;  %v11564_v37 = vsel %vm558_vm1, %v3494_v11, %v3496_v5  ;;  %v11581_v11 = vld [vmem:[%s11049_s14 + $0xd8] sm:$0xff]  ;;  %v11584_v5 = vld [vmem:[%s11049_s14 + $0xe0] sm:$0xff] }
 0x14c   : > { %v9103_v10 = vpop.f32.mrf.mxu1  ;;  %9402 = vmatmul.mubr.msk.f32.gmra.mxu1 %vm641_vm2, %v11532_v12  ;;  %9454 = vmatprep.mubr.msk.f32.mxu0 %vm641_vm2, %v11485_v22  ;;  %15439 = vst [vmem:[#allocation18_spill] sm:$0xff] %v11564_v37  ;;  %v11568_v12 = vsel %vm558_vm1, %v3498_v16, %v3499_v59 }
 0x14d   : > { %15437 = vst [vmem:[#allocation27_spill] sm:$0xff] %v11543_v52  ;;  %v11558_v47 = vadd.f32 %v2023_v13, %v1878_v60  ;;  %v1881_v28 = vadd.f32 %v9103_v10, %v11191_v7  ;;  %v2033_v17 = vpop.f32.mrf.mxu0  ;;  %9404 = vmatprep.mubr.msk.f32.mxu1 %vm641_vm2, %v11536_v49  ;;  %v3501_v52 = vrot.slane %v11541_v25, 1  ;;  %15440 = vst [vmem:[#allocation29_spill] sm:$0xff] %v11568_v12  ;;  %v3504_v13 = vrot.slane %v11552_v33, 1  ;;  %v11573_v60 = vld [vmem:[%s11049_s14 + $0xd0] sm:$0x3] }
 0x14e   : > { %v1761_v3 = vpop.f32.mrf.mxu1  ;;  %15441 = vst [vmem:[#allocation23_spill] sm:$0xff] %v11573_v60  ;;  %v3508_v25 = vrot.slane %v11581_v11, 1 }
 0x14f   : > { %15438 = vst [vmem:[#allocation8_spill] sm:$0xff] %v11558_v47  ;;  %v11575_v7 = vadd.f32 %v9153_v1, %v1881_v28  ;;  %v1880_v10 = vadd.f32 %v1761_v3, %v11200_v36  ;;  %v9156_v49 = vpop.f32.mrf.mxu0  ;;  %9455 = vmatmul.mubr.msk.f32.gmra.mxu0 %vm641_vm2, %v11488_v44  ;;  %v11596_v28 = vsel %vm558_vm1, %v3499_v59, %v3501_v52  ;;  %v11613_v59 = vld [vmem:[%s11049_s14 + $0xf0] sm:$0xff]  ;;  %v11616_v52 = vld [vmem:[%s11049_s14 + $0xf8] sm:$0xff] }
 0x150   : > { %v9106_v16 = vpop.f32.mrf.mxu1  ;;  %9405 = vmatmul.mubr.msk.f32.gmra.mxu1 %vm641_vm2, %v11564_v37  ;;  %9457 = vmatprep.mubr.msk.f32.mxu0 %vm641_vm2, %v11517_v0  ;;  %15444 = vst [vmem:[#allocation10_spill] sm:$0xff] %v11596_v28  ;;  %v11600_v37 = vsel %vm558_vm1, %v3503_v4, %v3504_v13 }
 0x151   : > { %15442 = vst [vmem:[#allocation19_spill] sm:$0xff] %v11575_v7  ;;  %v11590_v1 = vadd.f32 %v2033_v17, %v1880_v10  ;;  %v1883_v36 = vadd.f32 %v9106_v16, %v11205_v20  ;;  %v2043_v3 = vpop.f32.mrf.mxu0  ;;  %9407 = vmatprep.mubr.msk.f32.mxu1 %vm641_vm2, %v11568_v12  ;;  %v3506_v7 = vrot.slane %v11573_v60, 1  ;;  %15445 = vst [vmem:[#allocation31_spill] sm:$0xff] %v11600_v37  ;;  %v3509_v17 = vrot.slane %v11584_v5, 1  ;;  %v11605_v10 = vld [vmem:[%s11049_s14 + $0xe8] sm:$0x3] }
 0x152   : > { %v1771_v47 = vpop.f32.mrf.mxu1  ;;  %15446 = vst [vmem:[#allocation12_spill] sm:$0xff] %v11605_v10  ;;  %v3513_v60 = vrot.slane %v11613_v59, 1 }
 0x153   : > { %15443 = vst [vmem:[#allocation37_spill] sm:$0xff] %v11590_v1  ;;  %v11607_v20 = vadd.f32 %v9156_v49, %v1883_v36  ;;  %v1882_v16 = vadd.f32 %v1771_v47, %v11214_v43  ;;  %v9159_v12 = vpop.f32.mrf.mxu0  ;;  %9458 = vmatmul.mubr.msk.f32.gmra.mxu0 %vm641_vm2, %v11520_v26  ;;  %v11628_v36 = vsel %vm558_vm1, %v3504_v13, %v3506_v7  ;;  %v11645_v13 = vld [vmem:[%s11049_s14 + $0x108] sm:$0xff]  ;;  %v11648_v7 = vld [vmem:[%s11049_s14 + $0x110] sm:$0xff] }
 0x154   : > { %v9109_v4 = vpop.f32.mrf.mxu1  ;;  %9408 = vmatmul.mubr.msk.f32.gmra.mxu1 %vm641_vm2, %v11596_v28  ;;  %9460 = vmatprep.mubr.msk.f32.mxu0 %vm641_vm2, %v11549_v24  ;;  %15449 = vst [vmem:[#allocation35_spill] sm:$0xff] %v11628_v36  ;;  %v11632_v28 = vsel %vm558_vm1, %v3508_v25, %v3509_v17  ;;  %15453 = vst [vmem:[#allocation34_spill] sm:$0xff] %v11648_v7 }
 0x155   : > { %15447 = vst [vmem:[#allocation45_spill] sm:$0xff] %v11607_v20  ;;  %v11622_v49 = vadd.f32 %v2043_v3, %v1882_v16  ;;  %v1885_v43 = vadd.f32 %v9109_v4, %v11219_v31  ;;  %v2053_v47 = vpop.f32.mrf.mxu0  ;;  %9410 = vmatprep.mubr.msk.f32.mxu1 %vm641_vm2, %v11600_v37  ;;  %v3511_v20 = vrot.slane %v11605_v10, 1  ;;  %15450 = vst [vmem:[#allocation14_spill] sm:$0xff] %v11632_v28  ;;  %v3514_v3 = vrot.slane %v11616_v52, 1  ;;  %v11637_v16 = vld [vmem:[%s11049_s14 + $0x100] sm:$0x3] }
 0x156   : > { %v1781_v1 = vpop.f32.mrf.mxu1  ;;  %15451 = vst [vmem:[#allocation4_spill] sm:$0xff] %v11637_v16  ;;  %v3518_v10 = vrot.slane %v11645_v13, 1 }
 0x157   : > { %15448 = vst [vmem:[#allocation33_spill] sm:$0xff] %v11622_v49  ;;  %v11639_v31 = vadd.f32 %v9159_v12, %v1885_v43  ;;  %v1884_v4 = vadd.f32 %v1781_v1, %v11228_v42  ;;  %v9162_v37 = vpop.f32.mrf.mxu0  ;;  %9461 = vmatmul.mubr.msk.f32.gmra.mxu0 %vm641_vm2, %v11552_v33  ;;  %v11660_v43 = vsel %vm558_vm1, %v3509_v17, %v3511_v20  ;;  %v11677_v17 = vld [vmem:[%s11049_s14 + $0x120] sm:$0xff]  ;;  %v11680_v20 = vld [vmem:[%s11049_s14 + $0x128] sm:$0xff] }
 0x158   : > { %v9112_v25 = vpop.f32.mrf.mxu1  ;;  %9411 = vmatmul.mubr.msk.f32.gmra.mxu1 %vm641_vm2, %v11628_v36  ;;  %9463 = vmatprep.mubr.msk.f32.mxu0 %vm641_vm2, %v11581_v11  ;;  %15455 = vst [vmem:[#allocation6_spill] sm:$0xff] %v11660_v43  ;;  %v11664_v36 = vsel %vm558_vm1, %v3513_v60, %v3514_v3  ;;  %15459 = vst [vmem:[#allocation46_spill] sm:$0xff] %v11680_v20 }
 0x159   : > { %15452 = vst [vmem:[#allocation40_spill] sm:$0xff] %v11639_v31  ;;  %v11654_v12 = vadd.f32 %v2053_v47, %v1884_v4  ;;  %v1887_v42 = vadd.f32 %v9112_v25, %v11233_v41  ;;  %v2063_v1 = vpop.f32.mrf.mxu0  ;;  %9413 = vmatprep.mubr.msk.f32.mxu1 %vm641_vm2, %v11632_v28  ;;  %v3516_v31 = vrot.slane %v11637_v16, 1  ;;  %15456 = vst [vmem:[#allocation36_spill] sm:$0xff] %v11664_v36  ;;  %v3519_v47 = vrot.slane %v11648_v7, 1  ;;  %v11669_v4 = vld [vmem:[%s11049_s14 + $0x118] sm:$0x3] }
 0x15a   : > { %v1791_v49 = vpop.f32.mrf.mxu1  ;;  %15457 = vst [vmem:[#allocation39_spill] sm:$0xff] %v11669_v4  ;;  %v3523_v16 = vrot.slane %v11677_v17, 1 }
 0x15b   : > { %15454 = vst [vmem:[#allocation38_spill] sm:$0xff] %v11654_v12  ;;  %v11671_v41 = vadd.f32 %v9162_v37, %v1887_v42  ;;  %v1886_v25 = vadd.f32 %v1791_v49, %v11242_v8  ;;  %v9165_v28 = vpop.f32.mrf.mxu0  ;;  %9464 = vmatmul.mubr.msk.f32.gmra.mxu0 %vm641_vm2, %v11584_v5  ;;  %v11692_v42 = vsel %vm558_vm1, %v3514_v3, %v3516_v31  ;;  %v11709_v3 = vld [vmem:[%s11049_s14 + $0x138] sm:$0xff]  ;;  %v11712_v31 = vld [vmem:[%s11049_s14 + $0x140] sm:$0xff] }
 0x15c   : > { %v9115_v60 = vpop.f32.mrf.mxu1  ;;  %9414 = vmatmul.mubr.msk.f32.gmra.mxu1 %vm641_vm2, %v11660_v43  ;;  %9466 = vmatprep.mubr.msk.f32.mxu0 %vm641_vm2, %v11613_v59  ;;  %15461 = vst [vmem:[#allocation48_spill] sm:$0xff] %v11692_v42  ;;  %v11696_v43 = vsel %vm558_vm1, %v3518_v10, %v3519_v47  ;;  %15465 = vst [vmem:[#allocation52_spill] sm:$0xff] %v11709_v3 }
 0x15d   : > { %15458 = vst [vmem:[#allocation41_spill] sm:$0xff] %v11671_v41  ;;  %v11686_v37 = vadd.f32 %v2063_v1, %v1886_v25  ;;  %v1889_v8 = vadd.f32 %v9115_v60, %v11247_v23  ;;  %v2073_v49 = vpop.f32.mrf.mxu0  ;;  %9416 = vmatprep.mubr.msk.f32.mxu1 %vm641_vm2, %v11664_v36  ;;  %v3521_v41 = vrot.slane %v11669_v4, 1  ;;  %15462 = vst [vmem:[#allocation49_spill] sm:$0xff] %v11696_v43  ;;  %v3524_v1 = vrot.slane %v11680_v20, 1  ;;  %v11701_v25 = vld [vmem:[%s11049_s14 + $0x130] sm:$0x3] }
 0x15e   : > { %v1801_v12 = vpop.f32.mrf.mxu1  ;;  %15463 = vst [vmem:[#allocation50_spill] sm:$0xff] %v11701_v25  ;;  %15466 = vst [vmem:[#allocation53_spill] sm:$0xff] %v11712_v31  ;;  %v3528_v4 = vrot.slane %v11709_v3, 1 }
 0x15f   : > { %15460 = vst [vmem:[#allocation47_spill] sm:$0xff] %v11686_v37  ;;  %v11703_v23 = vadd.f32 %v9165_v28, %v1889_v8  ;;  %v1888_v60 = vadd.f32 %v1801_v12, %v11256_v39  ;;  %v9168_v36 = vpop.f32.mrf.mxu0  ;;  %9467 = vmatmul.mubr.msk.f32.gmra.mxu0 %vm641_vm2, %v11616_v52  ;;  %v11724_v8 = vsel %vm558_vm1, %v3519_v47, %v3521_v41  ;;  %v11741_v47 = vld [vmem:[%s11049_s14 + $0x150] sm:$0xff]  ;;  %v11744_v41 = vld [vmem:[%s11049_s14 + $0x158] sm:$0xff] }
 0x160   : > { %v9118_v10 = vpop.f32.mrf.mxu1  ;;  %9417 = vmatmul.mubr.msk.f32.gmra.mxu1 %vm641_vm2, %v11692_v42  ;;  %9469 = vmatprep.mubr.msk.f32.mxu0 %vm641_vm2, %v11645_v13  ;;  %15468 = vst [vmem:[#allocation55_spill] sm:$0xff] %v11724_v8  ;;  %v11728_v42 = vsel %vm558_vm1, %v3523_v16, %v3524_v1  ;;  %15472 = vst [vmem:[#allocation59_spill] sm:$0xff] %v11741_v47 }
 0x161   : > { %15464 = vst [vmem:[#allocation51_spill] sm:$0xff] %v11703_v23  ;;  %v11718_v28 = vadd.f32 %v2073_v49, %v1888_v60  ;;  %v1891_v39 = vadd.f32 %v9118_v10, %v11261_v14  ;;  %v2083_v12 = vpop.f32.mrf.mxu0  ;;  %9419 = vmatprep.mubr.msk.f32.mxu1 %vm641_vm2, %v11696_v43  ;;  %v3526_v23 = vrot.slane %v11701_v25, 1  ;;  %15469 = vst [vmem:[#allocation56_spill] sm:$0xff] %v11728_v42  ;;  %v3529_v49 = vrot.slane %v11712_v31, 1  ;;  %v11733_v60 = vld [vmem:[%s11049_s14 + $0x148] sm:$0x3] }
 0x162   : > { %v1811_v37 = vpop.f32.mrf.mxu1  ;;  %15470 = vst [vmem:[#allocation57_spill] sm:$0xff] %v11733_v60  ;;  %15473 = vst [vmem:[#allocation60_spill] sm:$0xff] %v11744_v41  ;;  %v3533_v25 = vrot.slane %v11741_v47, 1 }
 0x163   : > { %15467 = vst [vmem:[#allocation54_spill] sm:$0xff] %v11718_v28  ;;  %v11735_v14 = vadd.f32 %v9168_v36, %v1891_v39  ;;  %v1890_v10 = vadd.f32 %v1811_v37, %v11270_v38  ;;  %v9171_v43 = vpop.f32.mrf.mxu0  ;;  %9470 = vmatmul.mubr.msk.f32.gmra.mxu0 %vm641_vm2, %v11648_v7  ;;  %v11756_v39 = vsel %vm558_vm1, %v3524_v1, %v3526_v23  ;;  %v11773_v1 = vld [vmem:[%s11049_s14 + $0x168] sm:$0xff]  ;;  %v11776_v23 = vld [vmem:[%s11049_s14 + $0x170] sm:$0xff] }
 0x164   : > { %v9121_v16 = vpop.f32.mrf.mxu1  ;;  %9420 = vmatmul.mubr.msk.f32.gmra.mxu1 %vm641_vm2, %v11724_v8  ;;  %9472 = vmatprep.mubr.msk.f32.mxu0 %vm641_vm2, %v11677_v17  ;;  %15475 = vst [vmem:[#allocation62_spill] sm:$0xff] %v11756_v39  ;;  %v11760_v8 = vsel %vm558_vm1, %v3528_v4, %v3529_v49  ;;  %15478 = vst [vmem:[#allocation65_spill] sm:$0xff] %v11773_v1 }
 0x165   : > { %15471 = vst [vmem:[#allocation58_spill] sm:$0xff] %v11735_v14  ;;  %v11750_v36 = vadd.f32 %v2083_v12, %v1890_v10  ;;  %v1893_v38 = vadd.f32 %v9121_v16, %v11275_v62  ;;  %v2093_v37 = vpop.f32.mrf.mxu0  ;;  %9422 = vmatprep.mubr.msk.f32.mxu1 %vm641_vm2, %v11728_v42  ;;  %v3531_v14 = vrot.slane %v11733_v60, 1  ;;  %15476 = vst [vmem:[#allocation63_spill] sm:$0xff] %v11760_v8  ;;  %v3534_v12 = vrot.slane %v11744_v41, 1  ;;  %v11765_v10 = vld [vmem:[%s11049_s14 + $0x160] sm:$0x3] }
 0x166   : > { %v1821_v28 = vpop.f32.mrf.mxu1  ;;  %15479 = vst [vmem:[#allocation66_spill] sm:$0xff] %v11776_v23 }
 0x167   : > { %15474 = vst [vmem:[#allocation61_spill] sm:$0xff] %v11750_v36  ;;  %v11767_v62 = vadd.f32 %v9171_v43, %v1893_v38  ;;  %v1892_v16 = vadd.f32 %v1821_v28, %v11286_v30  ;;  %v9174_v42 = vpop.f32.mrf.mxu0  ;;  %9473 = vmatmul.mubr.msk.f32.gmra.mxu0 %vm641_vm2, %v11680_v20  ;;  %v11788_v38 = vsel %vm558_vm1, %v3529_v49, %v3531_v14 }
 0x168   : > { %v9124_v4 = vpop.f32.mrf.mxu1  ;;  %9423 = vmatmul.mubr.msk.f32.gmra.mxu1 %vm641_vm2, %v11756_v39  ;;  %9475 = vmatprep.mubr.msk.f32.mxu0 %vm641_vm2, %v11709_v3  ;;  %15481 = vst [vmem:[#allocation68_spill] sm:$0xff] %v11788_v38  ;;  %v11792_v60 = vsel %vm558_vm1, %v3533_v25, %v3534_v12  ;;  %v3538_v39 = vrot.slane %v11773_v1, 1 }
 0x169   : > { %15477 = vst [vmem:[#allocation64_spill] sm:$0xff] %v11767_v62  ;;  %v11782_v43 = vadd.f32 %v2093_v37, %v1892_v16  ;;  %v1895_v30 = vadd.f32 %v9124_v4, %v11294_v45  ;;  %v2103_v28 = vpop.f32.mrf.mxu0  ;;  %9425 = vmatprep.mubr.msk.f32.mxu1 %vm641_vm2, %v11760_v8  ;;  %v3536_v62 = vrot.slane %v11765_v10, 1  ;;  %15482 = vst [vmem:[#allocation69_spill] sm:$0xff] %v11792_v60  ;;  %v3539_v37 = vrot.slane %v11776_v23, 1  ;;  %v11797_v16 = vld [vmem:[%s11049_s14 + $0x178] sm:$0x3] }
 0x16a   : > { %v1831_v36 = vpop.f32.mrf.mxu1 }
 0x16b   : > { %15480 = vst [vmem:[#allocation67_spill] sm:$0xff] %v11782_v43  ;;  %v11799_v45 = vadd.f32 %v9174_v42, %v1895_v30  ;;  %v1894_v4 = vadd.f32 %v1831_v36, %v11303_v18  ;;  %v9177_v8 = vpop.f32.mrf.mxu0  ;;  %9476 = vmatmul.mubr.msk.f32.gmra.mxu0 %vm641_vm2, %v11712_v31  ;;  %v11814_v18 = vsel %vm558_vm1, %v3534_v12, %v3536_v62  ;;  %v3541_v42 = vrot.slane %v11797_v16, 1 }
 0x16c   : > { %v9127_v49 = vpop.f32.mrf.mxu1  ;;  %9426 = vmatmul.mubr.msk.f32.gmra.mxu1 %vm641_vm2, %v11788_v38  ;;  %9478 = vmatprep.mubr.msk.f32.mxu0 %vm641_vm2, %v11741_v47  ;;  %15485 = vst [vmem:[#allocation72_spill] sm:$0xff] %v11814_v18  ;;  %v11818_v30 = vsel %vm558_vm1, %v3538_v39, %v3539_v37 }
 0x16d   : > { %15483 = vst [vmem:[#allocation70_spill] sm:$0xff] %v11799_v45  ;;  %v11808_v25 = vadd.f32 %v2103_v28, %v1894_v4  ;;  %v1897_v14 = vadd.f32 %v9127_v49, %v11312_v29  ;;  %v2113_v43 = vpop.f32.mrf.mxu0  ;;  %9428 = vmatprep.mubr.msk.f32.mxu1 %vm641_vm2, %v11792_v60  ;;  %15486 = vst [vmem:[#allocation73_spill] sm:$0xff] %v11818_v30  ;;  %v4134_v49 = vrot.slane %v11318_v55, 2  ;;  %v4155_v60 = vrot.slane %v11456_v9, 2 }
 0x16e   : > { %v1841_v36 = vpop.f32.mrf.mxu1 }
 0x16f   : > { %15484 = vst [vmem:[#allocation71_spill] sm:$0xff] %v11808_v25  ;;  %v11820_v38 = vadd.f32 %v9177_v8, %v1897_v14  ;;  %v1896_v28 = vadd.f32 %v1841_v36, %v11327_v40  ;;  %v9180_v4 = vpop.f32.mrf.mxu0  ;;  %9479 = vmatmul.mubr.msk.f32.gmra.mxu0 %vm641_vm2, %v11744_v41  ;;  %v11835_v40 = vsel %vm558_vm1, %v3539_v37, %v3541_v42  ;;  %v4135_v14 = vrot.slane %v11321_v34, 2 }
 0x170   : > { %v9130_v29 = vpop.f32.mrf.mxu1  ;;  %9429 = vmatmul.mubr.msk.f32.gmra.mxu1 %vm641_vm2, %v11814_v18  ;;  %9481 = vmatprep.mubr.msk.f32.mxu0 %vm641_vm2, %v11773_v1  ;;  %15489 = vst [vmem:[#allocation76_spill] sm:$0xff] %v11835_v40 }
 0x171   : > { %15487 = vst [vmem:[#allocation74_spill] sm:$0xff] %v11820_v38  ;;  %v11829_v12 = vadd.f32 %v2113_v43, %v1896_v28  ;;  %v1899_v39 = vadd.f32 %v9130_v29, %v11339_v54  ;;  %v2123_v62 = vpop.f32.mrf.mxu0  ;;  %9431 = vmatprep.mubr.msk.f32.mxu1 %vm641_vm2, %v11818_v30  ;;  %v4185_v38 = vrot.slane %v11648_v7, 2  ;;  %v4189_v7 = vrot.slane %v11677_v17, 2 }
 0x172   : > { %v1851_v8 = vpop.f32.mrf.mxu1 }
 0x173   : > { %15488 = vst [vmem:[#allocation75_spill] sm:$0xff] %v11829_v12  ;;  %v11839_v36 = vadd.f32 %v9180_v4, %v1899_v39  ;;  %v1898_v18 = vadd.f32 %v1851_v8, %v11352_v19  ;;  %v9183_v43 = vpop.f32.mrf.mxu0  ;;  %9482 = vmatmul.mubr.msk.f32.gmra.mxu0 %vm641_vm2, %v11776_v23  ;;  %v15492_v4 = vld [vmem:[#allocation42_spill] sm:$0xff]  ;;  %v4137_v19 = vrot.slane %v11337_v21, 2  ;;  %v11855_v39 = vsel %vm1227_vm3, %v4134_v49, %v4135_v14  ;;  %v11869_v21 = vld [vmem:[%s15032_s5 + $0x18] sm:$0xf] }
 0x174   : > { %v9133_v54 = vpop.f32.mrf.mxu1  ;;  %9432 = vmatmul.mubr.msk.f32.gmra.mxu1 %vm641_vm2, %v11835_v40  ;;  %9536 = vmatprep.mubr.msk.f32.mxu0 %vm641_vm2, %v11318_v55  ;;  %15493 = vst [vmem:[#allocation42_spill] sm:$0xff] %v11855_v39  ;;  %v4139_v8 = vrot.slane %v11344_v35, 2  ;;  %v4140_v40 = vrot.slane %v11347_v32, 2  ;;  %15495 = vst [vmem:[#allocation80_spill] sm:$0xff] %v11869_v21  ;;  %v4184_v12 = vrot.slane %v11645_v13, 2 }
 0x175   : > { %15490 = vst [vmem:[#allocation77_spill] sm:$0xff] %v11839_v36  ;;  %v11848_v37 = vadd.f32 %v2123_v62, %v1898_v18  ;;  %v1901_v42 = vadd.f32 %v9133_v54, %v11366_v2  ;;  %v2133_v28 = vpop.f32.mrf.mxu0  ;;  %9486 = vmatprep.mubr.msk.f32.mxu1 %vm641_vm2, %v15492_v4  ;;  %v4145_v54 = vrot.slane %v11375_v51, 2  ;;  %v15515_v36 = vld [vmem:[#allocation4_spill] sm:$0xff] }
 0x176   : > { %v1861_v29 = vpop.f32.mrf.mxu1 }
 0x177   : > { %15491 = vst [vmem:[#allocation78_spill] sm:$0xff] %v11848_v37  ;;  %v11859_v30 = vadd.f32 %v9183_v43, %v1901_v42  ;;  %v1900_v55 = vadd.f32 %v1861_v29, %v11390_v53  ;;  %v11862_v18 = vpop.f32.mrf.mxu0  ;;  %9537 = vmatmul.mubr.msk.f32.vlgmr.msra.gmra.mxu0 %vm641_vm2, %v11321_v34  ;;  %v11880_v53 = vld [vmem:[%s15032_s5 + $0x1c] sm:$0xf]  ;;  %v11899_v43 = vsel %vm1227_vm3, %v4139_v8, %v4140_v40  ;;  %v4150_v29 = vrot.slane %v11422_v27, 2 }
 0x178   : > { %v11871_v2 = vpop.f32.mrf.mxu1  ;;  %9487 = vmatmul.mubr.msk.f32.vlgmr.msra.gmra.mxu1 %vm641_vm2, %v11099_v15  ;;  %9635 = vmatpush3.msk.msra.mxu0 %vm706_vm0, %v11388_v50  ;;  %15496 = vst [vmem:[#allocation81_spill] sm:$0xff] %v11880_v53  ;;  %v11891_v15 = vsel %vm1227_vm3, %v4135_v14, %v4137_v19  ;;  %v4142_v50 = vrot.slane %v11364_v63, 2  ;;  %15499 = vst [vmem:[#allocation84_spill] sm:$0xff] %v11899_v43  ;;  %v4149_v19 = vrot.slane %v11419_v6, 2 }
 0x179   : > { %15494 = vst [vmem:[#allocation79_spill] sm:$0xff] %v11859_v30  ;;  %v11882_v62 = vadd.f32 %v2133_v28, %v1900_v55  ;;  %9585 = vmatpush3.msk.msra.mxu1 %vm706_vm0, %v11380_v61  ;;  %v11886_v34 = vpop.f32.mrf.mxu0  ;;  %9489 = vmatprep.mubr.msk.f32.mxu1 %vm641_vm2, %v11855_v39  ;;  %15498 = vst [vmem:[#allocation83_spill] sm:$0xff] %v11891_v15  ;;  %v4144_v61 = vrot.slane %v11372_v56, 2  ;;  %v4152_v55 = vrot.slane %v11445_v48, 2  ;;  %v4157_v48 = vrot.slane %v11477_v46, 2  ;;  %v15514_v30 = vld [vmem:[#allocation12_spill] sm:$0xff] }
 0x17a   : > { %v11894_v49 = vpop.f32.mrf.mxu1  ;;  %9539 = vmatprep.mubr.msk.f32.mxu0 %vm641_vm2, %v11344_v35  ;;  %9684 = vmatprep.subr.msk.mxu1 %vm706_vm0, %v11869_v21  ;;  %v11922_v14 = vsel %vm1227_vm3, %v4140_v40, %v4142_v50  ;;  %v15510_v21 = vld [vmem:[#allocation25_spill] sm:$0xff]  ;;  %v4177_v39 = vrot.slane %v15514_v30, 2 }
 0x17b   : > { %15497 = vst [vmem:[#allocation82_spill] sm:$0xff] %v11882_v62  ;;  %v11905_v42 = vpop.f32.mrf.mxu0  ;;  %9540 = vmatmul.mubr.msk.f32.gmra.mxu0 %vm641_vm2, %v11347_v32  ;;  %9734 = vmatprep.subr.msk.mxu0 %vm706_vm0, %v11880_v53  ;;  %15500 = vst [vmem:[#allocation85_spill] sm:$0xff] %v11922_v14  ;;  %v4147_v32 = vrot.slane %v11409_v58, 2  ;;  %v11928_v4 = vsel %vm1227_vm3, %v4144_v61, %v4145_v54  ;;  %v4154_v61 = vrot.slane %v11453_v57, 2  ;;  %v4167_v53 = vrot.slane %v15510_v21, 2 }
 0x17c   : > { %v11911_v63 = vpop.f32.mrf.mxu1  ;;  %9490 = vmatmul.mubr.msk.f32.gmra.mxu1 %vm641_vm2, %v11891_v15  ;;  %9542 = vmatprep.mubr.msk.f32.mxu0 %vm641_vm2, %v11372_v56  ;;  %15501 = vst [vmem:[#allocation86_spill] sm:$0xff] %v11928_v4  ;;  %v15512_v15 = vld [vmem:[#allocation23_spill] sm:$0xff]  ;;  %v4175_v21 = vrot.slane %v11584_v5, 2 }
 0x17d   : > { %v11917_v35 = vpop.f32.mrf.mxu0  ;;  %9492 = vmatprep.mubr.msk.f32.mxu1 %vm641_vm2, %v11899_v43  ;;  %v11947_v40 = vsel %vm1227_vm3, %v4145_v54, %v4147_v32  ;;  %v11973_v32 = vsel %vm1227_vm3, %v4150_v29, %v4152_v55  ;;  %v4165_v43 = vrot.slane %v11520_v26, 2  ;;  %v4172_v62 = vrot.slane %v15512_v15, 2 }
 0x17e   : > { %v11925_v28 = vpop.f32.mrf.mxu1  ;;  %15502 = vst [vmem:[#allocation87_spill] sm:$0xff] %v11947_v40  ;;  %15504 = vst [vmem:[#allocation89_spill] sm:$0xff] %v11973_v32  ;;  %v4180_v15 = vrot.slane %v11616_v52, 2 }
 0x17f   : > { %v11932_v56 = vpop.f32.mrf.mxu0  ;;  %9543 = vmatmul.mubr.msk.f32.gmra.mxu0 %vm641_vm2, %v11375_v51  ;;  %v11953_v51 = vsel %vm1227_vm3, %v4149_v19, %v4150_v29  ;;  %v11993_v29 = vsel %vm1227_vm3, %v4155_v60, %v4157_v48  ;;  %v4170_v48 = vrot.slane %v11552_v33, 2 }
 0x180   : > { %v11936_v8 = vpop.f32.mrf.mxu1  ;;  %9493 = vmatmul.mubr.msk.f32.gmra.mxu1 %vm641_vm2, %v11922_v14  ;;  %9545 = vmatprep.mubr.msk.f32.mxu0 %vm641_vm2, %v11419_v6  ;;  %15503 = vst [vmem:[#allocation88_spill] sm:$0xff] %v11953_v51  ;;  %v4160_v14 = vrot.slane %v11488_v44, 2  ;;  %15507 = vst [vmem:[#allocation92_spill] sm:$0xff] %v11993_v29 }
 0x181   : > { %v11942_v58 = vpop.f32.mrf.mxu0  ;;  %9495 = vmatprep.mubr.msk.f32.mxu1 %vm641_vm2, %v11928_v4 }
 0x182   : > { %v11950_v50 = vpop.f32.mrf.mxu1 }
 0x183   : > { %v11957_v6 = vpop.f32.mrf.mxu0  ;;  %9546 = vmatmul.mubr.msk.f32.gmra.mxu0 %vm641_vm2, %v11422_v27  ;;  %v11978_v27 = vsel %vm1227_vm3, %v4154_v61, %v4155_v60  ;;  %v15509_v61 = vld [vmem:[#allocation13_spill] sm:$0xff]  ;;  %v4169_v60 = vrot.slane %v11549_v24, 2 }
 0x184   : > { %v11961_v4 = vpop.f32.mrf.mxu1  ;;  %9496 = vmatmul.mubr.msk.f32.gmra.mxu1 %vm641_vm2, %v11947_v40  ;;  %9548 = vmatprep.mubr.msk.f32.mxu0 %vm641_vm2, %v11453_v57  ;;  %15505 = vst [vmem:[#allocation90_spill] sm:$0xff] %v11978_v27  ;;  %v4159_v40 = vrot.slane %v11485_v22, 2 }
 0x185   : > { %v11968_v54 = vpop.f32.mrf.mxu0  ;;  %9498 = vmatprep.mubr.msk.f32.mxu1 %vm641_vm2, %v11953_v51  ;;  %v4162_v51 = vrot.slane %v15509_v61, 2  ;;  %v4174_v61 = vrot.slane %v11581_v11, 2 }
 0x186   : > { %v11975_v19 = vpop.f32.mrf.mxu1 }
 0x187   : > { %v11982_v57 = vpop.f32.mrf.mxu0  ;;  %9549 = vmatmul.mubr.msk.f32.gmra.mxu0 %vm641_vm2, %v11456_v9  ;;  %v4164_v9 = vrot.slane %v11517_v0, 2  ;;  %v12034_v30 = vsel %vm1227_vm3, %v4160_v14, %v4162_v51  ;;  %v12062_v51 = vsel %vm1227_vm3, %v4175_v21, %v4177_v39  ;;  %v4194_v39 = vrot.slane %v11709_v3, 2 }
 0x188   : > { %15506 = vst [vmem:[#allocation91_spill] sm:$0xff] %v11982_v57  ;;  %v11986_v46 = vpop.f32.mrf.mxu1  ;;  %9499 = vmatmul.mubr.msk.f32.gmra.mxu1 %vm641_vm2, %v11973_v32  ;;  %9551 = vmatprep.mubr.msk.f32.mxu0 %vm641_vm2, %v11485_v22  ;;  %v12006_v22 = vsel %vm1227_vm3, %v4159_v40, %v4160_v14  ;;  %v4179_v40 = vrot.slane %v11613_v59, 2  ;;  %15517 = vst [vmem:[#allocation12_spill] sm:$0xff] %v12034_v30  ;;  %v12053_v14 = vsel %vm1227_vm3, %v4169_v60, %v4170_v48 }
 0x189   : > { %v11995_v55 = vpop.f32.mrf.mxu0  ;;  %9501 = vmatprep.mubr.msk.f32.mxu1 %vm641_vm2, %v11978_v27  ;;  %15511 = vst [vmem:[#allocation13_spill] sm:$0xff] %v12006_v22  ;;  %15525 = vst [vmem:[#allocation96_spill] sm:$0xff] %v12062_v51 }
 0x18a   : > { %15508 = vst [vmem:[#allocation93_spill] sm:$0xff] %v11995_v55  ;;  %v12003_v32 = vpop.f32.mrf.mxu1  ;;  %v15521_v55 = vld [vmem:[#allocation50_spill] sm:$0xff] }
 0x18b   : > { %v12011_v27 = vpop.f32.mrf.mxu0  ;;  %9552 = vmatmul.mubr.msk.f32.gmra.mxu0 %vm641_vm2, %v11488_v44  ;;  %v4182_v44 = vrot.slane %v15515_v36, 2  ;;  %v15520_v36 = vld [vmem:[#allocation39_spill] sm:$0xff]  ;;  %v4192_v57 = vrot.slane %v15521_v55, 2  ;;  %v12077_v55 = vsel %vm1227_vm3, %v4184_v12, %v4185_v38 }
 0x18c   : > { %15513 = vst [vmem:[#allocation25_spill] sm:$0xff] %v12011_v27  ;;  %v12019_v37 = vpop.f32.mrf.mxu1  ;;  %9502 = vmatmul.mubr.msk.f32.gmra.mxu1 %vm641_vm2, %v11993_v29  ;;  %9554 = vmatprep.mubr.msk.f32.mxu0 %vm641_vm2, %v11517_v0  ;;  %v12037_v29 = vsel %vm1227_vm3, %v4164_v9, %v4165_v43  ;;  %v12040_v0 = vsel %vm1227_vm3, %v4165_v43, %v4167_v53  ;;  %v4187_v27 = vrot.slane %v15520_v36, 2  ;;  %15522 = vst [vmem:[#allocation39_spill] sm:$0xff] %v12053_v14 }
 0x18d   : > { %v12029_v25 = vpop.f32.mrf.mxu0  ;;  %9504 = vmatprep.mubr.msk.f32.mxu1 %vm641_vm2, %v12006_v22  ;;  %15518 = vst [vmem:[#allocation4_spill] sm:$0xff] %v12037_v29  ;;  %15519 = vst [vmem:[#allocation94_spill] sm:$0xff] %v12040_v0  ;;  %v12056_v53 = vsel %vm1227_vm3, %v4170_v48, %v4172_v62  ;;  %v12059_v43 = vsel %vm1227_vm3, %v4174_v61, %v4175_v21  ;;  %v12074_v62 = vsel %vm1227_vm3, %v4180_v15, %v4182_v44 }
 0x18e   : > { %15516 = vst [vmem:[#allocation23_spill] sm:$0xff] %v12029_v25  ;;  %v12042_v45 = vpop.f32.mrf.mxu1  ;;  %v4190_v25 = vrot.slane %v11680_v20, 2  ;;  %15523 = vst [vmem:[#allocation50_spill] sm:$0xff] %v12056_v53  ;;  %v4195_v48 = vrot.slane %v11712_v31, 2  ;;  %v4199_v21 = vrot.slane %v11741_v47, 2  ;;  %v12090_v12 = vsel %vm1227_vm3, %v4185_v38, %v4187_v27  ;;  %v12100_v31 = vld [vmem:[%s11049_s14 + $0x180] sm:$0xff] }
 0x18f   : > { %v12048_v22 = vpop.f32.mrf.mxu0  ;;  %9555 = vmatmul.mubr.msk.f32.gmra.mxu0 %vm641_vm2, %v11520_v26  ;;  %15524 = vst [vmem:[#allocation95_spill] sm:$0xff] %v12059_v43  ;;  %v12071_v26 = vsel %vm1227_vm3, %v4179_v40, %v4180_v15  ;;  %15527 = vst [vmem:[#allocation98_spill] sm:$0xff] %v12074_v62  ;;  %v4200_v40 = vrot.slane %v11744_v41, 2  ;;  %v3410_v15 = vld [vmem:[%s11049_s14 + $0x190] sm:$0x3]  ;;  %v4204_v41 = vrot.slane %v11773_v1, 2 }
 0x190   : > { %v12064_v9 = vpop.f32.mrf.mxu1  ;;  %9505 = vmatmul.mubr.msk.f32.gmra.mxu1 %vm641_vm2, %v12034_v30  ;;  %9557 = vmatprep.mubr.msk.f32.mxu0 %vm641_vm2, %v11549_v24  ;;  %15526 = vst [vmem:[#allocation97_spill] sm:$0xff] %v12071_v26  ;;  %15528 = vst [vmem:[#allocation99_spill] sm:$0xff] %v12077_v55  ;;  %v15529_v24 = vld [vmem:[#allocation57_spill] sm:$0xff]  ;;  %v12093_v36 = vsel %vm1227_vm3, %v4189_v7, %v4190_v25  ;;  %v12096_v30 = vsel %vm1227_vm3, %v4190_v25, %v4192_v57  ;;  %v4205_v38 = vrot.slane %v11776_v23, 2  ;;  %v12111_v47 = vld [vmem:[%s11049_s14 + $0x188] sm:$0xff] }
 0x191   : > { %v12080_v60 = vpop.f32.mrf.mxu0  ;;  %9507 = vmatprep.mubr.msk.f32.mxu1 %vm641_vm2, %v12037_v29  ;;  %v4197_v61 = vrot.slane %v15529_v24, 2  ;;  %15530 = vst [vmem:[#allocation57_spill] sm:$0xff] %v12090_v12  ;;  %15531 = vst [vmem:[#allocation100_spill] sm:$0xff] %v12093_v36  ;;  %v4202_v29 = vrot.slane %v11765_v10, 2  ;;  %v4804_v27 = vrot.slane %v12100_v31, 1  ;;  %v4207_v7 = vrot.slane %v11797_v16, 2 }
 0x192   : > { %v2314_v44 = vpop.f32.mrf.mxu1  ;;  %15532 = vst [vmem:[#allocation101_spill] sm:$0xff] %v12096_v30  ;;  %15533 = vst [vmem:[#allocation102_spill] sm:$0xff] %v12100_v31  ;;  %v5075_v10 = vrot.slane %v12100_v31, 2  ;;  %v5076_v57 = vrot.slane %v12111_v47, 2  ;;  %v4807_v23 = vrot.slane %v3410_v15, 1  ;;  %v12125_v16 = vsel %vm1227_vm3, %v4194_v39, %v4195_v48  ;;  %v15538_v30 = vld [vmem:[#allocation21_spill] sm:$0xff] }
 0x193   : > { %v12102_v24 = vpop.f32.mrf.mxu0  ;;  %9558 = vmatmul.mubr.msk.f32.gmra.mxu0 %vm641_vm2, %v11552_v33  ;;  %15534 = vst [vmem:[#allocation103_spill] sm:$0xff] %v12111_v47  ;;  %v4805_v33 = vrot.slane %v12111_v47, 1  ;;  %15535 = vst [vmem:[#allocation104_spill] sm:$0xff] %v12125_v16  ;;  %v5078_v31 = vrot.slane %v3410_v15, 2  ;;  %v2414_v36 = vadd.f32 %v11871_v2, %v15538_v30  ;;  %v15539_v47 = vld [vmem:[#allocation24_spill] sm:$0xff]  ;;  %v15540_v12 = vld [vmem:[#allocation30_spill] sm:$0xff]  ;;  %v12140_v39 = vsel %vm1227_vm3, %v4200_v40, %v4202_v29 }
 0x194   : > { %v9209_v25 = vpop.f32.mrf.mxu1  ;;  %9508 = vmatmul.mubr.msk.f32.gmra.mxu1 %vm641_vm2, %v12040_v0  ;;  %9560 = vmatprep.mubr.msk.f32.mxu0 %vm641_vm2, %v11581_v11  ;;  %v12128_v0 = vsel %vm1227_vm3, %v4195_v48, %v4197_v61  ;;  %v12131_v11 = vsel %vm1227_vm3, %v4199_v21, %v4200_v40  ;;  %v2413_v3 = vadd.f32 %v11894_v49, %v15539_v47  ;;  %v15542_v16 = vld [vmem:[#allocation32_spill] sm:$0xff]  ;;  %v15543_v61 = vld [vmem:[#allocation5_spill] sm:$0xff]  ;;  %v15550_v29 = vld [vmem:[#allocation15_spill] sm:$0xff] }
 0x195   : > { %v12120_v1 = vpop.f32.mrf.mxu0  ;;  %9510 = vmatprep.mubr.msk.f32.mxu1 %vm641_vm2, %v12053_v14  ;;  %15536 = vst [vmem:[#allocation105_spill] sm:$0xff] %v12128_v0  ;;  %15537 = vst [vmem:[#allocation106_spill] sm:$0xff] %v12131_v11  ;;  %v2416_v20 = vadd.f32 %v11911_v63, %v15540_v12  ;;  %v2415_v48 = vadd.f32 %v11925_v28, %v15542_v16  ;;  %v2418_v21 = vadd.f32 %v11936_v8, %v15543_v61  ;;  %v15551_v40 = vld [vmem:[#allocation17_spill] sm:$0xff]  ;;  %v15561_v61 = vld [vmem:[#allocation38_spill] sm:$0xff] }
 0x196   : > { %v2324_v14 = vpop.f32.mrf.mxu1  ;;  %15541 = vst [vmem:[#allocation21_spill] sm:$0xff] %v12140_v39  ;;  %v12151_v47 = vsel %vm1227_vm3, %v4204_v41, %v4205_v38  ;;  %v12154_v2 = vsel %vm1227_vm3, %v4205_v38, %v4207_v7  ;;  %v12161_v63 = vsel %vm558_vm1, %v4804_v27, %v4805_v33  ;;  %v12164_v28 = vsel %vm1227_vm3, %v5075_v10, %v5076_v57  ;;  %v15549_v41 = vld [vmem:[#allocation7_spill] sm:$0xff] }
 0x197   : > { %v12146_v15 = vpop.f32.mrf.mxu0  ;;  %9561 = vmatmul.mubr.msk.f32.gmra.mxu0 %vm641_vm2, %v11584_v5  ;;  %15544 = vst [vmem:[#allocation24_spill] sm:$0xff] %v12151_v47  ;;  %15545 = vst [vmem:[#allocation30_spill] sm:$0xff] %v12154_v2  ;;  %v12167_v5 = vsel %vm558_vm1, %v4805_v33, %v4807_v23  ;;  %v2417_v8 = vadd.f32 %v11950_v50, %v15549_v41  ;;  %v2420_v30 = vadd.f32 %v11961_v4, %v15550_v29  ;;  %v15553_v4 = vld [vmem:[#allocation27_spill] sm:$0xff]  ;;  %v15554_v33 = vld [vmem:[#allocation8_spill] sm:$0xff] }
 0x198   : > { %v9212_v49 = vpop.f32.mrf.mxu1  ;;  %9511 = vmatmul.mubr.msk.f32.gmra.mxu1 %vm641_vm2, %v12056_v53  ;;  %9563 = vmatprep.mubr.msk.f32.mxu0 %vm641_vm2, %v11613_v59  ;;  %15546 = vst [vmem:[#allocation32_spill] sm:$0xff] %v12161_v63  ;;  %15547 = vst [vmem:[#allocation5_spill] sm:$0xff] %v12164_v28  ;;  %v2419_v12 = vadd.f32 %v11975_v19, %v15551_v40  ;;  %v12178_v59 = vsel %vm1227_vm3, %v5076_v57, %v5078_v31  ;;  %v15558_v57 = vld [vmem:[#allocation33_spill] sm:$0xff]  ;;  %v15591_v63 = vld [vmem:[#allocation70_spill] sm:$0xff] }
 0x199   : > { %15548 = vst [vmem:[#allocation107_spill] sm:$0xff] %v12167_v5  ;;  %v2602_v38 = vpop.f32.mrf.mxu0  ;;  %9513 = vmatprep.mubr.msk.f32.mxu1 %vm641_vm2, %v12059_v43  ;;  %15552 = vst [vmem:[#allocation7_spill] sm:$0xff] %v12178_v59  ;;  %v12181_v27 = vadd.f32 %v11862_v18, %v2414_v36  ;;  %v12184_v23 = vadd.f32 %v11886_v34, %v2413_v3  ;;  %v12187_v50 = vadd.f32 %v11905_v42, %v2416_v20  ;;  %v15555_v36 = vld [vmem:[#allocation19_spill] sm:$0xff]  ;;  %v15556_v20 = vld [vmem:[#allocation37_spill] sm:$0xff] }
 0x19a   : > { %v2422_v19 = vadd.f32 %v11986_v46, %v15553_v4  ;;  %v2334_v7 = vpop.f32.mrf.mxu1  ;;  %v12192_v10 = vadd.f32 %v11917_v35, %v2415_v48  ;;  %v12195_v31 = vadd.f32 %v11932_v56, %v2418_v21  ;;  %v2421_v18 = vadd.f32 %v12003_v32, %v15554_v33  ;;  %v15557_v46 = vld [vmem:[#allocation45_spill] sm:$0xff]  ;;  %v15559_v32 = vld [vmem:[#allocation40_spill] sm:$0xff]  ;;  %v15567_v33 = vld [vmem:[#allocation54_spill] sm:$0xff] }
 0x19b   : > { %v2424_v3 = vadd.f32 %v12019_v37, %v15555_v36  ;;  %v9265_v34 = vpop.f32.mrf.mxu0  ;;  %9564 = vmatmul.mubr.msk.f32.gmra.mxu0 %vm641_vm2, %v11616_v52  ;;  %v2423_v42 = vadd.f32 %v12042_v45, %v15556_v20  ;;  %v2426_v35 = vadd.f32 %v12064_v9, %v15557_v46  ;;  %v2425_v16 = vadd.f32 %v2314_v44, %v15558_v57  ;;  %v15562_v41 = vld [vmem:[#allocation41_spill] sm:$0xff]  ;;  %v15568_v20 = vld [vmem:[#allocation34_spill] sm:$0xff]  ;;  %v12263_v57 = vld [vmem:[%s12216_s13 + $0x8] sm:$0xff] }
 0x19c   : > { %v9215_v56 = vpop.f32.mrf.mxu1  ;;  %9514 = vmatmul.mubr.msk.f32.gmra.mxu1 %vm641_vm2, %v12062_v51  ;;  %9566 = vmatprep.mubr.msk.f32.mxu0 %vm641_vm2, %v11645_v13  ;;  %v12219_v52 = vadd.f32 %v11942_v58, %v2417_v8  ;;  %v12222_v45 = vadd.f32 %v11957_v6, %v2420_v30  ;;  %v12225_v37 = vadd.f32 %v11968_v54, %v2419_v12  ;;  %v15560_v13 = vld [vmem:[#allocation91_spill] sm:$0xff]  ;;  %v15564_v54 = vld [vmem:[#allocation93_spill] sm:$0xff] }
 0x19d   : > { %v2428_v9 = vadd.f32 %v9209_v25, %v15559_v32  ;;  %v2612_v44 = vpop.f32.mrf.mxu0  ;;  %9516 = vmatprep.mubr.msk.f32.mxu1 %vm641_vm2, %v12071_v26  ;;  %v12231_v48 = vadd.f32 %v15560_v13, %v2422_v19  ;;  %v2427_v21 = vadd.f32 %v2324_v14, %v15561_v61  ;;  %v2430_v58 = vadd.f32 %v9212_v49, %v15562_v41  ;;  %v15563_v8 = vld [vmem:[#allocation47_spill] sm:$0xff]  ;;  %v15565_v25 = vld [vmem:[#allocation25_spill] sm:$0xff]  ;;  %v3412_v26 = vld [vmem:[%s11049_s14 + $0x1a0] sm:$0xff] }
 0x19e   : > { %v2429_v6 = vadd.f32 %v2334_v7, %v15563_v8  ;;  %v2344_v29 = vpop.f32.mrf.mxu1  ;;  %v12237_v30 = vadd.f32 %v15564_v54, %v2421_v18  ;;  %v12240_v40 = vadd.f32 %v15565_v25, %v2424_v3  ;;  %v15566_v12 = vld [vmem:[#allocation51_spill] sm:$0xff]  ;;  %v12250_v7 = vadd.f32 %v12048_v22, %v2426_v35  ;;  %v12260_v3 = vld [vmem:[%s12216_s13] sm:$0xff]  ;;  %v15577_v41 = vld [vmem:[#allocation61_spill] sm:$0xff] }
 0x19f   : > { %v2432_v4 = vadd.f32 %v9215_v56, %v15566_v12  ;;  %v2431_v19 = vadd.f32 %v2344_v29, %v15567_v33  ;;  %v9268_v36 = vpop.f32.mrf.mxu0  ;;  %9567 = vmatmul.mubr.msk.f32.gmra.mxu0 %vm641_vm2, %v15568_v20  ;;  %v15569_v14 = vld [vmem:[#allocation23_spill] sm:$0xff]  ;;  %v12253_v18 = vadd.f32 %v12080_v60, %v2425_v16  ;;  %v15571_v56 = vld [vmem:[#allocation58_spill] sm:$0xff]  ;;  %v6347_v35 = vrot.slane %v12260_v3, 7  ;;  %v15583_v33 = vld [vmem:[#allocation64_spill] sm:$0xff] }
 0x1a0   : > { %v12247_v49 = vadd.f32 %v15569_v14, %v2423_v42  ;;  %v9218_v46 = vpop.f32.mrf.mxu1  ;;  %9517 = vmatmul.mubr.msk.f32.gmra.mxu1 %vm641_vm2, %v12074_v62  ;;  %9569 = vmatprep.mubr.msk.f32.mxu0 %vm641_vm2, %v11677_v17  ;;  %v12266_v42 = vadd.f32 %v12102_v24, %v2428_v9  ;;  %v6348_v16 = vrot.slane %v12263_v57, 7  ;;  %v12274_v17 = vadd.f32 %v12120_v1, %v2427_v21  ;;  %v15578_v54 = vld [vmem:[#allocation46_spill] sm:$0xff]  ;;  %v12289_v1 = vld [vmem:[%s12216_s13 + $0x18] sm:$0xff]  ;;  %v15584_v20 = vld [vmem:[#allocation100_spill] sm:$0xff] }
 0x1a1   : > { %v2434_v22 = vadd.f32 %v9218_v46, %v15571_v56  ;;  %v2622_v60 = vpop.f32.mrf.mxu0  ;;  %9519 = vmatprep.mubr.msk.f32.mxu1 %vm641_vm2, %v12077_v55  ;;  %v12277_v32 = vadd.f32 %v12146_v15, %v2430_v58  ;;  %v12279_v24 = vadd.f32 %v2602_v38, %v2429_v6  ;;  %v12281_v13 = vadd.f32 %v9265_v34, %v2432_v4  ;;  %v12292_v15 = vld [vmem:[%s12216_s13 + $0x20] sm:$0xff]  ;;  %v15580_v34 = vld [vmem:[#allocation57_spill] sm:$0xff]  ;;  %v12302_v6 = vld [vmem:[%s12216_s13 + $0x28] sm:$0x3] }
 0x1a2   : > { %15570 = vst [vmem:[#allocation15_spill] sm:$0xff] %v12266_v42  ;;  %15572 = vst [vmem:[#allocation17_spill] sm:$0xff] %v12274_v17  ;;  %v2354_v9 = vpop.f32.mrf.mxu1  ;;  %v12283_v61 = vadd.f32 %v2612_v44, %v2431_v19  ;;  %v6349_v38 = vsel %vm6346_vm4, %v6347_v35, %v6348_v16  ;;  %v15581_v44 = vld [vmem:[#allocation52_spill] sm:$0xff]  ;;  %v12305_v25 = vmax.f32 %v12289_v1, %v6347_v35  ;;  %v12317_v46 = vrot.slane %v12289_v1, 7  ;;  %v12419_v62 = vld [vmem:[%s12216_s13 + $0x40] sm:$0x3] }
 0x1a3   : > { %15573 = vst [vmem:[#allocation27_spill] sm:$0xff] %v12277_v32  ;;  %15574 = vst [vmem:[#allocation8_spill] sm:$0xff] %v12279_v24  ;;  %v2433_v8 = vadd.f32 %v2354_v9, %v15577_v41  ;;  %v9271_v29 = vpop.f32.mrf.mxu0  ;;  %9570 = vmatmul.mubr.msk.f32.gmra.mxu0 %vm641_vm2, %v15578_v54  ;;  %v12295_v21 = vadd.f32 %v9268_v36, %v2434_v22  ;;  %v6444_v12 = vmax.f32 %v12292_v15, %v6349_v38  ;;  %v12314_v14 = vld [vmem:[%s12216_s13 + $0x10] sm:$0x3]  ;;  %v15586_v54 = vld [vmem:[#allocation67_spill] sm:$0xff] }
 0x1a4   : > { %15575 = vst [vmem:[#allocation19_spill] sm:$0xff] %v12281_v13  ;;  %15576 = vst [vmem:[#allocation37_spill] sm:$0xff] %v12283_v61  ;;  %v9221_v58 = vpop.f32.mrf.mxu1  ;;  %9520 = vmatmul.mubr.msk.f32.gmra.mxu1 %vm641_vm2, %v15580_v34  ;;  %9572 = vmatprep.mubr.msk.f32.mxu0 %vm641_vm2, %v15581_v44  ;;  %v12320_v56 = vrot.slane %v12292_v15, 7  ;;  %v6555_v41 = vrot.slane %v12260_v3, 1  ;;  %v15587_v44 = vld [vmem:[#allocation53_spill] sm:$0xff]  ;;  %v15243_v59 = vrot.slane %v12314_v14, 1 }
 0x1a5   : > { %15579 = vst [vmem:[#allocation45_spill] sm:$0xff] %v12295_v21  ;;  %v12308_v4 = vadd.f32 %v2622_v60, %v2433_v8  ;;  %v2436_v19 = vadd.f32 %v9221_v58, %v15583_v33  ;;  %v2632_v36 = vpop.f32.mrf.mxu0  ;;  %9522 = vmatprep.mubr.msk.f32.mxu1 %vm641_vm2, %v15584_v20  ;;  %v12323_v60 = vmax.f32 %v12302_v6, %v6348_v16  ;;  %v12337_v33 = vld [vmem:[%s12216_s13 + $0x30] sm:$0xff]  ;;  %v12340_v16 = vld [vmem:[%s12216_s13 + $0x38] sm:$0xff]  ;;  %v15601_v32 = vld [vmem:[#allocation66_spill] sm:$0xff] }
 0x1a6   : > { %v2364_v22 = vpop.f32.mrf.mxu1  ;;  %v12328_v9 = vmax.f32 %v6444_v12, %v12263_v57  ;;  %v12345_v35 = vsel %vm6346_vm4, %v12317_v46, %v12320_v56  ;;  %v6556_v12 = vrot.slane %v12263_v57, 1  ;;  %v15595_v34 = vld [vmem:[#allocation60_spill] sm:$0xff]  ;;  %v6566_v13 = vrot.slane %v12340_v16, 1  ;;  %v15605_v17 = vld [vmem:[#allocation77_spill] sm:$0xff] }
 0x1a7   : > { %15582 = vst [vmem:[#allocation33_spill] sm:$0xff] %v12308_v4  ;;  %v12331_v8 = vadd.f32 %v9271_v29, %v2436_v19  ;;  %v2435_v38 = vadd.f32 %v2364_v22, %v15586_v54  ;;  %v9274_v58 = vpop.f32.mrf.mxu0  ;;  %9573 = vmatmul.mubr.msk.f32.gmra.mxu0 %vm641_vm2, %v15587_v44  ;;  %v15588_v29 = vld [vmem:[#allocation101_spill] sm:$0xff]  ;;  %v15589_v19 = vld [vmem:[#allocation59_spill] sm:$0xff]  ;;  %v6446_v22 = vmax.f32 %v12337_v33, %v12317_v46  ;;  %v12368_v4 = vrot.slane %v12340_v16, 7  ;;  %v12391_v61 = vld [vmem:[%s12216_s13 + $0x50] sm:$0xff] }
 0x1a8   : > { %v9224_v5 = vpop.f32.mrf.mxu1  ;;  %9523 = vmatmul.mubr.msk.f32.gmra.mxu1 %vm641_vm2, %v15588_v29  ;;  %9575 = vmatprep.mubr.msk.f32.mxu0 %vm641_vm2, %v15589_v19  ;;  %v6447_v54 = vmax.f32 %v12340_v16, %v12345_v35  ;;  %v15592_v29 = vld [vmem:[#allocation104_spill] sm:$0xff]  ;;  %v12365_v19 = vrot.slane %v12337_v33, 7 }
 0x1a9   : > { %15585 = vst [vmem:[#allocation40_spill] sm:$0xff] %v12331_v8  ;;  %v12359_v57 = vadd.f32 %v2632_v36, %v2435_v38  ;;  %v2438_v28 = vadd.f32 %v9224_v5, %v15591_v63  ;;  %v2642_v8 = vpop.f32.mrf.mxu0  ;;  %9525 = vmatprep.mubr.msk.f32.mxu1 %vm641_vm2, %v15592_v29  ;;  %v12371_v44 = vmax.f32 %v6446_v22, %v12289_v1  ;;  %v12388_v22 = vld [vmem:[%s12216_s13 + $0x48] sm:$0xff] }
 0x1aa   : > { %v2374_v21 = vpop.f32.mrf.mxu1  ;;  %v12374_v36 = vmax.f32 %v6447_v54, %v12292_v15  ;;  %v6557_v38 = vsel %vm558_vm1, %v6555_v41, %v6556_v12  ;;  %v12380_v63 = vsel %vm558_vm1, %v6556_v12, %v15243_v59  ;;  %v12396_v41 = vsel %vm6346_vm4, %v12365_v19, %v12368_v4 }
 0x1ab   : > { %15590 = vst [vmem:[#allocation91_spill] sm:$0xff] %v12359_v57  ;;  %v12382_v5 = vadd.f32 %v9274_v58, %v2438_v28  ;;  %v15594_v57 = vld [vmem:[#allocation71_spill] sm:$0xff]  ;;  %v9277_v20 = vpop.f32.mrf.mxu0  ;;  %9576 = vmatmul.mubr.msk.f32.gmra.mxu0 %vm641_vm2, %v15595_v34  ;;  %v6560_v12 = vrot.slane %v12289_v1, 1  ;;  %v6449_v34 = vmax.f32 %v12388_v22, %v12365_v19  ;;  %v6450_v58 = vmax.f32 %v12391_v61, %v12396_v41  ;;  %v15598_v1 = vld [vmem:[#allocation74_spill] sm:$0xff] }
 0x1ac   : > { %v2437_v29 = vadd.f32 %v2374_v21, %v15594_v57  ;;  %v9227_v28 = vpop.f32.mrf.mxu1  ;;  %9526 = vmatmul.mubr.msk.f32.gmra.mxu1 %vm641_vm2, %v12128_v0  ;;  %v15596_v21 = vld [vmem:[#allocation65_spill] sm:$0xff]  ;;  %v6561_v54 = vrot.slane %v12292_v15, 1  ;;  %v12409_v57 = vrot.slane %v12302_v6, 1 }
 0x1ad   : > { %15593 = vst [vmem:[#allocation38_spill] sm:$0xff] %v12382_v5  ;;  %9578 = vmatprep.mubr.msk.f32.mxu0 %vm641_vm2, %v15596_v21  ;;  %v2440_v5 = vadd.f32 %v9227_v28, %v15598_v1  ;;  %v2652_v0 = vpop.f32.mrf.mxu0  ;;  %9528 = vmatprep.mubr.msk.f32.mxu1 %vm641_vm2, %v12131_v11  ;;  %v6565_v21 = vrot.slane %v12337_v33, 1  ;;  %v12422_v15 = vmax.f32 %v6449_v34, %v12337_v33  ;;  %v12438_v34 = vld [vmem:[%s11049_s14 + $0x198] sm:$0xff] }
 0x1ae   : > { %v12411_v59 = vadd.f32 %v2642_v8, %v2437_v29  ;;  %v2384_v55 = vpop.f32.mrf.mxu1  ;;  %v12425_v8 = vmax.f32 %v6450_v58, %v12340_v16  ;;  %v6562_v29 = vsel %vm558_vm1, %v6560_v12, %v6561_v54  ;;  %v12430_v28 = vsel %vm558_vm1, %v6561_v54, %v12409_v57  ;;  %15602 = vst [vmem:[#allocation93_spill] sm:$0xff] %v12438_v34 }
 0x1af   : > { %v12432_v1 = vadd.f32 %v9277_v20, %v2440_v5  ;;  %v9280_v24 = vpop.f32.mrf.mxu0  ;;  %9579 = vmatmul.mubr.msk.f32.gmra.mxu0 %vm641_vm2, %v15601_v32  ;;  %v12442_v58 = vsel %vm558_vm1, %v6565_v21, %v6566_v13  ;;  %v12445_v12 = vrot.slane %v12419_v62, 1  ;;  %v15603_v20 = vld [vmem:[#allocation102_spill] sm:$0xff]  ;;  %v3413_v32 = vld [vmem:[%s11049_s14 + $0x1a8] sm:$0x3]  ;;  %v15604_v5 = vmax.f32 %v12305_v25, %v12260_v3 }
 0x1b0   : > { %15597 = vst [vmem:[#allocation41_spill] sm:$0xff] %v12411_v59  ;;  %v15600_v59 = vld [vmem:[#allocation75_spill] sm:$0xff]  ;;  %v9230_v51 = vpop.f32.mrf.mxu1  ;;  %9529 = vmatmul.mubr.msk.f32.gmra.mxu1 %vm641_vm2, %v12140_v39  ;;  %9581 = vmatprep.mubr.msk.f32.mxu0 %vm641_vm2, %v15603_v20  ;;  %v6684_v21 = vmax.f32 %v12328_v9, %v12380_v63  ;;  %v5618_v20 = vrot.slane %v3413_v32, 1  ;;  %v15607_v25 = vrot.slane %v12314_v14, 1 }
 0x1b1   : > { %15599 = vst [vmem:[#allocation47_spill] sm:$0xff] %v12432_v1  ;;  %v2439_v11 = vadd.f32 %v2384_v55, %v15600_v59  ;;  %v5615_v55 = vrot.slane %v12438_v34, 1  ;;  %v5616_v59 = vrot.slane %v3412_v26, 1  ;;  %v6683_v54 = vmax.f32 %v15604_v5, %v6557_v38  ;;  %v2662_v42 = vpop.f32.mrf.mxu0  ;;  %9531 = vmatprep.mubr.msk.f32.mxu1 %vm641_vm2, %v12151_v47  ;;  %v15609_v38 = vld [vmem:[#allocation78_spill] sm:$0xff]  ;;  %v15610_v32 = vld [vmem:[#allocation103_spill] sm:$0xff] }
 0x1b2   : > { %v2442_v39 = vadd.f32 %v9230_v51, %v15605_v17  ;;  %v12466_v26 = vsel %vm558_vm1, %v6566_v13, %v12445_v12  ;;  %v2394_v43 = vpop.f32.mrf.mxu1  ;;  %v6686_v51 = vmax.f32 %v12371_v44, %v6562_v29  ;;  %v6687_v17 = vmax.f32 %v12374_v36, %v12430_v28  ;;  %v15615_v5 = vld [vmem:[#allocation79_spill] sm:$0xff] }
 0x1b3   : > { %v12459_v1 = vadd.f32 %v2652_v0, %v2439_v11  ;;  %v12469_v3 = vsel %vm558_vm1, %v5615_v55, %v5616_v59  ;;  %v15608_v0 = vmax.f32 %v12323_v60, %v12314_v14  ;;  %v2441_v13 = vadd.f32 %v2394_v43, %v15609_v38  ;;  %v9283_v63 = vpop.f32.mrf.mxu0  ;;  %9582 = vmatmul.mubr.msk.f32.gmra.mxu0 %vm641_vm2, %v15610_v32  ;;  %v15625_v14 = vld [vmem:[#allocation80_spill] sm:$0xff] }
 0x1b4   : > { %15606 = vst [vmem:[#allocation25_spill] sm:$0xff] %v12469_v3  ;;  %v12479_v9 = vadd.f32 %v9280_v24, %v2442_v39  ;;  %v12492_v60 = vsel %vm558_vm1, %v5616_v59, %v5618_v20  ;;  %v9233_v44 = vpop.f32.mrf.mxu1  ;;  %9532 = vmatmul.mubr.msk.f32.gmra.mxu1 %vm641_vm2, %v12154_v2  ;;  %v15613_v39 = vld [vmem:[#allocation42_spill] sm:$0xff]  ;;  %v6739_v36 = vmax.f32 %v6683_v54, %v12317_v46  ;;  %v12504_v55 = vrot.slane %v12388_v22, 7  ;;  %v15626_v24 = vld [vmem:[#allocation16_spill] sm:$0xff] }
 0x1b5   : > { %v6685_v11 = vmax.f32 %v15608_v0, %v15607_v25  ;;  %15612 = vst [vmem:[#allocation51_spill] sm:$0xff] %v12492_v60  ;;  %9636 = vmatprep.mubr.msk.f32.mxu0 %vm641_vm2, %v15613_v39  ;;  %v12506_v59 = vadd.f32 %v2662_v42, %v2441_v13  ;;  %v2444_v20 = vadd.f32 %v9233_v44, %v15615_v5  ;;  %v2672_v25 = vpop.f32.mrf.mxu0  ;;  %v15616_v0 = vld [vmem:[#allocation43_spill] sm:$0xff]  ;;  %v12520_v13 = vrot.slane %v12391_v61, 7  ;;  %v15618_v5 = vld [vmem:[#allocation82_spill] sm:$0xff]  ;;  %v15628_v60 = vld [vmem:[#allocation85_spill] sm:$0xff] }
 0x1b6   : > { %9586 = vmatprep.mubr.msk.f32.mxu1 %vm641_vm2, %v15616_v0  ;;  %v6740_v38 = vmax.f32 %v6684_v21, %v12345_v35  ;;  %v12513_v32 = vmax.f32 %v6686_v51, %v12365_v19  ;;  %v2404_v39 = vpop.f32.mrf.mxu1  ;;  %v12516_v46 = vmax.f32 %v6687_v17, %v12396_v41  ;;  %v6796_v54 = vmax.f32 %v6739_v36, %v6562_v29  ;;  %v15619_v21 = vld [vmem:[#allocation83_spill] sm:$0xff]  ;;  %v12536_v29 = vld [vmem:[%s15032_s5 + $0x20] sm:$0xf]  ;;  %v15622_v36 = vld [vmem:[#allocation81_spill] sm:$0xff] }
 0x1b7   : > { %15614 = vst [vmem:[#allocation54_spill] sm:$0xff] %v12506_v59  ;;  %v6741_v42 = vmax.f32 %v6685_v11, %v12320_v56  ;;  %v12522_v44 = vadd.f32 %v9283_v63, %v2444_v20  ;;  %v2443_v0 = vadd.f32 %v2404_v39, %v15618_v5  ;;  %v9338_v35 = vpop.f32.mrf.mxu0  ;;  %9637 = vmatmul.mubr.msk.f32.vlgmr.msra.gmra.mxu0 %vm641_vm2, %v15619_v21  ;;  %15620 = vst [vmem:[#allocation23_spill] sm:$0xff] %v12536_v29  ;;  %v15621_v63 = vld [vmem:[#allocation44_spill] sm:$0xff]  ;;  %v12548_v20 = vld [vmem:[%s15034_s7] sm:$0xf] }
 0x1b8   : > { %v6797_v11 = vmax.f32 %v6740_v38, %v12430_v28  ;;  %v9288_v17 = vpop.f32.mrf.mxu1  ;;  %9587 = vmatmul.mubr.msk.f32.vlgmr.msra.gmra.mxu1 %vm641_vm2, %v15621_v63  ;;  %9735 = vmatpush3.msk.msra.mxu0 %vm706_vm0, %v15622_v36  ;;  %15623 = vst [vmem:[#allocation58_spill] sm:$0xff] %v12548_v20  ;;  %v6852_v38 = vmax.f32 %v6796_v54, %v12365_v19  ;;  %v12555_v5 = vld [vmem:[%s12216_s13 + $0x60] sm:$0xff]  ;;  %v6570_v21 = vrot.slane %v12388_v22, 1  ;;  %v12567_v54 = vld [vmem:[%s12216_s13 + $0x58] sm:$0x3]  ;;  %v6571_v28 = vrot.slane %v12391_v61, 1 }
 0x1b9   : > { %15617 = vst [vmem:[#allocation34_spill] sm:$0xff] %v12522_v44  ;;  %v6798_v39 = vmax.f32 %v6741_v42, %v12409_v57  ;;  %v12558_v63 = vadd.f32 %v2672_v25, %v2443_v0  ;;  %v2954_v36 = vadd.f32 %v9288_v17, %v12181_v27  ;;  %9685 = vmatpush3.msk.msra.mxu1 %vm706_vm0, %v15625_v14  ;;  %v3065_v51 = vpop.f32.mrf.mxu0  ;;  %v12570_v42 = vld [vmem:[%s12216_s13 + $0x68] sm:$0xff]  ;;  %v12576_v27 = vld [vmem:[%s15031_s4] ss:$0 sm:$0xff]  ;;  %v15627_v0 = vld [vmem:[#allocation84_spill] sm:$0xff]  ;;  %v12590_v17 = vrot.slane %v12567_v54, 1 }
 0x1ba   : > { %9589 = vmatprep.mubr.msk.f32.mxu1 %vm641_vm2, %v15626_v24  ;;  %v6853_v19 = vmax.f32 %v6797_v11, %v12396_v41  ;;  %v2794_v25 = vpop.f32.mrf.mxu1  ;;  %9639 = vmatprep.mubr.msk.f32.mxu0 %vm641_vm2, %v15627_v0  ;;  %v6900_v41 = vmax.f32 %v6852_v38, %v12337_v33  ;;  %v12587_v11 = vsel %vm6346_vm4, %v12504_v55, %v12520_v13  ;;  %v12602_v38 = vrot.slane %v12555_v5, 7  ;;  %v15629_v3 = vld [vmem:[#allocation26_spill] sm:$0xff]  ;;  %v15632_v44 = vld [vmem:[#allocation87_spill] sm:$0xff] }
 0x1bb   : > { %15624 = vst [vmem:[#allocation61_spill] sm:$0xff] %v12558_v63  ;;  %9784 = vmatprep.subr.msk.mxu1 %vm706_vm0, %v12536_v29  ;;  %v6854_v14 = vmax.f32 %v6798_v39, %v12368_v4  ;;  %v3225_v43 = vadd.f32 %v9338_v35, %v2954_v36  ;;  %v2953_v34 = vadd.f32 %v2794_v25, %v12184_v23  ;;  %v9341_v0 = vpop.f32.mrf.mxu0  ;;  %v15630_v35 = vld [vmem:[#allocation86_spill] sm:$0xff] }
 0x1bc   : > { %9640 = vmatmul.mubr.msk.f32.gmra.mxu0 %vm641_vm2, %v15628_v60  ;;  %9834 = vmatprep.subr.msk.mxu0 %vm706_vm0, %v12548_v20  ;;  %v6901_v33 = vmax.f32 %v6853_v19, %v12340_v16  ;;  %v9291_v39 = vpop.f32.mrf.mxu1  ;;  %v6957_v23 = vmax.f32 %v6900_v41, %v12442_v58  ;;  %v6452_v25 = vmax.f32 %v12555_v5, %v12504_v55  ;;  %v12613_v60 = vrot.slane %v12570_v42, 7  ;;  %v15633_v24 = vld [vmem:[#allocation2_spill] sm:$0xff] }
 0x1bd   : > { %9590 = vmatmul.mubr.msk.f32.gmra.mxu1 %vm641_vm2, %v15629_v3  ;;  %9642 = vmatprep.mubr.msk.f32.mxu0 %vm641_vm2, %v15630_v35  ;;  %v6902_v36 = vmax.f32 %v6854_v14, %v12419_v62  ;;  %v3264_v16 = vadd.f32 %v12576_v27, %v3225_v43  ;;  %v3224_v19 = vadd.f32 %v3065_v51, %v2953_v34  ;;  %v3075_v20 = vpop.f32.mrf.mxu0  ;;  %v15631_v3 = vld [vmem:[#allocation28_spill] sm:$0xff] }
 0x1be   : > { %v2956_v29 = vadd.f32 %v9291_v39, %v12187_v50  ;;  %9592 = vmatprep.mubr.msk.f32.mxu1 %vm641_vm2, %v15631_v3  ;;  %v6958_v35 = vmax.f32 %v6901_v33, %v12466_v26  ;;  %v2804_v41 = vpop.f32.mrf.mxu1  ;;  %v7053_v14 = vrot.slane %v6957_v23, 1  ;;  %v6453_v34 = vmax.f32 %v12570_v42, %v12587_v11 }
 0x1bf   : > { %v6959_v63 = vmax.f32 %v6902_v36, %v12445_v12  ;;  %v12630_v50 = vmax.f32 %v6452_v25, %v12388_v22  ;;  %v3296_v43 = vmax.f32 %v3264_v16, 0.0  ;;  %v3263_v51 = vadd.f32 %v12576_v27, %v3224_v19  ;;  %v9344_v3 = vpop.f32.mrf.mxu0  ;;  %v15634_v36 = vld [vmem:[#allocation88_spill] sm:$0xff] }
 0x1c0   : > { %v3227_v33 = vadd.f32 %v9341_v0, %v2956_v29  ;;  %v2955_v39 = vadd.f32 %v2804_v41, %v12192_v10  ;;  %9643 = vmatmul.mubr.msk.f32.gmra.mxu0 %vm641_vm2, %v15632_v44  ;;  %v9294_v23 = vpop.f32.mrf.mxu1  ;;  %v7054_v59 = vrot.slane %v6958_v35, 1  ;;  %v12641_v16 = vmax.f32 %v6453_v34, %v12391_v61 }
 0x1c1   : > { %9593 = vmatmul.mubr.msk.f32.gmra.mxu1 %vm641_vm2, %v15633_v24  ;;  %9645 = vmatprep.mubr.msk.f32.mxu0 %vm641_vm2, %v15634_v36  ;;  %v7056_v25 = vrot.slane %v6959_v63, 1  ;;  %v12644_v29 = vsel %vm558_vm1, %v6570_v21, %v6571_v28  ;;  %3329 = vst.msk [vmem:[%s12624_s25 + $0x8] sm:$0xff] %vm3327_vm5, %v3296_v43  ;;  %v3295_v10 = vmax.f32 %v3263_v51, 0.0  ;;  %v2958_v41 = vadd.f32 %v9294_v23, %v12195_v31  ;;  %v3085_v44 = vpop.f32.mrf.mxu0  ;;  %v15635_v24 = vld [vmem:[#allocation3_spill] sm:$0xff]  ;;  %v15639_v23 = vld [vmem:[#allocation9_spill] sm:$0xff]  ;;  %v15670_v36 = vld [vmem:[#allocation6_spill] sm:$0xff] }
 0x1c2   : > { %v3266_v0 = vadd.f32 %v12576_v27, %v3227_v33  ;;  %v3226_v19 = vadd.f32 %v3075_v20, %v2955_v39  ;;  %9595 = vmatprep.mubr.msk.f32.mxu1 %vm641_vm2, %v15635_v24  ;;  %v2814_v35 = vpop.f32.mrf.mxu1  ;;  %v12653_v63 = vsel %vm558_vm1, %v7053_v14, %v7054_v59  ;;  %v12660_v21 = vsel %vm558_vm1, %v6571_v28, %v12590_v17  ;;  %v15638_v39 = vld [vmem:[#allocation89_spill] sm:$0xff]  ;;  %v15640_v28 = vld [vmem:[#allocation90_spill] sm:$0xff] }
 0x1c3   : > { %15636 = vst [vmem:[#allocation46_spill] sm:$0xff] %v12653_v63  ;;  %v12656_v34 = vsel %vm558_vm1, %v7054_v59, %v7056_v25  ;;  %3328 = vst.msk [vmem:[%s12624_s25] sm:$0xff] %vm3327_vm5, %v3295_v10  ;;  %v3229_v51 = vadd.f32 %v9344_v3, %v2958_v41  ;;  %v2957_v14 = vadd.f32 %v2814_v35, %v12219_v52  ;;  %v9347_v33 = vpop.f32.mrf.mxu0  ;;  %v15692_v63 = vld [vmem:[#allocation101_spill] sm:$0xff] }
 0x1c4   : > { %15637 = vst [vmem:[#allocation52_spill] sm:$0xff] %v12656_v34  ;;  %v3298_v31 = vmax.f32 %v3266_v0, 0.0  ;;  %v3265_v43 = vadd.f32 %v12576_v27, %v3226_v19  ;;  %9646 = vmatmul.mubr.msk.f32.gmra.mxu0 %vm641_vm2, %v15638_v39  ;;  %v9297_v59 = vpop.f32.mrf.mxu1  ;;  %v15641_v3 = vmax.f32 %v12422_v15, %v12442_v58  ;;  %v15642_v10 = vmax.f32 %v12425_v8, %v12466_v26  ;;  %v15646_v19 = vld [vmem:[#allocation92_spill] sm:$0xff]  ;;  %v15666_v39 = vld [vmem:[#allocation14_spill] sm:$0xff]  ;;  %v15671_v34 = vld [vmem:[#allocation97_spill] sm:$0xff] }
 0x1c5   : > { %9596 = vmatmul.mubr.msk.f32.gmra.mxu1 %vm641_vm2, %v15639_v23  ;;  %9648 = vmatprep.mubr.msk.f32.mxu0 %vm641_vm2, %v15640_v28  ;;  %v3268_v35 = vadd.f32 %v12576_v27, %v3229_v51  ;;  %v3228_v25 = vadd.f32 %v3085_v44, %v2957_v14  ;;  %v2960_v20 = vadd.f32 %v9297_v59, %v12222_v45  ;;  %v3095_v15 = vpop.f32.mrf.mxu0  ;;  %v15643_v28 = vld [vmem:[#allocation11_spill] sm:$0xff] }
 0x1c6   : > { %v12680_v52 = vmax.f32 %v15641_v3, %v12504_v55  ;;  %v12686_v0 = vmax.f32 %v15642_v10, %v12587_v11  ;;  %3331 = vst.msk [vmem:[%s12624_s25 + $0x18] sm:$0xff] %vm3327_vm5, %v3298_v31  ;;  %v3297_v41 = vmax.f32 %v3265_v43, 0.0  ;;  %9598 = vmatprep.mubr.msk.f32.mxu1 %vm641_vm2, %v15643_v28  ;;  %v2824_v3 = vpop.f32.mrf.mxu1  ;;  %v15644_v31 = vmax.f32 %v12513_v32, %v12442_v58 }
 0x1c7   : > { %v15645_v45 = vmax.f32 %v12516_v46, %v12466_v26  ;;  %v3300_v51 = vmax.f32 %v3268_v35, 0.0  ;;  %v3267_v14 = vadd.f32 %v12576_v27, %v3228_v25  ;;  %v3231_v59 = vadd.f32 %v9347_v33, %v2960_v20  ;;  %v9350_v10 = vpop.f32.mrf.mxu0  ;;  %v15648_v26 = vld [vmem:[#allocation13_spill] sm:$0xff] }
 0x1c8   : > { %v6855_v43 = vmax.f32 %v15644_v31, %v12504_v55  ;;  %3330 = vst.msk [vmem:[%s12624_s25 + $0x10] sm:$0xff] %vm3327_vm5, %v3297_v41  ;;  %v2959_v8 = vadd.f32 %v2824_v3, %v12225_v37  ;;  %9649 = vmatmul.mubr.msk.f32.gmra.mxu0 %vm641_vm2, %v15646_v19  ;;  %v9300_v58 = vpop.f32.mrf.mxu1  ;;  %v15647_v55 = vld [vmem:[#allocation20_spill] sm:$0xff]  ;;  %v6448_v37 = vmax.f32 %v12419_v62, %v12320_v56  ;;  %v15649_v3 = vld [vmem:[#allocation22_spill] sm:$0xff] }
 0x1c9   : > { %v6856_v44 = vmax.f32 %v15645_v45, %v12587_v11  ;;  %9599 = vmatmul.mubr.msk.f32.gmra.mxu1 %vm641_vm2, %v15647_v55  ;;  %9651 = vmatprep.mubr.msk.f32.mxu0 %vm641_vm2, %v15648_v26  ;;  %3333 = vst.msk [vmem:[%s12624_s25 + $0x28] sm:$0xff] %vm3327_vm5, %v3300_v51  ;;  %v3299_v20 = vmax.f32 %v3267_v14, 0.0  ;;  %v3270_v33 = vadd.f32 %v12576_v27, %v3231_v59  ;;  %v3105_v35 = vpop.f32.mrf.mxu0  ;;  %v15650_v14 = vld [vmem:[#allocation12_spill] sm:$0xff]  ;;  %v12748_v59 = vld [vmem:[%s12216_s13 + $0x80] sm:$0xff]  ;;  %v15653_v11 = vld [vmem:[#allocation29_spill] sm:$0xff] }
 0x1ca   : > { %v6903_v32 = vmax.f32 %v6855_v43, %v12388_v22  ;;  %v3230_v25 = vadd.f32 %v3095_v15, %v2959_v8  ;;  %v2962_v41 = vadd.f32 %v9300_v58, %v12231_v48  ;;  %9601 = vmatprep.mubr.msk.f32.mxu1 %vm641_vm2, %v15649_v3  ;;  %v2834_v22 = vpop.f32.mrf.mxu1  ;;  %v6496_v43 = vmax.f32 %v6448_v37, %v12302_v6  ;;  %v15651_v58 = vld [vmem:[#allocation18_spill] sm:$0xff] }
 0x1cb   : > { %v6904_v46 = vmax.f32 %v6856_v44, %v12391_v61  ;;  %v12729_v61 = vld [vmem:[%s12216_s13 + $0x78] sm:$0xff]  ;;  %v12739_v15 = vsel %vm6346_vm4, %v12602_v38, %v12613_v60  ;;  %3332 = vst.msk [vmem:[%s12624_s25 + $0x20] sm:$0xff] %vm3327_vm5, %v3299_v20  ;;  %v3302_v48 = vmax.f32 %v3270_v33, 0.0  ;;  %v2961_v44 = vadd.f32 %v2834_v22, %v12237_v30  ;;  %v9353_v51 = vpop.f32.mrf.mxu0 }
 0x1cc   : > { %v6960_v56 = vmax.f32 %v6903_v32, %v12644_v29  ;;  %v3269_v8 = vadd.f32 %v12576_v27, %v3230_v25  ;;  %v3233_v45 = vadd.f32 %v9350_v10, %v2962_v41  ;;  %9652 = vmatmul.mubr.msk.f32.gmra.mxu0 %vm641_vm2, %v15650_v14  ;;  %v9303_v6 = vpop.f32.mrf.mxu1  ;;  %v15652_v32 = vld [vmem:[#allocation4_spill] sm:$0xff]  ;;  %v6688_v10 = vmax.f32 %v6496_v43, %v12409_v57  ;;  %v15660_v14 = vld [vmem:[#allocation31_spill] sm:$0xff] }
 0x1cd   : > { %v12733_v31 = vmax.f32 %v6904_v46, %v12660_v21  ;;  %9602 = vmatmul.mubr.msk.f32.gmra.mxu1 %vm641_vm2, %v15651_v58  ;;  %9654 = vmatprep.mubr.msk.f32.mxu0 %vm641_vm2, %v15652_v32  ;;  %v6455_v30 = vmax.f32 %v12729_v61, %v12602_v38  ;;  %3335 = vst.msk [vmem:[%s12624_s25 + $0x38] sm:$0xff] %vm3327_vm5, %v3302_v48  ;;  %v3115_v22 = vpop.f32.mrf.mxu0  ;;  %v15656_v32 = vld [vmem:[#allocation10_spill] sm:$0xff] }
 0x1ce   : > { %v7058_v46 = vrot.slane %v6960_v56, 1  ;;  %v3301_v20 = vmax.f32 %v3269_v8, 0.0  ;;  %v3272_v33 = vadd.f32 %v12576_v27, %v3233_v45  ;;  %v3232_v25 = vadd.f32 %v3105_v35, %v2961_v44  ;;  %9604 = vmatprep.mubr.msk.f32.mxu1 %vm641_vm2, %v15653_v11  ;;  %v2844_v56 = vpop.f32.mrf.mxu1 }
 0x1cf   : > { %v15263_v37 = vrot.slane %v12733_v31, 1  ;;  %v2964_v41 = vadd.f32 %v9303_v6, %v12240_v40  ;;  %v6744_v43 = vmax.f32 %v6688_v10, %v12368_v4  ;;  %v6456_v48 = vmax.f32 %v12748_v59, %v12739_v15  ;;  %v9356_v6 = vpop.f32.mrf.mxu0  ;;  %v12782_v10 = vld [vmem:[%s12216_s13 + $0x70] sm:$0x3] }
 0x1d0   : > { %v12773_v35 = vmax.f32 %v6455_v30, %v12555_v5  ;;  %3334 = vst.msk [vmem:[%s12624_s25 + $0x30] sm:$0xff] %vm3327_vm5, %v3301_v20  ;;  %v3304_v40 = vmax.f32 %v3272_v33, 0.0  ;;  %v3271_v8 = vadd.f32 %v12576_v27, %v3232_v25  ;;  %v2963_v44 = vadd.f32 %v2844_v56, %v12247_v49  ;;  %v15657_v30 = vld [vmem:[#allocation39_spill] sm:$0xff] }
 0x1d1   : > { %v12767_v57 = vsel %vm558_vm1, %v7058_v46, %v15263_v37  ;;  %v3235_v45 = vadd.f32 %v9353_v51, %v2964_v41  ;;  %v15655_v46 = vld [vmem:[#allocation94_spill] sm:$0xff]  ;;  %v9306_v37 = vpop.f32.mrf.mxu1  ;;  %9605 = vmatmul.mubr.msk.f32.gmra.mxu1 %vm641_vm2, %v15656_v32  ;;  %v6801_v20 = vmax.f32 %v6744_v43, %v12445_v12  ;;  %v12790_v51 = vmax.f32 %v6456_v48, %v12570_v42  ;;  %v3125_v48 = vpop.f32.mrf.mxu0 }
 0x1d2   : > { %15654 = vst [vmem:[#allocation64_spill] sm:$0xff] %v12767_v57  ;;  %9655 = vmatmul.mubr.msk.f32.gmra.mxu0 %vm641_vm2, %v15655_v46  ;;  %v15658_v49 = vrot.slane %v12570_v42, 1  ;;  %v15659_v33 = vrot.slane %v12555_v5, 1  ;;  %v12800_v41 = vrot.slane %v12782_v10, 1  ;;  %3337 = vst.msk [vmem:[%s12624_s25 + $0x48] sm:$0xff] %vm3327_vm5, %v3304_v40  ;;  %v3303_v56 = vmax.f32 %v3271_v8, 0.0  ;;  %9607 = vmatprep.mubr.msk.f32.mxu1 %vm641_vm2, %v15660_v14 }
 0x1d3   : > { %9657 = vmatprep.mubr.msk.f32.mxu0 %vm641_vm2, %v15657_v30  ;;  %v3274_v30 = vadd.f32 %v12576_v27, %v3235_v45  ;;  %v3234_v43 = vadd.f32 %v3115_v22, %v2963_v44  ;;  %v2966_v46 = vadd.f32 %v9306_v37, %v12250_v7  ;;  %v2854_v26 = vpop.f32.mrf.mxu1  ;;  %v6857_v19 = vmax.f32 %v6801_v20, %v12520_v13  ;;  %v9359_v20 = vpop.f32.mrf.mxu0  ;;  %v15662_v40 = vld [vmem:[#allocation35_spill] sm:$0xff]  ;;  %v15669_v57 = vld [vmem:[#allocation96_spill] sm:$0xff] }
 0x1d4   : > { %v12797_v25 = vsel %vm558_vm1, %v15659_v33, %v15658_v49  ;;  %v12813_v33 = vsel %vm558_vm1, %v15658_v49, %v12800_v41  ;;  %v15661_v7 = vmax.f32 %v12630_v50, %v12644_v29  ;;  %3336 = vst.msk [vmem:[%s12624_s25 + $0x40] sm:$0xff] %vm3327_vm5, %v3303_v56  ;;  %v2965_v44 = vadd.f32 %v2854_v26, %v12253_v18  ;;  %v15663_v50 = vld [vmem:[#allocation95_spill] sm:$0xff] }
 0x1d5   : > { %v3306_v22 = vmax.f32 %v3274_v30, 0.0  ;;  %v3273_v8 = vadd.f32 %v12576_v27, %v3234_v43  ;;  %v3237_v45 = vadd.f32 %v9356_v6, %v2966_v46  ;;  %v9309_v49 = vpop.f32.mrf.mxu1  ;;  %9608 = vmatmul.mubr.msk.f32.gmra.mxu1 %vm641_vm2, %v15662_v40  ;;  %v15664_v18 = vmax.f32 %v12641_v16, %v12660_v21 }
 0x1d6   : > { %v12821_v37 = vmax.f32 %v15661_v7, %v12602_v38  ;;  %9658 = vmatmul.mubr.msk.f32.gmra.mxu0 %vm641_vm2, %v12056_v53  ;;  %v6905_v7 = vmax.f32 %v6857_v19, %v12567_v54  ;;  %v12843_v6 = vrot.slane %v12729_v61, 7  ;;  %v3236_v43 = vadd.f32 %v3125_v48, %v2965_v44  ;;  %v15665_v19 = vld [vmem:[#allocation15_spill] sm:$0xff]  ;;  %v3135_v53 = vpop.f32.mrf.mxu0  ;;  %9610 = vmatprep.mubr.msk.f32.mxu1 %vm641_vm2, %v15666_v39 }
 0x1d7   : > { %9660 = vmatprep.mubr.msk.f32.mxu0 %vm641_vm2, %v15663_v50  ;;  %v12840_v26 = vmax.f32 %v15664_v18, %v12739_v15  ;;  %3339 = vst.msk [vmem:[%s12624_s25 + $0x58] sm:$0xff] %vm3327_vm5, %v3306_v22  ;;  %v3305_v46 = vmax.f32 %v3273_v8, 0.0  ;;  %v3276_v56 = vadd.f32 %v12576_v27, %v3237_v45  ;;  %v2968_v50 = vadd.f32 %v9309_v49, %v15665_v19  ;;  %v2864_v30 = vpop.f32.mrf.mxu1  ;;  %v15668_v49 = vld [vmem:[#allocation17_spill] sm:$0xff] }
 0x1d8   : > { %v6962_v16 = vmax.f32 %v6905_v7, %v12590_v17  ;;  %v15667_v22 = vmax.f32 %v12680_v52, %v12644_v29  ;;  %v3275_v45 = vadd.f32 %v12576_v27, %v3236_v43  ;;  %v2967_v7 = vadd.f32 %v2864_v30, %v15668_v49  ;;  %v9362_v19 = vpop.f32.mrf.mxu0  ;;  %v15673_v43 = vld [vmem:[#allocation27_spill] sm:$0xff]  ;;  %v15674_v49 = vld [vmem:[#allocation36_spill] sm:$0xff] }
 0x1d9   : > { %3338 = vst.msk [vmem:[%s12624_s25 + $0x50] sm:$0xff] %vm3327_vm5, %v3305_v46  ;;  %v3308_v8 = vmax.f32 %v3276_v56, 0.0  ;;  %v3239_v44 = vadd.f32 %v9359_v20, %v2968_v50  ;;  %v9312_v18 = vpop.f32.mrf.mxu1  ;;  %9611 = vmatmul.mubr.msk.f32.gmra.mxu1 %vm641_vm2, %v15670_v36  ;;  %v15672_v29 = vmax.f32 %v12686_v0, %v12660_v21  ;;  %v6451_v50 = vmax.f32 %v12567_v54, %v12368_v4 }
 0x1da   : > { %v6858_v48 = vmax.f32 %v15667_v22, %v12602_v38  ;;  %9661 = vmatmul.mubr.msk.f32.gmra.mxu0 %vm641_vm2, %v15669_v57  ;;  %v7061_v38 = vrot.slane %v6962_v16, 1  ;;  %v3307_v30 = vmax.f32 %v3275_v45, 0.0  ;;  %v3238_v56 = vadd.f32 %v3135_v53, %v2967_v7  ;;  %v3145_v22 = vpop.f32.mrf.mxu0  ;;  %9613 = vmatprep.mubr.msk.f32.mxu1 %vm641_vm2, %v15674_v49  ;;  %v15677_v45 = vld [vmem:[#allocation8_spill] sm:$0xff] }
 0x1db   : > { %9663 = vmatprep.mubr.msk.f32.mxu0 %vm641_vm2, %v15671_v34  ;;  %v6859_v52 = vmax.f32 %v15672_v29, %v12739_v15  ;;  %3341 = vst.msk [vmem:[%s12624_s25 + $0x68] sm:$0xff] %vm3327_vm5, %v3308_v8  ;;  %v3278_v46 = vadd.f32 %v12576_v27, %v3239_v44  ;;  %v2970_v16 = vadd.f32 %v9312_v18, %v15673_v43  ;;  %v2874_v21 = vpop.f32.mrf.mxu1  ;;  %v15675_v0 = vrot.slane %v12733_v31, 1  ;;  %v15678_v31 = vld [vmem:[#allocation98_spill] sm:$0xff]  ;;  %v15679_v29 = vld [vmem:[#allocation48_spill] sm:$0xff]  ;;  %v15681_v43 = vld [vmem:[#allocation19_spill] sm:$0xff] }
 0x1dc   : > { %v6906_v20 = vmax.f32 %v6858_v48, %v12555_v5  ;;  %v6499_v48 = vmax.f32 %v6451_v50, %v12419_v62  ;;  %3340 = vst.msk [vmem:[%s12624_s25 + $0x60] sm:$0xff] %vm3327_vm5, %v3307_v30  ;;  %v3277_v18 = vadd.f32 %v12576_v27, %v3238_v56  ;;  %v2969_v44 = vadd.f32 %v2874_v21, %v15677_v45  ;;  %v9365_v7 = vpop.f32.mrf.mxu0  ;;  %v15680_v62 = vld [vmem:[#allocation99_spill] sm:$0xff] }
 0x1dd   : > { %v12886_v5 = vsel %vm558_vm1, %v15675_v0, %v7061_v38  ;;  %v6907_v4 = vmax.f32 %v6859_v52, %v12570_v42  ;;  %v3310_v53 = vmax.f32 %v3278_v46, 0.0  ;;  %v3241_v8 = vadd.f32 %v9362_v19, %v2970_v16  ;;  %v12898_v38 = vld [vmem:[%s12216_s13 + $0x90] sm:$0xff]  ;;  %v9315_v42 = vpop.f32.mrf.mxu1  ;;  %9614 = vmatmul.mubr.msk.f32.gmra.mxu1 %vm641_vm2, %v15679_v29  ;;  %v15682_v0 = vld [vmem:[#allocation49_spill] sm:$0xff] }
 0x1de   : > { %15676 = vst [vmem:[#allocation67_spill] sm:$0xff] %v12886_v5  ;;  %v6963_v15 = vmax.f32 %v6906_v20, %v12797_v25  ;;  %9664 = vmatmul.mubr.msk.f32.gmra.mxu0 %vm641_vm2, %v15678_v31  ;;  %v6691_v20 = vmax.f32 %v6499_v48, %v12445_v12  ;;  %v12909_v50 = vrot.slane %v12748_v59, 7  ;;  %v3309_v30 = vmax.f32 %v3277_v18, 0.0  ;;  %v3155_v21 = vpop.f32.mrf.mxu0  ;;  %9616 = vmatprep.mubr.msk.f32.mxu1 %vm641_vm2, %v15682_v0  ;;  %v15684_v12 = vld [vmem:[#allocation57_spill] sm:$0xff]  ;;  %v15686_v31 = vld [vmem:[#allocation100_spill] sm:$0xff] }
 0x1df   : > { %9666 = vmatprep.mubr.msk.f32.mxu0 %vm641_vm2, %v15680_v62  ;;  %v12905_v52 = vmax.f32 %v6907_v4, %v12813_v33  ;;  %3343 = vst.msk [vmem:[%s12624_s25 + $0x78] sm:$0xff] %vm3327_vm5, %v3310_v53  ;;  %v3280_v46 = vadd.f32 %v12576_v27, %v3241_v8  ;;  %v3240_v56 = vadd.f32 %v3145_v22, %v2969_v44  ;;  %v12918_v4 = vld [vmem:[%s12216_s13 + $0x98] sm:$0xff]  ;;  %v15685_v62 = vld [vmem:[#allocation55_spill] sm:$0xff] }
 0x1e0   : > { %v7063_v19 = vrot.slane %v6963_v15, 1  ;;  %v2972_v16 = vadd.f32 %v9315_v42, %v15681_v43  ;;  %v2884_v15 = vpop.f32.mrf.mxu1  ;;  %v6747_v48 = vmax.f32 %v6691_v20, %v12520_v13  ;;  %v12925_v53 = vsel %vm6346_vm4, %v12843_v6, %v12909_v50  ;;  %3342 = vst.msk [vmem:[%s12624_s25 + $0x70] sm:$0xff] %vm3327_vm5, %v3309_v30  ;;  %v15683_v44 = vld [vmem:[#allocation37_spill] sm:$0xff]  ;;  %v9368_v43 = vpop.f32.mrf.mxu0 }
 0x1e1   : > { %v6458_v22 = vmax.f32 %v12898_v38, %v12843_v6  ;;  %v3312_v18 = vmax.f32 %v3280_v46, 0.0  ;;  %v3279_v8 = vadd.f32 %v12576_v27, %v3240_v56  ;;  %v2971_v42 = vadd.f32 %v2884_v15, %v15683_v44  ;;  %9617 = vmatmul.mubr.msk.f32.gmra.mxu1 %vm641_vm2, %v15685_v62 }
 0x1e2   : > { %v3243_v45 = vadd.f32 %v9365_v7, %v2972_v16  ;;  %9667 = vmatmul.mubr.msk.f32.gmra.mxu0 %vm641_vm2, %v15684_v12  ;;  %v9318_v20 = vpop.f32.mrf.mxu1  ;;  %v15687_v34 = vrot.slane %v12905_v52, 1  ;;  %v6804_v7 = vmax.f32 %v6747_v48, %v12590_v17  ;;  %v6459_v46 = vmax.f32 %v12918_v4, %v12925_v53  ;;  %v3165_v57 = vpop.f32.mrf.mxu0 }
 0x1e3   : > { %9669 = vmatprep.mubr.msk.f32.mxu0 %vm641_vm2, %v15686_v31  ;;  %v6580_v56 = vrot.slane %v12729_v61, 1  ;;  %3345 = vst.msk [vmem:[%s12624_s25 + $0x88] sm:$0xff] %vm3327_vm5, %v3312_v18  ;;  %v3311_v16 = vmax.f32 %v3279_v8, 0.0  ;;  %v3242_v44 = vadd.f32 %v3155_v21, %v2971_v42  ;;  %v15689_v31 = vld [vmem:[#allocation45_spill] sm:$0xff]  ;;  %v6581_v18 = vrot.slane %v12748_v59, 1 }
 0x1e4   : > { %v12942_v30 = vsel %vm558_vm1, %v7063_v19, %v15687_v34  ;;  %v3282_v15 = vadd.f32 %v12576_v27, %v3243_v45  ;;  %v2974_v12 = vadd.f32 %v9318_v20, %v15689_v31  ;;  %v15690_v34 = vld [vmem:[#allocation56_spill] sm:$0xff]  ;;  %v2894_v19 = vpop.f32.mrf.mxu1  ;;  %v6860_v48 = vmax.f32 %v6804_v7, %v12613_v60  ;;  %v15691_v45 = vld [vmem:[#allocation33_spill] sm:$0xff]  ;;  %v9371_v20 = vpop.f32.mrf.mxu0 }
 0x1e5   : > { %15688 = vst [vmem:[#allocation53_spill] sm:$0xff] %v12942_v30  ;;  %9619 = vmatprep.mubr.msk.f32.mxu1 %vm641_vm2, %v15690_v34  ;;  %v12956_v30 = vmax.f32 %v6458_v22, %v12729_v61  ;;  %v12959_v5 = vmax.f32 %v6459_v46, %v12748_v59  ;;  %3344 = vst.msk [vmem:[%s12624_s25 + $0x80] sm:$0xff] %vm3327_vm5, %v3311_v16  ;;  %v3281_v31 = vadd.f32 %v12576_v27, %v3242_v44  ;;  %v12969_v22 = vld [vmem:[%s12216_s13 + $0x88] sm:$0x3]  ;;  %v15693_v46 = vld [vmem:[#allocation62_spill] sm:$0xff] }
 0x1e6   : > { %v3314_v21 = vmax.f32 %v3282_v15, 0.0  ;;  %v3245_v8 = vadd.f32 %v9368_v43, %v2974_v12  ;;  %v2973_v42 = vadd.f32 %v2894_v19, %v15691_v45  ;;  %9670 = vmatmul.mubr.msk.f32.gmra.mxu0 %vm641_vm2, %v15692_v63  ;;  %v9321_v7 = vpop.f32.mrf.mxu1  ;;  %9620 = vmatmul.mubr.msk.f32.gmra.mxu1 %vm641_vm2, %v15693_v46  ;;  %v15694_v34 = vld [vmem:[#allocation104_spill] sm:$0xff]  ;;  %v6908_v16 = vmax.f32 %v6860_v48, %v12782_v10  ;;  %v3175_v46 = vpop.f32.mrf.mxu0 }
 0x1e7   : > { %9672 = vmatprep.mubr.msk.f32.mxu0 %vm641_vm2, %v15694_v34  ;;  %v12977_v12 = vsel %vm558_vm1, %v6580_v56, %v6581_v18  ;;  %v12980_v43 = vrot.slane %v12969_v22, 1  ;;  %v15695_v15 = vmax.f32 %v12773_v35, %v12797_v25  ;;  %v3313_v19 = vmax.f32 %v3281_v31, 0.0  ;;  %v15696_v48 = vld [vmem:[#allocation40_spill] sm:$0xff]  ;;  %v15697_v56 = vld [vmem:[#allocation63_spill] sm:$0xff] }
 0x1e8   : > { %3347 = vst.msk [vmem:[%s12624_s25 + $0x98] sm:$0xff] %vm3327_vm5, %v3314_v21  ;;  %v3284_v45 = vadd.f32 %v12576_v27, %v3245_v8  ;;  %v3244_v34 = vadd.f32 %v3165_v57, %v2973_v42  ;;  %v2976_v63 = vadd.f32 %v9321_v7, %v15696_v48  ;;  %9622 = vmatprep.mubr.msk.f32.mxu1 %vm641_vm2, %v15697_v56  ;;  %v2904_v62 = vpop.f32.mrf.mxu1  ;;  %v15700_v48 = vld [vmem:[#allocation105_spill] sm:$0xff]  ;;  %v15701_v56 = vld [vmem:[#allocation68_spill] sm:$0xff] }
 0x1e9   : > { %v12986_v44 = vmax.f32 %v15695_v15, %v12843_v6  ;;  %v6965_v0 = vmax.f32 %v6908_v16, %v12800_v41  ;;  %v12997_v35 = vsel %vm558_vm1, %v6581_v18, %v12980_v43  ;;  %v15698_v57 = vmax.f32 %v12790_v51, %v12813_v33  ;;  %3346 = vst.msk [vmem:[%s12624_s25 + $0x90] sm:$0xff] %vm3327_vm5, %v3313_v19  ;;  %v15699_v16 = vld [vmem:[#allocation91_spill] sm:$0xff]  ;;  %v9374_v18 = vpop.f32.mrf.mxu0  ;;  %v15702_v51 = vld [vmem:[#allocation106_spill] sm:$0xff] }
 0x1ea   : > { %v3316_v8 = vmax.f32 %v3284_v45, 0.0  ;;  %v3283_v42 = vadd.f32 %v12576_v27, %v3244_v34  ;;  %v3247_v7 = vadd.f32 %v9371_v20, %v2976_v63  ;;  %v2975_v15 = vadd.f32 %v2904_v62, %v15699_v16  ;;  %9673 = vmatmul.mubr.msk.f32.gmra.mxu0 %vm641_vm2, %v15700_v48  ;;  %v9324_v21 = vpop.f32.mrf.mxu1  ;;  %9623 = vmatmul.mubr.msk.f32.gmra.mxu1 %vm641_vm2, %v15701_v56  ;;  %v15703_v16 = vld [vmem:[#allocation38_spill] sm:$0xff] }
 0x1eb   : > { %v13005_v31 = vmax.f32 %v15698_v57, %v12925_v53  ;;  %9675 = vmatprep.mubr.msk.f32.mxu0 %vm641_vm2, %v15702_v51  ;;  %v7066_v57 = vrot.slane %v6965_v0, 1  ;;  %v2978_v48 = vadd.f32 %v9324_v21, %v15703_v16  ;;  %v3185_v51 = vpop.f32.mrf.mxu0  ;;  %v15704_v0 = vld [vmem:[#allocation69_spill] sm:$0xff]  ;;  %v15705_v19 = vrot.slane %v12905_v52, 1 }
 0x1ec   : > { %3349 = vst.msk [vmem:[%s12624_s25 + $0xa8] sm:$0xff] %vm3327_vm5, %v3316_v8  ;;  %v3315_v34 = vmax.f32 %v3283_v42, 0.0  ;;  %v3286_v20 = vadd.f32 %v12576_v27, %v3247_v7  ;;  %v3246_v45 = vadd.f32 %v3175_v46, %v2975_v15  ;;  %9625 = vmatprep.mubr.msk.f32.mxu1 %vm641_vm2, %v15704_v0  ;;  %v2914_v56 = vpop.f32.mrf.mxu1  ;;  %v15707_v8 = vmax.f32 %v12821_v37, %v12797_v25  ;;  %v15710_v25 = vld [vmem:[#allocation21_spill] sm:$0xff] }
 0x1ed   : > { %v13032_v63 = vsel %vm558_vm1, %v15705_v19, %v7066_v57  ;;  %v15708_v46 = vmax.f32 %v12840_v26, %v12813_v33  ;;  %v6454_v7 = vmax.f32 %v12782_v10, %v12520_v13  ;;  %v3249_v57 = vadd.f32 %v9374_v18, %v2978_v48  ;;  %v15709_v19 = vld [vmem:[#allocation41_spill] sm:$0xff]  ;;  %v9377_v62 = vpop.f32.mrf.mxu0 }
 0x1ee   : > { %15706 = vst [vmem:[#allocation59_spill] sm:$0xff] %v13032_v63  ;;  %v6861_v42 = vmax.f32 %v15707_v8, %v12843_v6  ;;  %3348 = vst.msk [vmem:[%s12624_s25 + $0xa0] sm:$0xff] %vm3327_vm5, %v3315_v34  ;;  %v3318_v52 = vmax.f32 %v3286_v20, 0.0  ;;  %v3285_v15 = vadd.f32 %v12576_v27, %v3246_v45  ;;  %v2977_v16 = vadd.f32 %v2914_v56, %v15709_v19  ;;  %v9327_v37 = vpop.f32.mrf.mxu1  ;;  %v15711_v6 = vld [vmem:[#allocation72_spill] sm:$0xff]  ;;  %v15712_v34 = vld [vmem:[#allocation47_spill] sm:$0xff] }
 0x1ef   : > { %v6862_v21 = vmax.f32 %v15708_v46, %v12925_v53  ;;  %9676 = vmatmul.mubr.msk.f32.gmra.mxu0 %vm641_vm2, %v15710_v25  ;;  %9626 = vmatmul.mubr.msk.f32.gmra.mxu1 %vm641_vm2, %v15711_v6  ;;  %v6502_v26 = vmax.f32 %v6454_v7, %v12567_v54  ;;  %v13058_v53 = vrot.slane %v12898_v38, 7  ;;  %v3288_v18 = vadd.f32 %v12576_v27, %v3249_v57  ;;  %v3195_v45 = vpop.f32.mrf.mxu0  ;;  %v13081_v57 = vld [vmem:[%s12216_s13 + $0xa8] sm:$0xff]  ;;  %v13084_v19 = vld [vmem:[%s12216_s13 + $0xb0] sm:$0xff]  ;;  %v15725_v63 = vld [vmem:[#allocation26_spill] sm:$0xff] }
 0x1f0   : > { %9678 = vmatprep.mubr.msk.f32.mxu0 %vm641_vm2, %v12151_v47  ;;  %v6909_v13 = vmax.f32 %v6861_v42, %v12729_v61  ;;  %3351 = vst.msk [vmem:[%s12624_s25 + $0xb8] sm:$0xff] %vm3327_vm5, %v3318_v52  ;;  %v3317_v56 = vmax.f32 %v3285_v15, 0.0  ;;  %v3248_v48 = vadd.f32 %v3185_v51, %v2977_v16  ;;  %v2980_v20 = vadd.f32 %v9327_v37, %v15712_v34  ;;  %v15713_v61 = vld [vmem:[#allocation73_spill] sm:$0xff]  ;;  %v15714_v16 = vld [vmem:[#allocation76_spill] sm:$0xff] }
 0x1f1   : > { %v6910_v33 = vmax.f32 %v6862_v21, %v12748_v59  ;;  %9628 = vmatprep.mubr.msk.f32.mxu1 %vm641_vm2, %v15713_v61  ;;  %v2924_v59 = vpop.f32.mrf.mxu1  ;;  %v6694_v42 = vmax.f32 %v6502_v26, %v12590_v17  ;;  %v13072_v46 = vrot.slane %v12918_v4, 7  ;;  %v3320_v51 = vmax.f32 %v3288_v18, 0.0  ;;  %v9380_v15 = vpop.f32.mrf.mxu0  ;;  %v15715_v37 = vld [vmem:[#allocation5_spill] sm:$0xff]  ;;  %v9895_v25 = vld [vmem:[%s11049_s14 + $0x30] sm:$0xff] }
 0x1f2   : > { %v6966_v54 = vmax.f32 %v6909_v13, %v12977_v12  ;;  %3350 = vst.msk [vmem:[%s12624_s25 + $0xb0] sm:$0xff] %vm3327_vm5, %v3317_v56  ;;  %v3287_v21 = vadd.f32 %v12576_v27, %v3248_v48  ;;  %v3251_v7 = vadd.f32 %v9377_v62, %v2980_v20  ;;  %v2979_v52 = vadd.f32 %v2924_v59, %v12459_v1  ;;  %v15716_v20 = vld [vmem:[#allocation32_spill] sm:$0xff] }
 0x1f3   : > { %v13068_v8 = vmax.f32 %v6910_v33, %v12997_v35  ;;  %9679 = vmatmul.mubr.msk.f32.gmra.mxu0 %vm641_vm2, %v12154_v2  ;;  %v9330_v17 = vpop.f32.mrf.mxu1  ;;  %9629 = vmatmul.mubr.msk.f32.gmra.mxu1 %vm641_vm2, %v15714_v16  ;;  %v6750_v1 = vmax.f32 %v6694_v42, %v12613_v60  ;;  %v13095_v33 = vsel %vm6346_vm4, %v13058_v53, %v13072_v46  ;;  %v3205_v34 = vpop.f32.mrf.mxu0  ;;  %v15721_v2 = vld [vmem:[#allocation16_spill] sm:$0xff] }
 0x1f4   : > { %9681 = vmatprep.mubr.msk.f32.mxu0 %vm641_vm2, %v15715_v37  ;;  %v7068_v13 = vrot.slane %v6966_v54, 1  ;;  %3353 = vst.msk [vmem:[%s12624_s25 + $0xc8] sm:$0xff] %vm3327_vm5, %v3320_v51  ;;  %v3319_v26 = vmax.f32 %v3287_v21, 0.0  ;;  %v3290_v56 = vadd.f32 %v12576_v27, %v3251_v7  ;;  %v3250_v18 = vadd.f32 %v3195_v45, %v2979_v52  ;;  %9631 = vmatprep.mubr.msk.f32.mxu1 %vm641_vm2, %v15716_v20  ;;  %v15718_v52 = vld [vmem:[#allocation54_spill] sm:$0xff]  ;;  %v15720_v37 = vld [vmem:[#allocation107_spill] sm:$0xff]  ;;  %v9896_v20 = vld [vmem:[%s11049_s14 + $0x38] sm:$0xff] }
 0x1f5   : > { %v15265_v62 = vrot.slane %v13068_v8, 1  ;;  %v2982_v48 = vadd.f32 %v9330_v17, %v12479_v9  ;;  %v2934_v59 = vpop.f32.mrf.mxu1  ;;  %v6807_v42 = vmax.f32 %v6750_v1, %v12800_v41  ;;  %v6461_v51 = vmax.f32 %v13081_v57, %v13058_v53 }
 0x1f6   : > { %v6462_v45 = vmax.f32 %v13084_v19, %v13095_v33  ;;  %3352 = vst.msk [vmem:[%s12624_s25 + $0xc0] sm:$0xff] %vm3327_vm5, %v3319_v26  ;;  %v3322_v9 = vmax.f32 %v3290_v56, 0.0  ;;  %v3289_v21 = vadd.f32 %v12576_v27, %v3250_v18  ;;  %v2981_v17 = vadd.f32 %v2934_v59, %v15718_v52 }
 0x1f7   : > { %v13106_v54 = vsel %vm558_vm1, %v7068_v13, %v15265_v62  ;;  %v3253_v7 = vadd.f32 %v9380_v15, %v2982_v48  ;;  %v9383_v13 = vpop.f32.mrf.mxu0  ;;  %v15719_v62 = vld [vmem:[#allocation7_spill] sm:$0xff]  ;;  %v9333_v1 = vpop.f32.mrf.mxu1  ;;  %9632 = vmatmul.mubr.msk.f32.gmra.mxu1 %vm641_vm2, %v15720_v37  ;;  %v6863_v26 = vmax.f32 %v6807_v42, %v12909_v50  ;;  %v13125_v56 = vmax.f32 %v6461_v51, %v12898_v38  ;;  %v13138_v42 = vld [vmem:[%s12216_s13 + $0xa0] sm:$0x3] }
 0x1f8   : > { %15717 = vst [vmem:[#allocation70_spill] sm:$0xff] %v13106_v54  ;;  %9682 = vmatmul.mubr.msk.f32.gmra.mxu0 %vm641_vm2, %v15719_v62  ;;  %v13128_v15 = vmax.f32 %v6462_v45, %v12918_v4  ;;  %v6585_v18 = vrot.slane %v12898_v38, 1  ;;  %3355 = vst.msk [vmem:[%s12624_s25 + $0xd8] sm:$0xff] %vm3327_vm5, %v3322_v9  ;;  %v3321_v48 = vmax.f32 %v3289_v21, 0.0  ;;  %v3252_v52 = vadd.f32 %v3205_v34, %v2981_v17  ;;  %v15722_v62 = vld [vmem:[#allocation34_spill] sm:$0xff]  ;;  %v15724_v17 = vld [vmem:[#allocation61_spill] sm:$0xff] }
 0x1f9   : > { %9736 = vmatprep.mubr.msk.f32.mxu0 %vm641_vm2, %v15721_v2  ;;  %v3292_v59 = vadd.f32 %v12576_v27, %v3253_v7  ;;  %v2984_v47 = vadd.f32 %v9333_v1, %v15722_v62  ;;  %v3215_v2 = vpop.f32.mrf.mxu0  ;;  %9686 = vmatprep.mubr.msk.f32.mxu1 %vm641_vm2, %v9895_v25  ;;  %v2944_v51 = vpop.f32.mrf.mxu1  ;;  %v6911_v45 = vmax.f32 %v6863_v26, %v12969_v22  ;;  %v6586_v54 = vrot.slane %v12918_v4, 1 }
 0x1fa   : > { %v13143_v9 = vrot.slane %v13138_v42, 1  ;;  %v15723_v34 = vmax.f32 %v12956_v30, %v12977_v12  ;;  %3354 = vst.msk [vmem:[%s12624_s25 + $0xd0] sm:$0xff] %vm3327_vm5, %v3321_v48  ;;  %v3291_v21 = vadd.f32 %v12576_v27, %v3252_v52  ;;  %v2983_v1 = vadd.f32 %v2944_v51, %v15724_v17  ;;  %v15726_v30 = vld [vmem:[#allocation58_spill] sm:$0xff]  ;;  %v15728_v17 = vld [vmem:[#allocation28_spill] sm:$0xff] }
 0x1fb   : > { %v3324_v25 = vmax.f32 %v3292_v59, 0.0  ;;  %v3255_v7 = vadd.f32 %v9383_v13, %v2984_v47  ;;  %v9438_v26 = vpop.f32.mrf.mxu0  ;;  %v9388_v37 = vpop.f32.mrf.mxu1  ;;  %9687 = vmatmul.mubr.msk.f32.vlgmr.msra.gmra.mxu1 %vm641_vm2, %v9896_v20  ;;  %v6968_v48 = vmax.f32 %v6911_v45, %v12980_v43  ;;  %v13163_v59 = vsel %vm558_vm1, %v6585_v18, %v6586_v54  ;;  %v15727_v45 = vld [vmem:[#allocation23_spill] sm:$0xff] }
 0x1fc   : > { %v13149_v62 = vmax.f32 %v15723_v34, %v13058_v53  ;;  %9737 = vmatmul.mubr.msk.f32.vlgmr.msra.gmra.mxu0 %vm641_vm2, %v15725_v63  ;;  %v13167_v47 = vsel %vm558_vm1, %v6586_v54, %v13143_v9  ;;  %v13170_v13 = vrot.slane %v13081_v57, 7  ;;  %v3323_v63 = vmax.f32 %v3291_v21, 0.0  ;;  %9785 = vmatpush3.msk.msra.mxu1 %vm706_vm0, %v15727_v45  ;;  %v9897_v34 = vld [vmem:[%s11049_s14 + $0x48] sm:$0xff] }
 0x1fd   : > { %9835 = vmatpush3.msk.msra.mxu0 %vm706_vm0, %v15726_v30  ;;  %3357 = vst.msk [vmem:[%s12624_s25 + $0xe8] sm:$0xff] %vm3327_vm5, %v3324_v25  ;;  %v3294_v20 = vadd.f32 %v12576_v27, %v3255_v7  ;;  %v3254_v52 = vadd.f32 %v3215_v2, %v2983_v1  ;;  %v13175_v51 = vadd.f32 %v9438_v26, %v9388_v37  ;;  %v3970_v18 = vpop.f32.mrf.mxu0  ;;  %v3678_v54 = vpop.f32.mrf.mxu1  ;;  %v7071_v25 = vrot.slane %v6968_v48, 1 }
 0x1fe   : > { %9689 = vmatprep.mubr.msk.f32.mxu1 %vm641_vm2, %v9897_v34  ;;  %9739 = vmatprep.mubr.msk.f32.mxu0 %vm641_vm2, %v15728_v17  ;;  %v6701_v21 = vmax.f32 %v13125_v56, %v13163_v59  ;;  %v6702_v37 = vmax.f32 %v13128_v15, %v13167_v47  ;;  %v15729_v2 = vmax.f32 %v12959_v5, %v12997_v35  ;;  %v15730_v56 = vld [vmem:[#allocation2_spill] sm:$0xff]  ;;  %v9898_v17 = vld [vmem:[%s11049_s14 + $0x50] sm:$0xff] }
 0x1ff   : > { %3356 = vst.msk [vmem:[%s12624_s25 + $0xe0] sm:$0xff] %vm3327_vm5, %v3323_v63  ;;  %v3326_v1 = vmax.f32 %v3294_v20, 0.0  ;;  %v3293_v26 = vadd.f32 %v12576_v27, %v3254_v52  ;;  %v13196_v30 = vadd.f32 %v3970_v18, %v3678_v54  ;;  %v9441_v48 = vpop.f32.mrf.mxu0  ;;  %v6811_v45 = vmax.f32 %v13149_v62, %v13163_v59  ;;  %v13203_v5 = vld [vmem:[%s12216_s13 + $0xc0] sm:$0xff]  ;;  %v9391_v34 = vpop.f32.mrf.mxu1  ;;  %9690 = vmatmul.mubr.msk.f32.gmra.mxu1 %vm641_vm2, %v9898_v17  ;;  %v13221_v54 = vld [vmem:[%s12216_s13 + $0xc8] sm:$0xff] }
 0x200   : > { %v13191_v7 = vmax.f32 %v15729_v2, %v13095_v33  ;;  %9740 = vmatmul.mubr.msk.f32.gmra.mxu0 %vm641_vm2, %v15730_v56  ;;  %v15731_v27 = vrot.slane %v13068_v8, 1  ;;  %v15732_v52 = vmax.f32 %v12986_v44, %v12977_v12  ;;  %v13224_v2 = vrot.slane %v13084_v19, 7  ;;  %v9899_v56 = vld [vmem:[%s11049_s14 + $0x60] sm:$0xff] }
 0x201   : > { %9742 = vmatprep.mubr.msk.f32.mxu0 %vm641_vm2, %v15635_v24  ;;  %3359 = vst.msk [vmem:[%s12624_s25 + $0xf8] sm:$0xff] %vm3327_vm5, %v3326_v1  ;;  %v3325_v24 = vmax.f32 %v3293_v26, 0.0  ;;  %v13228_v8 = vadd.f32 %v9441_v48, %v9391_v34  ;;  %9692 = vmatprep.mubr.msk.f32.mxu1 %vm641_vm2, %v9899_v56  ;;  %v15733_v12 = vmax.f32 %v13005_v31, %v12997_v35  ;;  %v3688_v17 = vpop.f32.mrf.mxu1  ;;  %v6590_v34 = vrot.slane %v13081_v57, 1 }
 0x202   : > { %v13212_v63 = vsel %vm558_vm1, %v15731_v27, %v7071_v25  ;;  %v6812_v20 = vmax.f32 %v13191_v7, %v13167_v47  ;;  %v6864_v18 = vmax.f32 %v15732_v52, %v13058_v53  ;;  %v3980_v25 = vpop.f32.mrf.mxu0  ;;  %v6457_v53 = vmax.f32 %v12969_v22, %v12613_v60  ;;  %v9904_v7 = vld [vmem:[%s11049_s14 + $0x98] sm:$0xff] }
 0x203   : > { %v6865_v44 = vmax.f32 %v15733_v12, %v13095_v33  ;;  %v6370_v26 = vsel %vm6346_vm4, %v13170_v13, %v13224_v2  ;;  %v6464_v48 = vmax.f32 %v13203_v5, %v13170_v13  ;;  %3358 = vst.msk [vmem:[%s12624_s25 + $0xf0] sm:$0xff] %vm3327_vm5, %v3325_v24  ;;  %v13247_v35 = vadd.f32 %v3980_v25, %v3688_v17  ;;  %v13254_v33 = vld [vmem:[%s12216_s13 + $0xb8] sm:$0x3]  ;;  %v9394_v52 = vpop.f32.mrf.mxu1 }
 0x204   : > { %v6912_v1 = vmax.f32 %v6864_v18, %v12898_v38  ;;  %v9444_v31 = vpop.f32.mrf.mxu0  ;;  %9743 = vmatmul.mubr.msk.f32.gmra.mxu0 %vm641_vm2, %v15639_v23  ;;  %v6505_v38 = vmax.f32 %v6457_v53, %v12782_v10  ;;  %v6465_v27 = vmax.f32 %v13221_v54, %v6370_v26  ;;  %v9900_v18 = vld [vmem:[%s11049_s14 + $0x68] sm:$0xff]  ;;  %v6591_v23 = vrot.slane %v13084_v19, 1  ;;  %v9901_v12 = vld [vmem:[%s11049_s14 + $0x78] sm:$0xff] }
 0x205   : > { %v6913_v60 = vmax.f32 %v6865_v44, %v12918_v4  ;;  %9693 = vmatmul.mubr.msk.f32.gmra.mxu1 %vm641_vm2, %v9900_v18  ;;  %9745 = vmatprep.mubr.msk.f32.mxu0 %vm641_vm2, %v15643_v28  ;;  %v13263_v25 = vmax.f32 %v6464_v48, %v13081_v57  ;;  %v13267_v10 = vrot.slane %v13254_v33, 1  ;;  %v13269_v4 = vadd.f32 %v9444_v31, %v9394_v52  ;;  %v3698_v17 = vpop.f32.mrf.mxu1 }
 0x206   : > { %v6969_v24 = vmax.f32 %v6912_v1, %v13163_v59  ;;  %v3990_v56 = vpop.f32.mrf.mxu0  ;;  %9695 = vmatprep.mubr.msk.f32.mxu1 %vm641_vm2, %v9901_v12  ;;  %v6697_v28 = vmax.f32 %v6505_v38, %v12800_v41  ;;  %v13278_v53 = vmax.f32 %v6465_v27, %v13084_v19  ;;  %v13281_v48 = vsel %vm558_vm1, %v6590_v34, %v6591_v23 }
 0x207   : > { %v13274_v44 = vmax.f32 %v6913_v60, %v13167_v47  ;;  %v13285_v31 = vsel %vm558_vm1, %v6591_v23, %v13267_v10  ;;  %v13288_v52 = vmax.f32 %v6701_v21, %v13170_v13  ;;  %v13290_v60 = vadd.f32 %v3990_v56, %v3698_v17  ;;  %v9397_v27 = vpop.f32.mrf.mxu1  ;;  %v13312_v56 = vld [vmem:[%s12216_s13 + $0xd8] sm:$0xff]  ;;  %v9903_v17 = vld [vmem:[%s11049_s14 + $0x90] sm:$0xff] }
 0x208   : > { %v7073_v1 = vrot.slane %v6969_v24, 1  ;;  %v9447_v18 = vpop.f32.mrf.mxu0  ;;  %9746 = vmatmul.mubr.msk.f32.gmra.mxu0 %vm641_vm2, %v15647_v55  ;;  %v6753_v34 = vmax.f32 %v6697_v28, %v12909_v50  ;;  %v6704_v38 = vmax.f32 %v13263_v25, %v13281_v48  ;;  %v9902_v24 = vld [vmem:[%s11049_s14 + $0x80] sm:$0xff]  ;;  %v6705_v21 = vmax.f32 %v13278_v53, %v13285_v31 }
 0x209   : > { %v15268_v41 = vrot.slane %v13274_v44, 1  ;;  %9696 = vmatmul.mubr.msk.f32.gmra.mxu1 %vm641_vm2, %v9902_v24  ;;  %9748 = vmatprep.mubr.msk.f32.mxu0 %vm641_vm2, %v15649_v3  ;;  %v13307_v55 = vmax.f32 %v6702_v37, %v6370_v26  ;;  %v13315_v12 = vrot.slane %v13203_v5, 7  ;;  %v13317_v28 = vadd.f32 %v9447_v18, %v9397_v27  ;;  %v3708_v23 = vpop.f32.mrf.mxu1 }
 0x20a   : > { %v4000_v3 = vpop.f32.mrf.mxu0  ;;  %9698 = vmatprep.mubr.msk.f32.mxu1 %vm641_vm2, %v9903_v17  ;;  %v6810_v37 = vmax.f32 %v6753_v34, %v12980_v43  ;;  %v6867_v24 = vmax.f32 %v6811_v45, %v13170_v13  ;;  %v6868_v27 = vmax.f32 %v6812_v20, %v6370_v26  ;;  %v13339_v17 = vld [vmem:[%s12216_s13 + $0xe0] sm:$0xff]  ;;  %v13342_v34 = vrot.slane %v13221_v54, 7 }
 0x20b   : > { %v13324_v15 = vsel %vm558_vm1, %v7073_v1, %v15268_v41  ;;  %v6815_v18 = vmax.f32 %v13307_v55, %v13285_v31  ;;  %v6460_v1 = vmax.f32 %v13138_v42, %v12909_v50  ;;  %v13344_v41 = vadd.f32 %v4000_v3, %v3708_v23  ;;  %v9400_v50 = vpop.f32.mrf.mxu1  ;;  %v9905_v3 = vld [vmem:[%s11049_s14 + $0xa8] sm:$0xff] }
 0x20c   : > { %v9450_v62 = vpop.f32.mrf.mxu0  ;;  %9749 = vmatmul.mubr.msk.f32.gmra.mxu0 %vm641_vm2, %v15651_v58  ;;  %v6866_v59 = vmax.f32 %v6810_v37, %v13072_v46  ;;  %v6915_v47 = vmax.f32 %v6867_v24, %v13081_v57  ;;  %v6467_v13 = vmax.f32 %v13312_v56, %v13315_v12  ;;  %v6916_v45 = vmax.f32 %v6868_v27, %v13084_v19 }
 0x20d   : > { %9699 = vmatmul.mubr.msk.f32.gmra.mxu1 %vm641_vm2, %v9904_v7  ;;  %9751 = vmatprep.mubr.msk.f32.mxu0 %vm641_vm2, %v15653_v11  ;;  %v6508_v20 = vmax.f32 %v6460_v1, %v12969_v22  ;;  %v6373_v58 = vsel %vm6346_vm4, %v13315_v12, %v13342_v34  ;;  %v6595_v57 = vrot.slane %v13203_v5, 1  ;;  %v13362_v26 = vadd.f32 %v9450_v62, %v9400_v50  ;;  %v3718_v19 = vpop.f32.mrf.mxu1 }
 0x20e   : > { %v4010_v23 = vpop.f32.mrf.mxu0  ;;  %9701 = vmatprep.mubr.msk.f32.mxu1 %vm641_vm2, %v9905_v3  ;;  %v6914_v37 = vmax.f32 %v6866_v59, %v13138_v42  ;;  %v6972_v11 = vmax.f32 %v6915_v47, %v13281_v48  ;;  %v6468_v22 = vmax.f32 %v13339_v17, %v6373_v58  ;;  %v13370_v24 = vmax.f32 %v6916_v45, %v13285_v31  ;;  %v13383_v3 = vld [vmem:[%s12216_s13 + $0xd0] sm:$0x3] }
 0x20f   : > { %v6700_v27 = vmax.f32 %v6508_v20, %v12980_v43  ;;  %v13374_v1 = vmax.f32 %v6467_v13, %v13203_v5  ;;  %v6596_v62 = vrot.slane %v13221_v54, 1  ;;  %v13377_v50 = vadd.f32 %v4010_v23, %v3718_v19  ;;  %v9403_v43 = vpop.f32.mrf.mxu1  ;;  %v9906_v13 = vld [vmem:[%s11049_s14 + $0xb0] sm:$0xff]  ;;  %v9907_v19 = vld [vmem:[%s11049_s14 + $0xc0] sm:$0xff] }
 0x210   : > { %v9453_v7 = vpop.f32.mrf.mxu0  ;;  %9752 = vmatmul.mubr.msk.f32.gmra.mxu0 %vm641_vm2, %v15656_v32  ;;  %v6971_v59 = vmax.f32 %v6914_v37, %v13143_v9  ;;  %v7078_v47 = vrot.slane %v6972_v11, 1  ;;  %v13386_v45 = vmax.f32 %v6468_v22, %v13221_v54  ;;  %v15269_v20 = vrot.slane %v13370_v24, 1 }
 0x211   : > { %9702 = vmatmul.mubr.msk.f32.gmra.mxu1 %vm641_vm2, %v9906_v13  ;;  %9754 = vmatprep.mubr.msk.f32.mxu0 %vm641_vm2, %v15660_v14  ;;  %v6756_v23 = vmax.f32 %v6700_v27, %v13072_v46  ;;  %v13395_v32 = vsel %vm558_vm1, %v6595_v57, %v6596_v62  ;;  %v13398_v37 = vrot.slane %v13383_v3, 1  ;;  %v13400_v11 = vadd.f32 %v9453_v7, %v9403_v43  ;;  %v3728_v27 = vpop.f32.mrf.mxu1 }
 0x212   : > { %v4020_v22 = vpop.f32.mrf.mxu0  ;;  %9704 = vmatprep.mubr.msk.f32.mxu1 %vm641_vm2, %v9907_v19  ;;  %v7076_v13 = vrot.slane %v6971_v59, 1  ;;  %v13410_v57 = vmax.f32 %v6704_v38, %v13315_v12  ;;  %v13415_v7 = vsel %vm558_vm1, %v7078_v47, %v15269_v20  ;;  %v13425_v19 = vmax.f32 %v6705_v21, %v6373_v58  ;;  %v13441_v21 = vld [vmem:[%s12216_s13 + $0xf0] sm:$0xff]  ;;  %v13506_v20 = vld [vmem:[%s12216_s13 + $0xe8] sm:$0x3] }
 0x213   : > { %v6813_v43 = vmax.f32 %v6756_v23, %v13143_v9  ;;  %v13420_v59 = vsel %vm558_vm1, %v6596_v62, %v13398_v37  ;;  %v13427_v25 = vadd.f32 %v4020_v22, %v3728_v27  ;;  %v15734_v47 = vrot.slane %v13274_v44, 1  ;;  %v9406_v22 = vpop.f32.mrf.mxu1  ;;  %v9908_v27 = vld [vmem:[%s11049_s14 + $0xc8] sm:$0xff]  ;;  %v13467_v44 = vld [vmem:[%s12216_s13 + $0xf8] sm:$0xff] }
 0x214   : > { %v9456_v38 = vpop.f32.mrf.mxu0  ;;  %9755 = vmatmul.mubr.msk.f32.gmra.mxu0 %vm641_vm2, %v15662_v40  ;;  %v13455_v53 = vrot.slane %v13312_v56, 7  ;;  %v6600_v31 = vrot.slane %v13312_v56, 1 }
 0x215   : > { %v13434_v23 = vsel %vm558_vm1, %v15734_v47, %v7076_v13  ;;  %9705 = vmatmul.mubr.msk.f32.gmra.mxu1 %vm641_vm2, %v9908_v27  ;;  %9757 = vmatprep.mubr.msk.f32.mxu0 %vm641_vm2, %v15666_v39  ;;  %v6869_v40 = vmax.f32 %v6813_v43, %v13224_v2  ;;  %v15735_v13 = vmax.f32 %v13288_v52, %v13281_v48  ;;  %v9909_v27 = vld [vmem:[%s11049_s14 + $0xd8] sm:$0xff]  ;;  %v13470_v48 = vrot.slane %v13339_v17, 7  ;;  %v3738_v52 = vpop.f32.mrf.mxu1 }
 0x216   : > { %v13457_v62 = vadd.f32 %v9456_v38, %v9406_v22  ;;  %v4030_v14 = vpop.f32.mrf.mxu0  ;;  %9707 = vmatprep.mubr.msk.f32.mxu1 %vm641_vm2, %v9909_v27  ;;  %v6871_v39 = vmax.f32 %v6815_v18, %v6373_v58  ;;  %v6463_v43 = vmax.f32 %v13254_v33, %v13072_v46  ;;  %v6470_v22 = vmax.f32 %v13441_v21, %v13455_v53 }
 0x217   : > { %v6870_v47 = vmax.f32 %v15735_v13, %v13315_v12  ;;  %v6917_v12 = vmax.f32 %v6869_v40, %v13254_v33  ;;  %v13477_v55 = vadd.f32 %v4030_v14, %v3738_v52  ;;  %v9409_v40 = vpop.f32.mrf.mxu1  ;;  %v9910_v13 = vld [vmem:[%s11049_s14 + $0xe0] sm:$0xff] }
 0x218   : > { %v9459_v18 = vpop.f32.mrf.mxu0  ;;  %9758 = vmatmul.mubr.msk.f32.gmra.mxu0 %vm641_vm2, %v15670_v36  ;;  %v6919_v46 = vmax.f32 %v6871_v39, %v13221_v54  ;;  %v6511_v58 = vmax.f32 %v6463_v43, %v13138_v42  ;;  %v6601_v42 = vrot.slane %v13339_v17, 1  ;;  %v9911_v39 = vld [vmem:[%s11049_s14 + $0xf0] sm:$0xff]  ;;  %v13503_v52 = vmax.f32 %v6470_v22, %v13312_v56 }
 0x219   : > { %v6918_v38 = vmax.f32 %v6870_v47, %v13203_v5  ;;  %15736 = vst [vmem:[#allocation71_spill] sm:$0xff] %v13477_v55  ;;  %v6376_v5 = vsel %vm6346_vm4, %v13455_v53, %v13470_v48  ;;  %9708 = vmatmul.mubr.msk.f32.gmra.mxu1 %vm641_vm2, %v9910_v13  ;;  %9760 = vmatprep.mubr.msk.f32.mxu0 %vm641_vm2, %v15674_v49 }
 0x21a   : > { %v6974_v14 = vmax.f32 %v6917_v12, %v13267_v10  ;;  %v6471_v54 = vmax.f32 %v13467_v44, %v6376_v5  ;;  %v13494_v47 = vadd.f32 %v9459_v18, %v9409_v40  ;;  %v4040_v27 = vpop.f32.mrf.mxu0  ;;  %9710 = vmatprep.mubr.msk.f32.mxu1 %vm641_vm2, %v9911_v39  ;;  %v13499_v43 = vmax.f32 %v6919_v46, %v13420_v59  ;;  %v3748_v12 = vpop.f32.mrf.mxu1 }
 0x21b   : > { %v6975_v36 = vmax.f32 %v6918_v38, %v13395_v32  ;;  %v6703_v49 = vmax.f32 %v6511_v58, %v13143_v9  ;;  %v13512_v40 = vsel %vm558_vm1, %v6600_v31, %v6601_v42  ;;  %v13514_v39 = vadd.f32 %v4040_v27, %v3748_v12  ;;  %v15739_v31 = vld [vmem:[#allocation49_spill] sm:$0xff] }
 0x21c   : > { %15737 = vst [vmem:[#allocation60_spill] sm:$0xff] %v13494_v47  ;;  %v7081_v38 = vrot.slane %v6974_v14, 1  ;;  %v13509_v18 = vmax.f32 %v6471_v54, %v13339_v17  ;;  %v9462_v46 = vpop.f32.mrf.mxu0  ;;  %9761 = vmatmul.mubr.msk.f32.gmra.mxu0 %vm641_vm2, %v15679_v29  ;;  %v13521_v58 = vrot.slane %v13506_v20, 1  ;;  %v9412_v14 = vpop.f32.mrf.mxu1  ;;  %v15740_v54 = vrot.slane %v13370_v24, 1  ;;  %v15747_v47 = vld [vmem:[#allocation55_spill] sm:$0xff] }
 0x21d   : > { %v7083_v13 = vrot.slane %v6975_v36, 1  ;;  %15738 = vst [vmem:[#allocation65_spill] sm:$0xff] %v13514_v39  ;;  %v6759_v22 = vmax.f32 %v6703_v49, %v13224_v2  ;;  %v9912_v36 = vld [vmem:[%s11049_s14 + $0xf8] sm:$0xff]  ;;  %9763 = vmatprep.mubr.msk.f32.mxu0 %vm641_vm2, %v15739_v31  ;;  %v15741_v49 = vmax.f32 %v13374_v1, %v13395_v32  ;;  %v13541_v9 = vrot.slane %v13441_v21, 7  ;;  %v9913_v39 = vld [vmem:[%s11049_s14 + $0x108] sm:$0xff] }
 0x21e   : > { %9711 = vmatmul.mubr.msk.f32.gmra.mxu1 %vm641_vm2, %v9912_v36  ;;  %v13530_v27 = vsel %vm558_vm1, %v15740_v54, %v7081_v38  ;;  %v13543_v36 = vadd.f32 %v9462_v46, %v9412_v14  ;;  %v4050_v31 = vpop.f32.mrf.mxu0  ;;  %v15743_v24 = vrot.slane %v13499_v43, 1  ;;  %v13555_v1 = vsel %vm558_vm1, %v6601_v42, %v13521_v58  ;;  %v3758_v46 = vpop.f32.mrf.mxu1 }
 0x21f   : > { %v13538_v12 = vmax.f32 %v15741_v49, %v13455_v53  ;;  %9713 = vmatprep.mubr.msk.f32.mxu1 %vm641_vm2, %v9913_v39  ;;  %v6816_v54 = vmax.f32 %v6759_v22, %v13267_v10  ;;  %v13558_v49 = vld [vmem:[%s12216_s13 + $0x108] sm:$0xff]  ;;  %v15744_v39 = vmax.f32 %v13386_v45, %v13420_v59  ;;  %v15745_v22 = vmax.f32 %v13410_v57, %v13395_v32  ;;  %v9914_v32 = vld [vmem:[%s11049_s14 + $0x110] sm:$0xff] }
 0x220   : > { %15742 = vst [vmem:[#allocation74_spill] sm:$0xff] %v13543_v36  ;;  %v13550_v38 = vsel %vm558_vm1, %v7083_v13, %v15743_v24  ;;  %v13573_v24 = vadd.f32 %v4050_v31, %v3758_v46  ;;  %v9465_v36 = vpop.f32.mrf.mxu0  ;;  %9764 = vmatmul.mubr.msk.f32.gmra.mxu0 %vm641_vm2, %v15747_v47  ;;  %v15748_v45 = vmax.f32 %v13425_v19, %v13420_v59  ;;  %v9415_v55 = vpop.f32.mrf.mxu1  ;;  %v15749_v57 = vld [vmem:[#allocation56_spill] sm:$0xff]  ;;  %v13591_v31 = vrot.slane %v13467_v44, 7 }
 0x221   : > { %v13565_v29 = vmax.f32 %v15744_v39, %v6376_v5  ;;  %v6873_v42 = vmax.f32 %v15745_v22, %v13455_v53  ;;  %v6872_v14 = vmax.f32 %v6816_v54, %v13342_v34  ;;  %v6466_v13 = vmax.f32 %v13383_v3, %v13224_v2  ;;  %9766 = vmatprep.mubr.msk.f32.mxu0 %vm641_vm2, %v15749_v57  ;;  %v13603_v22 = vld [vmem:[%s12216_s13 + $0x110] sm:$0xff] }
 0x222   : > { %15746 = vst [vmem:[#allocation75_spill] sm:$0xff] %v13573_v24  ;;  %v6874_v39 = vmax.f32 %v15748_v45, %v6376_v5  ;;  %9714 = vmatmul.mubr.msk.f32.gmra.mxu1 %vm641_vm2, %v9914_v32  ;;  %v6473_v59 = vmax.f32 %v13558_v49, %v13541_v9  ;;  %v13595_v2 = vadd.f32 %v9465_v36, %v9415_v55  ;;  %v4060_v19 = vpop.f32.mrf.mxu0  ;;  %v9915_v5 = vld [vmem:[%s11049_s14 + $0x120] sm:$0xff]  ;;  %v6605_v32 = vrot.slane %v13441_v21, 1 }
 0x223   : > { %v6921_v47 = vmax.f32 %v6873_v42, %v13312_v56  ;;  %9716 = vmatprep.mubr.msk.f32.mxu1 %vm641_vm2, %v9915_v5  ;;  %v6920_v54 = vmax.f32 %v6872_v14, %v13383_v3  ;;  %v6514_v56 = vmax.f32 %v6466_v13, %v13254_v33  ;;  %v3768_v42 = vpop.f32.mrf.mxu1  ;;  %v6379_v55 = vsel %vm6346_vm4, %v13541_v9, %v13591_v31  ;;  %v9916_v5 = vld [vmem:[%s11049_s14 + $0x128] sm:$0xff] }
 0x224   : > { %15750 = vst [vmem:[#allocation66_spill] sm:$0xff] %v13595_v2  ;;  %v6922_v46 = vmax.f32 %v6874_v39, %v13339_v17  ;;  %v13610_v36 = vmax.f32 %v6473_v59, %v13441_v21  ;;  %v13613_v14 = vadd.f32 %v4060_v19, %v3768_v42  ;;  %v9468_v17 = vpop.f32.mrf.mxu0  ;;  %v15752_v39 = vld [vmem:[#allocation62_spill] sm:$0xff]  ;;  %v15753_v19 = vld [vmem:[#allocation63_spill] sm:$0xff]  ;;  %v6474_v53 = vmax.f32 %v13603_v22, %v6379_v55 }
 0x225   : > { %v6978_v45 = vmax.f32 %v6921_v47, %v13512_v40  ;;  %9767 = vmatmul.mubr.msk.f32.gmra.mxu0 %vm641_vm2, %v15752_v39  ;;  %v6977_v33 = vmax.f32 %v6920_v54, %v13398_v37  ;;  %v6706_v57 = vmax.f32 %v6514_v56, %v13267_v10  ;;  %v13623_v47 = vld [vmem:[%s12216_s13 + $0x100] sm:$0x3]  ;;  %v9418_v59 = vpop.f32.mrf.mxu1  ;;  %v6606_v39 = vrot.slane %v13467_v44, 1  ;;  %v9917_v56 = vld [vmem:[%s11049_s14 + $0x138] sm:$0xff] }
 0x226   : > { %15751 = vst [vmem:[#allocation102_spill] sm:$0xff] %v13613_v14  ;;  %v13619_v13 = vmax.f32 %v6922_v46, %v13555_v1  ;;  %9717 = vmatmul.mubr.msk.f32.gmra.mxu1 %vm641_vm2, %v9916_v5  ;;  %9769 = vmatprep.mubr.msk.f32.mxu0 %vm641_vm2, %v15753_v19  ;;  %v13632_v54 = vrot.slane %v13623_v47, 1  ;;  %v13634_v46 = vadd.f32 %v9468_v17, %v9418_v59  ;;  %v4070_v10 = vpop.f32.mrf.mxu0  ;;  %v15757_v5 = vld [vmem:[#allocation68_spill] sm:$0xff] }
 0x227   : > { %v7088_v42 = vrot.slane %v6978_v45, 1  ;;  %9719 = vmatprep.mubr.msk.f32.mxu1 %vm641_vm2, %v9917_v56  ;;  %v7086_v14 = vrot.slane %v6977_v33, 1  ;;  %v6762_v19 = vmax.f32 %v6706_v57, %v13342_v34  ;;  %v3778_v45 = vpop.f32.mrf.mxu1  ;;  %v13641_v2 = vmax.f32 %v6474_v53, %v13467_v44 }
 0x228   : > { %15754 = vst [vmem:[#allocation77_spill] sm:$0xff] %v13634_v46  ;;  %v13644_v24 = vsel %vm558_vm1, %v6605_v32, %v6606_v39  ;;  %v13648_v17 = vsel %vm558_vm1, %v6606_v39, %v13632_v54  ;;  %v15755_v33 = vmax.f32 %v13503_v52, %v13512_v40  ;;  %v13656_v56 = vadd.f32 %v4070_v10, %v3778_v45  ;;  %v9471_v57 = vpop.f32.mrf.mxu0  ;;  %v9918_v10 = vld [vmem:[%s11049_s14 + $0x140] sm:$0xff] }
 0x229   : > { %9770 = vmatmul.mubr.msk.f32.gmra.mxu0 %vm641_vm2, %v15757_v5  ;;  %v15758_v53 = vrot.slane %v13499_v43, 1  ;;  %v15759_v39 = vrot.slane %v13619_v13, 1  ;;  %v6819_v52 = vmax.f32 %v6762_v19, %v13398_v37  ;;  %v13685_v19 = vld [vmem:[%s12216_s13 + $0x120] sm:$0xff]  ;;  %v13688_v45 = vrot.slane %v13558_v49, 7 }
 0x22a   : > { %v13654_v59 = vmax.f32 %v15755_v33, %v13541_v9  ;;  %15756 = vst [vmem:[#allocation78_spill] sm:$0xff] %v13656_v56  ;;  %v9421_v33 = vpop.f32.mrf.mxu1  ;;  %9720 = vmatmul.mubr.msk.f32.gmra.mxu1 %vm641_vm2, %v9918_v10  ;;  %9772 = vmatprep.mubr.msk.f32.mxu0 %vm641_vm2, %v15704_v0  ;;  %v4080_v0 = vpop.f32.mrf.mxu0 }
 0x22b   : > { %v13663_v32 = vsel %vm558_vm1, %v15758_v53, %v7086_v14  ;;  %v13668_v46 = vsel %vm558_vm1, %v7088_v42, %v15759_v39  ;;  %v15760_v42 = vmax.f32 %v13509_v18, %v13555_v1  ;;  %v13690_v53 = vadd.f32 %v9471_v57, %v9421_v33  ;;  %v9919_v39 = vld [vmem:[%s11049_s14 + $0x150] sm:$0xff]  ;;  %v9923_v57 = vld [vmem:[%s11049_s14 + $0x180] sm:$0xff] }
 0x22c   : > { %9722 = vmatprep.mubr.msk.f32.mxu1 %vm641_vm2, %v9919_v39  ;;  %v6875_v10 = vmax.f32 %v6819_v52, %v13470_v48  ;;  %v15762_v18 = vmax.f32 %v13538_v12, %v13512_v40  ;;  %v3788_v43 = vpop.f32.mrf.mxu1  ;;  %v15763_v33 = vmax.f32 %v13565_v29, %v13555_v1  ;;  %v6469_v52 = vmax.f32 %v13506_v20, %v13342_v34  ;;  %v13709_v39 = vld [vmem:[%s12216_s13 + $0x128] sm:$0xff]  ;;  %v9474_v40 = vpop.f32.mrf.mxu0  ;;  %v9920_v1 = vld [vmem:[%s11049_s14 + $0x158] sm:$0xff] }
 0x22d   : > { %v13682_v5 = vmax.f32 %v15760_v42, %v6379_v55  ;;  %15761 = vst [vmem:[#allocation103_spill] sm:$0xff] %v13690_v53  ;;  %v13712_v14 = vrot.slane %v13603_v22, 7  ;;  %v13714_v56 = vadd.f32 %v4080_v0, %v3788_v43  ;;  %9773 = vmatmul.mubr.msk.f32.gmra.mxu0 %vm641_vm2, %v15711_v6  ;;  %v6476_v12 = vmax.f32 %v13685_v19, %v13688_v45 }
 0x22e   : > { %v6876_v42 = vmax.f32 %v15762_v18, %v13541_v9  ;;  %v6877_v53 = vmax.f32 %v15763_v33, %v6379_v55  ;;  %v6923_v9 = vmax.f32 %v6875_v10, %v13506_v20  ;;  %v9424_v34 = vpop.f32.mrf.mxu1  ;;  %9723 = vmatmul.mubr.msk.f32.gmra.mxu1 %vm641_vm2, %v9920_v1  ;;  %9775 = vmatprep.mubr.msk.f32.mxu0 %vm641_vm2, %v15713_v61  ;;  %v4090_v10 = vpop.f32.mrf.mxu0  ;;  %v9921_v18 = vld [vmem:[%s11049_s14 + $0x168] sm:$0xff] }
 0x22f   : > { %15764 = vst [vmem:[#allocation42_spill] sm:$0xff] %v13714_v56  ;;  %v6517_v43 = vmax.f32 %v6469_v52, %v13383_v3  ;;  %v6382_v6 = vsel %vm6346_vm4, %v13688_v45, %v13712_v14  ;;  %v13732_v0 = vadd.f32 %v9474_v40, %v9424_v34  ;;  %9725 = vmatprep.mubr.msk.f32.mxu1 %vm641_vm2, %v9921_v18  ;;  %v6611_v40 = vrot.slane %v13603_v22, 1  ;;  %v13752_v18 = vld [vmem:[%s12216_s13 + $0x118] sm:$0x3]  ;;  %v13875_v56 = vld [vmem:[%s12216_s13 + $0x130] sm:$0x3] }
 0x230   : > { %v6924_v29 = vmax.f32 %v6876_v42, %v13441_v21  ;;  %v6925_v55 = vmax.f32 %v6877_v53, %v13467_v44  ;;  %v6610_v21 = vrot.slane %v13558_v49, 1  ;;  %v6980_v42 = vmax.f32 %v6923_v9, %v13521_v58  ;;  %v3798_v44 = vpop.f32.mrf.mxu1  ;;  %v9477_v1 = vpop.f32.mrf.mxu0 }
 0x231   : > { %15765 = vst [vmem:[#allocation79_spill] sm:$0xff] %v13732_v0  ;;  %v6477_v3 = vmax.f32 %v13709_v39, %v6382_v6  ;;  %v6709_v33 = vmax.f32 %v6517_v43, %v13398_v37  ;;  %v13744_v52 = vmax.f32 %v6476_v12, %v13558_v49  ;;  %v13747_v34 = vadd.f32 %v4090_v10, %v3798_v44  ;;  %v9922_v43 = vld [vmem:[%s11049_s14 + $0x170] sm:$0xff] }
 0x232   : > { %v6981_v61 = vmax.f32 %v6924_v29, %v13644_v24  ;;  %v13740_v53 = vmax.f32 %v6925_v55, %v13648_v17  ;;  %9776 = vmatmul.mubr.msk.f32.gmra.mxu0 %vm641_vm2, %v15714_v16  ;;  %v7091_v9 = vrot.slane %v6980_v42, 1  ;;  %v9427_v37 = vpop.f32.mrf.mxu1  ;;  %9726 = vmatmul.mubr.msk.f32.gmra.mxu1 %vm641_vm2, %v9922_v43  ;;  %v15767_v12 = vld [vmem:[#allocation32_spill] sm:$0xff]  ;;  %v13764_v16 = vsel %vm558_vm1, %v6610_v21, %v6611_v40 }
 0x233   : > { %15766 = vst [vmem:[#allocation43_spill] sm:$0xff] %v13747_v34  ;;  %v13755_v55 = vmax.f32 %v6477_v3, %v13603_v22  ;;  %9778 = vmatprep.mubr.msk.f32.mxu0 %vm641_vm2, %v15767_v12  ;;  %v6765_v44 = vmax.f32 %v6709_v33, %v13470_v48  ;;  %v13767_v42 = vrot.slane %v13752_v18, 1  ;;  %v4100_v3 = vpop.f32.mrf.mxu0  ;;  %9728 = vmatprep.mubr.msk.f32.mxu1 %vm641_vm2, %v9923_v57  ;;  %v15769_v43 = vrot.slane %v13619_v13, 1  ;;  %v13853_v34 = vld [vmem:[%s11049_s14 + $0x1a0] sm:$0xff] }
 0x234   : > { %v7093_v29 = vrot.slane %v6981_v61, 1  ;;  %v15270_v10 = vrot.slane %v13740_v53, 1  ;;  %v13769_v61 = vadd.f32 %v9477_v1, %v9427_v37  ;;  %v15770_v33 = vmax.f32 %v13610_v36, %v13644_v24  ;;  %v3808_v37 = vpop.f32.mrf.mxu1  ;;  %15781 = vst [vmem:[#allocation3_spill] sm:$0xff] %v13853_v34 }
 0x235   : > { %v13776_v12 = vsel %vm558_vm1, %v15769_v43, %v7091_v9  ;;  %v6822_v13 = vmax.f32 %v6765_v44, %v13521_v58  ;;  %v13794_v9 = vsel %vm558_vm1, %v6611_v40, %v13767_v42  ;;  %v15772_v43 = vmax.f32 %v13641_v2, %v13648_v17 }
 0x236   : > { %15768 = vst [vmem:[#allocation82_spill] sm:$0xff] %v13769_v61  ;;  %v13784_v1 = vmax.f32 %v15770_v33, %v13688_v45  ;;  %v13789_v57 = vsel %vm558_vm1, %v7093_v29, %v15270_v10  ;;  %v13801_v36 = vadd.f32 %v4100_v3, %v3808_v37  ;;  %v9480_v33 = vpop.f32.mrf.mxu0  ;;  %v15774_v61 = vld [vmem:[#allocation107_spill] sm:$0xff]  ;;  %v15775_v40 = vmax.f32 %v13654_v59, %v13644_v24  ;;  %v9430_v3 = vpop.f32.mrf.mxu1  ;;  %v15776_v10 = vld [vmem:[#allocation25_spill] sm:$0xff] }
 0x237   : > { %15771 = vst [vmem:[#allocation83_spill] sm:$0xff] %v13789_v57  ;;  %v13799_v21 = vmax.f32 %v15772_v43, %v6382_v6  ;;  %9779 = vmatmul.mubr.msk.f32.gmra.mxu0 %vm641_vm2, %v15774_v61  ;;  %v13814_v43 = vld [vmem:[%s12216_s13 + $0x138] sm:$0xff]  ;;  %v9924_v37 = vld [vmem:[%s11049_s14 + $0x188] sm:$0xff]  ;;  %v6878_v61 = vmax.f32 %v6822_v13, %v13591_v31  ;;  %v15777_v29 = vmax.f32 %v13682_v5, %v13648_v17  ;;  %v6383_v59 = vrot.slane %v13685_v19, 7  ;;  %v13835_v13 = vld [vmem:[%s12216_s13 + $0x140] sm:$0xff] }
 0x238   : > { %15773 = vst [vmem:[#allocation44_spill] sm:$0xff] %v13801_v36  ;;  %v6879_v2 = vmax.f32 %v15775_v40, %v13688_v45  ;;  %9729 = vmatmul.mubr.msk.f32.gmra.mxu1 %vm641_vm2, %v9924_v37  ;;  %9781 = vmatprep.mubr.msk.f32.mxu0 %vm641_vm2, %v15776_v10  ;;  %v13827_v45 = vadd.f32 %v9480_v33, %v9430_v3  ;;  %v4110_v40 = vpop.f32.mrf.mxu0  ;;  %v9925_v36 = vld [vmem:[%s11049_s14 + $0x198] sm:$0xff]  ;;  %v13838_v44 = vrot.slane %v13709_v39, 7  ;;  %v3818_v17 = vpop.f32.mrf.mxu1 }
 0x239   : > { %v6880_v24 = vmax.f32 %v15777_v29, %v6382_v6  ;;  %9731 = vmatprep.mubr.msk.f32.mxu1 %vm641_vm2, %v9925_v36  ;;  %v6472_v10 = vmax.f32 %v13623_v47, %v13470_v48  ;;  %v6926_v5 = vmax.f32 %v6878_v61, %v13623_v47  ;;  %v6479_v33 = vmax.f32 %v13814_v43, %v6383_v59 }
 0x23a   : > { %15778 = vst [vmem:[#allocation81_spill] sm:$0xff] %v13827_v45  ;;  %v6927_v37 = vmax.f32 %v6879_v2, %v13558_v49  ;;  %v6615_v36 = vrot.slane %v13685_v19, 1  ;;  %v13844_v29 = vadd.f32 %v4110_v40, %v3818_v17  ;;  %v9483_v49 = vpop.f32.mrf.mxu0  ;;  %v15780_v2 = vld [vmem:[#allocation51_spill] sm:$0xff]  ;;  %v6385_v45 = vsel %vm6346_vm4, %v6383_v59, %v13838_v44  ;;  %v9433_v61 = vpop.f32.mrf.mxu1 }
 0x23b   : > { %v6928_v6 = vmax.f32 %v6880_v24, %v13603_v22  ;;  %9782 = vmatmul.mubr.msk.f32.gmra.mxu0 %vm641_vm2, %v15780_v2  ;;  %v6520_v3 = vmax.f32 %v6472_v10, %v13506_v20  ;;  %v15782_v22 = vld [vmem:[#allocation46_spill] sm:$0xff]  ;;  %v6983_v24 = vmax.f32 %v6926_v5, %v13632_v54  ;;  %v6480_v20 = vmax.f32 %v13835_v13, %v6385_v45  ;;  %v15784_v2 = vld [vmem:[#allocation84_spill] sm:$0xff] }
 0x23c   : > { %15779 = vst [vmem:[#allocation80_spill] sm:$0xff] %v13844_v29  ;;  %v6984_v48 = vmax.f32 %v6927_v37, %v13764_v16  ;;  %9732 = vmatmul.mubr.msk.f32.gmra.mxu1 %vm641_vm2, %v13853_v34  ;;  %9836 = vmatprep.mubr.msk.f32.mxu0 %vm641_vm2, %v15782_v22  ;;  %v6616_v37 = vrot.slane %v13709_v39, 1  ;;  %v13865_v10 = vadd.f32 %v9483_v49, %v9433_v61  ;;  %v4120_v17 = vpop.f32.mrf.mxu0  ;;  %v3828_v5 = vpop.f32.mrf.mxu1 }
 0x23d   : > { %v13861_v40 = vmax.f32 %v6928_v6, %v13794_v9  ;;  %9786 = vmatprep.mubr.msk.f32.mxu1 %vm641_vm2, %v15784_v2  ;;  %v6712_v34 = vmax.f32 %v6520_v3, %v13521_v58  ;;  %v13871_v22 = vmax.f32 %v6479_v33, %v13685_v19  ;;  %v7096_v0 = vrot.slane %v6983_v24, 1  ;;  %v15786_v2 = vld [vmem:[#allocation52_spill] sm:$0xff] }
 0x23e   : > { %15783 = vst [vmem:[#allocation9_spill] sm:$0xff] %v13865_v10  ;;  %v7098_v29 = vrot.slane %v6984_v48, 1  ;;  %v13878_v57 = vmax.f32 %v6480_v20, %v13709_v39  ;;  %v13881_v49 = vsel %vm558_vm1, %v6615_v36, %v6616_v37  ;;  %v13883_v61 = vadd.f32 %v4120_v17, %v3828_v5  ;;  %v9538_v48 = vpop.f32.mrf.mxu0  ;;  %v9488_v24 = vpop.f32.mrf.mxu1  ;;  %v15787_v20 = vld [vmem:[#allocation85_spill] sm:$0xff]  ;;  %v15788_v36 = vld [vmem:[#allocation64_spill] sm:$0xff] }
 0x23f   : > { %v15273_v6 = vrot.slane %v13861_v40, 1  ;;  %9837 = vmatmul.mubr.msk.f32.vlgmr.msra.gmra.mxu0 %vm641_vm2, %v15786_v2  ;;  %v6768_v58 = vmax.f32 %v6712_v34, %v13591_v31  ;;  %v13889_v33 = vrot.slane %v13875_v56, 1  ;;  %v15789_v17 = vrot.slane %v13740_v53, 1  ;;  %v13939_v10 = vld [vmem:[%s12216_s13 + $0x150] sm:$0xff] }
 0x240   : > { %15785 = vst [vmem:[#allocation11_spill] sm:$0xff] %v13883_v61  ;;  %9787 = vmatmul.mubr.msk.f32.vlgmr.msra.gmra.mxu1 %vm641_vm2, %v15787_v20  ;;  %9839 = vmatprep.mubr.msk.f32.mxu0 %vm641_vm2, %v15788_v36  ;;  %v15791_v2 = vmax.f32 %v13744_v52, %v13764_v16  ;;  %v13913_v20 = vrot.slane %v13814_v43, 7  ;;  %v4504_v36 = vadd.f32 %v9488_v24, %v13175_v51  ;;  %v4612_v53 = vpop.f32.mrf.mxu0  ;;  %v15792_v61 = vld [vmem:[#allocation86_spill] sm:$0xff] }
 0x241   : > { %v13900_v5 = vsel %vm558_vm1, %v15789_v17, %v7096_v0  ;;  %v13905_v34 = vsel %vm558_vm1, %v7098_v29, %v15273_v6  ;;  %9789 = vmatprep.mubr.msk.f32.mxu1 %vm641_vm2, %v15792_v61  ;;  %v6825_v0 = vmax.f32 %v6768_v58, %v13632_v54  ;;  %v13921_v29 = vsel %vm558_vm1, %v6616_v37, %v13889_v33  ;;  %v15796_v6 = vld [vmem:[#allocation67_spill] sm:$0xff] }
 0x242   : > { %15790 = vst [vmem:[#allocation20_spill] sm:$0xff] %v13905_v34  ;;  %v13910_v3 = vmax.f32 %v15791_v2, %v6383_v59  ;;  %v15793_v52 = vmax.f32 %v13755_v55, %v13794_v9  ;;  %v4344_v2 = vpop.f32.mrf.mxu1  ;;  %v15794_v61 = vmax.f32 %v13784_v1, %v13764_v16  ;;  %v15795_v37 = vmax.f32 %v13799_v21, %v13794_v9  ;;  %v9541_v34 = vpop.f32.mrf.mxu0  ;;  %v15798_v21 = vld [vmem:[#allocation53_spill] sm:$0xff] }
 0x243   : > { %v13941_v55 = vadd.f32 %v9538_v48, %v4504_v36  ;;  %9840 = vmatmul.mubr.msk.f32.gmra.mxu0 %vm641_vm2, %v15796_v6  ;;  %v6881_v51 = vmax.f32 %v6825_v0, %v13712_v14  ;;  %v13958_v6 = vld [vmem:[%s12216_s13 + $0x158] sm:$0xff]  ;;  %v13961_v48 = vrot.slane %v13835_v13, 7 }
 0x244   : > { %v13926_v17 = vmax.f32 %v15793_v52, %v6385_v45  ;;  %v6882_v58 = vmax.f32 %v15794_v61, %v6383_v59  ;;  %v6883_v24 = vmax.f32 %v15795_v37, %v6385_v45  ;;  %v4503_v52 = vadd.f32 %v4344_v2, %v13196_v30  ;;  %v9491_v1 = vpop.f32.mrf.mxu1  ;;  %v15797_v59 = vld [vmem:[#allocation87_spill] sm:$0xff]  ;;  %9842 = vmatprep.mubr.msk.f32.mxu0 %vm641_vm2, %v15798_v21  ;;  %v4622_v2 = vpop.f32.mrf.mxu0  ;;  %v15799_v61 = vld [vmem:[#allocation88_spill] sm:$0xff] }
 0x245   : > { %9790 = vmatmul.mubr.msk.f32.gmra.mxu1 %vm641_vm2, %v15797_v59  ;;  %v6475_v45 = vmax.f32 %v13752_v18, %v13591_v31  ;;  %v4506_v0 = vadd.f32 %v9491_v1, %v13228_v8  ;;  %v6388_v8 = vsel %vm6346_vm4, %v13913_v20, %v13961_v48  ;;  %v15800_v1 = vld [vmem:[#allocation59_spill] sm:$0xff] }
 0x246   : > { %v6930_v9 = vmax.f32 %v6882_v58, %v13685_v19  ;;  %v6931_v30 = vmax.f32 %v6883_v24, %v13709_v39  ;;  %v13963_v36 = vadd.f32 %v4612_v53, %v4503_v52  ;;  %9792 = vmatprep.mubr.msk.f32.mxu1 %vm641_vm2, %v15799_v61  ;;  %v6929_v19 = vmax.f32 %v6881_v51, %v13752_v18  ;;  %v4354_v58 = vpop.f32.mrf.mxu1  ;;  %v9544_v51 = vpop.f32.mrf.mxu0 }
 0x247   : > { %v6482_v39 = vmax.f32 %v13939_v10, %v13913_v20  ;;  %v6523_v53 = vmax.f32 %v6475_v45, %v13623_v47  ;;  %v13979_v24 = vadd.f32 %v9541_v34, %v4506_v0  ;;  %v4505_v52 = vadd.f32 %v4354_v58, %v13247_v35  ;;  %9843 = vmatmul.mubr.msk.f32.gmra.mxu0 %vm641_vm2, %v15800_v1  ;;  %v15802_v47 = vld [vmem:[#allocation70_spill] sm:$0xff] }
 0x248   : > { %v6987_v31 = vmax.f32 %v6930_v9, %v13881_v49  ;;  %v13973_v37 = vmax.f32 %v6931_v30, %v13921_v29  ;;  %v6986_v59 = vmax.f32 %v6929_v19, %v13767_v42  ;;  %v6483_v21 = vmax.f32 %v13958_v6, %v6388_v8  ;;  %v9494_v9 = vpop.f32.mrf.mxu1  ;;  %v15801_v30 = vld [vmem:[#allocation89_spill] sm:$0xff]  ;;  %9845 = vmatprep.mubr.msk.f32.mxu0 %vm641_vm2, %v15802_v47  ;;  %v4632_v58 = vpop.f32.mrf.mxu0  ;;  %v15803_v1 = vld [vmem:[#allocation90_spill] sm:$0xff] }
 0x249   : > { %9793 = vmatmul.mubr.msk.f32.gmra.mxu1 %vm641_vm2, %v15801_v30  ;;  %v6715_v35 = vmax.f32 %v6523_v53, %v13632_v54  ;;  %v13993_v0 = vmax.f32 %v6482_v39, %v13814_v43  ;;  %v13995_v61 = vadd.f32 %v4622_v2, %v4505_v52  ;;  %v4508_v19 = vadd.f32 %v9494_v9, %v13269_v4  ;;  %v14010_v2 = vld [vmem:[%s12216_s13 + $0x148] sm:$0x3] }
 0x24a   : > { %v7103_v34 = vrot.slane %v6987_v31, 1  ;;  %v7104_v45 = vrot.slane %v13973_v37, 1  ;;  %9795 = vmatprep.mubr.msk.f32.mxu1 %vm641_vm2, %v15803_v1  ;;  %v7101_v30 = vrot.slane %v6986_v59, 1  ;;  %v14001_v16 = vmax.f32 %v6483_v21, %v13835_v13  ;;  %v4364_v31 = vpop.f32.mrf.mxu1  ;;  %v9547_v21 = vpop.f32.mrf.mxu0  ;;  %v15805_v1 = vld [vmem:[#allocation92_spill] sm:$0xff] }
 0x24b   : > { %v6771_v39 = vmax.f32 %v6715_v35, %v13712_v14  ;;  %v6620_v4 = vrot.slane %v13814_v43, 1  ;;  %v6621_v53 = vrot.slane %v13835_v13, 1  ;;  %v14014_v52 = vadd.f32 %v9544_v51, %v4508_v19  ;;  %9846 = vmatmul.mubr.msk.f32.gmra.mxu0 %vm641_vm2, %v13212_v63 }
 0x24c   : > { %v14006_v54 = vsel %vm558_vm1, %v7103_v34, %v7104_v45  ;;  %v4507_v59 = vadd.f32 %v4364_v31, %v13290_v60  ;;  %v15804_v9 = vrot.slane %v13861_v40, 1  ;;  %v14025_v34 = vrot.slane %v14010_v2, 1  ;;  %v9497_v35 = vpop.f32.mrf.mxu1  ;;  %9848 = vmatprep.mubr.msk.f32.mxu0 %vm641_vm2, %v13324_v15  ;;  %v4642_v15 = vpop.f32.mrf.mxu0 }
 0x24d   : > { %9796 = vmatmul.mubr.msk.f32.gmra.mxu1 %vm641_vm2, %v15805_v1  ;;  %v6828_v60 = vmax.f32 %v6771_v39, %v13767_v42  ;;  %v14033_v51 = vsel %vm558_vm1, %v6620_v4, %v6621_v53  ;;  %v15806_v63 = vmax.f32 %v13871_v22, %v13881_v49  ;;  %v14042_v19 = vrot.slane %v13939_v10, 7  ;;  %v14078_v22 = vld [vmem:[%s12216_s13 + $0x168] sm:$0xff] }
 0x24e   : > { %v14022_v47 = vsel %vm558_vm1, %v15804_v9, %v7101_v30  ;;  %v14044_v30 = vadd.f32 %v4632_v58, %v4507_v59  ;;  %v4510_v31 = vadd.f32 %v9497_v35, %v13317_v28  ;;  %v15807_v9 = vld [vmem:[#allocation13_spill] sm:$0xff]  ;;  %v14051_v39 = vsel %vm558_vm1, %v6621_v53, %v14025_v34  ;;  %v4374_v4 = vpop.f32.mrf.mxu1 }
 0x24f   : > { %v14039_v40 = vmax.f32 %v15806_v63, %v13913_v20  ;;  %9798 = vmatprep.mubr.msk.f32.mxu1 %vm641_vm2, %v15807_v9  ;;  %v6884_v1 = vmax.f32 %v6828_v60, %v13838_v44  ;;  %v15808_v28 = vmax.f32 %v13878_v57, %v13921_v29  ;;  %v4509_v53 = vadd.f32 %v4374_v4, %v13344_v41  ;;  %v9550_v9 = vpop.f32.mrf.mxu0 }
 0x250   : > { %v14065_v63 = vadd.f32 %v9547_v21, %v4510_v31  ;;  %9849 = vmatmul.mubr.msk.f32.gmra.mxu0 %vm641_vm2, %v13434_v23  ;;  %v15809_v60 = vmax.f32 %v13910_v3, %v13881_v49  ;;  %v15810_v57 = vmax.f32 %v13926_v17, %v13921_v29  ;;  %v9500_v21 = vpop.f32.mrf.mxu1  ;;  %v15811_v31 = vld [vmem:[#allocation12_spill] sm:$0xff]  ;;  %v6478_v49 = vmax.f32 %v13875_v56, %v13712_v14 }
 0x251   : > { %v14061_v59 = vmax.f32 %v15808_v28, %v6388_v8  ;;  %v6832_v35 = vmax.f32 %v14039_v40, %v14033_v51  ;;  %9799 = vmatmul.mubr.msk.f32.gmra.mxu1 %vm641_vm2, %v15811_v31  ;;  %9851 = vmatprep.mubr.msk.f32.mxu0 %vm641_vm2, %v13415_v7  ;;  %v6932_v41 = vmax.f32 %v6884_v1, %v13875_v56  ;;  %v14090_v3 = vrot.slane %v13958_v6, 7  ;;  %v4652_v17 = vpop.f32.mrf.mxu0  ;;  %v14100_v1 = vld [vmem:[%s12216_s13 + $0x170] sm:$0xff] }
 0x252   : > { %v6885_v58 = vmax.f32 %v15809_v60, %v13913_v20  ;;  %v6886_v28 = vmax.f32 %v15810_v57, %v6388_v8  ;;  %v14092_v20 = vadd.f32 %v4642_v15, %v4509_v53  ;;  %v4512_v29 = vadd.f32 %v9500_v21, %v13362_v26  ;;  %v15812_v8 = vld [vmem:[#allocation4_spill] sm:$0xff]  ;;  %v4384_v60 = vpop.f32.mrf.mxu1  ;;  %v15813_v21 = vld [vmem:[#allocation94_spill] sm:$0xff] }
 0x253   : > { %v6833_v23 = vmax.f32 %v14061_v59, %v14051_v39  ;;  %9801 = vmatprep.mubr.msk.f32.mxu1 %vm641_vm2, %v15812_v8  ;;  %v6989_v14 = vmax.f32 %v6932_v41, %v13889_v33  ;;  %v6526_v57 = vmax.f32 %v6478_v49, %v13752_v18  ;;  %v6391_v15 = vsel %vm6346_vm4, %v14042_v19, %v14090_v3  ;;  %v15814_v8 = vld [vmem:[#allocation39_spill] sm:$0xff] }
 0x254   : > { %v6933_v7 = vmax.f32 %v6885_v58, %v13814_v43  ;;  %v6934_v4 = vmax.f32 %v6886_v28, %v13835_v13  ;;  %v6485_v26 = vmax.f32 %v14078_v22, %v14042_v19  ;;  %v14109_v53 = vadd.f32 %v9550_v9, %v4512_v29  ;;  %v9553_v58 = vpop.f32.mrf.mxu0  ;;  %9852 = vmatmul.mubr.msk.f32.gmra.mxu0 %vm641_vm2, %v13530_v27  ;;  %v9503_v18 = vpop.f32.mrf.mxu1 }
 0x255   : > { %v4511_v43 = vadd.f32 %v4384_v60, %v13377_v50  ;;  %9802 = vmatmul.mubr.msk.f32.gmra.mxu1 %vm641_vm2, %v15813_v21  ;;  %9854 = vmatprep.mubr.msk.f32.mxu0 %vm641_vm2, %v13550_v38  ;;  %v7106_v9 = vrot.slane %v6989_v14, 1  ;;  %v6718_v31 = vmax.f32 %v6526_v57, %v13767_v42  ;;  %v6486_v50 = vmax.f32 %v14100_v1, %v6391_v15 }
 0x256   : > { %v6990_v13 = vmax.f32 %v6933_v7, %v14033_v51  ;;  %v14116_v28 = vmax.f32 %v6934_v4, %v14051_v39  ;;  %v14125_v41 = vmax.f32 %v6485_v26, %v13939_v10  ;;  %v4514_v49 = vadd.f32 %v9503_v18, %v13400_v11  ;;  %v4662_v29 = vpop.f32.mrf.mxu0  ;;  %9804 = vmatprep.mubr.msk.f32.mxu1 %vm641_vm2, %v15814_v8  ;;  %v4394_v4 = vpop.f32.mrf.mxu1  ;;  %v15815_v18 = vld [vmem:[#allocation50_spill] sm:$0xff]  ;;  %v15818_v8 = vld [vmem:[#allocation95_spill] sm:$0xff] }
 0x257   : > { %v14127_v27 = vadd.f32 %v4652_v17, %v4511_v43  ;;  %v14136_v42 = vsel %vm558_vm1, %v7104_v45, %v7106_v9  ;;  %v6774_v60 = vmax.f32 %v6718_v31, %v13838_v44  ;;  %v14140_v17 = vmax.f32 %v6486_v50, %v13958_v6  ;;  %v14154_v45 = vld [vmem:[%s12216_s13 + $0x160] sm:$0x3] }
 0x258   : > { %v7108_v7 = vrot.slane %v6990_v13, 1  ;;  %v7109_v38 = vrot.slane %v14116_v28, 1  ;;  %v6625_v11 = vrot.slane %v13939_v10, 1  ;;  %v14143_v14 = vadd.f32 %v9553_v58, %v4514_v49  ;;  %v9556_v26 = vpop.f32.mrf.mxu0  ;;  %9855 = vmatmul.mubr.msk.f32.gmra.mxu0 %vm641_vm2, %v13663_v32  ;;  %v9506_v13 = vpop.f32.mrf.mxu1  ;;  %v14276_v28 = vld [vmem:[%s12216_s13 + $0x178] sm:$0x3] }
 0x259   : > { %v4513_v57 = vadd.f32 %v4394_v4, %v13427_v25  ;;  %v6626_v43 = vrot.slane %v13958_v6, 1  ;;  %9805 = vmatmul.mubr.msk.f32.gmra.mxu1 %vm641_vm2, %v15815_v18  ;;  %9857 = vmatprep.mubr.msk.f32.mxu0 %vm641_vm2, %v13668_v46  ;;  %v6831_v25 = vmax.f32 %v6774_v60, %v13889_v33  ;;  %v14163_v32 = vrot.slane %v14154_v45, 1 }
 0x25a   : > { %v14151_v37 = vsel %vm558_vm1, %v7108_v7, %v7109_v38  ;;  %v15816_v58 = vmax.f32 %v13993_v0, %v14033_v51  ;;  %v15817_v9 = vmax.f32 %v14001_v16, %v14051_v39  ;;  %v4516_v46 = vadd.f32 %v9506_v13, %v13457_v62  ;;  %v4672_v49 = vpop.f32.mrf.mxu0  ;;  %9807 = vmatprep.mubr.msk.f32.mxu1 %vm641_vm2, %v15818_v8  ;;  %v4404_v16 = vpop.f32.mrf.mxu1 }
 0x25b   : > { %v14176_v50 = vadd.f32 %v4662_v29, %v4513_v57  ;;  %v14182_v7 = vsel %vm558_vm1, %v6625_v11, %v6626_v43  ;;  %v6888_v0 = vmax.f32 %v6832_v35, %v14042_v19  ;;  %v6887_v4 = vmax.f32 %v6831_v25, %v13961_v48  ;;  %v15819_v57 = vld [vmem:[#allocation71_spill] sm:$0xff] }
 0x25c   : > { %v14169_v21 = vmax.f32 %v15816_v58, %v14042_v19  ;;  %v14174_v31 = vmax.f32 %v15817_v9, %v6391_v15  ;;  %v14191_v29 = vsel %vm558_vm1, %v6626_v43, %v14163_v32  ;;  %v6725_v62 = vmax.f32 %v14125_v41, %v14182_v7  ;;  %v9559_v18 = vpop.f32.mrf.mxu0  ;;  %9858 = vmatmul.mubr.msk.f32.gmra.mxu0 %vm641_vm2, %v13776_v12  ;;  %v14207_v19 = vld [vmem:[%s12216_s13 + $0x180] sm:$0xff]  ;;  %v9509_v35 = vpop.f32.mrf.mxu1  ;;  %v15820_v43 = vld [vmem:[#allocation96_spill] sm:$0xff] }
 0x25d   : > { %v14197_v11 = vadd.f32 %v9556_v26, %v4516_v46  ;;  %v4515_v13 = vadd.f32 %v4404_v16, %v15819_v57  ;;  %v6726_v51 = vmax.f32 %v14140_v17, %v14191_v29  ;;  %9808 = vmatmul.mubr.msk.f32.gmra.mxu1 %vm641_vm2, %v15820_v43  ;;  %v15821_v26 = vld [vmem:[#allocation83_spill] sm:$0xff]  ;;  %v6935_v25 = vmax.f32 %v6887_v4, %v14010_v2  ;;  %v15822_v46 = vld [vmem:[#allocation60_spill] sm:$0xff]  ;;  %v15823_v57 = vld [vmem:[#allocation97_spill] sm:$0xff] }
 0x25e   : > { %v6835_v60 = vmax.f32 %v14169_v21, %v14182_v7  ;;  %9860 = vmatprep.mubr.msk.f32.mxu0 %vm641_vm2, %v15821_v26  ;;  %v6889_v12 = vmax.f32 %v6833_v23, %v6391_v15  ;;  %v6936_v17 = vmax.f32 %v6888_v0, %v13939_v10  ;;  %v6392_v58 = vrot.slane %v14078_v22, 7  ;;  %v4682_v16 = vpop.f32.mrf.mxu0  ;;  %9810 = vmatprep.mubr.msk.f32.mxu1 %vm641_vm2, %v15823_v57  ;;  %v14227_v4 = vld [vmem:[%s12216_s13 + $0x188] sm:$0xff]  ;;  %v4414_v59 = vpop.f32.mrf.mxu1  ;;  %v15825_v57 = vld [vmem:[#allocation98_spill] sm:$0xff] }
 0x25f   : > { %v14219_v9 = vadd.f32 %v4672_v49, %v4515_v13  ;;  %v4518_v8 = vadd.f32 %v9509_v35, %v15822_v46  ;;  %v6481_v43 = vmax.f32 %v14010_v2, %v13838_v44  ;;  %v14230_v39 = vrot.slane %v14100_v1, 7  ;;  %v15824_v13 = vld [vmem:[#allocation65_spill] sm:$0xff] }
 0x260   : > { %v6992_v10 = vmax.f32 %v6935_v25, %v14025_v34  ;;  %v6937_v23 = vmax.f32 %v6889_v12, %v13958_v6  ;;  %v6993_v15 = vmax.f32 %v6936_v17, %v14182_v7  ;;  %v6488_v49 = vmax.f32 %v14207_v19, %v6392_v58  ;;  %v9562_v26 = vpop.f32.mrf.mxu0  ;;  %9861 = vmatmul.mubr.msk.f32.gmra.mxu0 %vm641_vm2, %v13900_v5  ;;  %v9512_v25 = vpop.f32.mrf.mxu1  ;;  %v15826_v6 = vld [vmem:[#allocation20_spill] sm:$0xff] }
 0x261   : > { %v14236_v0 = vadd.f32 %v9559_v18, %v4518_v8  ;;  %v4517_v35 = vadd.f32 %v4414_v59, %v15824_v13  ;;  %v6529_v44 = vmax.f32 %v6481_v43, %v13875_v56  ;;  %v6394_v46 = vsel %vm6346_vm4, %v6392_v58, %v14230_v39  ;;  %9811 = vmatmul.mubr.msk.f32.gmra.mxu1 %vm641_vm2, %v15825_v57  ;;  %v15827_v56 = vld [vmem:[#allocation74_spill] sm:$0xff]  ;;  %v15828_v13 = vld [vmem:[#allocation99_spill] sm:$0xff] }
 0x262   : > { %9863 = vmatprep.mubr.msk.f32.mxu0 %vm641_vm2, %v15826_v6  ;;  %v7111_v18 = vrot.slane %v6992_v10, 1  ;;  %v14249_v12 = vmax.f32 %v6937_v23, %v14191_v29  ;;  %v7113_v17 = vrot.slane %v6993_v15, 1  ;;  %v6489_v8 = vmax.f32 %v14227_v4, %v6394_v46  ;;  %v4692_v59 = vpop.f32.mrf.mxu0  ;;  %9813 = vmatprep.mubr.msk.f32.mxu1 %vm641_vm2, %v15828_v13  ;;  %v4424_v10 = vpop.f32.mrf.mxu1 }
 0x263   : > { %v14252_v5 = vadd.f32 %v4682_v16, %v4517_v35  ;;  %v4520_v43 = vadd.f32 %v9512_v25, %v15827_v56  ;;  %v6721_v57 = vmax.f32 %v6529_v44, %v13889_v33  ;;  %v14259_v6 = vmax.f32 %v6488_v49, %v14078_v22  ;;  %v15829_v56 = vld [vmem:[#allocation75_spill] sm:$0xff] }
 0x264   : > { %v7112_v23 = vsel %vm558_vm1, %v7109_v38, %v7111_v18  ;;  %v15274_v16 = vrot.slane %v14249_v12, 1  ;;  %v14266_v15 = vmax.f32 %v6489_v8, %v14100_v1  ;;  %v6630_v35 = vrot.slane %v14078_v22, 1  ;;  %v9565_v33 = vpop.f32.mrf.mxu0  ;;  %9864 = vmatmul.mubr.msk.f32.gmra.mxu0 %vm641_vm2, %v14022_v47  ;;  %v9515_v44 = vpop.f32.mrf.mxu1  ;;  %v15830_v18 = vld [vmem:[#allocation57_spill] sm:$0xff] }
 0x265   : > { %v14269_v25 = vadd.f32 %v9562_v26, %v4520_v43  ;;  %v4519_v13 = vadd.f32 %v4424_v10, %v15829_v56  ;;  %v6777_v49 = vmax.f32 %v6721_v57, %v13961_v48  ;;  %v6631_v38 = vrot.slane %v14100_v1, 1  ;;  %9814 = vmatmul.mubr.msk.f32.gmra.mxu1 %vm641_vm2, %v15830_v18  ;;  %9866 = vmatprep.mubr.msk.f32.mxu0 %vm641_vm2, %v14006_v54  ;;  %v15831_v10 = vld [vmem:[#allocation66_spill] sm:$0xff]  ;;  %v15832_v18 = vld [vmem:[#allocation100_spill] sm:$0xff] }
 0x266   : > { %v7115_v26 = vsel %vm558_vm1, %v7113_v17, %v15274_v16  ;;  %v14287_v8 = vrot.slane %v14276_v28, 1  ;;  %v14292_v47 = vmax.f32 %v6725_v62, %v6392_v58  ;;  %v14294_v43 = vmax.f32 %v6726_v51, %v6394_v46  ;;  %v4702_v54 = vpop.f32.mrf.mxu0  ;;  %9816 = vmatprep.mubr.msk.f32.mxu1 %vm641_vm2, %v15832_v18  ;;  %v4434_v40 = vpop.f32.mrf.mxu1  ;;  %v15834_v18 = vld [vmem:[#allocation101_spill] sm:$0xff] }
 0x267   : > { %v14296_v57 = vadd.f32 %v4692_v59, %v4519_v13  ;;  %v4522_v56 = vadd.f32 %v9515_v44, %v15831_v10  ;;  %v6834_v17 = vmax.f32 %v6777_v49, %v14025_v34  ;;  %v14303_v16 = vsel %vm558_vm1, %v6630_v35, %v6631_v38  ;;  %v15833_v49 = vld [vmem:[#allocation102_spill] sm:$0xff]  ;;  %v14325_v10 = vld [vmem:[%s12216_s13 + $0x190] sm:$0x3] }
 0x268   : > { %v14307_v41 = vsel %vm558_vm1, %v6631_v38, %v14287_v8  ;;  %v6728_v62 = vmax.f32 %v14259_v6, %v14303_v16  ;;  %v6838_v51 = vmax.f32 %v14292_v47, %v14303_v16  ;;  %v6891_v59 = vmax.f32 %v6835_v60, %v6392_v58  ;;  %v9568_v44 = vpop.f32.mrf.mxu0  ;;  %9867 = vmatmul.mubr.msk.f32.gmra.mxu0 %vm641_vm2, %v14136_v42  ;;  %v9518_v47 = vpop.f32.mrf.mxu1 }
 0x269   : > { %v14316_v13 = vadd.f32 %v9565_v33, %v4522_v56  ;;  %v4521_v35 = vadd.f32 %v4434_v40, %v15833_v49  ;;  %v6890_v38 = vmax.f32 %v6834_v17, %v14090_v3  ;;  %v6729_v6 = vmax.f32 %v14266_v15, %v14307_v41  ;;  %9817 = vmatmul.mubr.msk.f32.gmra.mxu1 %vm641_vm2, %v15834_v18  ;;  %v15836_v15 = vld [vmem:[#allocation77_spill] sm:$0xff]  ;;  %v15837_v17 = vld [vmem:[#allocation104_spill] sm:$0xff] }
 0x26a   : > { %9869 = vmatprep.mubr.msk.f32.mxu0 %vm641_vm2, %v14151_v37  ;;  %v6839_v21 = vmax.f32 %v14294_v43, %v14307_v41  ;;  %v15835_v42 = vmax.f32 %v14174_v31, %v14191_v29  ;;  %v6939_v60 = vmax.f32 %v6891_v59, %v14078_v22  ;;  %v6733_v40 = vrot.slane %v14207_v19, 7  ;;  %v4712_v56 = vpop.f32.mrf.mxu0  ;;  %9819 = vmatprep.mubr.msk.f32.mxu1 %vm641_vm2, %v15837_v17  ;;  %v4444_v49 = vpop.f32.mrf.mxu1  ;;  %v15838_v59 = vld [vmem:[#allocation78_spill] sm:$0xff]  ;;  %v15839_v18 = vld [vmem:[#allocation105_spill] sm:$0xff] }
 0x26b   : > { %v14338_v58 = vadd.f32 %v4702_v54, %v4521_v35  ;;  %v4524_v33 = vadd.f32 %v9518_v47, %v15836_v15  ;;  %v6938_v37 = vmax.f32 %v6890_v38, %v14154_v45  ;;  %v6484_v43 = vmax.f32 %v14154_v45, %v13961_v48 }
 0x26c   : > { %v6892_v7 = vmax.f32 %v15835_v42, %v6394_v46  ;;  %v6996_v22 = vmax.f32 %v6939_v60, %v14303_v16  ;;  %v6490_v29 = vmax.f32 %v14325_v10, %v14230_v39  ;;  %v14351_v46 = vrot.slane %v14227_v4, 7  ;;  %v9571_v47 = vpop.f32.mrf.mxu0  ;;  %9870 = vmatmul.mubr.msk.f32.gmra.mxu0 %vm641_vm2, %v7112_v23  ;;  %v15840_v60 = vld [vmem:[#allocation103_spill] sm:$0xff] }
 0x26d   : > { %v14353_v54 = vadd.f32 %v9568_v44, %v4524_v33  ;;  %v4523_v35 = vadd.f32 %v4444_v49, %v15838_v59  ;;  %v6995_v48 = vmax.f32 %v6938_v37, %v14163_v32  ;;  %v6532_v38 = vmax.f32 %v6484_v43, %v14010_v2  ;;  %9820 = vmatmul.mubr.msk.f32.gmra.mxu1 %vm641_vm2, %v15839_v18  ;;  %v15841_v33 = vld [vmem:[#allocation106_spill] sm:$0xff] }
 0x26e   : > { %v6940_v31 = vmax.f32 %v6892_v7, %v14100_v1  ;;  %v9521_v1 = vpop.f32.mrf.mxu1  ;;  %9872 = vmatprep.mubr.msk.f32.mxu0 %vm641_vm2, %v7115_v26  ;;  %v7118_v44 = vrot.slane %v6996_v22, 1  ;;  %v14366_v42 = vmax.f32 %v6490_v29, %v14276_v28  ;;  %v6735_v23 = vsel %vm6346_vm4, %v6733_v40, %v14351_v46  ;;  %v4722_v15 = vpop.f32.mrf.mxu0  ;;  %9822 = vmatprep.mubr.msk.f32.mxu1 %vm641_vm2, %v15841_v33 }
 0x26f   : > { %v14370_v7 = vadd.f32 %v4712_v56, %v4523_v35  ;;  %v4526_v2 = vadd.f32 %v9521_v1, %v15840_v60  ;;  %v7116_v17 = vrot.slane %v6995_v48, 1  ;;  %v6724_v26 = vmax.f32 %v6532_v38, %v14025_v34  ;;  %v15842_v56 = vld [vmem:[#allocation42_spill] sm:$0xff]  ;;  %v15844_v38 = vld [vmem:[#allocation21_spill] sm:$0xff]  ;;  %v15845_v60 = vld [vmem:[#allocation79_spill] sm:$0xff] }
 0x270   : > { %v14363_v16 = vmax.f32 %v6940_v31, %v14307_v41  ;;  %v4454_v41 = vpop.f32.mrf.mxu1  ;;  %v6784_v43 = vmax.f32 %v6728_v62, %v6733_v40  ;;  %v14377_v49 = vmax.f32 %v6729_v6, %v6735_v23  ;;  %v6788_v31 = vrot.slane %v14207_v19, 1  ;;  %v9574_v59 = vpop.f32.mrf.mxu0 }
 0x271   : > { %v14380_v22 = vadd.f32 %v9571_v47, %v4526_v2  ;;  %v4525_v29 = vadd.f32 %v4454_v41, %v15842_v56  ;;  %v15843_v35 = vrot.slane %v14249_v12, 1  ;;  %v6780_v48 = vmax.f32 %v6724_v26, %v14090_v3  ;;  %9823 = vmatmul.mubr.msk.f32.gmra.mxu1 %vm641_vm2, %v15844_v38 }
 0x272   : > { %v15275_v37 = vrot.slane %v14363_v16, 1  ;;  %v9524_v34 = vpop.f32.mrf.mxu1  ;;  %v6789_v6 = vrot.slane %v14227_v4, 1  ;;  %v14395_v47 = vrot.slane %v14325_v10, 1  ;;  %v6894_v12 = vmax.f32 %v6838_v51, %v6733_v40  ;;  %v4732_v33 = vpop.f32.mrf.mxu0 }
 0x273   : > { %v7117_v1 = vsel %vm558_vm1, %v15843_v35, %v7116_v17  ;;  %v14397_v18 = vadd.f32 %v4722_v15, %v4525_v29  ;;  %v4528_v2 = vadd.f32 %v9524_v34, %v15845_v60  ;;  %v15846_v17 = vld [vmem:[#allocation24_spill] sm:$0xff]  ;;  %v6837_v26 = vmax.f32 %v6780_v48, %v14163_v32  ;;  %v14414_v60 = vld [vmem:[%s12216_s13 + $0x198] sm:$0xff] }
 0x274   : > { %9873 = vmatmul.mubr.msk.f32.gmra.mxu0 %vm641_vm2, %v7117_v1  ;;  %v7120_v62 = vsel %vm558_vm1, %v7118_v44, %v15275_v37  ;;  %9825 = vmatprep.mubr.msk.f32.mxu1 %vm641_vm2, %v15846_v17  ;;  %v15847_v44 = vld [vmem:[#allocation3_spill] sm:$0xff]  ;;  %v4464_v56 = vpop.f32.mrf.mxu1  ;;  %v6790_v35 = vsel %vm558_vm1, %v6788_v31, %v6789_v6  ;;  %v6792_v51 = vsel %vm558_vm1, %v6789_v6, %v14395_v47  ;;  %v9577_v38 = vpop.f32.mrf.mxu0  ;;  %v15849_v37 = vld [vmem:[#allocation30_spill] sm:$0xff] }
 0x275   : > { %9875 = vmatprep.mubr.msk.f32.mxu0 %vm641_vm2, %v7120_v62  ;;  %v15276_v41 = vrot.slane %v15847_v44, 2  ;;  %v6895_v40 = vmax.f32 %v6839_v21, %v6735_v23  ;;  %v6942_v15 = vmax.f32 %v6894_v12, %v14207_v19  ;;  %v14409_v29 = vadd.f32 %v9574_v59, %v4528_v2  ;;  %v15848_v1 = vld [vmem:[#allocation43_spill] sm:$0xff]  ;;  %9826 = vmatmul.mubr.msk.f32.gmra.mxu1 %vm641_vm2, %v15849_v37  ;;  %v14423_v59 = vld [vmem:[%s12216_s13 + $0x1a0] sm:$0xff]  ;;  %v15852_v37 = vld [vmem:[#allocation93_spill] sm:$0xff] }
 0x276   : > { %v4527_v34 = vadd.f32 %v4464_v56, %v15848_v1  ;;  %v6893_v62 = vmax.f32 %v6837_v26, %v14230_v39  ;;  %v6841_v48 = vmax.f32 %v6784_v43, %v6790_v35  ;;  %v9527_v17 = vpop.f32.mrf.mxu1  ;;  %v6842_v31 = vmax.f32 %v14377_v49, %v6792_v51  ;;  %v15850_v12 = vld [vmem:[#allocation82_spill] sm:$0xff]  ;;  %v4742_v26 = vpop.f32.mrf.mxu0  ;;  %v15851_v56 = vld [vmem:[#allocation5_spill] sm:$0xff] }
 0x277   : > { %v6943_v21 = vmax.f32 %v6895_v40, %v14227_v4  ;;  %v6999_v23 = vmax.f32 %v6942_v15, %v6790_v35  ;;  %v6487_v19 = vmax.f32 %v14276_v28, %v14090_v3  ;;  %v4530_v43 = vadd.f32 %v9527_v17, %v15850_v12  ;;  %9828 = vmatprep.mubr.msk.f32.mxu1 %vm641_vm2, %v15851_v56 }
 0x278   : > { %v14425_v6 = vadd.f32 %v4732_v33, %v4527_v34  ;;  %v6941_v2 = vmax.f32 %v6893_v62, %v14276_v28  ;;  %v15853_v4 = vrot.slane %v15852_v37, 2  ;;  %v4474_v35 = vpop.f32.mrf.mxu1  ;;  %v6846_v15 = vrot.slane %v14414_v60, 7  ;;  %v15854_v34 = vld [vmem:[#allocation44_spill] sm:$0xff]  ;;  %v9580_v17 = vpop.f32.mrf.mxu0 }
 0x279   : > { %v14436_v3 = vmax.f32 %v6943_v21, %v6792_v51  ;;  %v7123_v40 = vrot.slane %v6999_v23, 1  ;;  %v6535_v33 = vmax.f32 %v6487_v19, %v14154_v45  ;;  %v14440_v1 = vadd.f32 %v9577_v38, %v4530_v43  ;;  %v15855_v51 = vld [vmem:[#allocation7_spill] sm:$0xff]  ;;  %v15856_v43 = vld [vmem:[#allocation81_spill] sm:$0xff] }
 0x27a   : > { %v5888_v49 = vsel %vm1227_vm3, %v15853_v4, %v15276_v41  ;;  %v6998_v28 = vmax.f32 %v6941_v2, %v14287_v8  ;;  %v4529_v62 = vadd.f32 %v4474_v35, %v15854_v34  ;;  %v6847_v12 = vrot.slane %v14423_v59, 7  ;;  %v9530_v37 = vpop.f32.mrf.mxu1  ;;  %9829 = vmatmul.mubr.msk.f32.gmra.mxu1 %vm641_vm2, %v15855_v51  ;;  %v4752_v4 = vpop.f32.mrf.mxu0  ;;  %v6313_v35 = vld [vmem:[%s12216_s13 + $0x1a8] sm:$0x3] }
 0x27b   : > { %v7124_v56 = vrot.slane %v14436_v3, 1  ;;  %v6727_v45 = vmax.f32 %v6535_v33, %v14163_v32  ;;  %v6897_v21 = vmax.f32 %v6841_v48, %v6846_v15  ;;  %v6949_v38 = vrot.slane %v14414_v60, 1  ;;  %9831 = vmatprep.mubr.msk.f32.mxu1 %vm641_vm2, %v5888_v49  ;;  %v15858_v49 = vld [vmem:[#allocation80_spill] sm:$0xff] }
 0x27c   : > { %v7121_v23 = vrot.slane %v6998_v28, 1  ;;  %v14450_v19 = vadd.f32 %v4742_v26, %v4529_v62  ;;  %v4532_v2 = vadd.f32 %v9530_v37, %v15856_v43  ;;  %v6848_v34 = vsel %vm6346_vm4, %v6846_v15, %v6847_v12  ;;  %v4484_v48 = vpop.f32.mrf.mxu1  ;;  %v9583_v41 = vpop.f32.mrf.mxu0 }
 0x27d   : > { %v7125_v51 = vsel %vm558_vm1, %v7123_v40, %v7124_v56  ;;  %v6783_v32 = vmax.f32 %v6727_v45, %v14230_v39  ;;  %v6898_v33 = vmax.f32 %v6842_v31, %v6848_v34  ;;  %v6945_v26 = vmax.f32 %v6897_v21, %v14414_v60  ;;  %v9927_v60 = vld [vmem:[%s11049_s14 + $0x1a8] sm:$0x3] }
 0x27e   : > { %v15857_v28 = vrot.slane %v14363_v16, 1  ;;  %v14464_v37 = vadd.f32 %v9580_v17, %v4532_v2  ;;  %v4531_v43 = vadd.f32 %v4484_v48, %v15858_v49  ;;  %v6950_v15 = vrot.slane %v14423_v59, 1  ;;  %v9533_v45 = vpop.f32.mrf.mxu1  ;;  %v4762_v48 = vpop.f32.mrf.mxu0 }
 0x27f   : > { %v6840_v40 = vmax.f32 %v6783_v32, %v14287_v8  ;;  %v6946_v39 = vmax.f32 %v6898_v33, %v14423_v59  ;;  %v6952_v31 = vrot.slane %v6313_v35, 1  ;;  %v5889_v21 = vrot.slane %v9927_v60, 2 }
 0x280   : > { %v7122_v62 = vsel %vm558_vm1, %v15857_v28, %v7121_v23  ;;  %v14473_v16 = vadd.f32 %v4752_v4, %v4531_v43  ;;  %v6951_v17 = vsel %vm558_vm1, %v6949_v38, %v6950_v15  ;;  %v15859_v23 = vld [vmem:[#allocation9_spill] sm:$0xff]  ;;  %v6730_v34 = vmax.f32 %v14366_v42, %v14287_v8  ;;  %v15861_v43 = vld [vmem:[#allocation11_spill] sm:$0xff]  ;;  %v9638_v42 = vpop.f32.mrf.mxu0 }
 0x281   : > { %9876 = vmatmul.mubr.msk.f32.gmra.mxu0 %vm641_vm2, %v7122_v62  ;;  %v4534_v2 = vadd.f32 %v9533_v45, %v15859_v23  ;;  %v6896_v32 = vmax.f32 %v6840_v40, %v14351_v46  ;;  %v6953_v59 = vsel %vm558_vm1, %v6950_v15, %v6952_v31  ;;  %v7002_v33 = vmax.f32 %v6945_v26, %v6951_v17 }
 0x282   : > { %9878 = vmatprep.mubr.msk.f32.mxu0 %vm641_vm2, %v7125_v51  ;;  %v15860_v28 = vrot.slane %v15847_v44, 2  ;;  %v4494_v51 = vpop.f32.mrf.mxu1  ;;  %v7003_v4 = vmax.f32 %v6946_v39, %v6953_v59  ;;  %v6786_v38 = vmax.f32 %v6730_v34, %v14351_v46 }
 0x283   : > { %v14484_v49 = vadd.f32 %v9583_v41, %v4534_v2  ;;  %v4533_v8 = vadd.f32 %v4494_v51, %v15861_v43  ;;  %v6944_v40 = vmax.f32 %v6896_v32, %v14325_v10  ;;  %v7128_v45 = vrot.slane %v7002_v33, 1  ;;  %v5155_v41 = vpop.f32.mrf.mxu0 }
 0x284   : > { %v5890_v62 = vsel %vm1227_vm3, %v15860_v28, %v5889_v21  ;;  %v9588_v15 = vpop.f32.mrf.mxu1  ;;  %v7129_v26 = vrot.slane %v7003_v4, 1  ;;  %v6843_v44 = vmax.f32 %v6786_v38, %v14395_v47 }
 0x285   : > { %9832 = vmatmul.mubr.msk.f32.gmra.mxu1 %vm641_vm2, %v5890_v62  ;;  %v14491_v60 = vadd.f32 %v4762_v48, %v4533_v8  ;;  %v5044_v39 = vadd.f32 %v9588_v15, %v13941_v55  ;;  %v7001_v21 = vmax.f32 %v6944_v40, %v14395_v47  ;;  %v9641_v34 = vpop.f32.mrf.mxu0 }
 0x286   : > { %v4884_v17 = vpop.f32.mrf.mxu1  ;;  %v6899_v23 = vmax.f32 %v6843_v44, %v6847_v12  ;;  %v7130_v59 = vsel %vm558_vm1, %v7128_v45, %v7129_v26 }
 0x287   : > { %v14495_v46 = vadd.f32 %v9638_v42, %v5044_v39  ;;  %v5043_v2 = vadd.f32 %v4884_v17, %v13963_v36  ;;  %v7126_v10 = vrot.slane %v7001_v21, 1  ;;  %v5165_v55 = vpop.f32.mrf.mxu0 }
 0x288   : > { %v9591_v32 = vpop.f32.mrf.mxu1  ;;  %v6947_v33 = vmax.f32 %v6899_v23, %v6313_v35 }
 0x289   : > { %v14499_v28 = vadd.f32 %v5155_v41, %v5043_v2  ;;  %v5046_v48 = vadd.f32 %v9591_v32, %v13979_v24  ;;  %v7127_v47 = vsel %vm558_vm1, %v7124_v56, %v7126_v10  ;;  %v9644_v4 = vpop.f32.mrf.mxu0 }
 0x28a   : > { %v4894_v12 = vpop.f32.mrf.mxu1  ;;  %9879 = vmatmul.mubr.msk.f32.gmra.mxu0 %vm641_vm2, %v7127_v47  ;;  %v7004_v62 = vmax.f32 %v6947_v33, %v6952_v31 }
 0x28b   : > { %v14506_v36 = vadd.f32 %v9641_v34, %v5046_v48  ;;  %v5045_v51 = vadd.f32 %v4894_v12, %v13995_v61  ;;  %9881 = vmatprep.mubr.msk.f32.mxu0 %vm641_vm2, %v7130_v59  ;;  %v5175_v3 = vpop.f32.mrf.mxu0 }
 0x28c   : > { %v9594_v35 = vpop.f32.mrf.mxu1  ;;  %v7131_v38 = vrot.slane %v7004_v62, 1 }
 0x28d   : > { %v14510_v43 = vadd.f32 %v5165_v55, %v5045_v51  ;;  %v5048_v24 = vadd.f32 %v9594_v35, %v14014_v52  ;;  %v9647_v40 = vpop.f32.mrf.mxu0 }
 0x28e   : > { %v4904_v8 = vpop.f32.mrf.mxu1  ;;  %v7132_v56 = vsel %vm558_vm1, %v7129_v26, %v7131_v38 }
 0x28f   : > { %v14514_v42 = vadd.f32 %v9644_v4, %v5048_v24  ;;  %v5047_v31 = vadd.f32 %v4904_v8, %v14044_v30  ;;  %9882 = vmatmul.mubr.msk.f32.gmra.mxu0 %vm641_vm2, %v7132_v56  ;;  %v5185_v44 = vpop.f32.mrf.mxu0 }
 0x290   : > { %v9597_v61 = vpop.f32.mrf.mxu1 }
 0x291   : > { %v14518_v45 = vadd.f32 %v5175_v3, %v5047_v31  ;;  %v5050_v15 = vadd.f32 %v9597_v61, %v14065_v63  ;;  %v9650_v21 = vpop.f32.mrf.mxu0 }
 0x292   : > { %v4914_v39 = vpop.f32.mrf.mxu1 }
 0x293   : > { %v14521_v41 = vadd.f32 %v9647_v40, %v5050_v15  ;;  %v5049_v52 = vadd.f32 %v4914_v39, %v14092_v20  ;;  %v5195_v23 = vpop.f32.mrf.mxu0 }
 0x294   : > { %v9600_v26 = vpop.f32.mrf.mxu1 }
 0x295   : > { %v14524_v17 = vadd.f32 %v5185_v44, %v5049_v52  ;;  %v5052_v30 = vadd.f32 %v9600_v26, %v14109_v53  ;;  %v9653_v32 = vpop.f32.mrf.mxu0 }
 0x296   : > { %v4924_v2 = vpop.f32.mrf.mxu1 }
 0x297   : > { %v14527_v34 = vadd.f32 %v9650_v21, %v5052_v30  ;;  %v5051_v10 = vadd.f32 %v4924_v2, %v14127_v27  ;;  %v5205_v48 = vpop.f32.mrf.mxu0 }
 0x298   : > { %v9603_v63 = vpop.f32.mrf.mxu1 }
 0x299   : > { %v14530_v59 = vadd.f32 %v5195_v23, %v5051_v10  ;;  %v5054_v33 = vadd.f32 %v9603_v63, %v14143_v14  ;;  %v9656_v12 = vpop.f32.mrf.mxu0 }
 0x29a   : > { %v4934_v20 = vpop.f32.mrf.mxu1 }
 0x29b   : > { %v14533_v55 = vadd.f32 %v9653_v32, %v5054_v33  ;;  %v5053_v47 = vadd.f32 %v4934_v20, %v14176_v50  ;;  %v5215_v4 = vpop.f32.mrf.mxu0 }
 0x29c   : > { %v9606_v53 = vpop.f32.mrf.mxu1 }
 0x29d   : > { %v14536_v62 = vadd.f32 %v5205_v48, %v5053_v47  ;;  %v5056_v51 = vadd.f32 %v9606_v53, %v14197_v11  ;;  %v9659_v24 = vpop.f32.mrf.mxu0 }
 0x29e   : > { %v4944_v27 = vpop.f32.mrf.mxu1 }
 0x29f   : > { %v14539_v35 = vadd.f32 %v9656_v12, %v5056_v51  ;;  %v5055_v38 = vadd.f32 %v4944_v27, %v14219_v9  ;;  %v5225_v56 = vpop.f32.mrf.mxu0 }
 0x2a0   : > { %v9609_v14 = vpop.f32.mrf.mxu1 }
 0x2a1   : > { %v14542_v3 = vadd.f32 %v5215_v4, %v5055_v38  ;;  %v5058_v8 = vadd.f32 %v9609_v14, %v14236_v0  ;;  %v9662_v61 = vpop.f32.mrf.mxu0 }
 0x2a2   : > { %v4954_v50 = vpop.f32.mrf.mxu1 }
 0x2a3   : > { %v14545_v31 = vadd.f32 %v9659_v24, %v5058_v8  ;;  %v5057_v40 = vadd.f32 %v4954_v50, %v14252_v5  ;;  %v5235_v39 = vpop.f32.mrf.mxu0 }
 0x2a4   : > { %v9612_v11 = vpop.f32.mrf.mxu1 }
 0x2a5   : > { %v14548_v15 = vadd.f32 %v5225_v56, %v5057_v40  ;;  %v5060_v44 = vadd.f32 %v9612_v11, %v14269_v25  ;;  %v9665_v26 = vpop.f32.mrf.mxu0 }
 0x2a6   : > { %v4964_v9 = vpop.f32.mrf.mxu1 }
 0x2a7   : > { %v14551_v52 = vadd.f32 %v9662_v61, %v5060_v44  ;;  %v5059_v21 = vadd.f32 %v4964_v9, %v14296_v57  ;;  %v5245_v2 = vpop.f32.mrf.mxu0 }
 0x2a8   : > { %v9615_v0 = vpop.f32.mrf.mxu1 }
 0x2a9   : > { %v14554_v30 = vadd.f32 %v5235_v39, %v5059_v21  ;;  %v5062_v23 = vadd.f32 %v9615_v0, %v14316_v13  ;;  %v9668_v63 = vpop.f32.mrf.mxu0 }
 0x2aa   : > { %v4974_v5 = vpop.f32.mrf.mxu1 }
 0x2ab   : > { %v14557_v10 = vadd.f32 %v9665_v26, %v5062_v23  ;;  %v5061_v32 = vadd.f32 %v4974_v5, %v14338_v58  ;;  %v5255_v20 = vpop.f32.mrf.mxu0 }
 0x2ac   : > { %v9618_v25 = vpop.f32.mrf.mxu1 }
 0x2ad   : > { %15862 = vst [vmem:[#allocation22_spill] sm:$0xff] %v14557_v10  ;;  %v14560_v33 = vadd.f32 %v5245_v2, %v5061_v32  ;;  %v5064_v48 = vadd.f32 %v9618_v25, %v14353_v54  ;;  %v9671_v53 = vpop.f32.mrf.mxu0 }
 0x2ae   : > { %v4984_v57 = vpop.f32.mrf.mxu1 }
 0x2af   : > { %15863 = vst [vmem:[#allocation18_spill] sm:$0xff] %v14560_v33  ;;  %v14563_v47 = vadd.f32 %v9668_v63, %v5064_v48  ;;  %v5063_v12 = vadd.f32 %v4984_v57, %v14370_v7  ;;  %v5265_v27 = vpop.f32.mrf.mxu0 }
 0x2b0   : > { %v9621_v13 = vpop.f32.mrf.mxu1 }
 0x2b1   : > { %15864 = vst [vmem:[#allocation29_spill] sm:$0xff] %v14563_v47  ;;  %v14566_v51 = vadd.f32 %v5255_v20, %v5063_v12  ;;  %v5066_v4 = vadd.f32 %v9621_v13, %v14380_v22  ;;  %v9674_v14 = vpop.f32.mrf.mxu0 }
 0x2b2   : > { %v4994_v58 = vpop.f32.mrf.mxu1 }
 0x2b3   : > { %15865 = vst [vmem:[#allocation10_spill] sm:$0xff] %v14566_v51  ;;  %v14569_v38 = vadd.f32 %v9671_v53, %v5066_v4  ;;  %v5065_v24 = vadd.f32 %v4994_v58, %v14397_v18  ;;  %v5275_v50 = vpop.f32.mrf.mxu0 }
 0x2b4   : > { %v9624_v54 = vpop.f32.mrf.mxu1 }
 0x2b5   : > { %15866 = vst [vmem:[#allocation31_spill] sm:$0xff] %v14569_v38  ;;  %v14572_v8 = vadd.f32 %v5265_v27, %v5065_v24  ;;  %v5068_v56 = vadd.f32 %v9624_v54, %v14409_v29  ;;  %v9677_v11 = vpop.f32.mrf.mxu0 }
 0x2b6   : > { %v5004_v7 = vpop.f32.mrf.mxu1 }
 0x2b7   : > { %15867 = vst [vmem:[#allocation35_spill] sm:$0xff] %v14572_v8  ;;  %v14575_v40 = vadd.f32 %v9674_v14, %v5068_v56  ;;  %v5067_v61 = vadd.f32 %v5004_v7, %v14425_v6  ;;  %v5285_v9 = vpop.f32.mrf.mxu0 }
 0x2b8   : > { %v9627_v22 = vpop.f32.mrf.mxu1 }
 0x2b9   : > { %15868 = vst [vmem:[#allocation15_spill] sm:$0xff] %v14575_v40  ;;  %v14578_v44 = vadd.f32 %v5275_v50, %v5067_v61  ;;  %v5070_v39 = vadd.f32 %v9627_v22, %v14440_v1  ;;  %v9680_v0 = vpop.f32.mrf.mxu0 }
 0x2ba   : > { %v5014_v18 = vpop.f32.mrf.mxu1 }
 0x2bb   : > { %15869 = vst [vmem:[#allocation14_spill] sm:$0xff] %v14578_v44  ;;  %v14581_v21 = vadd.f32 %v9677_v11, %v5070_v39  ;;  %v5069_v26 = vadd.f32 %v5014_v18, %v14450_v19  ;;  %v5295_v5 = vpop.f32.mrf.mxu0 }
 0x2bc   : > { %v9630_v29 = vpop.f32.mrf.mxu1 }
 0x2bd   : > { %15870 = vst [vmem:[#allocation17_spill] sm:$0xff] %v14581_v21  ;;  %v14584_v23 = vadd.f32 %v5285_v9, %v5069_v26  ;;  %v5072_v2 = vadd.f32 %v9630_v29, %v14464_v37  ;;  %v9683_v25 = vpop.f32.mrf.mxu0 }
 0x2be   : > { %v5024_v6 = vpop.f32.mrf.mxu1 }
 0x2bf   : > { %15871 = vst [vmem:[#allocation6_spill] sm:$0xff] %v14584_v23  ;;  %v14587_v32 = vadd.f32 %v9680_v0, %v5072_v2  ;;  %v5071_v63 = vadd.f32 %v5024_v6, %v14473_v16  ;;  %v5305_v57 = vpop.f32.mrf.mxu0 }
 0x2c0   : > { %v9633_v1 = vpop.f32.mrf.mxu1 }
 0x2c1   : > { %15872 = vst [vmem:[#allocation27_spill] sm:$0xff] %v14587_v32  ;;  %v14590_v48 = vadd.f32 %v5295_v5, %v5071_v63  ;;  %v5074_v20 = vadd.f32 %v9633_v1, %v14484_v49  ;;  %v14596_v13 = vpop.f32.mrf.mxu0 }
 0x2c2   : > { %v5034_v19 = vpop.f32.mrf.mxu1 }
 0x2c3   : > { %15873 = vst [vmem:[#allocation36_spill] sm:$0xff] %v14590_v48  ;;  %v14593_v12 = vadd.f32 %v9683_v25, %v5074_v20  ;;  %v5073_v53 = vadd.f32 %v5034_v19, %v14491_v60  ;;  %v14600_v27 = vpop.f32.mrf.mxu0 }
 0x2c4   : > { %v9688_v37 = vpop.f32.mrf.mxu1 }
 0x2c5   : > { %v14598_v4 = vadd.f32 %v5305_v57, %v5073_v53  ;;  %v14602_v58 = vpop.f32.mrf.mxu0 }
 0x2c6   : > { %v5423_v16 = vpop.f32.mrf.mxu1 }
 0x2c7   : > { %v14606_v14 = vpop.f32.mrf.mxu0 }
 0x2c8   : > { %v14604_v24 = vpop.f32.mrf.mxu1 }
 0x2c9   : > { %v14610_v54 = vpop.f32.mrf.mxu0 }
 0x2ca   : > { %v14608_v49 = vpop.f32.mrf.mxu1 }
 0x2cb   : > { %v14614_v60 = vpop.f32.mrf.mxu0 }
 0x2cc   : > { %v14612_v56 = vpop.f32.mrf.mxu1 }
 0x2cd   : > { %v14618_v7 = vpop.f32.mrf.mxu0 }
 0x2ce   : > { %v14616_v50 = vpop.f32.mrf.mxu1 }
 0x2cf   : > { %v14622_v11 = vpop.f32.mrf.mxu0 }
 0x2d0   : > { %v14620_v61 = vpop.f32.mrf.mxu1 }
 0x2d1   : > { %v14626_v39 = vpop.f32.mrf.mxu0 }
 0x2d2   : > { %v14624_v22 = vpop.f32.mrf.mxu1 }
 0x2d3   : > { %v14630_v18 = vpop.f32.mrf.mxu0 }
 0x2d4   : > { %v14628_v9 = vpop.f32.mrf.mxu1 }
 0x2d5   : > { %v14634_v0 = vpop.f32.mrf.mxu0 }
 0x2d6   : > { %v14632_v26 = vpop.f32.mrf.mxu1 }
 0x2d7   : > { %v14638_v2 = vpop.f32.mrf.mxu0 }
 0x2d8   : > { %v14636_v29 = vpop.f32.mrf.mxu1 }
 0x2d9   : > { %v14642_v6 = vpop.f32.mrf.mxu0 }
 0x2da   : > { %v14640_v5 = vpop.f32.mrf.mxu1 }
 0x2db   : > { %v14646_v25 = vpop.f32.mrf.mxu0 }
 0x2dc   : > { %v14644_v63 = vpop.f32.mrf.mxu1 }
 0x2dd   : > { %v14650_v20 = vpop.f32.mrf.mxu0 }
 0x2de   : > { %v14648_v1 = vpop.f32.mrf.mxu1 }
 0x2df   : > { %v14654_v19 = vpop.f32.mrf.mxu0 }
 0x2e0   : > { %v14652_v57 = vpop.f32.mrf.mxu1  ;;  %15874 = vst [vmem:[#allocation8_spill] sm:$0xff] %v14654_v19 }
 0x2e1   : > { %v14658_v48 = vpop.f32.mrf.mxu0 }
 0x2e2   : > { %v14656_v53 = vpop.f32.mrf.mxu1  ;;  %15875 = vst [vmem:[#allocation48_spill] sm:$0xff] %v14658_v48 }
 0x2e3   : > { %v14662_v23 = vpop.f32.mrf.mxu0 }
 0x2e4   : > { %v14660_v32 = vpop.f32.mrf.mxu1  ;;  %15876 = vst [vmem:[#allocation19_spill] sm:$0xff] %v14662_v23 }
 0x2e5   : > { %v14666_v44 = vpop.f32.mrf.mxu0 }
 0x2e6   : > { %v14664_v21 = vpop.f32.mrf.mxu1  ;;  %15877 = vst [vmem:[#allocation37_spill] sm:$0xff] %v14666_v44 }
 0x2e7   : > { %v14670_v8 = vpop.f32.mrf.mxu0 }
 0x2e8   : > { %v14668_v40 = vpop.f32.mrf.mxu1  ;;  %15879 = vst [vmem:[#allocation33_spill] sm:$0xff] %v14670_v8 }
 0x2e9   : > { %15878 = vst [vmem:[#allocation45_spill] sm:$0xff] %v14668_v40  ;;  %v14674_v51 = vpop.f32.mrf.mxu0 }
 0x2ea   : > { %v14672_v38 = vpop.f32.mrf.mxu1  ;;  %15881 = vst [vmem:[#allocation91_spill] sm:$0xff] %v14674_v51 }
 0x2eb   : > { %15880 = vst [vmem:[#allocation40_spill] sm:$0xff] %v14672_v38  ;;  %v14678_v33 = vpop.f32.mrf.mxu0 }
 0x2ec   : > { %v14676_v47 = vpop.f32.mrf.mxu1  ;;  %15883 = vst [vmem:[#allocation69_spill] sm:$0xff] %v14678_v33 }
 0x2ed   : > { %15882 = vst [vmem:[#allocation38_spill] sm:$0xff] %v14676_v47  ;;  %v14682_v10 = vpop.f32.mrf.mxu0 }
 0x2ee   : > { %v14680_v48 = vpop.f32.mrf.mxu1  ;;  %15885 = vst [vmem:[#allocation72_spill] sm:$0xff] %v14682_v10 }
 0x2ef   : > { %15884 = vst [vmem:[#allocation41_spill] sm:$0xff] %v14680_v48  ;;  %v14686_v19 = vpop.f32.mrf.mxu0 }
 0x2f0   : > { %v14684_v23 = vpop.f32.mrf.mxu1  ;;  %15887 = vst [vmem:[#allocation73_spill] sm:$0xff] %v14686_v19 }
 0x2f1   : > { %15886 = vst [vmem:[#allocation47_spill] sm:$0xff] %v14684_v23  ;;  %v14690_v40 = vpop.f32.mrf.mxu0 }
 0x2f2   : > { %v14688_v44 = vpop.f32.mrf.mxu1  ;;  %15889 = vst [vmem:[#allocation54_spill] sm:$0xff] %v14690_v40 }
 0x2f3   : > { %15888 = vst [vmem:[#allocation76_spill] sm:$0xff] %v14688_v44  ;;  %v14694_v38 = vpop.f32.mrf.mxu0 }
 0x2f4   : > { %v14692_v8 = vpop.f32.mrf.mxu1  ;;  %15891 = vst [vmem:[#allocation34_spill] sm:$0xff] %v14694_v38  ;;  %v5583_v38 = vadd.f32 %v9688_v37, %v14495_v46 }
 0x2f5   : > { %15890 = vst [vmem:[#allocation16_spill] sm:$0xff] %v14692_v8  ;;  %v14698_v47 = vpop.f32.mrf.mxu0 }
 0x2f6   : > { %v14696_v51 = vpop.f32.mrf.mxu1  ;;  %15893 = vst [vmem:[#allocation26_spill] sm:$0xff] %v14698_v47  ;;  %v5582_v47 = vadd.f32 %v5423_v16, %v14499_v28 }
 0x2f7   : > { %15892 = vst [vmem:[#allocation61_spill] sm:$0xff] %v14696_v51  ;;  %v14702_v48 = vpop.f32.mrf.mxu0 }
 0x2f8   : > { %v14700_v33 = vpop.f32.mrf.mxu1  ;;  %15895 = vst [vmem:[#allocation23_spill] sm:$0xff] %v14702_v48 }
 0x2f9   : > { %15894 = vst [vmem:[#allocation58_spill] sm:$0xff] %v14700_v33  ;;  %v14706_v23 = vpop.f32.mrf.mxu0 }
 0x2fa   : > { %v14704_v10 = vpop.f32.mrf.mxu1  ;;  %15897 = vst [vmem:[#allocation2_spill] sm:$0xff] %v14706_v23  ;;  %v14720_v23 = vld [vmem:[%s15035_s8] ss:$0 sm:$0xff] }
 0x2fb   : > { %15896 = vst [vmem:[#allocation28_spill] sm:$0xff] %v14704_v10  ;;  %v14710_v44 = vpop.f32.mrf.mxu0  ;;  %v5854_v10 = vadd.f32 %v14600_v27, %v5582_v47  ;;  %v5587_v47 = vadd.f32 %v14612_v56, %v14514_v42  ;;  %v5586_v27 = vadd.f32 %v14616_v50, %v14518_v45  ;;  %v5589_v50 = vadd.f32 %v14620_v61, %v14521_v41 }
 0x2fc   : > { %v14708_v19 = vpop.f32.mrf.mxu1  ;;  %15899 = vst [vmem:[#allocation55_spill] sm:$0xff] %v14710_v44  ;;  %v5855_v44 = vadd.f32 %v14596_v13, %v5583_v38  ;;  %v5584_v38 = vadd.f32 %v14608_v49, %v14510_v43 }
 0x2fd   : > { %15898 = vst [vmem:[#allocation49_spill] sm:$0xff] %v14708_v19  ;;  %v9783_v8 = vpop.f32.mrf.mxu0 }
 0x2fe   : > { %v14712_v40 = vpop.f32.mrf.mxu1  ;;  %v5856_v49 = vadd.f32 %v14606_v14, %v5584_v38 }
 0x2ff   : > { %15900 = vst [vmem:[#allocation56_spill] sm:$0xff] %v14712_v40  ;;  %v5845_v48 = vpop.f32.mrf.mxu0  ;;  %v5585_v40 = vadd.f32 %v14604_v24, %v14506_v36 }
 0x300   : > { %v9733_v51 = vpop.f32.mrf.mxu1 }
 0x301   : > { %v5613_v33 = vadd.f32 %v9733_v51, %v14593_v12  ;;  %v9838_v28 = vpop.f32.mrf.mxu0  ;;  %v14731_v51 = vld [vmem:[%s15033_s6] ss:$0 sm:$0xff] }
 0x302   : > { %v5573_v19 = vpop.f32.mrf.mxu1  ;;  %v7280_v12 = vadd.f32 %v9838_v28, %v14720_v23 }
 0x303   : > { %v14725_v46 = vadd.f32 %v9783_v8, %v5613_v33  ;;  %v5612_v37 = vadd.f32 %v5573_v19, %v14598_v4  ;;  %v7274_v8 = vpop.f32.mrf.mxu0  ;;  %v5857_v19 = vadd.f32 %v14602_v58, %v5585_v40 }
 0x304   : > { %v9788_v16 = vpop.f32.mrf.mxu1  ;;  %v7434_v13 = vmax.f32 %v7280_v12, 0.0  ;;  %v7275_v24 = vadd.f32 %v14720_v23, %v7274_v8 }
 0x305   : > { %v14737_v36 = vadd.f32 %v5845_v48, %v5612_v37  ;;  %v6126_v33 = vadd.f32 %v9788_v16, %v5855_v44  ;;  %v9841_v48 = vpop.f32.mrf.mxu0 }
 0x306   : > { %v5966_v4 = vpop.f32.mrf.mxu1  ;;  %7466 = vst.msk [vmem:[%s14743_s26 + $0x8] sm:$0xff] %vm3327_vm5, %v7434_v13  ;;  %v7433_v40 = vmax.f32 %v7275_v24, 0.0  ;;  %v7290_v42 = vadd.f32 %v9841_v48, %v14720_v23 }
 0x307   : > { %v6165_v43 = vadd.f32 %v14731_v51, %v6126_v33  ;;  %v6125_v44 = vadd.f32 %v5966_v4, %v5854_v10  ;;  %v7284_v45 = vpop.f32.mrf.mxu0  ;;  %v5859_v33 = vadd.f32 %v14610_v54, %v5587_v47  ;;  %v5858_v4 = vadd.f32 %v14614_v60, %v5586_v27 }
 0x308   : > { %v9791_v58 = vpop.f32.mrf.mxu1  ;;  %7465 = vst.msk [vmem:[%s14743_s26] sm:$0xff] %vm3327_vm5, %v7433_v40  ;;  %v7436_v28 = vmax.f32 %v7290_v42, 0.0  ;;  %v7285_v12 = vadd.f32 %v14720_v23, %v7284_v45  ;;  %v5588_v54 = vadd.f32 %v14624_v22, %v14524_v17  ;;  %v5861_v60 = vadd.f32 %v14618_v7, %v5589_v50 }
 0x309   : > { %v6197_v56 = vmax.f32 %v6165_v43, 0.0  ;;  %v6164_v10 = vadd.f32 %v14731_v51, %v6125_v44  ;;  %v6128_v37 = vadd.f32 %v9791_v58, %v5857_v19  ;;  %v9844_v13 = vpop.f32.mrf.mxu0  ;;  %v5591_v17 = vadd.f32 %v14628_v9, %v14527_v34 }
 0x30a   : > { %v5976_v16 = vpop.f32.mrf.mxu1  ;;  %7468 = vst.msk [vmem:[%s14743_s26 + $0x18] sm:$0xff] %vm3327_vm5, %v7436_v28  ;;  %v7435_v41 = vmax.f32 %v7285_v12, 0.0  ;;  %v7300_v24 = vadd.f32 %v9844_v13, %v14720_v23  ;;  %v5590_v7 = vadd.f32 %v14632_v26, %v14530_v59  ;;  %v5860_v34 = vadd.f32 %v14622_v11, %v5588_v54 }
 0x30b   : > { %6229 = vst.msk [vmem:[%s14756_s19 + $0x8] sm:$0xff] %vm3327_vm5, %v6197_v56  ;;  %v6196_v14 = vmax.f32 %v6164_v10, 0.0  ;;  %v6167_v38 = vadd.f32 %v14731_v51, %v6128_v37  ;;  %v6127_v8 = vadd.f32 %v5976_v16, %v5856_v49  ;;  %v7294_v44 = vpop.f32.mrf.mxu0  ;;  %v5593_v59 = vadd.f32 %v14636_v29, %v14533_v55 }
 0x30c   : > { %v9794_v61 = vpop.f32.mrf.mxu1  ;;  %7467 = vst.msk [vmem:[%s14743_s26 + $0x10] sm:$0xff] %vm3327_vm5, %v7435_v41  ;;  %v7438_v48 = vmax.f32 %v7300_v24, 0.0  ;;  %v7295_v40 = vadd.f32 %v14720_v23, %v7294_v44  ;;  %v5863_v11 = vadd.f32 %v14626_v39, %v5591_v17  ;;  %v5862_v13 = vadd.f32 %v14630_v18, %v5590_v7 }
 0x30d   : > { %6228 = vst.msk [vmem:[%s14756_s19] sm:$0xff] %vm3327_vm5, %v6196_v14  ;;  %v6199_v19 = vmax.f32 %v6167_v38, 0.0  ;;  %v6166_v47 = vadd.f32 %v14731_v51, %v6127_v8  ;;  %v6130_v43 = vadd.f32 %v9794_v61, %v5859_v33  ;;  %v9847_v49 = vpop.f32.mrf.mxu0  ;;  %v5592_v39 = vadd.f32 %v14640_v5, %v14536_v62 }
 0x30e   : > { %v5986_v27 = vpop.f32.mrf.mxu1  ;;  %7470 = vst.msk [vmem:[%s14743_s26 + $0x28] sm:$0xff] %vm3327_vm5, %v7438_v48  ;;  %v7437_v56 = vmax.f32 %v7295_v40, 0.0  ;;  %v7310_v37 = vadd.f32 %v9847_v49, %v14720_v23  ;;  %v5865_v18 = vadd.f32 %v14634_v0, %v5593_v59  ;;  %v5595_v62 = vadd.f32 %v14644_v63, %v14539_v35 }
 0x30f   : > { %6231 = vst.msk [vmem:[%s14756_s19 + $0x18] sm:$0xff] %vm3327_vm5, %v6199_v19  ;;  %v6198_v22 = vmax.f32 %v6166_v47, 0.0  ;;  %v6169_v58 = vadd.f32 %v14731_v51, %v6130_v43  ;;  %v6129_v42 = vadd.f32 %v5986_v27, %v5858_v4  ;;  %v7304_v28 = vpop.f32.mrf.mxu0  ;;  %v5594_v0 = vadd.f32 %v14648_v1, %v14542_v3 }
 0x310   : > { %v9797_v10 = vpop.f32.mrf.mxu1  ;;  %7469 = vst.msk [vmem:[%s14743_s26 + $0x20] sm:$0xff] %vm3327_vm5, %v7437_v56  ;;  %v7440_v26 = vmax.f32 %v7310_v37, 0.0  ;;  %v7305_v12 = vadd.f32 %v14720_v23, %v7304_v28  ;;  %v5864_v35 = vadd.f32 %v14638_v2, %v5592_v39  ;;  %v5597_v3 = vadd.f32 %v14652_v57, %v14545_v31 }
 0x311   : > { %6230 = vst.msk [vmem:[%s14756_s19 + $0x10] sm:$0xff] %vm3327_vm5, %v6198_v22  ;;  %v6201_v9 = vmax.f32 %v6169_v58, 0.0  ;;  %v6168_v45 = vadd.f32 %v14731_v51, %v6129_v42  ;;  %v6132_v50 = vadd.f32 %v9797_v10, %v5861_v60  ;;  %v9850_v8 = vpop.f32.mrf.mxu0  ;;  %v5867_v2 = vadd.f32 %v14642_v6, %v5595_v62 }
 0x312   : > { %v5996_v16 = vpop.f32.mrf.mxu1  ;;  %7472 = vst.msk [vmem:[%s14743_s26 + $0x38] sm:$0xff] %vm3327_vm5, %v7440_v26  ;;  %v7439_v55 = vmax.f32 %v7305_v12, 0.0  ;;  %v7320_v4 = vadd.f32 %v9850_v8, %v14720_v23  ;;  %v5596_v6 = vadd.f32 %v14656_v53, %v14548_v15  ;;  %v5599_v15 = vadd.f32 %v14660_v32, %v14551_v52 }
 0x313   : > { %6233 = vst.msk [vmem:[%s14756_s19 + $0x28] sm:$0xff] %vm3327_vm5, %v6201_v9  ;;  %v6200_v33 = vmax.f32 %v6168_v45, 0.0  ;;  %v6171_v14 = vadd.f32 %v14731_v51, %v6132_v50  ;;  %v6131_v38 = vadd.f32 %v5996_v16, %v5860_v34  ;;  %v7314_v54 = vpop.f32.mrf.mxu0  ;;  %v5866_v9 = vadd.f32 %v14646_v25, %v5594_v0 }
 0x314   : > { %v9800_v29 = vpop.f32.mrf.mxu1  ;;  %7471 = vst.msk [vmem:[%s14743_s26 + $0x30] sm:$0xff] %vm3327_vm5, %v7439_v55  ;;  %v7442_v19 = vmax.f32 %v7320_v4, 0.0  ;;  %v7315_v43 = vadd.f32 %v14720_v23, %v7314_v54  ;;  %v5869_v25 = vadd.f32 %v14650_v20, %v5597_v3  ;;  %v5598_v20 = vadd.f32 %v14664_v21, %v14554_v30 }
 0x315   : > { %6232 = vst.msk [vmem:[%s14756_s19 + $0x20] sm:$0xff] %vm3327_vm5, %v6200_v33  ;;  %v6203_v41 = vmax.f32 %v6171_v14, 0.0  ;;  %v6170_v61 = vadd.f32 %v14731_v51, %v6131_v38  ;;  %v6134_v24 = vadd.f32 %v9800_v29, %v5863_v11  ;;  %v9853_v48 = vpop.f32.mrf.mxu0  ;;  %v15901_v29 = vld [vmem:[#allocation8_spill] sm:$0xff] }
 0x316   : > { %v6006_v47 = vpop.f32.mrf.mxu1  ;;  %7474 = vst.msk [vmem:[%s14743_s26 + $0x48] sm:$0xff] %vm3327_vm5, %v7442_v19  ;;  %v7441_v27 = vmax.f32 %v7315_v43, 0.0  ;;  %v7330_v17 = vadd.f32 %v9853_v48, %v14720_v23  ;;  %v5868_v52 = vadd.f32 %v15901_v29, %v5596_v6  ;;  %v15904_v19 = vld [vmem:[#allocation48_spill] sm:$0xff]  ;;  %v15911_v6 = vld [vmem:[#allocation10_spill] sm:$0xff]  ;;  %v15916_v29 = vld [vmem:[#allocation91_spill] sm:$0xff] }
 0x317   : > { %6235 = vst.msk [vmem:[%s14756_s19 + $0x38] sm:$0xff] %vm3327_vm5, %v6203_v41  ;;  %v6202_v5 = vmax.f32 %v6170_v61, 0.0  ;;  %v6173_v44 = vadd.f32 %v14731_v51, %v6134_v24  ;;  %v6133_v60 = vadd.f32 %v6006_v47, %v5862_v13  ;;  %v7324_v42 = vpop.f32.mrf.mxu0  ;;  %v15902_v61 = vld [vmem:[#allocation22_spill] sm:$0xff]  ;;  %v15903_v24 = vld [vmem:[#allocation45_spill] sm:$0xff]  ;;  %v5871_v47 = vadd.f32 %v15904_v19, %v5599_v15  ;;  %v15919_v19 = vld [vmem:[#allocation76_spill] sm:$0xff] }
 0x318   : > { %v9803_v40 = vpop.f32.mrf.mxu1  ;;  %7473 = vst.msk [vmem:[%s14743_s26 + $0x40] sm:$0xff] %vm3327_vm5, %v7441_v27  ;;  %v7444_v1 = vmax.f32 %v7330_v17, 0.0  ;;  %v7325_v7 = vadd.f32 %v14720_v23, %v7324_v42  ;;  %v5601_v30 = vadd.f32 %v15903_v24, %v15902_v61  ;;  %v15906_v17 = vld [vmem:[#allocation18_spill] sm:$0xff]  ;;  %v15917_v61 = vld [vmem:[#allocation69_spill] sm:$0xff] }
 0x319   : > { %6234 = vst.msk [vmem:[%s14756_s19 + $0x30] sm:$0xff] %vm3327_vm5, %v6202_v5  ;;  %v6205_v63 = vmax.f32 %v6173_v44, 0.0  ;;  %v6172_v22 = vadd.f32 %v14731_v51, %v6133_v60  ;;  %v6136_v58 = vadd.f32 %v9803_v40, %v5865_v18  ;;  %v9856_v34 = vpop.f32.mrf.mxu0  ;;  %v15905_v60 = vld [vmem:[#allocation19_spill] sm:$0xff] }
 0x31a   : > { %v6016_v49 = vpop.f32.mrf.mxu1  ;;  %7476 = vst.msk [vmem:[%s14743_s26 + $0x58] sm:$0xff] %vm3327_vm5, %v7444_v1  ;;  %v7443_v31 = vmax.f32 %v7325_v7, 0.0  ;;  %v7340_v45 = vadd.f32 %v9856_v34, %v14720_v23  ;;  %v5870_v48 = vadd.f32 %v15905_v60, %v5598_v20  ;;  %v15908_v1 = vld [vmem:[#allocation37_spill] sm:$0xff]  ;;  %v15920_v60 = vld [vmem:[#allocation72_spill] sm:$0xff] }
 0x31b   : > { %6237 = vst.msk [vmem:[%s14756_s19 + $0x48] sm:$0xff] %vm3327_vm5, %v6205_v63  ;;  %v6204_v56 = vmax.f32 %v6172_v22, 0.0  ;;  %v6175_v10 = vadd.f32 %v14731_v51, %v6136_v58  ;;  %v6135_v37 = vadd.f32 %v6016_v49, %v5864_v35  ;;  %v7334_v26 = vpop.f32.mrf.mxu0  ;;  %v15907_v35 = vld [vmem:[#allocation40_spill] sm:$0xff]  ;;  %v5873_v49 = vadd.f32 %v15908_v1, %v5601_v30  ;;  %v15923_v1 = vld [vmem:[#allocation14_spill] sm:$0xff] }
 0x31c   : > { %v9806_v57 = vpop.f32.mrf.mxu1  ;;  %7475 = vst.msk [vmem:[%s14743_s26 + $0x50] sm:$0xff] %vm3327_vm5, %v7443_v31  ;;  %v7446_v16 = vmax.f32 %v7340_v45, 0.0  ;;  %v7335_v11 = vadd.f32 %v14720_v23, %v7334_v26  ;;  %v5600_v63 = vadd.f32 %v15907_v35, %v15906_v17  ;;  %v15921_v17 = vld [vmem:[#allocation15_spill] sm:$0xff]  ;;  %v15922_v35 = vld [vmem:[#allocation16_spill] sm:$0xff] }
 0x31d   : > { %6236 = vst.msk [vmem:[%s14756_s19 + $0x40] sm:$0xff] %vm3327_vm5, %v6204_v56  ;;  %v6207_v50 = vmax.f32 %v6175_v10, 0.0  ;;  %v6174_v28 = vadd.f32 %v14731_v51, %v6135_v37  ;;  %v6138_v59 = vadd.f32 %v9806_v57, %v5867_v2  ;;  %v9859_v38 = vpop.f32.mrf.mxu0  ;;  %v15909_v10 = vld [vmem:[#allocation29_spill] sm:$0xff]  ;;  %v15910_v37 = vld [vmem:[#allocation38_spill] sm:$0xff] }
 0x31e   : > { %v6026_v12 = vpop.f32.mrf.mxu1  ;;  %7478 = vst.msk [vmem:[%s14743_s26 + $0x68] sm:$0xff] %vm3327_vm5, %v7446_v16  ;;  %v7445_v8 = vmax.f32 %v7335_v11, 0.0  ;;  %v7350_v55 = vadd.f32 %v9859_v38, %v14720_v23  ;;  %v5603_v34 = vadd.f32 %v15910_v37, %v15909_v10  ;;  %v15913_v16 = vld [vmem:[#allocation33_spill] sm:$0xff]  ;;  %v15915_v38 = vld [vmem:[#allocation47_spill] sm:$0xff] }
 0x31f   : > { %6239 = vst.msk [vmem:[%s14756_s19 + $0x58] sm:$0xff] %vm3327_vm5, %v6207_v50  ;;  %v6206_v53 = vmax.f32 %v6174_v28, 0.0  ;;  %v6177_v33 = vadd.f32 %v14731_v51, %v6138_v59  ;;  %v6137_v14 = vadd.f32 %v6026_v12, %v5866_v9  ;;  %v7344_v41 = vpop.f32.mrf.mxu0  ;;  %v15912_v50 = vld [vmem:[#allocation41_spill] sm:$0xff]  ;;  %v5872_v12 = vadd.f32 %v15913_v16, %v5600_v63  ;;  %v15928_v16 = vld [vmem:[#allocation54_spill] sm:$0xff] }
 0x320   : > { %v9809_v13 = vpop.f32.mrf.mxu1  ;;  %7477 = vst.msk [vmem:[%s14743_s26 + $0x60] sm:$0xff] %vm3327_vm5, %v7445_v8  ;;  %v7448_v21 = vmax.f32 %v7350_v55, 0.0  ;;  %v7345_v18 = vadd.f32 %v14720_v23, %v7344_v41  ;;  %v5602_v28 = vadd.f32 %v15912_v50, %v15911_v6  ;;  %v5607_v63 = vadd.f32 %v15922_v35, %v15921_v17  ;;  %v15925_v37 = vld [vmem:[#allocation73_spill] sm:$0xff]  ;;  %v15927_v50 = vld [vmem:[#allocation58_spill] sm:$0xff] }
 0x321   : > { %6238 = vst.msk [vmem:[%s14756_s19 + $0x50] sm:$0xff] %vm3327_vm5, %v6206_v53  ;;  %v6209_v32 = vmax.f32 %v6177_v33, 0.0  ;;  %v6176_v4 = vadd.f32 %v14731_v51, %v6137_v14  ;;  %v6140_v39 = vadd.f32 %v9809_v13, %v5869_v25  ;;  %v9862_v44 = vpop.f32.mrf.mxu0  ;;  %v15914_v14 = vld [vmem:[#allocation31_spill] sm:$0xff]  ;;  %v15926_v6 = vld [vmem:[#allocation17_spill] sm:$0xff] }
 0x322   : > { %v6036_v54 = vpop.f32.mrf.mxu1  ;;  %7480 = vst.msk [vmem:[%s14743_s26 + $0x78] sm:$0xff] %vm3327_vm5, %v7448_v21  ;;  %v7447_v0 = vmax.f32 %v7345_v18, 0.0  ;;  %v7360_v40 = vadd.f32 %v9862_v44, %v14720_v23  ;;  %v5605_v20 = vadd.f32 %v15915_v38, %v15914_v14  ;;  %v5874_v24 = vadd.f32 %v15917_v61, %v5602_v28  ;;  %v15918_v18 = vld [vmem:[#allocation35_spill] sm:$0xff]  ;;  %v15930_v38 = vld [vmem:[#allocation6_spill] sm:$0xff] }
 0x323   : > { %6241 = vst.msk [vmem:[%s14756_s19 + $0x68] sm:$0xff] %vm3327_vm5, %v6209_v32  ;;  %v6208_v43 = vmax.f32 %v6176_v4, 0.0  ;;  %v6179_v62 = vadd.f32 %v14731_v51, %v6140_v39  ;;  %v6139_v5 = vadd.f32 %v6036_v54, %v5868_v52  ;;  %v7354_v3 = vpop.f32.mrf.mxu0  ;;  %v5875_v52 = vadd.f32 %v15916_v29, %v5603_v34 }
 0x324   : > { %v9812_v27 = vpop.f32.mrf.mxu1  ;;  %7479 = vst.msk [vmem:[%s14743_s26 + $0x70] sm:$0xff] %vm3327_vm5, %v7447_v0  ;;  %v7450_v7 = vmax.f32 %v7360_v40, 0.0  ;;  %v7355_v56 = vadd.f32 %v14720_v23, %v7354_v3  ;;  %v5609_v28 = vadd.f32 %v15927_v50, %v15926_v6 }
 0x325   : > { %6240 = vst.msk [vmem:[%s14756_s19 + $0x60] sm:$0xff] %vm3327_vm5, %v6208_v43  ;;  %v6211_v22 = vmax.f32 %v6179_v62, 0.0  ;;  %v6178_v58 = vadd.f32 %v14731_v51, %v6139_v5  ;;  %v6142_v42 = vadd.f32 %v9812_v27, %v5871_v47  ;;  %v9865_v45 = vpop.f32.mrf.mxu0  ;;  %v5604_v47 = vadd.f32 %v15919_v19, %v15918_v18 }
 0x326   : > { %v6046_v2 = vpop.f32.mrf.mxu1  ;;  %7482 = vst.msk [vmem:[%s14743_s26 + $0x88] sm:$0xff] %vm3327_vm5, %v7450_v7  ;;  %v7449_v59 = vmax.f32 %v7355_v56, 0.0  ;;  %v7370_v25 = vadd.f32 %v9865_v45, %v14720_v23 }
 0x327   : > { %6243 = vst.msk [vmem:[%s14756_s19 + $0x78] sm:$0xff] %vm3327_vm5, %v6211_v22  ;;  %v6210_v9 = vmax.f32 %v6178_v58, 0.0  ;;  %v6181_v31 = vadd.f32 %v14731_v51, %v6142_v42  ;;  %v6141_v57 = vadd.f32 %v6046_v2, %v5870_v48  ;;  %v7364_v33 = vpop.f32.mrf.mxu0  ;;  %v5877_v48 = vadd.f32 %v15920_v60, %v5605_v20  ;;  %v15931_v20 = vld [vmem:[#allocation28_spill] sm:$0xff] }
 0x328   : > { %v9815_v26 = vpop.f32.mrf.mxu1  ;;  %7481 = vst.msk [vmem:[%s14743_s26 + $0x80] sm:$0xff] %vm3327_vm5, %v7449_v59  ;;  %v7452_v8 = vmax.f32 %v7370_v25, 0.0  ;;  %v7365_v55 = vadd.f32 %v14720_v23, %v7364_v33  ;;  %v5876_v34 = vadd.f32 %v15925_v37, %v5604_v47  ;;  %v15929_v33 = vld [vmem:[#allocation34_spill] sm:$0xff] }
 0x329   : > { %6242 = vst.msk [vmem:[%s14756_s19 + $0x70] sm:$0xff] %vm3327_vm5, %v6210_v9  ;;  %v6213_v11 = vmax.f32 %v6181_v31, 0.0  ;;  %v6180_v15 = vadd.f32 %v14731_v51, %v6141_v57  ;;  %v6144_v53 = vadd.f32 %v9815_v26, %v5873_v49  ;;  %v9868_v41 = vpop.f32.mrf.mxu0  ;;  %v15924_v49 = vld [vmem:[#allocation61_spill] sm:$0xff] }
 0x32a   : > { %v6056_v13 = vpop.f32.mrf.mxu1  ;;  %7484 = vst.msk [vmem:[%s14743_s26 + $0x98] sm:$0xff] %vm3327_vm5, %v7452_v8  ;;  %v7451_v30 = vmax.f32 %v7365_v55, 0.0  ;;  %v7380_v54 = vadd.f32 %v9868_v41, %v14720_v23  ;;  %v5606_v7 = vadd.f32 %v15924_v49, %v15923_v1  ;;  %v5608_v8 = vadd.f32 %v15931_v20, %v15930_v38  ;;  %v15932_v41 = vld [vmem:[#allocation26_spill] sm:$0xff] }
 0x32b   : > { %6245 = vst.msk [vmem:[%s14756_s19 + $0x88] sm:$0xff] %vm3327_vm5, %v6213_v11  ;;  %v6212_v32 = vmax.f32 %v6180_v15, 0.0  ;;  %v6183_v4 = vadd.f32 %v14731_v51, %v6144_v53  ;;  %v6143_v39 = vadd.f32 %v6056_v13, %v5872_v12  ;;  %v7374_v44 = vpop.f32.mrf.mxu0  ;;  %v5879_v12 = vadd.f32 %v15928_v16, %v5607_v63 }
 0x32c   : > { %v9818_v21 = vpop.f32.mrf.mxu1  ;;  %7483 = vst.msk [vmem:[%s14743_s26 + $0x90] sm:$0xff] %vm3327_vm5, %v7451_v30  ;;  %v7454_v0 = vmax.f32 %v7380_v54, 0.0  ;;  %v7375_v40 = vadd.f32 %v14720_v23, %v7374_v44  ;;  %v5878_v14 = vadd.f32 %v15929_v33, %v5606_v7  ;;  %v5881_v61 = vadd.f32 %v15932_v41, %v5609_v28  ;;  %v15934_v30 = vld [vmem:[#allocation49_spill] sm:$0xff] }
 0x32d   : > { %6244 = vst.msk [vmem:[%s14756_s19 + $0x80] sm:$0xff] %vm3327_vm5, %v6212_v32  ;;  %v6215_v43 = vmax.f32 %v6183_v4, 0.0  ;;  %v6182_v62 = vadd.f32 %v14731_v51, %v6143_v39  ;;  %v6146_v5 = vadd.f32 %v9818_v21, %v5875_v52  ;;  %v9871_v3 = vpop.f32.mrf.mxu0 }
 0x32e   : > { %v6066_v27 = vpop.f32.mrf.mxu1  ;;  %7486 = vst.msk [vmem:[%s14743_s26 + $0xa8] sm:$0xff] %vm3327_vm5, %v7454_v0  ;;  %v7453_v2 = vmax.f32 %v7375_v40, 0.0  ;;  %v7390_v10 = vadd.f32 %v9871_v3, %v14720_v23  ;;  %v15936_v0 = vld [vmem:[#allocation36_spill] sm:$0xff] }
 0x32f   : > { %6247 = vst.msk [vmem:[%s14756_s19 + $0x98] sm:$0xff] %vm3327_vm5, %v6215_v43  ;;  %v6214_v22 = vmax.f32 %v6182_v62, 0.0  ;;  %v6185_v58 = vadd.f32 %v14731_v51, %v6146_v5  ;;  %v6145_v42 = vadd.f32 %v6066_v27, %v5874_v24  ;;  %v7384_v45 = vpop.f32.mrf.mxu0  ;;  %v15933_v24 = vld [vmem:[#allocation27_spill] sm:$0xff]  ;;  %v15937_v27 = vld [vmem:[#allocation56_spill] sm:$0xff] }
 0x330   : > { %v9821_v56 = vpop.f32.mrf.mxu1  ;;  %7485 = vst.msk [vmem:[%s14743_s26 + $0xa0] sm:$0xff] %vm3327_vm5, %v7453_v2  ;;  %v7456_v59 = vmax.f32 %v7390_v10, 0.0  ;;  %v7385_v25 = vadd.f32 %v14720_v23, %v7384_v45  ;;  %v5611_v21 = vadd.f32 %v15934_v30, %v15933_v24  ;;  %v15935_v5 = vld [vmem:[#allocation23_spill] sm:$0xff]  ;;  %v5610_v40 = vadd.f32 %v15937_v27, %v15936_v0 }
 0x331   : > { %6246 = vst.msk [vmem:[%s14756_s19 + $0x90] sm:$0xff] %vm3327_vm5, %v6214_v22  ;;  %v6217_v9 = vmax.f32 %v6185_v58, 0.0  ;;  %v6184_v31 = vadd.f32 %v14731_v51, %v6145_v42  ;;  %v6148_v57 = vadd.f32 %v9821_v56, %v5877_v48  ;;  %v5880_v44 = vadd.f32 %v15935_v5, %v5608_v8  ;;  %v15938_v42 = vld [vmem:[#allocation2_spill] sm:$0xff]  ;;  %v15939_v56 = vld [vmem:[#allocation55_spill] sm:$0xff] }
 0x332   : > { %v6076_v26 = vpop.f32.mrf.mxu1  ;;  %7488 = vst.msk [vmem:[%s14743_s26 + $0xb8] sm:$0xff] %vm3327_vm5, %v7456_v59  ;;  %v7455_v13 = vmax.f32 %v7385_v25, 0.0  ;;  %v5883_v3 = vadd.f32 %v15938_v42, %v5611_v21  ;;  %v5882_v10 = vadd.f32 %v15939_v56, %v5610_v40 }
 0x333   : > { %6249 = vst.msk [vmem:[%s14756_s19 + $0xa8] sm:$0xff] %vm3327_vm5, %v6217_v9  ;;  %v6216_v11 = vmax.f32 %v6184_v31, 0.0  ;;  %v6187_v15 = vadd.f32 %v14731_v51, %v6148_v57  ;;  %v6147_v53 = vadd.f32 %v6076_v26, %v5876_v34 }
 0x334   : > { %v9824_v55 = vpop.f32.mrf.mxu1  ;;  %v9874_v29 = vpop.f32.mrf.mxu0  ;;  %7487 = vst.msk [vmem:[%s14743_s26 + $0xb0] sm:$0xff] %vm3327_vm5, %v7455_v13 }
 0x335   : > { %6248 = vst.msk [vmem:[%s14756_s19 + $0xa0] sm:$0xff] %vm3327_vm5, %v6216_v11  ;;  %v6219_v52 = vmax.f32 %v6187_v15, 0.0  ;;  %v6186_v32 = vadd.f32 %v14731_v51, %v6147_v53  ;;  %v6150_v4 = vadd.f32 %v9824_v55, %v5879_v12  ;;  %v7400_v39 = vadd.f32 %v9874_v29, %v14720_v23 }
 0x336   : > { %v6086_v54 = vpop.f32.mrf.mxu1  ;;  %v7394_v18 = vpop.f32.mrf.mxu0 }
 0x337   : > { %6251 = vst.msk [vmem:[%s14756_s19 + $0xb8] sm:$0xff] %vm3327_vm5, %v6219_v52  ;;  %v6218_v19 = vmax.f32 %v6186_v32, 0.0  ;;  %v6189_v47 = vadd.f32 %v14731_v51, %v6150_v4  ;;  %v7458_v43 = vmax.f32 %v7400_v39, 0.0  ;;  %v6149_v62 = vadd.f32 %v6086_v54, %v5878_v14 }
 0x338   : > { %v7395_v60 = vadd.f32 %v14720_v23, %v7394_v18  ;;  %v9827_v48 = vpop.f32.mrf.mxu1 }
 0x339   : > { %6250 = vst.msk [vmem:[%s14756_s19 + $0xb0] sm:$0xff] %vm3327_vm5, %v6218_v19  ;;  %v6221_v17 = vmax.f32 %v6189_v47, 0.0  ;;  %7490 = vst.msk [vmem:[%s14743_s26 + $0xc8] sm:$0xff] %vm3327_vm5, %v7458_v43  ;;  %v6188_v35 = vadd.f32 %v14731_v51, %v6149_v62  ;;  %v6152_v63 = vadd.f32 %v9827_v48, %v5881_v61 }
 0x33a   : > { %v7457_v22 = vmax.f32 %v7395_v60, 0.0  ;;  %v6096_v58 = vpop.f32.mrf.mxu1 }
 0x33b   : > { %6253 = vst.msk [vmem:[%s14756_s19 + $0xc8] sm:$0xff] %vm3327_vm5, %v6221_v17  ;;  %v6220_v1 = vmax.f32 %v6188_v35, 0.0  ;;  %v6191_v49 = vadd.f32 %v14731_v51, %v6152_v63  ;;  %v6151_v7 = vadd.f32 %v6096_v58, %v5880_v44 }
 0x33c   : > { %7489 = vst.msk [vmem:[%s14743_s26 + $0xc0] sm:$0xff] %vm3327_vm5, %v7457_v22  ;;  %v9830_v2 = vpop.f32.mrf.mxu1 }
 0x33d   : > { %6252 = vst.msk [vmem:[%s14756_s19 + $0xc0] sm:$0xff] %vm3327_vm5, %v6220_v1  ;;  %v6223_v37 = vmax.f32 %v6191_v49, 0.0  ;;  %v6190_v34 = vadd.f32 %v14731_v51, %v6151_v7  ;;  %v6154_v9 = vadd.f32 %v9830_v2, %v5883_v3 }
 0x33e   : > { %v6106_v31 = vpop.f32.mrf.mxu1 }
 0x33f   : > { %6255 = vst.msk [vmem:[%s14756_s19 + $0xd8] sm:$0xff] %vm3327_vm5, %v6223_v37  ;;  %v6222_v57 = vmax.f32 %v6190_v34, 0.0  ;;  %v6193_v45 = vadd.f32 %v14731_v51, %v6154_v9  ;;  %v6153_v6 = vadd.f32 %v6106_v31, %v5882_v10 }
 0x341   : > { %v9877_v50 = vpop.f32.mrf.mxu0  ;;  %6254 = vst.msk [vmem:[%s14756_s19 + $0xd0] sm:$0xff] %vm3327_vm5, %v6222_v57  ;;  %v6225_v59 = vmax.f32 %v6193_v45, 0.0  ;;  %v6192_v26 = vadd.f32 %v14731_v51, %v6153_v6 }
 0x342   : > { %v7410_v28 = vadd.f32 %v9877_v50, %v14720_v23 }
 0x343   : > { %v7404_v25 = vpop.f32.mrf.mxu0  ;;  %6257 = vst.msk [vmem:[%s14756_s19 + $0xe8] sm:$0xff] %vm3327_vm5, %v6225_v59  ;;  %v6224_v11 = vmax.f32 %v6192_v26, 0.0 }
 0x344   : > { %v7460_v16 = vmax.f32 %v7410_v28, 0.0  ;;  %v7405_v12 = vadd.f32 %v14720_v23, %v7404_v25 }
 0x345   : > { %v9833_v15 = vpop.f32.mrf.mxu1  ;;  %6256 = vst.msk [vmem:[%s14756_s19 + $0xe0] sm:$0xff] %vm3327_vm5, %v6224_v11 }
 0x346   : > { %v6156_v53 = vadd.f32 %v9833_v15, %v14725_v46  ;;  %7492 = vst.msk [vmem:[%s14743_s26 + $0xd8] sm:$0xff] %vm3327_vm5, %v7460_v16  ;;  %v7459_v33 = vmax.f32 %v7405_v12, 0.0 }
 0x347   : > { %v6116_v14 = vpop.f32.mrf.mxu1 }
 0x348   : > { %v6195_v38 = vadd.f32 %v14731_v51, %v6156_v53  ;;  %v6155_v20 = vadd.f32 %v6116_v14, %v14737_v36  ;;  %7491 = vst.msk [vmem:[%s14743_s26 + $0xd0] sm:$0xff] %vm3327_vm5, %v7459_v33 }
 0x34a   : > { %v6227_v8 = vmax.f32 %v6195_v38, 0.0  ;;  %v6194_v13 = vadd.f32 %v14731_v51, %v6155_v20  ;;  %v9880_v55 = vpop.f32.mrf.mxu0 }
 0x34b   : > { %v7420_v29 = vadd.f32 %v9880_v55, %v14720_v23 }
 0x34c   : > { %6259 = vst.msk [vmem:[%s14756_s19 + $0xf8] sm:$0xff] %vm3327_vm5, %v6227_v8  ;;  %v6226_v46 = vmax.f32 %v6194_v13, 0.0  ;;  %v7414_v52 = vpop.f32.mrf.mxu0 }
 0x34d   : > { %v7462_v32 = vmax.f32 %v7420_v29, 0.0  ;;  %v7415_v36 = vadd.f32 %v14720_v23, %v7414_v52 }
 0x34e   : > { %6258 = vst.msk [vmem:[%s14756_s19 + $0xf0] sm:$0xff] %vm3327_vm5, %v6226_v46 }
 0x34f   : > { %7494 = vst.msk [vmem:[%s14743_s26 + $0xe8] sm:$0xff] %vm3327_vm5, %v7462_v32  ;;  %v7461_v4 = vmax.f32 %v7415_v36, 0.0  ;;  %v9883_v39 = vpop.f32.mrf.mxu0 }
 0x350   : > { %v7430_v51 = vadd.f32 %v9883_v39, %v14720_v23 }
 0x351   : > { %7493 = vst.msk [vmem:[%s14743_s26 + $0xe0] sm:$0xff] %vm3327_vm5, %v7461_v4  ;;  %v7424_v41 = vpop.f32.mrf.mxu0 }
 0x352   : > { %v7464_v61 = vmax.f32 %v7430_v51, 0.0  ;;  %v7425_v24 = vadd.f32 %v14720_v23, %v7424_v41 }
 0x354   : > { %7496 = vst.msk [vmem:[%s14743_s26 + $0xf8] sm:$0xff] %vm3327_vm5, %v7464_v61  ;;  %v7463_v30 = vmax.f32 %v7425_v24, 0.0 }
 0x356   : > { %7495 = vst.msk [vmem:[%s14743_s26 + $0xf0] sm:$0xff] %vm3327_vm5, %v7463_v30 }
 0x357 PF: > { %s22_s17 = sadd.s32 1, %s9934_s17  }
 0x358   : > { %p19_p5 = scmp.ge.s32.totalorder %s22_s17, 4  }
 0x35a   :  { %21 = sbr.rel (!%p19_p5) target bundleno = 1 (0x1), region = 132 }

</bundles_post_ra>
